<compile_context>
chip_gen: v7x
topology: tpu7x:2x2x1
jax: 0.10.0
libtpu: 0.0.40
codegen_flags: <defaults>
</compile_context>

<pallas_src>
import numpy as np
import jax
import jax.numpy as jnp
from jax import lax
from jax.experimental import pallas as pl
from jax.experimental.pallas import tpu as pltpu

NUM_BINS = 10            # nsplines
HIDDEN = 64              # maker -> MLP(..., layers=[64, 64, 64])
NSTACK = 3               # coupling_spline(nstack=3)
NBP = 16                 # per-dim parameter block, sublane-tile aligned (>= NUM_BINS + 1)
MIN_BIN_WIDTH = 1e-3
MIN_BIN_HEIGHT = 1e-3
MIN_DERIVATIVE = 1e-3
SEL_EPS = 1e-6           # nflows searchsorted eps on the last knot


def _round_up(a, m):
    return ((a + m - 1) // m) * m


# --------------------------------------------------------------------------- kernel
def _make_kernel(T, P):
    """T transform dims, P = T*NBP parameter rows per parameter type."""
    SW = 1.0 - MIN_BIN_WIDTH * NUM_BINS
    SH = 1.0 - MIN_BIN_HEIGHT * NUM_BINS

    def kernel(xtr_ref, xid_ref, mcum_ref, w0_ref, b0_ref, w1_ref, b1_ref,
               w2_ref, b2_ref, w3_ref, b3_ref, out_ref):
        TB = xtr_ref.shape[1]

        # Per-bin-row constants, built once per invocation (hoisted out of all loops).
        s_iota = lax.broadcasted_iota(jnp.int32, (1, NBP, 1), 1)
        binno = s_iota.astype(jnp.float32)                 # bin index inside a block
        valid_b = s_iota < NUM_BINS                        # valid width/height bins
        binmask = valid_b.astype(jnp.float32)
        last_b = s_iota == (NUM_BINS - 1)                  # last valid bin
        last_f = last_b.astype(jnp.float32)
        mcum = mcum_ref[...]                               # [MROWS, P] cumsum (+ totals) matrix

        def knots(u_flat, min_size, scale):
            # per-dim masked softmax + min-size floor + cumulative knots, for all T dims.
            u3 = u_flat.reshape(T, NBP, TB)
            um = jnp.where(valid_b, u3, -jnp.inf)          # mask padded rows
            m = jnp.max(um, axis=1, keepdims=True)         # PER-DIM max (correctness fix)
            e3 = jnp.exp(um - m)                           # padded rows -> exp(-inf) = 0
            # inclusive / exclusive cumsum AND per-dim total, in one MXU matmul
            cums = jnp.dot(mcum, e3.reshape(P, TB),
                           preferred_element_type=jnp.float32)        # [MROWS, TB]
            ci = cums[0:P].reshape(T, NBP, TB)             # inclusive cumsum
            ce = cums[P:2 * P].reshape(T, NBP, TB)         # exclusive cumsum
            gs = cums[2 * P:2 * P + T].reshape(T, 1, TB)   # per-dim total
            inv = 1.0 / gs                                 # exact (no approx reciprocal)
            incl = min_size * (binno + 1.0) + scale * ci * inv   # right knot of bin k
            excl = min_size * binno + scale * ce * inv           # left knot of bin k
            incl = jnp.where(last_b, 1.0, incl)                  # exact right endpoint
            return excl, incl

        x_id = xid_ref[...]                                # [ID_ROWS, TB], never modified
        x_tr = xtr_ref[...]                                # [T, TB], updated every layer
        total_ld = jnp.zeros((1, TB), jnp.float32)

        for li in range(NSTACK):
            # ---- transform-net MLP on the conditioner half (bf16 hidden matmuls, f32 acc) ----
            h = jnp.dot(w0_ref[li], x_id, preferred_element_type=jnp.float32) + b0_ref[li]
            h = jnp.maximum(h, 0.0)
            h = jnp.dot(w1_ref[li], h.astype(jnp.bfloat16),
                        preferred_element_type=jnp.float32) + b1_ref[li]
            h = jnp.maximum(h, 0.0)
            h = jnp.dot(w2_ref[li], h.astype(jnp.bfloat16),
                        preferred_element_type=jnp.float32) + b2_ref[li]
            h = jnp.maximum(h, 0.0)
            raw = jnp.dot(w3_ref[li], h.astype(jnp.bfloat16),
                          preferred_element_type=jnp.float32) + b3_ref[li]   # [3P, TB]

            # ---- rational-quadratic spline, vectorized over all transform dims ----
            exclw, inclw = knots(raw[0:P], MIN_BIN_WIDTH, SW)
            exclh, inclh = knots(raw[P:2 * P], MIN_BIN_HEIGHT, SH)

            ud = raw[2 * P:3 * P]
            softplus = jnp.maximum(ud, 0.0) + jnp.log(1.0 + jnp.exp(-jnp.abs(ud)))
            deriv = MIN_DERIVATIVE + softplus                         # [P, TB]
            # deriv[k+1] at row k: one XLU sublane rotate (wrapped rows land in unused pad bins)
            derivn = pltpu.roll(deriv, P - 1, 0)
            d3 = deriv.reshape(T, NBP, TB)
            dn3 = derivn.reshape(T, NBP, TB)

            # TODO(synk): nflows raises for inputs outside [0,1] (tails=None); we clamp.
            x3 = jnp.clip(x_tr, 0.0, 1.0).reshape(T, 1, TB)
            x3b = jnp.broadcast_to(x3, (T, NBP, TB))       # hoisted (used in both compares)

            # one-hot bin selection (nflows searchsorted semantics incl. last-knot eps)
            in_bin = (x3b >= exclw) & (x3b < inclw + SEL_EPS * last_f)
            sel = jnp.where(in_bin, binmask, 0.0)          # padded bins never selected

            def gsel(a):
                return jnp.sum(sel * a, axis=1, keepdims=True)        # [T, 1, TB]

            exw = gsel(exclw)
            inw = gsel(inclw)
            exh = gsel(exclh)
            inh = gsel(inclh)
            dk = gsel(d3)
            dk1 = gsel(dn3)

            bw = inw - exw
            bh = inh - exh
            delta = bh / bw
            theta = (x3 - exw) / bw
            om = 1.0 - theta
            t1mt = theta * om
            th2 = theta * theta
            num = bh * (delta * th2 + dk * t1mt)
            den = delta + (dk + dk1 - 2.0 * delta) * t1mt
            y = exh + num / den                                       # [T, 1, TB]
            dnum = (delta * delta) * (dk1 * th2 + 2.0 * delta * t1mt + dk * om * om)
            lad = jnp.log(dnum) - 2.0 * jnp.log(den)                  # [T, 1, TB]

            total_ld = total_ld + jnp.sum(lad, axis=0)                # single reduction
            x_tr = y.reshape(T, TB)        # in-place update; no scatter / permute needed

        # packed, lane-dense output block: rows [0:T] transformed half, row T = log-det.
        out_ref[pl.ds(0, T), :] = x_tr
        out_ref[pl.ds(T, 1), :] = total_ld
        # (rows T+1.. of the 8-row-aligned output block are padding and never read)

    return kernel


# --------------------------------------------------------- parameter construction (glue)
def _xavier(key, out_dim, in_dim):
    a = float(np.sqrt(6.0 / (in_dim + out_dim)))
    return jax.random.uniform(key, (out_dim, in_dim), jnp.float32, minval=-a, maxval=a)


def build_nsf_ot(key, input_dim):
    D = input_dim
    # TODO(synk): odd input_dim would break the fixed even/odd physical split; demo uses even D.
    assert D >= 2 and D % 2 == 0
    T = D // 2
    P = T * NBP
    M = 3 * NUM_BINS + 1            # params per transform dim (widths + heights + derivatives)
    ID_ROWS = _round_up(T, 8)
    OUT_ROWS = _round_up(T + 1, 8)
    MROWS = _round_up(2 * P + T, 8)

    w0s, b0s, w1s, b1s, w2s, b2s, w3s, b3s = ([] for _ in range(8))

    sigma = list(range(D))          # logical position -> original feature index
    for i in range(NSTACK):
        # nflows create_alternating_binary_mask(D, even=(i % 2 == 0))
        mask = np.zeros(D, np.int32)
        mask[(0 if i % 2 == 0 else 1)::2] = 1
        tr_orig = [sigma[p] for p in range(D) if mask[p] > 0]    # coupling transform order
        id_orig = [sigma[p] for p in range(D) if mask[p] <= 0]   # coupling conditioner order
        # alternating mask + ReversePermutation + even D  =>  transformed set is always the
        # even originals, conditioners are always the odd originals (fixed physical layout).
        assert all(f % 2 == 0 for f in tr_orig) and all(f % 2 == 1 for f in id_orig)

        key, k0, k1, k2, k3 = jax.random.split(key, 5)
        w0l = _xavier(k0, HIDDEN, T)
        w1l = _xavier(k1, HIDDEN, HIDDEN)
        w2l = _xavier(k2, HIDDEN, HIDDEN)
        w3l = _xavier(k3, T * M, HIDDEN)

        # conditioner columns -> kernel's fixed physical id layout (row r = original 2r+1)
        cols = np.asarray([f // 2 for f in id_orig])
        w0f = jnp.zeros((HIDDEN, ID_ROWS), jnp.float32).at[:, cols].set(w0l)

        # reorder + pad the last-layer output rows so kernel param block r corresponds to
        # physical transform row r (= original 2r); blocks are 16-row aligned and laid out
        # as (widths | heights | derivatives).
        dst = np.zeros(T * M, np.int64)
        for d in range(T):
            r = tr_orig[d] // 2
            for k in range(NUM_BINS):
                dst[d * M + k] = r * NBP + k
                dst[d * M + NUM_BINS + k] = P + r * NBP + k
            for j in range(NUM_BINS + 1):
                dst[d * M + 2 * NUM_BINS + j] = 2 * P + r * NBP + j
        w3p = jnp.zeros((3 * P, HIDDEN), jnp.float32).at[dst].set(w3l)

        w0s.append(w0f)
        w1s.append(w1l.astype(jnp.bfloat16))
        w2s.append(w2l.astype(jnp.bfloat16))
        w3s.append(w3p.astype(jnp.bfloat16))
        b0s.append(jnp.zeros((HIDDEN, 1), jnp.float32))   # MLP biases zero-initialized
        b1s.append(jnp.zeros((HIDDEN, 1), jnp.float32))
        b2s.append(jnp.zeros((HIDDEN, 1), jnp.float32))
        b3s.append(jnp.zeros((3 * P, 1), jnp.float32))

        sigma = [sigma[D - 1 - j] for j in range(D)]      # ReversePermutation (lu=0)

    # final output column gather (applied once in the wrapper, outside the kernel):
    # output position j holds original feature sigma[j]; evens come from the kernel output,
    # odds are the untouched input columns.
    out_cols = np.asarray([(f // 2) if f % 2 == 0 else (T + f // 2) for f in sigma])

    # inclusive / exclusive per-dim cumsum matrix with per-dim total rows appended.
    # (Dense: fine for small D; a block-diagonal batched form would be needed at large D.)
    mcum = np.zeros((MROWS, P), np.float32)
    for d in range(T):
        for k in range(NBP):
            r = d * NBP + k
            for m_ in range(NUM_BINS):
                c = d * NBP + m_
                if m_ <= k:
                    mcum[r, c] = 1.0
                if m_ < k:
                    mcum[P + r, c] = 1.0
        for m_ in range(NUM_BINS):
            mcum[2 * P + d, d * NBP + m_] = 1.0

    return dict(
        D=D, T=T, P=P, ID_ROWS=ID_ROWS, OUT_ROWS=OUT_ROWS,
        out_cols=out_cols,
        mcum=jnp.asarray(mcum),
        w0=jnp.stack(w0s), b0=jnp.stack(b0s),
        w1=jnp.stack(w1s), b1=jnp.stack(b1s),
        w2=jnp.stack(w2s), b2=jnp.stack(b2s),
        w3=jnp.stack(w3s), b3=jnp.stack(b3s),
    )


# ----------------------------------------------------------------------------- forward
def nsf_ot_forward(x, model, get_det=0):
    """NsfOT.forward (coupling-spline path): one fused Pallas call for all NSTACK layers."""
    B, D = x.shape
    assert D == model["D"]
    T = model["T"]
    ID_ROWS = model["ID_ROWS"]
    OUT_ROWS = model["OUT_ROWS"]

    # Batch tiling: large lane-dense tiles (amortize the ~0.35us/step overhead) while
    # keeping >=2 grid steps for medium batches so v7x megacore can split the batch.
    B128 = _round_up(B, 128)
    if B128 >= 2048:
        TILE_B = 1024
    elif B128 >= 1024:
        TILE_B = 512
    else:
        TILE_B = B128
    B_pad = _round_up(B, TILE_B)

    # Layout plumbing (outside the kernel): pad batch, split even/odd original features
    # into the kernel's fixed physical layout, batch along the 128-lane dimension.
    xp = x if B_pad == B else jnp.pad(x, ((0, B_pad - B), (0, 0)), constant_values=0.5)
    x_tr_in = jnp.transpose(xp[:, 0::2])                             # [T, B_pad]
    x_id_in = jnp.transpose(xp[:, 1::2])                             # [T, B_pad]
    if ID_ROWS > T:
        x_id_in = jnp.pad(x_id_in, ((0, ID_ROWS - T), (0, 0)))

    kern = _make_kernel(T, model["P"])

    def _const_spec(arr):
        n = arr.ndim
        # Resident across the grid (constant index map); at this size the default
        # double-buffering of constants is negligible (pl.Buffered(1) if they ever grow).
        return pl.BlockSpec(arr.shape, lambda *_: (0,) * n)

    consts = (model["mcum"], model["w0"], model["b0"], model["w1"], model["b1"],
              model["w2"], model["b2"], model["w3"], model["b3"])

    in_specs = [pl.BlockSpec((T, TILE_B), lambda i: (0, i)),
                pl.BlockSpec((ID_ROWS, TILE_B), lambda i: (0, i))]
    in_specs += [_const_spec(a) for a in consts]
    out_specs = pl.BlockSpec((OUT_ROWS, TILE_B), lambda i: (0, i))
    out_shape = jax.ShapeDtypeStruct((OUT_ROWS, B_pad), jnp.float32)

    out = pl.pallas_call(
        kern,
        grid=(B_pad // TILE_B,),
        in_specs=in_specs,
        out_specs=out_specs,
        out_shape=out_shape,
        compiler_params=pltpu.CompilerParams(
            dimension_semantics=("parallel",),
            vmem_limit_bytes=48 * 1024 * 1024),
    )(x_tr_in, x_id_in, *consts)

    # Reassemble the logical feature order: one static column gather on [B, D] in XLA.
    y_even = jnp.transpose(out[0:T, :B])                             # [B, T]: col r = orig 2r
    x_odd = x[:, 1::2]                                               # [B, T]: col r = orig 2r+1
    vals = jnp.concatenate([y_even, x_odd], axis=1)
    encoding = vals[:, model["out_cols"]]
    log_det = out[T, :B]
    # output_activ=None -> identity
    if get_det:
        return encoding, log_det
    return encoding


if __name__ == "__main__":
    key = jax.random.PRNGKey(0)
    B, D = 8, 8                                                      # batch, input_dim
    kx, kp = jax.random.split(key)
    # tails=None -> spline domain is [0,1]; sample inputs inside it.
    x = jax.random.uniform(kx, (B, D), jnp.float32, minval=0.05, maxval=0.95)
    model = build_nsf_ot(kp, D)

    fwd = jax.jit(lambda x_: nsf_ot_forward(x_, model, get_det=1))
    encoding, log_det = fwd(x)
    jax.block_until_ready((encoding, log_det))
    assert encoding.shape == (B, D) and log_det.shape == (B,)
    assert bool(jnp.all(jnp.isfinite(encoding))) and bool(jnp.all(jnp.isfinite(log_det)))
    print("KERNEL_OK")
</pallas_src>

<mosaic_0001>
module attributes {stable_mosaic.version = 11 : i64} {
  func.func @kernel(%arg0: i32, %arg1: memref<4x128xf32, #tpu.memory_space<vmem>>, %arg2: memref<8x128xf32, #tpu.memory_space<vmem>>, %arg3: memref<136x64xf32, #tpu.memory_space<vmem>>, %arg4: memref<3x64x8xf32, #tpu.memory_space<vmem>>, %arg5: memref<3x64x1xf32, #tpu.memory_space<vmem>>, %arg6: memref<3x64x64xbf16, #tpu.memory_space<vmem>>, %arg7: memref<3x64x1xf32, #tpu.memory_space<vmem>>, %arg8: memref<3x64x64xbf16, #tpu.memory_space<vmem>>, %arg9: memref<3x64x1xf32, #tpu.memory_space<vmem>>, %arg10: memref<3x192x64xbf16, #tpu.memory_space<vmem>>, %arg11: memref<3x192x1xf32, #tpu.memory_space<vmem>>, %arg12: memref<8x128xf32, #tpu.memory_space<vmem>>) attributes {dimension_semantics = [#tpu.dimension_semantics<parallel>], iteration_bounds = array<i64: 1>, scalar_prefetch = 0 : i64, scratch_operands = 0 : i64, tpu.core_type = #tpu.core_type<tc>, window_params = [{transform_indices = @transform_0, window_bounds = array<i64: 4, 128>}, {transform_indices = @transform_1, window_bounds = array<i64: 8, 128>}, {pipeline_mode = #tpu.pipeline_mode<synchronous>, transform_indices = @transform_2, window_bounds = array<i64: 136, 64>}, {pipeline_mode = #tpu.pipeline_mode<synchronous>, transform_indices = @transform_3, window_bounds = array<i64: 3, 64, 8>}, {pipeline_mode = #tpu.pipeline_mode<synchronous>, transform_indices = @transform_4, window_bounds = array<i64: 3, 64, 1>}, {pipeline_mode = #tpu.pipeline_mode<synchronous>, transform_indices = @transform_5, window_bounds = array<i64: 3, 64, 64>}, {pipeline_mode = #tpu.pipeline_mode<synchronous>, transform_indices = @transform_6, window_bounds = array<i64: 3, 64, 1>}, {pipeline_mode = #tpu.pipeline_mode<synchronous>, transform_indices = @transform_7, window_bounds = array<i64: 3, 64, 64>}, {pipeline_mode = #tpu.pipeline_mode<synchronous>, transform_indices = @transform_8, window_bounds = array<i64: 3, 64, 1>}, {pipeline_mode = #tpu.pipeline_mode<synchronous>, transform_indices = @transform_9, window_bounds = array<i64: 3, 192, 64>}, {pipeline_mode = #tpu.pipeline_mode<synchronous>, transform_indices = @transform_10, window_bounds = array<i64: 3, 192, 1>}, {transform_indices = @transform_11, window_bounds = array<i64: 8, 128>}]} {
    %0 = tpu.iota {dimensions = array<i32: 1>} : vector<1x16x1xi32>
    %1 = arith.sitofp %0 : vector<1x16x1xi32> to vector<1x16x1xf32>
    %c10_i32 = arith.constant 10 : i32
    %2 = vector.broadcast %c10_i32 : i32 to vector<1x16x1xi32>
    %3 = arith.cmpi slt, %0, %2 : vector<1x16x1xi32>
    %4 = arith.extui %3 : vector<1x16x1xi1> to vector<1x16x1xi32>
    %5 = arith.sitofp %4 : vector<1x16x1xi32> to vector<1x16x1xf32>
    %c9_i32 = arith.constant 9 : i32
    %6 = vector.broadcast %c9_i32 : i32 to vector<1x16x1xi32>
    %7 = arith.cmpi eq, %0, %6 : vector<1x16x1xi32>
    %8 = arith.extui %7 : vector<1x16x1xi1> to vector<1x16x1xi32>
    %9 = arith.sitofp %8 : vector<1x16x1xi32> to vector<1x16x1xf32>
    %c0 = arith.constant 0 : index
    %c0_0 = arith.constant 0 : index
    %10 = vector.load %arg3[%c0, %c0_0] : memref<136x64xf32, #tpu.memory_space<vmem>>, vector<136x64xf32>
    %c0_1 = arith.constant 0 : index
    %c0_2 = arith.constant 0 : index
    %11 = vector.load %arg2[%c0_1, %c0_2] : memref<8x128xf32, #tpu.memory_space<vmem>>, vector<8x128xf32>
    %c0_3 = arith.constant 0 : index
    %c0_4 = arith.constant 0 : index
    %12 = vector.load %arg1[%c0_3, %c0_4] : memref<4x128xf32, #tpu.memory_space<vmem>>, vector<4x128xf32>
    %cst = arith.constant 0.000000e+00 : f32
    %13 = vector.broadcast %cst : f32 to vector<1x128xf32>
    %c0_5 = arith.constant 0 : index
    %c0_6 = arith.constant 0 : index
    %c0_7 = arith.constant 0 : index
    %14 = vector.load %arg4[%c0_5, %c0_6, %c0_7] : memref<3x64x8xf32, #tpu.memory_space<vmem>>, vector<1x64x8xf32>
    %15 = vector.shape_cast %14 : vector<1x64x8xf32> to vector<64x8xf32>
    %cst_8 = arith.constant dense<0.000000e+00> : vector<64x128xf32>
    %16 = tpu.matmul %15, %11, %cst_8 {dimension_numbers = #tpu.dot_dimension_numbers<[1], [0], [0], [1], [0, 0, 1, 1], [], []>} : vector<64x8xf32>, vector<8x128xf32>, vector<64x128xf32> -> vector<64x128xf32>
    %c0_9 = arith.constant 0 : index
    %c0_10 = arith.constant 0 : index
    %c0_11 = arith.constant 0 : index
    %17 = vector.load %arg5[%c0_9, %c0_10, %c0_11] : memref<3x64x1xf32, #tpu.memory_space<vmem>>, vector<1x64x1xf32>
    %18 = vector.shape_cast %17 : vector<1x64x1xf32> to vector<64x1xf32>
    %19 = vector.broadcast %18 : vector<64x1xf32> to vector<64x128xf32>
    %20 = arith.addf %16, %19 : vector<64x128xf32>
    %cst_12 = arith.constant 0.000000e+00 : f32
    %21 = vector.broadcast %cst_12 : f32 to vector<64x128xf32>
    %22 = arith.maximumf %20, %21 : vector<64x128xf32>
    %c0_13 = arith.constant 0 : index
    %c0_14 = arith.constant 0 : index
    %c0_15 = arith.constant 0 : index
    %23 = vector.load %arg6[%c0_13, %c0_14, %c0_15] : memref<3x64x64xbf16, #tpu.memory_space<vmem>>, vector<1x64x64xbf16>
    %24 = vector.shape_cast %23 : vector<1x64x64xbf16> to vector<64x64xbf16>
    %25 = arith.truncf %22 : vector<64x128xf32> to vector<64x128xbf16>
    %cst_16 = arith.constant dense<0.000000e+00> : vector<64x128xf32>
    %26 = tpu.matmul %24, %25, %cst_16 {dimension_numbers = #tpu.dot_dimension_numbers<[1], [0], [0], [1], [0, 0, 1, 1], [], []>} : vector<64x64xbf16>, vector<64x128xbf16>, vector<64x128xf32> -> vector<64x128xf32>
    %c0_17 = arith.constant 0 : index
    %c0_18 = arith.constant 0 : index
    %c0_19 = arith.constant 0 : index
    %27 = vector.load %arg7[%c0_17, %c0_18, %c0_19] : memref<3x64x1xf32, #tpu.memory_space<vmem>>, vector<1x64x1xf32>
    %28 = vector.shape_cast %27 : vector<1x64x1xf32> to vector<64x1xf32>
    %29 = vector.broadcast %28 : vector<64x1xf32> to vector<64x128xf32>
    %30 = arith.addf %26, %29 : vector<64x128xf32>
    %cst_20 = arith.constant 0.000000e+00 : f32
    %31 = vector.broadcast %cst_20 : f32 to vector<64x128xf32>
    %32 = arith.maximumf %30, %31 : vector<64x128xf32>
    %c0_21 = arith.constant 0 : index
    %c0_22 = arith.constant 0 : index
    %c0_23 = arith.constant 0 : index
    %33 = vector.load %arg8[%c0_21, %c0_22, %c0_23] : memref<3x64x64xbf16, #tpu.memory_space<vmem>>, vector<1x64x64xbf16>
    %34 = vector.shape_cast %33 : vector<1x64x64xbf16> to vector<64x64xbf16>
    %35 = arith.truncf %32 : vector<64x128xf32> to vector<64x128xbf16>
    %cst_24 = arith.constant dense<0.000000e+00> : vector<64x128xf32>
    %36 = tpu.matmul %34, %35, %cst_24 {dimension_numbers = #tpu.dot_dimension_numbers<[1], [0], [0], [1], [0, 0, 1, 1], [], []>} : vector<64x64xbf16>, vector<64x128xbf16>, vector<64x128xf32> -> vector<64x128xf32>
    %c0_25 = arith.constant 0 : index
    %c0_26 = arith.constant 0 : index
    %c0_27 = arith.constant 0 : index
    %37 = vector.load %arg9[%c0_25, %c0_26, %c0_27] : memref<3x64x1xf32, #tpu.memory_space<vmem>>, vector<1x64x1xf32>
    %38 = vector.shape_cast %37 : vector<1x64x1xf32> to vector<64x1xf32>
    %39 = vector.broadcast %38 : vector<64x1xf32> to vector<64x128xf32>
    %40 = arith.addf %36, %39 : vector<64x128xf32>
    %cst_28 = arith.constant 0.000000e+00 : f32
    %41 = vector.broadcast %cst_28 : f32 to vector<64x128xf32>
    %42 = arith.maximumf %40, %41 : vector<64x128xf32>
    %c0_29 = arith.constant 0 : index
    %c0_30 = arith.constant 0 : index
    %c0_31 = arith.constant 0 : index
    %43 = vector.load %arg10[%c0_29, %c0_30, %c0_31] : memref<3x192x64xbf16, #tpu.memory_space<vmem>>, vector<1x192x64xbf16>
    %44 = vector.shape_cast %43 : vector<1x192x64xbf16> to vector<192x64xbf16>
    %45 = arith.truncf %42 : vector<64x128xf32> to vector<64x128xbf16>
    %cst_32 = arith.constant dense<0.000000e+00> : vector<192x128xf32>
    %46 = tpu.matmul %44, %45, %cst_32 {dimension_numbers = #tpu.dot_dimension_numbers<[1], [0], [0], [1], [0, 0, 1, 1], [], []>} : vector<192x64xbf16>, vector<64x128xbf16>, vector<192x128xf32> -> vector<192x128xf32>
    %c0_33 = arith.constant 0 : index
    %c0_34 = arith.constant 0 : index
    %c0_35 = arith.constant 0 : index
    %47 = vector.load %arg11[%c0_33, %c0_34, %c0_35] : memref<3x192x1xf32, #tpu.memory_space<vmem>>, vector<1x192x1xf32>
    %48 = vector.shape_cast %47 : vector<1x192x1xf32> to vector<192x1xf32>
    %49 = vector.broadcast %48 : vector<192x1xf32> to vector<192x128xf32>
    %50 = arith.addf %46, %49 : vector<192x128xf32>
    %51 = vector.extract_strided_slice %50 {offsets = [0, 0], sizes = [64, 128], strides = [1, 1]} : vector<192x128xf32> to vector<64x128xf32>
    %52 = vector.shape_cast %51 : vector<64x128xf32> to vector<4x16x128xf32>
    %cst_36 = arith.constant 0xFF800000 : f32
    %53 = vector.shape_cast %3 : vector<1x16x1xi1> to vector<1x16x1xi1>
    %54 = vector.broadcast %53 : vector<1x16x1xi1> to vector<4x16x128xi1>
    %55 = vector.broadcast %cst_36 : f32 to vector<4x16x128xf32>
    %56 = arith.select %54, %52, %55 : vector<4x16x128xi1>, vector<4x16x128xf32>
    %cst_37 = arith.constant dense<0xFF800000> : vector<4x128xf32>
    %57 = vector.multi_reduction <maximumf>, %56, %cst_37 [1] : vector<4x16x128xf32> to vector<4x128xf32>
    %58 = vector.shape_cast %57 : vector<4x128xf32> to vector<4x1x128xf32>
    %59 = vector.broadcast %58 : vector<4x1x128xf32> to vector<4x16x128xf32>
    %60 = arith.subf %56, %59 : vector<4x16x128xf32>
    %61 = math.exp %60 : vector<4x16x128xf32>
    %62 = vector.shape_cast %61 : vector<4x16x128xf32> to vector<64x128xf32>
    %cst_38 = arith.constant dense<0.000000e+00> : vector<136x128xf32>
    %63 = tpu.matmul %10, %62, %cst_38 {dimension_numbers = #tpu.dot_dimension_numbers<[1], [0], [0], [1], [0, 0, 1, 1], [], []>} : vector<136x64xf32>, vector<64x128xf32>, vector<136x128xf32> -> vector<136x128xf32>
    %64 = vector.extract_strided_slice %63 {offsets = [0, 0], sizes = [64, 128], strides = [1, 1]} : vector<136x128xf32> to vector<64x128xf32>
    %65 = vector.shape_cast %64 : vector<64x128xf32> to vector<4x16x128xf32>
    %66 = vector.extract_strided_slice %63 {offsets = [64, 0], sizes = [64, 128], strides = [1, 1]} : vector<136x128xf32> to vector<64x128xf32>
    %67 = vector.shape_cast %66 : vector<64x128xf32> to vector<4x16x128xf32>
    %68 = vector.extract_strided_slice %63 {offsets = [128, 0], sizes = [4, 128], strides = [1, 1]} : vector<136x128xf32> to vector<4x128xf32>
    %69 = vector.shape_cast %68 : vector<4x128xf32> to vector<4x1x128xf32>
    %cst_39 = arith.constant 1.000000e+00 : f32
    %70 = vector.broadcast %cst_39 : f32 to vector<4x1x128xf32>
    %71 = arith.divf %70, %69 : vector<4x1x128xf32>
    %cst_40 = arith.constant 1.000000e+00 : f32
    %72 = vector.broadcast %cst_40 : f32 to vector<1x16x1xf32>
    %73 = arith.addf %1, %72 : vector<1x16x1xf32>
    %cst_41 = arith.constant 1.000000e-03 : f32
    %74 = vector.broadcast %cst_41 : f32 to vector<1x16x1xf32>
    %75 = arith.mulf %74, %73 : vector<1x16x1xf32>
    %cst_42 = arith.constant 9.900000e-01 : f32
    %76 = vector.broadcast %cst_42 : f32 to vector<4x16x128xf32>
    %77 = arith.mulf %76, %65 : vector<4x16x128xf32>
    %78 = vector.broadcast %71 : vector<4x1x128xf32> to vector<4x16x128xf32>
    %79 = arith.mulf %77, %78 : vector<4x16x128xf32>
    %80 = vector.broadcast %75 : vector<1x16x1xf32> to vector<4x16x128xf32>
    %81 = arith.addf %80, %79 : vector<4x16x128xf32>
    %cst_43 = arith.constant 1.000000e-03 : f32
    %82 = vector.broadcast %cst_43 : f32 to vector<1x16x1xf32>
    %83 = arith.mulf %82, %1 : vector<1x16x1xf32>
    %cst_44 = arith.constant 9.900000e-01 : f32
    %84 = vector.broadcast %cst_44 : f32 to vector<4x16x128xf32>
    %85 = arith.mulf %84, %67 : vector<4x16x128xf32>
    %86 = vector.broadcast %71 : vector<4x1x128xf32> to vector<4x16x128xf32>
    %87 = arith.mulf %85, %86 : vector<4x16x128xf32>
    %88 = vector.broadcast %83 : vector<1x16x1xf32> to vector<4x16x128xf32>
    %89 = arith.addf %88, %87 : vector<4x16x128xf32>
    %cst_45 = arith.constant 1.000000e+00 : f32
    %90 = vector.shape_cast %7 : vector<1x16x1xi1> to vector<1x16x1xi1>
    %91 = vector.broadcast %90 : vector<1x16x1xi1> to vector<4x16x128xi1>
    %92 = vector.broadcast %cst_45 : f32 to vector<4x16x128xf32>
    %93 = arith.select %91, %92, %81 : vector<4x16x128xi1>, vector<4x16x128xf32>
    %94 = vector.extract_strided_slice %50 {offsets = [64, 0], sizes = [64, 128], strides = [1, 1]} : vector<192x128xf32> to vector<64x128xf32>
    %95 = vector.shape_cast %94 : vector<64x128xf32> to vector<4x16x128xf32>
    %cst_46 = arith.constant 0xFF800000 : f32
    %96 = vector.shape_cast %3 : vector<1x16x1xi1> to vector<1x16x1xi1>
    %97 = vector.broadcast %96 : vector<1x16x1xi1> to vector<4x16x128xi1>
    %98 = vector.broadcast %cst_46 : f32 to vector<4x16x128xf32>
    %99 = arith.select %97, %95, %98 : vector<4x16x128xi1>, vector<4x16x128xf32>
    %cst_47 = arith.constant dense<0xFF800000> : vector<4x128xf32>
    %100 = vector.multi_reduction <maximumf>, %99, %cst_47 [1] : vector<4x16x128xf32> to vector<4x128xf32>
    %101 = vector.shape_cast %100 : vector<4x128xf32> to vector<4x1x128xf32>
    %102 = vector.broadcast %101 : vector<4x1x128xf32> to vector<4x16x128xf32>
    %103 = arith.subf %99, %102 : vector<4x16x128xf32>
    %104 = math.exp %103 : vector<4x16x128xf32>
    %105 = vector.shape_cast %104 : vector<4x16x128xf32> to vector<64x128xf32>
    %cst_48 = arith.constant dense<0.000000e+00> : vector<136x128xf32>
    %106 = tpu.matmul %10, %105, %cst_48 {dimension_numbers = #tpu.dot_dimension_numbers<[1], [0], [0], [1], [0, 0, 1, 1], [], []>} : vector<136x64xf32>, vector<64x128xf32>, vector<136x128xf32> -> vector<136x128xf32>
    %107 = vector.extract_strided_slice %106 {offsets = [0, 0], sizes = [64, 128], strides = [1, 1]} : vector<136x128xf32> to vector<64x128xf32>
    %108 = vector.shape_cast %107 : vector<64x128xf32> to vector<4x16x128xf32>
    %109 = vector.extract_strided_slice %106 {offsets = [64, 0], sizes = [64, 128], strides = [1, 1]} : vector<136x128xf32> to vector<64x128xf32>
    %110 = vector.shape_cast %109 : vector<64x128xf32> to vector<4x16x128xf32>
    %111 = vector.extract_strided_slice %106 {offsets = [128, 0], sizes = [4, 128], strides = [1, 1]} : vector<136x128xf32> to vector<4x128xf32>
    %112 = vector.shape_cast %111 : vector<4x128xf32> to vector<4x1x128xf32>
    %cst_49 = arith.constant 1.000000e+00 : f32
    %113 = vector.broadcast %cst_49 : f32 to vector<4x1x128xf32>
    %114 = arith.divf %113, %112 : vector<4x1x128xf32>
    %cst_50 = arith.constant 1.000000e+00 : f32
    %115 = vector.broadcast %cst_50 : f32 to vector<1x16x1xf32>
    %116 = arith.addf %1, %115 : vector<1x16x1xf32>
    %cst_51 = arith.constant 1.000000e-03 : f32
    %117 = vector.broadcast %cst_51 : f32 to vector<1x16x1xf32>
    %118 = arith.mulf %117, %116 : vector<1x16x1xf32>
    %cst_52 = arith.constant 9.900000e-01 : f32
    %119 = vector.broadcast %cst_52 : f32 to vector<4x16x128xf32>
    %120 = arith.mulf %119, %108 : vector<4x16x128xf32>
    %121 = vector.broadcast %114 : vector<4x1x128xf32> to vector<4x16x128xf32>
    %122 = arith.mulf %120, %121 : vector<4x16x128xf32>
    %123 = vector.broadcast %118 : vector<1x16x1xf32> to vector<4x16x128xf32>
    %124 = arith.addf %123, %122 : vector<4x16x128xf32>
    %cst_53 = arith.constant 1.000000e-03 : f32
    %125 = vector.broadcast %cst_53 : f32 to vector<1x16x1xf32>
    %126 = arith.mulf %125, %1 : vector<1x16x1xf32>
    %cst_54 = arith.constant 9.900000e-01 : f32
    %127 = vector.broadcast %cst_54 : f32 to vector<4x16x128xf32>
    %128 = arith.mulf %127, %110 : vector<4x16x128xf32>
    %129 = vector.broadcast %114 : vector<4x1x128xf32> to vector<4x16x128xf32>
    %130 = arith.mulf %128, %129 : vector<4x16x128xf32>
    %131 = vector.broadcast %126 : vector<1x16x1xf32> to vector<4x16x128xf32>
    %132 = arith.addf %131, %130 : vector<4x16x128xf32>
    %cst_55 = arith.constant 1.000000e+00 : f32
    %133 = vector.shape_cast %7 : vector<1x16x1xi1> to vector<1x16x1xi1>
    %134 = vector.broadcast %133 : vector<1x16x1xi1> to vector<4x16x128xi1>
    %135 = vector.broadcast %cst_55 : f32 to vector<4x16x128xf32>
    %136 = arith.select %134, %135, %124 : vector<4x16x128xi1>, vector<4x16x128xf32>
    %137 = vector.extract_strided_slice %50 {offsets = [128, 0], sizes = [64, 128], strides = [1, 1]} : vector<192x128xf32> to vector<64x128xf32>
    %cst_56 = arith.constant 0.000000e+00 : f32
    %138 = vector.broadcast %cst_56 : f32 to vector<64x128xf32>
    %139 = arith.maximumf %137, %138 : vector<64x128xf32>
    %140 = math.absf %137 : vector<64x128xf32>
    %cst_57 = arith.constant 0.000000e+00 : f32
    %141 = vector.broadcast %cst_57 : f32 to vector<64x128xf32>
    %142 = arith.subf %141, %140 : vector<64x128xf32>
    %143 = math.exp %142 : vector<64x128xf32>
    %cst_58 = arith.constant 1.000000e+00 : f32
    %144 = vector.broadcast %cst_58 : f32 to vector<64x128xf32>
    %145 = arith.addf %144, %143 : vector<64x128xf32>
    %146 = math.log %145 : vector<64x128xf32>
    %147 = arith.addf %139, %146 : vector<64x128xf32>
    %cst_59 = arith.constant 1.000000e-03 : f32
    %148 = vector.broadcast %cst_59 : f32 to vector<64x128xf32>
    %149 = arith.addf %148, %147 : vector<64x128xf32>
    %c63_i32 = arith.constant 63 : i32
    %150 = tpu.dynamic_rotate %149 by %c63_i32 dim 0 : vector<64x128xf32>, i32 -> vector<64x128xf32>
    %151 = vector.shape_cast %149 : vector<64x128xf32> to vector<4x16x128xf32>
    %152 = vector.shape_cast %150 : vector<64x128xf32> to vector<4x16x128xf32>
    %cst_60 = arith.constant 0.000000e+00 : f32
    %cst_61 = arith.constant 1.000000e+00 : f32
    %153 = vector.broadcast %cst_60 : f32 to vector<4x128xf32>
    %154 = arith.maximumf %153, %12 : vector<4x128xf32>
    %155 = vector.broadcast %cst_61 : f32 to vector<4x128xf32>
    %156 = arith.minimumf %155, %154 : vector<4x128xf32>
    %157 = vector.shape_cast %156 : vector<4x128xf32> to vector<4x1x128xf32>
    %158 = vector.shape_cast %157 : vector<4x1x128xf32> to vector<4x1x128xf32>
    %159 = vector.broadcast %158 : vector<4x1x128xf32> to vector<4x16x128xf32>
    %160 = arith.cmpf oge, %159, %89 : vector<4x16x128xf32>
    %cst_62 = arith.constant 9.99999997E-7 : f32
    %161 = vector.broadcast %cst_62 : f32 to vector<1x16x1xf32>
    %162 = arith.mulf %161, %9 : vector<1x16x1xf32>
    %163 = vector.broadcast %162 : vector<1x16x1xf32> to vector<4x16x128xf32>
    %164 = arith.addf %93, %163 : vector<4x16x128xf32>
    %165 = arith.cmpf olt, %159, %164 : vector<4x16x128xf32>
    %166 = arith.andi %160, %165 : vector<4x16x128xi1>
    %cst_63 = arith.constant 0.000000e+00 : f32
    %167 = vector.shape_cast %5 : vector<1x16x1xf32> to vector<1x16x1xf32>
    %168 = vector.broadcast %167 : vector<1x16x1xf32> to vector<4x16x128xf32>
    %169 = vector.broadcast %cst_63 : f32 to vector<4x16x128xf32>
    %170 = arith.select %166, %168, %169 : vector<4x16x128xi1>, vector<4x16x128xf32>
    %171 = arith.mulf %170, %89 : vector<4x16x128xf32>
    %cst_64 = arith.constant dense<0.000000e+00> : vector<4x128xf32>
    %172 = vector.multi_reduction <add>, %171, %cst_64 [1] : vector<4x16x128xf32> to vector<4x128xf32>
    %173 = vector.shape_cast %172 : vector<4x128xf32> to vector<4x1x128xf32>
    %174 = arith.mulf %170, %93 : vector<4x16x128xf32>
    %cst_65 = arith.constant dense<0.000000e+00> : vector<4x128xf32>
    %175 = vector.multi_reduction <add>, %174, %cst_65 [1] : vector<4x16x128xf32> to vector<4x128xf32>
    %176 = vector.shape_cast %175 : vector<4x128xf32> to vector<4x1x128xf32>
    %177 = arith.mulf %170, %132 : vector<4x16x128xf32>
    %cst_66 = arith.constant dense<0.000000e+00> : vector<4x128xf32>
    %178 = vector.multi_reduction <add>, %177, %cst_66 [1] : vector<4x16x128xf32> to vector<4x128xf32>
    %179 = vector.shape_cast %178 : vector<4x128xf32> to vector<4x1x128xf32>
    %180 = arith.mulf %170, %136 : vector<4x16x128xf32>
    %cst_67 = arith.constant dense<0.000000e+00> : vector<4x128xf32>
    %181 = vector.multi_reduction <add>, %180, %cst_67 [1] : vector<4x16x128xf32> to vector<4x128xf32>
    %182 = vector.shape_cast %181 : vector<4x128xf32> to vector<4x1x128xf32>
    %183 = arith.mulf %170, %151 : vector<4x16x128xf32>
    %cst_68 = arith.constant dense<0.000000e+00> : vector<4x128xf32>
    %184 = vector.multi_reduction <add>, %183, %cst_68 [1] : vector<4x16x128xf32> to vector<4x128xf32>
    %185 = vector.shape_cast %184 : vector<4x128xf32> to vector<4x1x128xf32>
    %186 = arith.mulf %170, %152 : vector<4x16x128xf32>
    %cst_69 = arith.constant dense<0.000000e+00> : vector<4x128xf32>
    %187 = vector.multi_reduction <add>, %186, %cst_69 [1] : vector<4x16x128xf32> to vector<4x128xf32>
    %188 = vector.shape_cast %187 : vector<4x128xf32> to vector<4x1x128xf32>
    %189 = arith.subf %176, %173 : vector<4x1x128xf32>
    %190 = arith.subf %182, %179 : vector<4x1x128xf32>
    %191 = arith.divf %190, %189 : vector<4x1x128xf32>
    %192 = arith.subf %157, %173 : vector<4x1x128xf32>
    %193 = arith.divf %192, %189 : vector<4x1x128xf32>
    %cst_70 = arith.constant 1.000000e+00 : f32
    %194 = vector.broadcast %cst_70 : f32 to vector<4x1x128xf32>
    %195 = arith.subf %194, %193 : vector<4x1x128xf32>
    %196 = arith.mulf %193, %195 : vector<4x1x128xf32>
    %197 = arith.mulf %193, %193 : vector<4x1x128xf32>
    %198 = arith.mulf %191, %197 : vector<4x1x128xf32>
    %199 = arith.mulf %185, %196 : vector<4x1x128xf32>
    %200 = arith.addf %198, %199 : vector<4x1x128xf32>
    %201 = arith.mulf %190, %200 : vector<4x1x128xf32>
    %202 = arith.addf %185, %188 : vector<4x1x128xf32>
    %cst_71 = arith.constant 2.000000e+00 : f32
    %203 = vector.broadcast %cst_71 : f32 to vector<4x1x128xf32>
    %204 = arith.mulf %203, %191 : vector<4x1x128xf32>
    %205 = arith.subf %202, %204 : vector<4x1x128xf32>
    %206 = arith.mulf %205, %196 : vector<4x1x128xf32>
    %207 = arith.addf %191, %206 : vector<4x1x128xf32>
    %208 = arith.divf %201, %207 : vector<4x1x128xf32>
    %209 = arith.addf %179, %208 : vector<4x1x128xf32>
    %210 = arith.mulf %191, %191 : vector<4x1x128xf32>
    %211 = arith.mulf %188, %197 : vector<4x1x128xf32>
    %cst_72 = arith.constant 2.000000e+00 : f32
    %212 = vector.broadcast %cst_72 : f32 to vector<4x1x128xf32>
    %213 = arith.mulf %212, %191 : vector<4x1x128xf32>
    %214 = arith.mulf %213, %196 : vector<4x1x128xf32>
    %215 = arith.addf %211, %214 : vector<4x1x128xf32>
    %216 = arith.mulf %185, %195 : vector<4x1x128xf32>
    %217 = arith.mulf %216, %195 : vector<4x1x128xf32>
    %218 = arith.addf %215, %217 : vector<4x1x128xf32>
    %219 = arith.mulf %210, %218 : vector<4x1x128xf32>
    %220 = math.log %219 : vector<4x1x128xf32>
    %221 = math.log %207 : vector<4x1x128xf32>
    %cst_73 = arith.constant 2.000000e+00 : f32
    %222 = vector.broadcast %cst_73 : f32 to vector<4x1x128xf32>
    %223 = arith.mulf %222, %221 : vector<4x1x128xf32>
    %224 = arith.subf %220, %223 : vector<4x1x128xf32>
    %cst_74 = arith.constant dense<0.000000e+00> : vector<1x128xf32>
    %225 = vector.multi_reduction <add>, %224, %cst_74 [0] : vector<4x1x128xf32> to vector<1x128xf32>
    %226 = arith.addf %13, %225 : vector<1x128xf32>
    %227 = vector.shape_cast %209 : vector<4x1x128xf32> to vector<4x128xf32>
    %c1 = arith.constant 1 : index
    %c0_75 = arith.constant 0 : index
    %c0_76 = arith.constant 0 : index
    %228 = vector.load %arg4[%c1, %c0_75, %c0_76] : memref<3x64x8xf32, #tpu.memory_space<vmem>>, vector<1x64x8xf32>
    %229 = vector.shape_cast %228 : vector<1x64x8xf32> to vector<64x8xf32>
    %cst_77 = arith.constant dense<0.000000e+00> : vector<64x128xf32>
    %230 = tpu.matmul %229, %11, %cst_77 {dimension_numbers = #tpu.dot_dimension_numbers<[1], [0], [0], [1], [0, 0, 1, 1], [], []>} : vector<64x8xf32>, vector<8x128xf32>, vector<64x128xf32> -> vector<64x128xf32>
    %c1_78 = arith.constant 1 : index
    %c0_79 = arith.constant 0 : index
    %c0_80 = arith.constant 0 : index
    %231 = vector.load %arg5[%c1_78, %c0_79, %c0_80] : memref<3x64x1xf32, #tpu.memory_space<vmem>>, vector<1x64x1xf32>
    %232 = vector.shape_cast %231 : vector<1x64x1xf32> to vector<64x1xf32>
    %233 = vector.broadcast %232 : vector<64x1xf32> to vector<64x128xf32>
    %234 = arith.addf %230, %233 : vector<64x128xf32>
    %cst_81 = arith.constant 0.000000e+00 : f32
    %235 = vector.broadcast %cst_81 : f32 to vector<64x128xf32>
    %236 = arith.maximumf %234, %235 : vector<64x128xf32>
    %c1_82 = arith.constant 1 : index
    %c0_83 = arith.constant 0 : index
    %c0_84 = arith.constant 0 : index
    %237 = vector.load %arg6[%c1_82, %c0_83, %c0_84] : memref<3x64x64xbf16, #tpu.memory_space<vmem>>, vector<1x64x64xbf16>
    %238 = vector.shape_cast %237 : vector<1x64x64xbf16> to vector<64x64xbf16>
    %239 = arith.truncf %236 : vector<64x128xf32> to vector<64x128xbf16>
    %cst_85 = arith.constant dense<0.000000e+00> : vector<64x128xf32>
    %240 = tpu.matmul %238, %239, %cst_85 {dimension_numbers = #tpu.dot_dimension_numbers<[1], [0], [0], [1], [0, 0, 1, 1], [], []>} : vector<64x64xbf16>, vector<64x128xbf16>, vector<64x128xf32> -> vector<64x128xf32>
    %c1_86 = arith.constant 1 : index
    %c0_87 = arith.constant 0 : index
    %c0_88 = arith.constant 0 : index
    %241 = vector.load %arg7[%c1_86, %c0_87, %c0_88] : memref<3x64x1xf32, #tpu.memory_space<vmem>>, vector<1x64x1xf32>
    %242 = vector.shape_cast %241 : vector<1x64x1xf32> to vector<64x1xf32>
    %243 = vector.broadcast %242 : vector<64x1xf32> to vector<64x128xf32>
    %244 = arith.addf %240, %243 : vector<64x128xf32>
    %cst_89 = arith.constant 0.000000e+00 : f32
    %245 = vector.broadcast %cst_89 : f32 to vector<64x128xf32>
    %246 = arith.maximumf %244, %245 : vector<64x128xf32>
    %c1_90 = arith.constant 1 : index
    %c0_91 = arith.constant 0 : index
    %c0_92 = arith.constant 0 : index
    %247 = vector.load %arg8[%c1_90, %c0_91, %c0_92] : memref<3x64x64xbf16, #tpu.memory_space<vmem>>, vector<1x64x64xbf16>
    %248 = vector.shape_cast %247 : vector<1x64x64xbf16> to vector<64x64xbf16>
    %249 = arith.truncf %246 : vector<64x128xf32> to vector<64x128xbf16>
    %cst_93 = arith.constant dense<0.000000e+00> : vector<64x128xf32>
    %250 = tpu.matmul %248, %249, %cst_93 {dimension_numbers = #tpu.dot_dimension_numbers<[1], [0], [0], [1], [0, 0, 1, 1], [], []>} : vector<64x64xbf16>, vector<64x128xbf16>, vector<64x128xf32> -> vector<64x128xf32>
    %c1_94 = arith.constant 1 : index
    %c0_95 = arith.constant 0 : index
    %c0_96 = arith.constant 0 : index
    %251 = vector.load %arg9[%c1_94, %c0_95, %c0_96] : memref<3x64x1xf32, #tpu.memory_space<vmem>>, vector<1x64x1xf32>
    %252 = vector.shape_cast %251 : vector<1x64x1xf32> to vector<64x1xf32>
    %253 = vector.broadcast %252 : vector<64x1xf32> to vector<64x128xf32>
    %254 = arith.addf %250, %253 : vector<64x128xf32>
    %cst_97 = arith.constant 0.000000e+00 : f32
    %255 = vector.broadcast %cst_97 : f32 to vector<64x128xf32>
    %256 = arith.maximumf %254, %255 : vector<64x128xf32>
    %c1_98 = arith.constant 1 : index
    %c0_99 = arith.constant 0 : index
    %c0_100 = arith.constant 0 : index
    %257 = vector.load %arg10[%c1_98, %c0_99, %c0_100] : memref<3x192x64xbf16, #tpu.memory_space<vmem>>, vector<1x192x64xbf16>
    %258 = vector.shape_cast %257 : vector<1x192x64xbf16> to vector<192x64xbf16>
    %259 = arith.truncf %256 : vector<64x128xf32> to vector<64x128xbf16>
    %cst_101 = arith.constant dense<0.000000e+00> : vector<192x128xf32>
    %260 = tpu.matmul %258, %259, %cst_101 {dimension_numbers = #tpu.dot_dimension_numbers<[1], [0], [0], [1], [0, 0, 1, 1], [], []>} : vector<192x64xbf16>, vector<64x128xbf16>, vector<192x128xf32> -> vector<192x128xf32>
    %c1_102 = arith.constant 1 : index
    %c0_103 = arith.constant 0 : index
    %c0_104 = arith.constant 0 : index
    %261 = vector.load %arg11[%c1_102, %c0_103, %c0_104] : memref<3x192x1xf32, #tpu.memory_space<vmem>>, vector<1x192x1xf32>
    %262 = vector.shape_cast %261 : vector<1x192x1xf32> to vector<192x1xf32>
    %263 = vector.broadcast %262 : vector<192x1xf32> to vector<192x128xf32>
    %264 = arith.addf %260, %263 : vector<192x128xf32>
    %265 = vector.extract_strided_slice %264 {offsets = [0, 0], sizes = [64, 128], strides = [1, 1]} : vector<192x128xf32> to vector<64x128xf32>
    %266 = vector.shape_cast %265 : vector<64x128xf32> to vector<4x16x128xf32>
    %cst_105 = arith.constant 0xFF800000 : f32
    %267 = vector.shape_cast %3 : vector<1x16x1xi1> to vector<1x16x1xi1>
    %268 = vector.broadcast %267 : vector<1x16x1xi1> to vector<4x16x128xi1>
    %269 = vector.broadcast %cst_105 : f32 to vector<4x16x128xf32>
    %270 = arith.select %268, %266, %269 : vector<4x16x128xi1>, vector<4x16x128xf32>
    %cst_106 = arith.constant dense<0xFF800000> : vector<4x128xf32>
    %271 = vector.multi_reduction <maximumf>, %270, %cst_106 [1] : vector<4x16x128xf32> to vector<4x128xf32>
    %272 = vector.shape_cast %271 : vector<4x128xf32> to vector<4x1x128xf32>
    %273 = vector.broadcast %272 : vector<4x1x128xf32> to vector<4x16x128xf32>
    %274 = arith.subf %270, %273 : vector<4x16x128xf32>
    %275 = math.exp %274 : vector<4x16x128xf32>
    %276 = vector.shape_cast %275 : vector<4x16x128xf32> to vector<64x128xf32>
    %cst_107 = arith.constant dense<0.000000e+00> : vector<136x128xf32>
    %277 = tpu.matmul %10, %276, %cst_107 {dimension_numbers = #tpu.dot_dimension_numbers<[1], [0], [0], [1], [0, 0, 1, 1], [], []>} : vector<136x64xf32>, vector<64x128xf32>, vector<136x128xf32> -> vector<136x128xf32>
    %278 = vector.extract_strided_slice %277 {offsets = [0, 0], sizes = [64, 128], strides = [1, 1]} : vector<136x128xf32> to vector<64x128xf32>
    %279 = vector.shape_cast %278 : vector<64x128xf32> to vector<4x16x128xf32>
    %280 = vector.extract_strided_slice %277 {offsets = [64, 0], sizes = [64, 128], strides = [1, 1]} : vector<136x128xf32> to vector<64x128xf32>
    %281 = vector.shape_cast %280 : vector<64x128xf32> to vector<4x16x128xf32>
    %282 = vector.extract_strided_slice %277 {offsets = [128, 0], sizes = [4, 128], strides = [1, 1]} : vector<136x128xf32> to vector<4x128xf32>
    %283 = vector.shape_cast %282 : vector<4x128xf32> to vector<4x1x128xf32>
    %cst_108 = arith.constant 1.000000e+00 : f32
    %284 = vector.broadcast %cst_108 : f32 to vector<4x1x128xf32>
    %285 = arith.divf %284, %283 : vector<4x1x128xf32>
    %cst_109 = arith.constant 1.000000e+00 : f32
    %286 = vector.broadcast %cst_109 : f32 to vector<1x16x1xf32>
    %287 = arith.addf %1, %286 : vector<1x16x1xf32>
    %cst_110 = arith.constant 1.000000e-03 : f32
    %288 = vector.broadcast %cst_110 : f32 to vector<1x16x1xf32>
    %289 = arith.mulf %288, %287 : vector<1x16x1xf32>
    %cst_111 = arith.constant 9.900000e-01 : f32
    %290 = vector.broadcast %cst_111 : f32 to vector<4x16x128xf32>
    %291 = arith.mulf %290, %279 : vector<4x16x128xf32>
    %292 = vector.broadcast %285 : vector<4x1x128xf32> to vector<4x16x128xf32>
    %293 = arith.mulf %291, %292 : vector<4x16x128xf32>
    %294 = vector.broadcast %289 : vector<1x16x1xf32> to vector<4x16x128xf32>
    %295 = arith.addf %294, %293 : vector<4x16x128xf32>
    %cst_112 = arith.constant 1.000000e-03 : f32
    %296 = vector.broadcast %cst_112 : f32 to vector<1x16x1xf32>
    %297 = arith.mulf %296, %1 : vector<1x16x1xf32>
    %cst_113 = arith.constant 9.900000e-01 : f32
    %298 = vector.broadcast %cst_113 : f32 to vector<4x16x128xf32>
    %299 = arith.mulf %298, %281 : vector<4x16x128xf32>
    %300 = vector.broadcast %285 : vector<4x1x128xf32> to vector<4x16x128xf32>
    %301 = arith.mulf %299, %300 : vector<4x16x128xf32>
    %302 = vector.broadcast %297 : vector<1x16x1xf32> to vector<4x16x128xf32>
    %303 = arith.addf %302, %301 : vector<4x16x128xf32>
    %cst_114 = arith.constant 1.000000e+00 : f32
    %304 = vector.shape_cast %7 : vector<1x16x1xi1> to vector<1x16x1xi1>
    %305 = vector.broadcast %304 : vector<1x16x1xi1> to vector<4x16x128xi1>
    %306 = vector.broadcast %cst_114 : f32 to vector<4x16x128xf32>
    %307 = arith.select %305, %306, %295 : vector<4x16x128xi1>, vector<4x16x128xf32>
    %308 = vector.extract_strided_slice %264 {offsets = [64, 0], sizes = [64, 128], strides = [1, 1]} : vector<192x128xf32> to vector<64x128xf32>
    %309 = vector.shape_cast %308 : vector<64x128xf32> to vector<4x16x128xf32>
    %cst_115 = arith.constant 0xFF800000 : f32
    %310 = vector.shape_cast %3 : vector<1x16x1xi1> to vector<1x16x1xi1>
    %311 = vector.broadcast %310 : vector<1x16x1xi1> to vector<4x16x128xi1>
    %312 = vector.broadcast %cst_115 : f32 to vector<4x16x128xf32>
    %313 = arith.select %311, %309, %312 : vector<4x16x128xi1>, vector<4x16x128xf32>
    %cst_116 = arith.constant dense<0xFF800000> : vector<4x128xf32>
    %314 = vector.multi_reduction <maximumf>, %313, %cst_116 [1] : vector<4x16x128xf32> to vector<4x128xf32>
    %315 = vector.shape_cast %314 : vector<4x128xf32> to vector<4x1x128xf32>
    %316 = vector.broadcast %315 : vector<4x1x128xf32> to vector<4x16x128xf32>
    %317 = arith.subf %313, %316 : vector<4x16x128xf32>
    %318 = math.exp %317 : vector<4x16x128xf32>
    %319 = vector.shape_cast %318 : vector<4x16x128xf32> to vector<64x128xf32>
    %cst_117 = arith.constant dense<0.000000e+00> : vector<136x128xf32>
    %320 = tpu.matmul %10, %319, %cst_117 {dimension_numbers = #tpu.dot_dimension_numbers<[1], [0], [0], [1], [0, 0, 1, 1], [], []>} : vector<136x64xf32>, vector<64x128xf32>, vector<136x128xf32> -> vector<136x128xf32>
    %321 = vector.extract_strided_slice %320 {offsets = [0, 0], sizes = [64, 128], strides = [1, 1]} : vector<136x128xf32> to vector<64x128xf32>
    %322 = vector.shape_cast %321 : vector<64x128xf32> to vector<4x16x128xf32>
    %323 = vector.extract_strided_slice %320 {offsets = [64, 0], sizes = [64, 128], strides = [1, 1]} : vector<136x128xf32> to vector<64x128xf32>
    %324 = vector.shape_cast %323 : vector<64x128xf32> to vector<4x16x128xf32>
    %325 = vector.extract_strided_slice %320 {offsets = [128, 0], sizes = [4, 128], strides = [1, 1]} : vector<136x128xf32> to vector<4x128xf32>
    %326 = vector.shape_cast %325 : vector<4x128xf32> to vector<4x1x128xf32>
    %cst_118 = arith.constant 1.000000e+00 : f32
    %327 = vector.broadcast %cst_118 : f32 to vector<4x1x128xf32>
    %328 = arith.divf %327, %326 : vector<4x1x128xf32>
    %cst_119 = arith.constant 1.000000e+00 : f32
    %329 = vector.broadcast %cst_119 : f32 to vector<1x16x1xf32>
    %330 = arith.addf %1, %329 : vector<1x16x1xf32>
    %cst_120 = arith.constant 1.000000e-03 : f32
    %331 = vector.broadcast %cst_120 : f32 to vector<1x16x1xf32>
    %332 = arith.mulf %331, %330 : vector<1x16x1xf32>
    %cst_121 = arith.constant 9.900000e-01 : f32
    %333 = vector.broadcast %cst_121 : f32 to vector<4x16x128xf32>
    %334 = arith.mulf %333, %322 : vector<4x16x128xf32>
    %335 = vector.broadcast %328 : vector<4x1x128xf32> to vector<4x16x128xf32>
    %336 = arith.mulf %334, %335 : vector<4x16x128xf32>
    %337 = vector.broadcast %332 : vector<1x16x1xf32> to vector<4x16x128xf32>
    %338 = arith.addf %337, %336 : vector<4x16x128xf32>
    %cst_122 = arith.constant 1.000000e-03 : f32
    %339 = vector.broadcast %cst_122 : f32 to vector<1x16x1xf32>
    %340 = arith.mulf %339, %1 : vector<1x16x1xf32>
    %cst_123 = arith.constant 9.900000e-01 : f32
    %341 = vector.broadcast %cst_123 : f32 to vector<4x16x128xf32>
    %342 = arith.mulf %341, %324 : vector<4x16x128xf32>
    %343 = vector.broadcast %328 : vector<4x1x128xf32> to vector<4x16x128xf32>
    %344 = arith.mulf %342, %343 : vector<4x16x128xf32>
    %345 = vector.broadcast %340 : vector<1x16x1xf32> to vector<4x16x128xf32>
    %346 = arith.addf %345, %344 : vector<4x16x128xf32>
    %cst_124 = arith.constant 1.000000e+00 : f32
    %347 = vector.shape_cast %7 : vector<1x16x1xi1> to vector<1x16x1xi1>
    %348 = vector.broadcast %347 : vector<1x16x1xi1> to vector<4x16x128xi1>
    %349 = vector.broadcast %cst_124 : f32 to vector<4x16x128xf32>
    %350 = arith.select %348, %349, %338 : vector<4x16x128xi1>, vector<4x16x128xf32>
    %351 = vector.extract_strided_slice %264 {offsets = [128, 0], sizes = [64, 128], strides = [1, 1]} : vector<192x128xf32> to vector<64x128xf32>
    %cst_125 = arith.constant 0.000000e+00 : f32
    %352 = vector.broadcast %cst_125 : f32 to vector<64x128xf32>
    %353 = arith.maximumf %351, %352 : vector<64x128xf32>
    %354 = math.absf %351 : vector<64x128xf32>
    %cst_126 = arith.constant 0.000000e+00 : f32
    %355 = vector.broadcast %cst_126 : f32 to vector<64x128xf32>
    %356 = arith.subf %355, %354 : vector<64x128xf32>
    %357 = math.exp %356 : vector<64x128xf32>
    %cst_127 = arith.constant 1.000000e+00 : f32
    %358 = vector.broadcast %cst_127 : f32 to vector<64x128xf32>
    %359 = arith.addf %358, %357 : vector<64x128xf32>
    %360 = math.log %359 : vector<64x128xf32>
    %361 = arith.addf %353, %360 : vector<64x128xf32>
    %cst_128 = arith.constant 1.000000e-03 : f32
    %362 = vector.broadcast %cst_128 : f32 to vector<64x128xf32>
    %363 = arith.addf %362, %361 : vector<64x128xf32>
    %c63_i32_129 = arith.constant 63 : i32
    %364 = tpu.dynamic_rotate %363 by %c63_i32_129 dim 0 : vector<64x128xf32>, i32 -> vector<64x128xf32>
    %365 = vector.shape_cast %363 : vector<64x128xf32> to vector<4x16x128xf32>
    %366 = vector.shape_cast %364 : vector<64x128xf32> to vector<4x16x128xf32>
    %cst_130 = arith.constant 0.000000e+00 : f32
    %cst_131 = arith.constant 1.000000e+00 : f32
    %367 = vector.broadcast %cst_130 : f32 to vector<4x128xf32>
    %368 = arith.maximumf %367, %227 : vector<4x128xf32>
    %369 = vector.broadcast %cst_131 : f32 to vector<4x128xf32>
    %370 = arith.minimumf %369, %368 : vector<4x128xf32>
    %371 = vector.shape_cast %370 : vector<4x128xf32> to vector<4x1x128xf32>
    %372 = vector.shape_cast %371 : vector<4x1x128xf32> to vector<4x1x128xf32>
    %373 = vector.broadcast %372 : vector<4x1x128xf32> to vector<4x16x128xf32>
    %374 = arith.cmpf oge, %373, %303 : vector<4x16x128xf32>
    %cst_132 = arith.constant 9.99999997E-7 : f32
    %375 = vector.broadcast %cst_132 : f32 to vector<1x16x1xf32>
    %376 = arith.mulf %375, %9 : vector<1x16x1xf32>
    %377 = vector.broadcast %376 : vector<1x16x1xf32> to vector<4x16x128xf32>
    %378 = arith.addf %307, %377 : vector<4x16x128xf32>
    %379 = arith.cmpf olt, %373, %378 : vector<4x16x128xf32>
    %380 = arith.andi %374, %379 : vector<4x16x128xi1>
    %cst_133 = arith.constant 0.000000e+00 : f32
    %381 = vector.shape_cast %5 : vector<1x16x1xf32> to vector<1x16x1xf32>
    %382 = vector.broadcast %381 : vector<1x16x1xf32> to vector<4x16x128xf32>
    %383 = vector.broadcast %cst_133 : f32 to vector<4x16x128xf32>
    %384 = arith.select %380, %382, %383 : vector<4x16x128xi1>, vector<4x16x128xf32>
    %385 = arith.mulf %384, %303 : vector<4x16x128xf32>
    %cst_134 = arith.constant dense<0.000000e+00> : vector<4x128xf32>
    %386 = vector.multi_reduction <add>, %385, %cst_134 [1] : vector<4x16x128xf32> to vector<4x128xf32>
    %387 = vector.shape_cast %386 : vector<4x128xf32> to vector<4x1x128xf32>
    %388 = arith.mulf %384, %307 : vector<4x16x128xf32>
    %cst_135 = arith.constant dense<0.000000e+00> : vector<4x128xf32>
    %389 = vector.multi_reduction <add>, %388, %cst_135 [1] : vector<4x16x128xf32> to vector<4x128xf32>
    %390 = vector.shape_cast %389 : vector<4x128xf32> to vector<4x1x128xf32>
    %391 = arith.mulf %384, %346 : vector<4x16x128xf32>
    %cst_136 = arith.constant dense<0.000000e+00> : vector<4x128xf32>
    %392 = vector.multi_reduction <add>, %391, %cst_136 [1] : vector<4x16x128xf32> to vector<4x128xf32>
    %393 = vector.shape_cast %392 : vector<4x128xf32> to vector<4x1x128xf32>
    %394 = arith.mulf %384, %350 : vector<4x16x128xf32>
    %cst_137 = arith.constant dense<0.000000e+00> : vector<4x128xf32>
    %395 = vector.multi_reduction <add>, %394, %cst_137 [1] : vector<4x16x128xf32> to vector<4x128xf32>
    %396 = vector.shape_cast %395 : vector<4x128xf32> to vector<4x1x128xf32>
    %397 = arith.mulf %384, %365 : vector<4x16x128xf32>
    %cst_138 = arith.constant dense<0.000000e+00> : vector<4x128xf32>
    %398 = vector.multi_reduction <add>, %397, %cst_138 [1] : vector<4x16x128xf32> to vector<4x128xf32>
    %399 = vector.shape_cast %398 : vector<4x128xf32> to vector<4x1x128xf32>
    %400 = arith.mulf %384, %366 : vector<4x16x128xf32>
    %cst_139 = arith.constant dense<0.000000e+00> : vector<4x128xf32>
    %401 = vector.multi_reduction <add>, %400, %cst_139 [1] : vector<4x16x128xf32> to vector<4x128xf32>
    %402 = vector.shape_cast %401 : vector<4x128xf32> to vector<4x1x128xf32>
    %403 = arith.subf %390, %387 : vector<4x1x128xf32>
    %404 = arith.subf %396, %393 : vector<4x1x128xf32>
    %405 = arith.divf %404, %403 : vector<4x1x128xf32>
    %406 = arith.subf %371, %387 : vector<4x1x128xf32>
    %407 = arith.divf %406, %403 : vector<4x1x128xf32>
    %cst_140 = arith.constant 1.000000e+00 : f32
    %408 = vector.broadcast %cst_140 : f32 to vector<4x1x128xf32>
    %409 = arith.subf %408, %407 : vector<4x1x128xf32>
    %410 = arith.mulf %407, %409 : vector<4x1x128xf32>
    %411 = arith.mulf %407, %407 : vector<4x1x128xf32>
    %412 = arith.mulf %405, %411 : vector<4x1x128xf32>
    %413 = arith.mulf %399, %410 : vector<4x1x128xf32>
    %414 = arith.addf %412, %413 : vector<4x1x128xf32>
    %415 = arith.mulf %404, %414 : vector<4x1x128xf32>
    %416 = arith.addf %399, %402 : vector<4x1x128xf32>
    %cst_141 = arith.constant 2.000000e+00 : f32
    %417 = vector.broadcast %cst_141 : f32 to vector<4x1x128xf32>
    %418 = arith.mulf %417, %405 : vector<4x1x128xf32>
    %419 = arith.subf %416, %418 : vector<4x1x128xf32>
    %420 = arith.mulf %419, %410 : vector<4x1x128xf32>
    %421 = arith.addf %405, %420 : vector<4x1x128xf32>
    %422 = arith.divf %415, %421 : vector<4x1x128xf32>
    %423 = arith.addf %393, %422 : vector<4x1x128xf32>
    %424 = arith.mulf %405, %405 : vector<4x1x128xf32>
    %425 = arith.mulf %402, %411 : vector<4x1x128xf32>
    %cst_142 = arith.constant 2.000000e+00 : f32
    %426 = vector.broadcast %cst_142 : f32 to vector<4x1x128xf32>
    %427 = arith.mulf %426, %405 : vector<4x1x128xf32>
    %428 = arith.mulf %427, %410 : vector<4x1x128xf32>
    %429 = arith.addf %425, %428 : vector<4x1x128xf32>
    %430 = arith.mulf %399, %409 : vector<4x1x128xf32>
    %431 = arith.mulf %430, %409 : vector<4x1x128xf32>
    %432 = arith.addf %429, %431 : vector<4x1x128xf32>
    %433 = arith.mulf %424, %432 : vector<4x1x128xf32>
    %434 = math.log %433 : vector<4x1x128xf32>
    %435 = math.log %421 : vector<4x1x128xf32>
    %cst_143 = arith.constant 2.000000e+00 : f32
    %436 = vector.broadcast %cst_143 : f32 to vector<4x1x128xf32>
    %437 = arith.mulf %436, %435 : vector<4x1x128xf32>
    %438 = arith.subf %434, %437 : vector<4x1x128xf32>
    %cst_144 = arith.constant dense<0.000000e+00> : vector<1x128xf32>
    %439 = vector.multi_reduction <add>, %438, %cst_144 [0] : vector<4x1x128xf32> to vector<1x128xf32>
    %440 = arith.addf %226, %439 : vector<1x128xf32>
    %441 = vector.shape_cast %423 : vector<4x1x128xf32> to vector<4x128xf32>
    %c2 = arith.constant 2 : index
    %c0_145 = arith.constant 0 : index
    %c0_146 = arith.constant 0 : index
    %442 = vector.load %arg4[%c2, %c0_145, %c0_146] : memref<3x64x8xf32, #tpu.memory_space<vmem>>, vector<1x64x8xf32>
    %443 = vector.shape_cast %442 : vector<1x64x8xf32> to vector<64x8xf32>
    %cst_147 = arith.constant dense<0.000000e+00> : vector<64x128xf32>
    %444 = tpu.matmul %443, %11, %cst_147 {dimension_numbers = #tpu.dot_dimension_numbers<[1], [0], [0], [1], [0, 0, 1, 1], [], []>} : vector<64x8xf32>, vector<8x128xf32>, vector<64x128xf32> -> vector<64x128xf32>
    %c2_148 = arith.constant 2 : index
    %c0_149 = arith.constant 0 : index
    %c0_150 = arith.constant 0 : index
    %445 = vector.load %arg5[%c2_148, %c0_149, %c0_150] : memref<3x64x1xf32, #tpu.memory_space<vmem>>, vector<1x64x1xf32>
    %446 = vector.shape_cast %445 : vector<1x64x1xf32> to vector<64x1xf32>
    %447 = vector.broadcast %446 : vector<64x1xf32> to vector<64x128xf32>
    %448 = arith.addf %444, %447 : vector<64x128xf32>
    %cst_151 = arith.constant 0.000000e+00 : f32
    %449 = vector.broadcast %cst_151 : f32 to vector<64x128xf32>
    %450 = arith.maximumf %448, %449 : vector<64x128xf32>
    %c2_152 = arith.constant 2 : index
    %c0_153 = arith.constant 0 : index
    %c0_154 = arith.constant 0 : index
    %451 = vector.load %arg6[%c2_152, %c0_153, %c0_154] : memref<3x64x64xbf16, #tpu.memory_space<vmem>>, vector<1x64x64xbf16>
    %452 = vector.shape_cast %451 : vector<1x64x64xbf16> to vector<64x64xbf16>
    %453 = arith.truncf %450 : vector<64x128xf32> to vector<64x128xbf16>
    %cst_155 = arith.constant dense<0.000000e+00> : vector<64x128xf32>
    %454 = tpu.matmul %452, %453, %cst_155 {dimension_numbers = #tpu.dot_dimension_numbers<[1], [0], [0], [1], [0, 0, 1, 1], [], []>} : vector<64x64xbf16>, vector<64x128xbf16>, vector<64x128xf32> -> vector<64x128xf32>
    %c2_156 = arith.constant 2 : index
    %c0_157 = arith.constant 0 : index
    %c0_158 = arith.constant 0 : index
    %455 = vector.load %arg7[%c2_156, %c0_157, %c0_158] : memref<3x64x1xf32, #tpu.memory_space<vmem>>, vector<1x64x1xf32>
    %456 = vector.shape_cast %455 : vector<1x64x1xf32> to vector<64x1xf32>
    %457 = vector.broadcast %456 : vector<64x1xf32> to vector<64x128xf32>
    %458 = arith.addf %454, %457 : vector<64x128xf32>
    %cst_159 = arith.constant 0.000000e+00 : f32
    %459 = vector.broadcast %cst_159 : f32 to vector<64x128xf32>
    %460 = arith.maximumf %458, %459 : vector<64x128xf32>
    %c2_160 = arith.constant 2 : index
    %c0_161 = arith.constant 0 : index
    %c0_162 = arith.constant 0 : index
    %461 = vector.load %arg8[%c2_160, %c0_161, %c0_162] : memref<3x64x64xbf16, #tpu.memory_space<vmem>>, vector<1x64x64xbf16>
    %462 = vector.shape_cast %461 : vector<1x64x64xbf16> to vector<64x64xbf16>
    %463 = arith.truncf %460 : vector<64x128xf32> to vector<64x128xbf16>
    %cst_163 = arith.constant dense<0.000000e+00> : vector<64x128xf32>
    %464 = tpu.matmul %462, %463, %cst_163 {dimension_numbers = #tpu.dot_dimension_numbers<[1], [0], [0], [1], [0, 0, 1, 1], [], []>} : vector<64x64xbf16>, vector<64x128xbf16>, vector<64x128xf32> -> vector<64x128xf32>
    %c2_164 = arith.constant 2 : index
    %c0_165 = arith.constant 0 : index
    %c0_166 = arith.constant 0 : index
    %465 = vector.load %arg9[%c2_164, %c0_165, %c0_166] : memref<3x64x1xf32, #tpu.memory_space<vmem>>, vector<1x64x1xf32>
    %466 = vector.shape_cast %465 : vector<1x64x1xf32> to vector<64x1xf32>
    %467 = vector.broadcast %466 : vector<64x1xf32> to vector<64x128xf32>
    %468 = arith.addf %464, %467 : vector<64x128xf32>
    %cst_167 = arith.constant 0.000000e+00 : f32
    %469 = vector.broadcast %cst_167 : f32 to vector<64x128xf32>
    %470 = arith.maximumf %468, %469 : vector<64x128xf32>
    %c2_168 = arith.constant 2 : index
    %c0_169 = arith.constant 0 : index
    %c0_170 = arith.constant 0 : index
    %471 = vector.load %arg10[%c2_168, %c0_169, %c0_170] : memref<3x192x64xbf16, #tpu.memory_space<vmem>>, vector<1x192x64xbf16>
    %472 = vector.shape_cast %471 : vector<1x192x64xbf16> to vector<192x64xbf16>
    %473 = arith.truncf %470 : vector<64x128xf32> to vector<64x128xbf16>
    %cst_171 = arith.constant dense<0.000000e+00> : vector<192x128xf32>
    %474 = tpu.matmul %472, %473, %cst_171 {dimension_numbers = #tpu.dot_dimension_numbers<[1], [0], [0], [1], [0, 0, 1, 1], [], []>} : vector<192x64xbf16>, vector<64x128xbf16>, vector<192x128xf32> -> vector<192x128xf32>
    %c2_172 = arith.constant 2 : index
    %c0_173 = arith.constant 0 : index
    %c0_174 = arith.constant 0 : index
    %475 = vector.load %arg11[%c2_172, %c0_173, %c0_174] : memref<3x192x1xf32, #tpu.memory_space<vmem>>, vector<1x192x1xf32>
    %476 = vector.shape_cast %475 : vector<1x192x1xf32> to vector<192x1xf32>
    %477 = vector.broadcast %476 : vector<192x1xf32> to vector<192x128xf32>
    %478 = arith.addf %474, %477 : vector<192x128xf32>
    %479 = vector.extract_strided_slice %478 {offsets = [0, 0], sizes = [64, 128], strides = [1, 1]} : vector<192x128xf32> to vector<64x128xf32>
    %480 = vector.shape_cast %479 : vector<64x128xf32> to vector<4x16x128xf32>
    %cst_175 = arith.constant 0xFF800000 : f32
    %481 = vector.shape_cast %3 : vector<1x16x1xi1> to vector<1x16x1xi1>
    %482 = vector.broadcast %481 : vector<1x16x1xi1> to vector<4x16x128xi1>
    %483 = vector.broadcast %cst_175 : f32 to vector<4x16x128xf32>
    %484 = arith.select %482, %480, %483 : vector<4x16x128xi1>, vector<4x16x128xf32>
    %cst_176 = arith.constant dense<0xFF800000> : vector<4x128xf32>
    %485 = vector.multi_reduction <maximumf>, %484, %cst_176 [1] : vector<4x16x128xf32> to vector<4x128xf32>
    %486 = vector.shape_cast %485 : vector<4x128xf32> to vector<4x1x128xf32>
    %487 = vector.broadcast %486 : vector<4x1x128xf32> to vector<4x16x128xf32>
    %488 = arith.subf %484, %487 : vector<4x16x128xf32>
    %489 = math.exp %488 : vector<4x16x128xf32>
    %490 = vector.shape_cast %489 : vector<4x16x128xf32> to vector<64x128xf32>
    %cst_177 = arith.constant dense<0.000000e+00> : vector<136x128xf32>
    %491 = tpu.matmul %10, %490, %cst_177 {dimension_numbers = #tpu.dot_dimension_numbers<[1], [0], [0], [1], [0, 0, 1, 1], [], []>} : vector<136x64xf32>, vector<64x128xf32>, vector<136x128xf32> -> vector<136x128xf32>
    %492 = vector.extract_strided_slice %491 {offsets = [0, 0], sizes = [64, 128], strides = [1, 1]} : vector<136x128xf32> to vector<64x128xf32>
    %493 = vector.shape_cast %492 : vector<64x128xf32> to vector<4x16x128xf32>
    %494 = vector.extract_strided_slice %491 {offsets = [64, 0], sizes = [64, 128], strides = [1, 1]} : vector<136x128xf32> to vector<64x128xf32>
    %495 = vector.shape_cast %494 : vector<64x128xf32> to vector<4x16x128xf32>
    %496 = vector.extract_strided_slice %491 {offsets = [128, 0], sizes = [4, 128], strides = [1, 1]} : vector<136x128xf32> to vector<4x128xf32>
    %497 = vector.shape_cast %496 : vector<4x128xf32> to vector<4x1x128xf32>
    %cst_178 = arith.constant 1.000000e+00 : f32
    %498 = vector.broadcast %cst_178 : f32 to vector<4x1x128xf32>
    %499 = arith.divf %498, %497 : vector<4x1x128xf32>
    %cst_179 = arith.constant 1.000000e+00 : f32
    %500 = vector.broadcast %cst_179 : f32 to vector<1x16x1xf32>
    %501 = arith.addf %1, %500 : vector<1x16x1xf32>
    %cst_180 = arith.constant 1.000000e-03 : f32
    %502 = vector.broadcast %cst_180 : f32 to vector<1x16x1xf32>
    %503 = arith.mulf %502, %501 : vector<1x16x1xf32>
    %cst_181 = arith.constant 9.900000e-01 : f32
    %504 = vector.broadcast %cst_181 : f32 to vector<4x16x128xf32>
    %505 = arith.mulf %504, %493 : vector<4x16x128xf32>
    %506 = vector.broadcast %499 : vector<4x1x128xf32> to vector<4x16x128xf32>
    %507 = arith.mulf %505, %506 : vector<4x16x128xf32>
    %508 = vector.broadcast %503 : vector<1x16x1xf32> to vector<4x16x128xf32>
    %509 = arith.addf %508, %507 : vector<4x16x128xf32>
    %cst_182 = arith.constant 1.000000e-03 : f32
    %510 = vector.broadcast %cst_182 : f32 to vector<1x16x1xf32>
    %511 = arith.mulf %510, %1 : vector<1x16x1xf32>
    %cst_183 = arith.constant 9.900000e-01 : f32
    %512 = vector.broadcast %cst_183 : f32 to vector<4x16x128xf32>
    %513 = arith.mulf %512, %495 : vector<4x16x128xf32>
    %514 = vector.broadcast %499 : vector<4x1x128xf32> to vector<4x16x128xf32>
    %515 = arith.mulf %513, %514 : vector<4x16x128xf32>
    %516 = vector.broadcast %511 : vector<1x16x1xf32> to vector<4x16x128xf32>
    %517 = arith.addf %516, %515 : vector<4x16x128xf32>
    %cst_184 = arith.constant 1.000000e+00 : f32
    %518 = vector.shape_cast %7 : vector<1x16x1xi1> to vector<1x16x1xi1>
    %519 = vector.broadcast %518 : vector<1x16x1xi1> to vector<4x16x128xi1>
    %520 = vector.broadcast %cst_184 : f32 to vector<4x16x128xf32>
    %521 = arith.select %519, %520, %509 : vector<4x16x128xi1>, vector<4x16x128xf32>
    %522 = vector.extract_strided_slice %478 {offsets = [64, 0], sizes = [64, 128], strides = [1, 1]} : vector<192x128xf32> to vector<64x128xf32>
    %523 = vector.shape_cast %522 : vector<64x128xf32> to vector<4x16x128xf32>
    %cst_185 = arith.constant 0xFF800000 : f32
    %524 = vector.shape_cast %3 : vector<1x16x1xi1> to vector<1x16x1xi1>
    %525 = vector.broadcast %524 : vector<1x16x1xi1> to vector<4x16x128xi1>
    %526 = vector.broadcast %cst_185 : f32 to vector<4x16x128xf32>
    %527 = arith.select %525, %523, %526 : vector<4x16x128xi1>, vector<4x16x128xf32>
    %cst_186 = arith.constant dense<0xFF800000> : vector<4x128xf32>
    %528 = vector.multi_reduction <maximumf>, %527, %cst_186 [1] : vector<4x16x128xf32> to vector<4x128xf32>
    %529 = vector.shape_cast %528 : vector<4x128xf32> to vector<4x1x128xf32>
    %530 = vector.broadcast %529 : vector<4x1x128xf32> to vector<4x16x128xf32>
    %531 = arith.subf %527, %530 : vector<4x16x128xf32>
    %532 = math.exp %531 : vector<4x16x128xf32>
    %533 = vector.shape_cast %532 : vector<4x16x128xf32> to vector<64x128xf32>
    %cst_187 = arith.constant dense<0.000000e+00> : vector<136x128xf32>
    %534 = tpu.matmul %10, %533, %cst_187 {dimension_numbers = #tpu.dot_dimension_numbers<[1], [0], [0], [1], [0, 0, 1, 1], [], []>} : vector<136x64xf32>, vector<64x128xf32>, vector<136x128xf32> -> vector<136x128xf32>
    %535 = vector.extract_strided_slice %534 {offsets = [0, 0], sizes = [64, 128], strides = [1, 1]} : vector<136x128xf32> to vector<64x128xf32>
    %536 = vector.shape_cast %535 : vector<64x128xf32> to vector<4x16x128xf32>
    %537 = vector.extract_strided_slice %534 {offsets = [64, 0], sizes = [64, 128], strides = [1, 1]} : vector<136x128xf32> to vector<64x128xf32>
    %538 = vector.shape_cast %537 : vector<64x128xf32> to vector<4x16x128xf32>
    %539 = vector.extract_strided_slice %534 {offsets = [128, 0], sizes = [4, 128], strides = [1, 1]} : vector<136x128xf32> to vector<4x128xf32>
    %540 = vector.shape_cast %539 : vector<4x128xf32> to vector<4x1x128xf32>
    %cst_188 = arith.constant 1.000000e+00 : f32
    %541 = vector.broadcast %cst_188 : f32 to vector<4x1x128xf32>
    %542 = arith.divf %541, %540 : vector<4x1x128xf32>
    %cst_189 = arith.constant 1.000000e+00 : f32
    %543 = vector.broadcast %cst_189 : f32 to vector<1x16x1xf32>
    %544 = arith.addf %1, %543 : vector<1x16x1xf32>
    %cst_190 = arith.constant 1.000000e-03 : f32
    %545 = vector.broadcast %cst_190 : f32 to vector<1x16x1xf32>
    %546 = arith.mulf %545, %544 : vector<1x16x1xf32>
    %cst_191 = arith.constant 9.900000e-01 : f32
    %547 = vector.broadcast %cst_191 : f32 to vector<4x16x128xf32>
    %548 = arith.mulf %547, %536 : vector<4x16x128xf32>
    %549 = vector.broadcast %542 : vector<4x1x128xf32> to vector<4x16x128xf32>
    %550 = arith.mulf %548, %549 : vector<4x16x128xf32>
    %551 = vector.broadcast %546 : vector<1x16x1xf32> to vector<4x16x128xf32>
    %552 = arith.addf %551, %550 : vector<4x16x128xf32>
    %cst_192 = arith.constant 1.000000e-03 : f32
    %553 = vector.broadcast %cst_192 : f32 to vector<1x16x1xf32>
    %554 = arith.mulf %553, %1 : vector<1x16x1xf32>
    %cst_193 = arith.constant 9.900000e-01 : f32
    %555 = vector.broadcast %cst_193 : f32 to vector<4x16x128xf32>
    %556 = arith.mulf %555, %538 : vector<4x16x128xf32>
    %557 = vector.broadcast %542 : vector<4x1x128xf32> to vector<4x16x128xf32>
    %558 = arith.mulf %556, %557 : vector<4x16x128xf32>
    %559 = vector.broadcast %554 : vector<1x16x1xf32> to vector<4x16x128xf32>
    %560 = arith.addf %559, %558 : vector<4x16x128xf32>
    %cst_194 = arith.constant 1.000000e+00 : f32
    %561 = vector.shape_cast %7 : vector<1x16x1xi1> to vector<1x16x1xi1>
    %562 = vector.broadcast %561 : vector<1x16x1xi1> to vector<4x16x128xi1>
    %563 = vector.broadcast %cst_194 : f32 to vector<4x16x128xf32>
    %564 = arith.select %562, %563, %552 : vector<4x16x128xi1>, vector<4x16x128xf32>
    %565 = vector.extract_strided_slice %478 {offsets = [128, 0], sizes = [64, 128], strides = [1, 1]} : vector<192x128xf32> to vector<64x128xf32>
    %cst_195 = arith.constant 0.000000e+00 : f32
    %566 = vector.broadcast %cst_195 : f32 to vector<64x128xf32>
    %567 = arith.maximumf %565, %566 : vector<64x128xf32>
    %568 = math.absf %565 : vector<64x128xf32>
    %cst_196 = arith.constant 0.000000e+00 : f32
    %569 = vector.broadcast %cst_196 : f32 to vector<64x128xf32>
    %570 = arith.subf %569, %568 : vector<64x128xf32>
    %571 = math.exp %570 : vector<64x128xf32>
    %cst_197 = arith.constant 1.000000e+00 : f32
    %572 = vector.broadcast %cst_197 : f32 to vector<64x128xf32>
    %573 = arith.addf %572, %571 : vector<64x128xf32>
    %574 = math.log %573 : vector<64x128xf32>
    %575 = arith.addf %567, %574 : vector<64x128xf32>
    %cst_198 = arith.constant 1.000000e-03 : f32
    %576 = vector.broadcast %cst_198 : f32 to vector<64x128xf32>
    %577 = arith.addf %576, %575 : vector<64x128xf32>
    %c63_i32_199 = arith.constant 63 : i32
    %578 = tpu.dynamic_rotate %577 by %c63_i32_199 dim 0 : vector<64x128xf32>, i32 -> vector<64x128xf32>
    %579 = vector.shape_cast %577 : vector<64x128xf32> to vector<4x16x128xf32>
    %580 = vector.shape_cast %578 : vector<64x128xf32> to vector<4x16x128xf32>
    %cst_200 = arith.constant 0.000000e+00 : f32
    %cst_201 = arith.constant 1.000000e+00 : f32
    %581 = vector.broadcast %cst_200 : f32 to vector<4x128xf32>
    %582 = arith.maximumf %581, %441 : vector<4x128xf32>
    %583 = vector.broadcast %cst_201 : f32 to vector<4x128xf32>
    %584 = arith.minimumf %583, %582 : vector<4x128xf32>
    %585 = vector.shape_cast %584 : vector<4x128xf32> to vector<4x1x128xf32>
    %586 = vector.shape_cast %585 : vector<4x1x128xf32> to vector<4x1x128xf32>
    %587 = vector.broadcast %586 : vector<4x1x128xf32> to vector<4x16x128xf32>
    %588 = arith.cmpf oge, %587, %517 : vector<4x16x128xf32>
    %cst_202 = arith.constant 9.99999997E-7 : f32
    %589 = vector.broadcast %cst_202 : f32 to vector<1x16x1xf32>
    %590 = arith.mulf %589, %9 : vector<1x16x1xf32>
    %591 = vector.broadcast %590 : vector<1x16x1xf32> to vector<4x16x128xf32>
    %592 = arith.addf %521, %591 : vector<4x16x128xf32>
    %593 = arith.cmpf olt, %587, %592 : vector<4x16x128xf32>
    %594 = arith.andi %588, %593 : vector<4x16x128xi1>
    %cst_203 = arith.constant 0.000000e+00 : f32
    %595 = vector.shape_cast %5 : vector<1x16x1xf32> to vector<1x16x1xf32>
    %596 = vector.broadcast %595 : vector<1x16x1xf32> to vector<4x16x128xf32>
    %597 = vector.broadcast %cst_203 : f32 to vector<4x16x128xf32>
    %598 = arith.select %594, %596, %597 : vector<4x16x128xi1>, vector<4x16x128xf32>
    %599 = arith.mulf %598, %517 : vector<4x16x128xf32>
    %cst_204 = arith.constant dense<0.000000e+00> : vector<4x128xf32>
    %600 = vector.multi_reduction <add>, %599, %cst_204 [1] : vector<4x16x128xf32> to vector<4x128xf32>
    %601 = vector.shape_cast %600 : vector<4x128xf32> to vector<4x1x128xf32>
    %602 = arith.mulf %598, %521 : vector<4x16x128xf32>
    %cst_205 = arith.constant dense<0.000000e+00> : vector<4x128xf32>
    %603 = vector.multi_reduction <add>, %602, %cst_205 [1] : vector<4x16x128xf32> to vector<4x128xf32>
    %604 = vector.shape_cast %603 : vector<4x128xf32> to vector<4x1x128xf32>
    %605 = arith.mulf %598, %560 : vector<4x16x128xf32>
    %cst_206 = arith.constant dense<0.000000e+00> : vector<4x128xf32>
    %606 = vector.multi_reduction <add>, %605, %cst_206 [1] : vector<4x16x128xf32> to vector<4x128xf32>
    %607 = vector.shape_cast %606 : vector<4x128xf32> to vector<4x1x128xf32>
    %608 = arith.mulf %598, %564 : vector<4x16x128xf32>
    %cst_207 = arith.constant dense<0.000000e+00> : vector<4x128xf32>
    %609 = vector.multi_reduction <add>, %608, %cst_207 [1] : vector<4x16x128xf32> to vector<4x128xf32>
    %610 = vector.shape_cast %609 : vector<4x128xf32> to vector<4x1x128xf32>
    %611 = arith.mulf %598, %579 : vector<4x16x128xf32>
    %cst_208 = arith.constant dense<0.000000e+00> : vector<4x128xf32>
    %612 = vector.multi_reduction <add>, %611, %cst_208 [1] : vector<4x16x128xf32> to vector<4x128xf32>
    %613 = vector.shape_cast %612 : vector<4x128xf32> to vector<4x1x128xf32>
    %614 = arith.mulf %598, %580 : vector<4x16x128xf32>
    %cst_209 = arith.constant dense<0.000000e+00> : vector<4x128xf32>
    %615 = vector.multi_reduction <add>, %614, %cst_209 [1] : vector<4x16x128xf32> to vector<4x128xf32>
    %616 = vector.shape_cast %615 : vector<4x128xf32> to vector<4x1x128xf32>
    %617 = arith.subf %604, %601 : vector<4x1x128xf32>
    %618 = arith.subf %610, %607 : vector<4x1x128xf32>
    %619 = arith.divf %618, %617 : vector<4x1x128xf32>
    %620 = arith.subf %585, %601 : vector<4x1x128xf32>
    %621 = arith.divf %620, %617 : vector<4x1x128xf32>
    %cst_210 = arith.constant 1.000000e+00 : f32
    %622 = vector.broadcast %cst_210 : f32 to vector<4x1x128xf32>
    %623 = arith.subf %622, %621 : vector<4x1x128xf32>
    %624 = arith.mulf %621, %623 : vector<4x1x128xf32>
    %625 = arith.mulf %621, %621 : vector<4x1x128xf32>
    %626 = arith.mulf %619, %625 : vector<4x1x128xf32>
    %627 = arith.mulf %613, %624 : vector<4x1x128xf32>
    %628 = arith.addf %626, %627 : vector<4x1x128xf32>
    %629 = arith.mulf %618, %628 : vector<4x1x128xf32>
    %630 = arith.addf %613, %616 : vector<4x1x128xf32>
    %cst_211 = arith.constant 2.000000e+00 : f32
    %631 = vector.broadcast %cst_211 : f32 to vector<4x1x128xf32>
    %632 = arith.mulf %631, %619 : vector<4x1x128xf32>
    %633 = arith.subf %630, %632 : vector<4x1x128xf32>
    %634 = arith.mulf %633, %624 : vector<4x1x128xf32>
    %635 = arith.addf %619, %634 : vector<4x1x128xf32>
    %636 = arith.divf %629, %635 : vector<4x1x128xf32>
    %637 = arith.addf %607, %636 : vector<4x1x128xf32>
    %638 = arith.mulf %619, %619 : vector<4x1x128xf32>
    %639 = arith.mulf %616, %625 : vector<4x1x128xf32>
    %cst_212 = arith.constant 2.000000e+00 : f32
    %640 = vector.broadcast %cst_212 : f32 to vector<4x1x128xf32>
    %641 = arith.mulf %640, %619 : vector<4x1x128xf32>
    %642 = arith.mulf %641, %624 : vector<4x1x128xf32>
    %643 = arith.addf %639, %642 : vector<4x1x128xf32>
    %644 = arith.mulf %613, %623 : vector<4x1x128xf32>
    %645 = arith.mulf %644, %623 : vector<4x1x128xf32>
    %646 = arith.addf %643, %645 : vector<4x1x128xf32>
    %647 = arith.mulf %638, %646 : vector<4x1x128xf32>
    %648 = math.log %647 : vector<4x1x128xf32>
    %649 = math.log %635 : vector<4x1x128xf32>
    %cst_213 = arith.constant 2.000000e+00 : f32
    %650 = vector.broadcast %cst_213 : f32 to vector<4x1x128xf32>
    %651 = arith.mulf %650, %649 : vector<4x1x128xf32>
    %652 = arith.subf %648, %651 : vector<4x1x128xf32>
    %cst_214 = arith.constant dense<0.000000e+00> : vector<1x128xf32>
    %653 = vector.multi_reduction <add>, %652, %cst_214 [0] : vector<4x1x128xf32> to vector<1x128xf32>
    %654 = arith.addf %440, %653 : vector<1x128xf32>
    %655 = vector.shape_cast %637 : vector<4x1x128xf32> to vector<4x128xf32>
    %c0_215 = arith.constant 0 : index
    %c0_216 = arith.constant 0 : index
    %656 = vector.load %arg12[%c0_215, %c0_216] : memref<8x128xf32, #tpu.memory_space<vmem>>, vector<4x128xf32>
    tpu.vector_store %arg12[%c0_215, %c0_216], %655 {strides = array<i32>} : memref<8x128xf32, #tpu.memory_space<vmem>>, vector<4x128xf32>,
    %c4 = arith.constant 4 : index
    %c0_217 = arith.constant 0 : index
    %657 = vector.load %arg12[%c4, %c0_217] : memref<8x128xf32, #tpu.memory_space<vmem>>, vector<1x128xf32>
    tpu.vector_store %arg12[%c4, %c0_217], %654 {strides = array<i32>} : memref<8x128xf32, #tpu.memory_space<vmem>>, vector<1x128xf32>,
    return
  }
  func.func @transform_0(%arg0: i32) -> (i32, i32) {
    %c0_i32 = arith.constant 0 : i32
    %c0_i32_0 = arith.constant 0 : i32
    return %c0_i32, %arg0 : i32, i32
  }
  func.func @transform_1(%arg0: i32) -> (i32, i32) {
    %c0_i32 = arith.constant 0 : i32
    %c0_i32_0 = arith.constant 0 : i32
    return %c0_i32, %arg0 : i32, i32
  }
  func.func @transform_2(%arg0: i32) -> (i32, i32) {
    %c0_i32 = arith.constant 0 : i32
    %c0_i32_0 = arith.constant 0 : i32
    %c0_i32_1 = arith.constant 0 : i32
    return %c0_i32, %c0_i32_0 : i32, i32
  }
  func.func @transform_3(%arg0: i32) -> (i32, i32, i32) {
    %c0_i32 = arith.constant 0 : i32
    %c0_i32_0 = arith.constant 0 : i32
    %c0_i32_1 = arith.constant 0 : i32
    %c0_i32_2 = arith.constant 0 : i32
    return %c0_i32, %c0_i32_0, %c0_i32_1 : i32, i32, i32
  }
  func.func @transform_4(%arg0: i32) -> (i32, i32, i32) {
    %c0_i32 = arith.constant 0 : i32
    %c0_i32_0 = arith.constant 0 : i32
    %c0_i32_1 = arith.constant 0 : i32
    %c0_i32_2 = arith.constant 0 : i32
    return %c0_i32, %c0_i32_0, %c0_i32_1 : i32, i32, i32
  }
  func.func @transform_5(%arg0: i32) -> (i32, i32, i32) {
    %c0_i32 = arith.constant 0 : i32
    %c0_i32_0 = arith.constant 0 : i32
    %c0_i32_1 = arith.constant 0 : i32
    %c0_i32_2 = arith.constant 0 : i32
    return %c0_i32, %c0_i32_0, %c0_i32_1 : i32, i32, i32
  }
  func.func @transform_6(%arg0: i32) -> (i32, i32, i32) {
    %c0_i32 = arith.constant 0 : i32
    %c0_i32_0 = arith.constant 0 : i32
    %c0_i32_1 = arith.constant 0 : i32
    %c0_i32_2 = arith.constant 0 : i32
    return %c0_i32, %c0_i32_0, %c0_i32_1 : i32, i32, i32
  }
  func.func @transform_7(%arg0: i32) -> (i32, i32, i32) {
    %c0_i32 = arith.constant 0 : i32
    %c0_i32_0 = arith.constant 0 : i32
    %c0_i32_1 = arith.constant 0 : i32
    %c0_i32_2 = arith.constant 0 : i32
    return %c0_i32, %c0_i32_0, %c0_i32_1 : i32, i32, i32
  }
  func.func @transform_8(%arg0: i32) -> (i32, i32, i32) {
    %c0_i32 = arith.constant 0 : i32
    %c0_i32_0 = arith.constant 0 : i32
    %c0_i32_1 = arith.constant 0 : i32
    %c0_i32_2 = arith.constant 0 : i32
    return %c0_i32, %c0_i32_0, %c0_i32_1 : i32, i32, i32
  }
  func.func @transform_9(%arg0: i32) -> (i32, i32, i32) {
    %c0_i32 = arith.constant 0 : i32
    %c0_i32_0 = arith.constant 0 : i32
    %c0_i32_1 = arith.constant 0 : i32
    %c0_i32_2 = arith.constant 0 : i32
    return %c0_i32, %c0_i32_0, %c0_i32_1 : i32, i32, i32
  }
  func.func @transform_10(%arg0: i32) -> (i32, i32, i32) {
    %c0_i32 = arith.constant 0 : i32
    %c0_i32_0 = arith.constant 0 : i32
    %c0_i32_1 = arith.constant 0 : i32
    %c0_i32_2 = arith.constant 0 : i32
    return %c0_i32, %c0_i32_0, %c0_i32_1 : i32, i32, i32
  }
  func.func @transform_11(%arg0: i32) -> (i32, i32) {
    %c0_i32 = arith.constant 0 : i32
    %c0_i32_0 = arith.constant 0 : i32
    return %c0_i32, %arg0 : i32, i32
  }
}

</mosaic_0001>

<bundles_post_ra>
// kernel: _lambda_.1
= control target key start
LH: loop header
LB: loop body
LE: loop exit
PB: predicated region body
PF: predicated region fallthrough
CT: control target
= control target key end

     0   :  { %vm131_vm0 = vcmask 64512   ;;  %v8367_v0 = vmov 0   ;;  %vm12494_vm1 = vcmask 523264   ;;  %vm12491_vm2 = vmmov 0   ;;  %s12451_s4 = inlined_call_operand.vmem [shape: f32[3,64,1], index: 4, kind: input, shape index: {}, may-alias: {4,6,8}]   ;;  %s12452_s1 = inlined_call_operand.vmem [shape: f32[8,128], index: 1, kind: input, shape index: {}]   ;;  %s12453_s3 = inlined_call_operand.vmem [shape: f32[3,64,8], index: 3, kind: input, shape index: {}]   ;;  %s12454_s6 = inlined_call_operand.vmem [shape: f32[3,64,1], index: 6, kind: input, shape index: {}, may-alias: {4,6,8}]   ;;  %s12455_s8 = inlined_call_operand.vmem [shape: f32[3,64,1], index: 8, kind: input, shape index: {}, may-alias: {4,6,8}]   ;;  %s12456_s10 = inlined_call_operand.vmem [shape: f32[3,192,1], index: 10, kind: input, shape index: {}]   ;;  %s12457_s5 = inlined_call_operand.vmem [shape: bf16[3,64,64], index: 5, kind: input, shape index: {}]   ;;  %s12458_s7 = inlined_call_operand.vmem [shape: bf16[3,64,64], index: 7, kind: input, shape index: {}]   ;;  %s12459_s9 = inlined_call_operand.vmem [shape: bf16[3,192,64], index: 9, kind: input, shape index: {}]   ;;  %s12460_s2 = inlined_call_operand.vmem [shape: f32[136,64], index: 2, kind: input, shape index: {}]   ;;  %s12461_s0 = inlined_call_operand.vmem [shape: f32[4,128], index: 0, kind: input, shape index: {}]   ;;  %s12462_s11 = inlined_call_operand.vmem [shape: f32[8,128], index: 11, kind: output, shape index: {}]  }
   0x1   :  { %7934 = vset.pattern.permute.xlu1 %v8367_v0  ;;  %7933 = vset.pattern.permute.xlu0 %v8367_v0  ;;  %v85_v1 = vld [vmem:[%s12451_s4 + $0x10] sm:$0xff]  ;;  %v83_v2 = vld [vmem:[%s12451_s4] sm:$0xff]  ;;  %v76_v5 = vld [vmem:[%s12453_s3 + $0x8] sm:$0xff] }
   0x2   :  { %v73_v3 = vld [vmem:[%s12452_s1] sm:$0xff]  ;;  %103 = vperm.xlu1 %7934, %v85_v1   ;;  %93 = vperm.xlu0 %7933, %v83_v2   ;;  %v86_v6 = vld [vmem:[%s12451_s4 + $0x18] sm:$0xff]  ;;  %v84_v7 = vld [vmem:[%s12451_s4 + $0x8] sm:$0xff] }
   0x3   :  { %v75_v4 = vld [vmem:[%s12453_s3] sm:$0xff]  ;;  %7212 = vmatprep.subr.mxu0 %v73_v3  ;;  %v77_v8 = vld [vmem:[%s12453_s3 + $0x10] sm:$0xff]  ;;  %v78_v9 = vld [vmem:[%s12453_s3 + $0x18] sm:$0xff] }
   0x4   :  { %7214 = vmatprep.mubr.msk.f32.mxu0 %vm131_vm0, %v75_v4  ;;  %7213 = vmatpush3.msra.mxu0 %v73_v3  ;;  %v88_v10 = vld [vmem:[%s12451_s4 + $0x28] sm:$0xff]  ;;  %v87_v11 = vld [vmem:[%s12451_s4 + $0x20] sm:$0xff]  ;;  %v90_v14 = vld [vmem:[%s12451_s4 + $0x38] sm:$0xff] }
   0x5   :  { %7215 = vmatmul.mubr.msk.f32.vlgmr.msra.gmra.mrb[0].mxu0 %vm131_vm0, %v76_v5  ;;  %v79_v12 = vld [vmem:[%s12453_s3 + $0x20] sm:$0xff]  ;;  %v80_v13 = vld [vmem:[%s12453_s3 + $0x28] sm:$0xff]  ;;  %v89_v15 = vld [vmem:[%s12451_s4 + $0x30] sm:$0xff] }
   0x6   :  { %108 = vperm.xlu1 %7934, %v86_v6   ;;  %98 = vperm.xlu0 %7933, %v84_v7   ;;  %v81_v16 = vld [vmem:[%s12453_s3 + $0x30] sm:$0xff]  ;;  %v82_v17 = vld [vmem:[%s12453_s3 + $0x38] sm:$0xff]  ;;  %v282_v18 = vld [vmem:[%s12454_s6 + $0x8] sm:$0xff] }
   0x7   :  { %7217 = vmatprep.mubr.msk.f32.mxu0 %vm131_vm0, %v77_v8  ;;  %v281_v19 = vld [vmem:[%s12454_s6] sm:$0xff]  ;;  %v284_v20 = vld [vmem:[%s12454_s6 + $0x18] sm:$0xff]  ;;  %v283_v21 = vld [vmem:[%s12454_s6 + $0x10] sm:$0xff] }
   0x8   :  { %v286_v22 = vld [vmem:[%s12454_s6 + $0x28] sm:$0xff]  ;;  %v285_v23 = vld [vmem:[%s12454_s6 + $0x20] sm:$0xff]  ;;  %v288_v24 = vld [vmem:[%s12454_s6 + $0x38] sm:$0xff] }
   0x9   :  { %7218 = vmatmul.mubr.msk.f32.gmra.mrb[2].mxu0 %vm131_vm0, %v78_v9  ;;  %v287_v25 = vld [vmem:[%s12454_s6 + $0x30] sm:$0xff]  ;;  %v448_v26 = vld [vmem:[%s12455_s8 + $0x8] sm:$0xff]  ;;  %v447_v27 = vld [vmem:[%s12455_s8] sm:$0xff] }
   0xa   :  { %118 = vperm.xlu1 %7934, %v88_v10   ;;  %113 = vperm.xlu0 %7933, %v87_v11   ;;  %v450_v28 = vld [vmem:[%s12455_s8 + $0x18] sm:$0xff]  ;;  %v449_v29 = vld [vmem:[%s12455_s8 + $0x10] sm:$0xff]  ;;  %v452_v30 = vld [vmem:[%s12455_s8 + $0x28] sm:$0xff] }
   0xb   :  { %7220 = vmatprep.mubr.msk.f32.mxu0 %vm131_vm0, %v79_v12  ;;  %v451_v31 = vld [vmem:[%s12455_s8 + $0x20] sm:$0xff]  ;;  %v454_v32 = vld [vmem:[%s12455_s8 + $0x38] sm:$0xff]  ;;  %v453_v33 = vld [vmem:[%s12455_s8 + $0x30] sm:$0xff] }
   0xc   :  { %v628_v34 = vld [vmem:[%s12456_s10] sm:$0xff]  ;;  %v629_v35 = vld [vmem:[%s12456_s10 + $0x8] sm:$0xff]  ;;  %v630_v36 = vld [vmem:[%s12456_s10 + $0x10] sm:$0xff] }
   0xd   :  { %7221 = vmatmul.mubr.msk.f32.gmra.mrb[4].mxu0 %vm131_vm0, %v80_v13  ;;  %v631_v37 = vld [vmem:[%s12456_s10 + $0x18] sm:$0xff]  ;;  %v632_v38 = vld [vmem:[%s12456_s10 + $0x20] sm:$0xff]  ;;  %v633_v39 = vld [vmem:[%s12456_s10 + $0x28] sm:$0xff] }
   0xe   :  { %128 = vperm.xlu1 %7934, %v90_v14   ;;  %123 = vperm.xlu0 %7933, %v89_v15   ;;  %v634_v40 = vld [vmem:[%s12456_s10 + $0x30] sm:$0xff]  ;;  %v635_v41 = vld [vmem:[%s12456_s10 + $0x38] sm:$0xff]  ;;  %v636_v42 = vld [vmem:[%s12456_s10 + $0x40] sm:$0xff] }
   0xf   :  { %7223 = vmatprep.mubr.msk.f32.mxu0 %vm131_vm0, %v81_v16  ;;  %v637_v43 = vld [vmem:[%s12456_s10 + $0x48] sm:$0xff]  ;;  %v638_v44 = vld [vmem:[%s12456_s10 + $0x50] sm:$0xff]  ;;  %v639_v45 = vld [vmem:[%s12456_s10 + $0x58] sm:$0xff] }
  0x10   :  { %v640_v46 = vld [vmem:[%s12456_s10 + $0x60] sm:$0xff]  ;;  %v641_v47 = vld [vmem:[%s12456_s10 + $0x68] sm:$0xff]  ;;  %v642_v48 = vld [vmem:[%s12456_s10 + $0x70] sm:$0xff] }
  0x11   :  { %7224 = vmatmul.mubr.msk.f32.gmra.mrb[6].mxu0 %vm131_vm0, %v82_v17  ;;  %v643_v49 = vld [vmem:[%s12456_s10 + $0x78] sm:$0xff]  ;;  %v6592_v50 = vld [vmem:[%s12451_s4 + $0x48] sm:$0xff]  ;;  %v6591_v51 = vld [vmem:[%s12451_s4 + $0x40] sm:$0xff] }
  0x12   :  { %296 = vperm.xlu1 %7934, %v282_v18   ;;  %291 = vperm.xlu0 %7933, %v281_v19   ;;  %v6594_v52 = vld [vmem:[%s12451_s4 + $0x58] sm:$0xff]  ;;  %v6593_v53 = vld [vmem:[%s12451_s4 + $0x50] sm:$0xff]  ;;  %v6596_v54 = vld [vmem:[%s12451_s4 + $0x68] sm:$0xff] }
  0x13   :  { %v6595_v55 = vld [vmem:[%s12451_s4 + $0x60] sm:$0xff]  ;;  %v6598_v56 = vld [vmem:[%s12451_s4 + $0x78] sm:$0xff]  ;;  %v6597_v57 = vld [vmem:[%s12451_s4 + $0x70] sm:$0xff] }
  0x14   :  { %v6616_v58 = vld [vmem:[%s12454_s6 + $0x48] sm:$0xff]  ;;  %v6615_v59 = vld [vmem:[%s12454_s6 + $0x40] sm:$0xff]  ;;  %v6618_v60 = vld [vmem:[%s12454_s6 + $0x58] sm:$0xff] }
  0x15   :  { %v6617_v61 = vld [vmem:[%s12454_s6 + $0x50] sm:$0xff]  ;;  %v6620_v62 = vld [vmem:[%s12454_s6 + $0x68] sm:$0xff]  ;;  %v6619_v63 = vld [vmem:[%s12454_s6 + $0x60] sm:$0xff] }
  0x16   :  { %306 = vperm.xlu1 %7934, %v284_v20   ;;  %301 = vperm.xlu0 %7933, %v283_v21   ;;  %v6622_v0 = vld [vmem:[%s12454_s6 + $0x78] sm:$0xff]  ;;  %v6621_v1 = vld [vmem:[%s12454_s6 + $0x70] sm:$0xff]  ;;  %v7935_v2 = vld [vmem:[%s12457_s5] sm:$0xff]  }
  0x17   :  { %v6640_v3 = vld [vmem:[%s12455_s8 + $0x48] sm:$0xff]  ;;  %v6639_v4 = vld [vmem:[%s12455_s8 + $0x40] sm:$0xff]  ;;  %7234 = vmatprep.mubr.msk.bf16.mxu1 %vm12494_vm1, %v7935_v2  ;;  %v6642_v5 = vld [vmem:[%s12455_s8 + $0x58] sm:$0xff] }
  0x18   :  { %v6641_v6 = vld [vmem:[%s12455_s8 + $0x50] sm:$0xff]  ;;  %v6644_v7 = vld [vmem:[%s12455_s8 + $0x68] sm:$0xff]  ;;  %v6643_v8 = vld [vmem:[%s12455_s8 + $0x60] sm:$0xff] }
  0x19   :  { %v6646_v9 = vld [vmem:[%s12455_s8 + $0x78] sm:$0xff]  ;;  %v6645_v10 = vld [vmem:[%s12455_s8 + $0x70] sm:$0xff]  ;;  %v6679_v11 = vld [vmem:[%s12456_s10 + $0xc0] sm:$0xff] }
  0x1a   :  { %316 = vperm.xlu1 %7934, %v286_v22   ;;  %311 = vperm.xlu0 %7933, %v285_v23   ;;  %v6680_v12 = vld [vmem:[%s12456_s10 + $0xc8] sm:$0xff]  ;;  %v6681_v13 = vld [vmem:[%s12456_s10 + $0xd0] sm:$0xff]  ;;  %v6682_v14 = vld [vmem:[%s12456_s10 + $0xd8] sm:$0xff] }
  0x1b   :  { %v6683_v15 = vld [vmem:[%s12456_s10 + $0xe0] sm:$0xff]  ;;  %v6684_v16 = vld [vmem:[%s12456_s10 + $0xe8] sm:$0xff]  ;;  %v6685_v17 = vld [vmem:[%s12456_s10 + $0xf0] sm:$0xff] }
  0x1c   :  { %v6686_v18 = vld [vmem:[%s12456_s10 + $0xf8] sm:$0xff]  ;;  %v6770_v19 = vld [vmem:[%s12451_s4 + $0x88] sm:$0xff]  ;;  %v6769_v20 = vld [vmem:[%s12451_s4 + $0x80] sm:$0xff] }
  0x1d   :  { %v6772_v21 = vld [vmem:[%s12451_s4 + $0x98] sm:$0xff]  ;;  %v6771_v22 = vld [vmem:[%s12451_s4 + $0x90] sm:$0xff]  ;;  %v6774_v23 = vld [vmem:[%s12451_s4 + $0xa8] sm:$0xff] }
  0x1e   :  { %326 = vperm.xlu1 %7934, %v288_v24   ;;  %321 = vperm.xlu0 %7933, %v287_v25   ;;  %v6773_v24 = vld [vmem:[%s12451_s4 + $0xa0] sm:$0xff] }
  0x22   :  { %462 = vperm.xlu1 %7934, %v448_v26   ;;  %457 = vperm.xlu0 %7933, %v447_v27   ;;  %v6776_v27 = vld [vmem:[%s12451_s4 + $0xb8] sm:$0xff] }
  0x26   :  { %472 = vperm.xlu1 %7934, %v450_v28   ;;  %467 = vperm.xlu0 %7933, %v449_v29   ;;  %v6775_v28 = vld [vmem:[%s12451_s4 + $0xb0] sm:$0xff] }
  0x2a   :  { %482 = vperm.xlu1 %7934, %v452_v30   ;;  %477 = vperm.xlu0 %7933, %v451_v31   ;;  %v6794_v30 = vld [vmem:[%s12454_s6 + $0x88] sm:$0xff]  ;;  %v6793_v31 = vld [vmem:[%s12454_s6 + $0x80] sm:$0xff] }
  0x2e   :  { %492 = vperm.xlu1 %7934, %v454_v32   ;;  %487 = vperm.xlu0 %7933, %v453_v33   ;;  %v6796_v33 = vld [vmem:[%s12454_s6 + $0x98] sm:$0xff] }
  0x32   :  { %654 = vperm.xlu1 %7934, %v628_v34   ;;  %659 = vperm.xlu0 %7933, %v629_v35   ;;  %v6795_v34 = vld [vmem:[%s12454_s6 + $0x90] sm:$0xff] }
  0x36   :  { %664 = vperm.xlu1 %7934, %v630_v36   ;;  %669 = vperm.xlu0 %7933, %v631_v37   ;;  %v6798_v37 = vld [vmem:[%s12454_s6 + $0xa8] sm:$0xff] }
  0x3a   :  { %674 = vperm.xlu1 %7934, %v632_v38   ;;  %679 = vperm.xlu0 %7933, %v633_v39   ;;  %v6797_v38 = vld [vmem:[%s12454_s6 + $0xa0] sm:$0xff] }
  0x3e   :  { %684 = vperm.xlu1 %7934, %v634_v40   ;;  %689 = vperm.xlu0 %7933, %v635_v41   ;;  %v6800_v40 = vld [vmem:[%s12454_s6 + $0xb8] sm:$0xff]  ;;  %v6799_v41 = vld [vmem:[%s12454_s6 + $0xb0] sm:$0xff] }
  0x42   :  { %694 = vperm.xlu1 %7934, %v636_v42   ;;  %699 = vperm.xlu0 %7933, %v637_v43   ;;  %v6687_v43 = vld [vmem:[%s12456_s10 + $0x100] sm:$0xff] }
  0x46   :  { %704 = vperm.xlu1 %7934, %v638_v44   ;;  %709 = vperm.xlu0 %7933, %v639_v45   ;;  %v6688_v44 = vld [vmem:[%s12456_s10 + $0x108] sm:$0xff] }
  0x4a   :  { %714 = vperm.xlu1 %7934, %v640_v46   ;;  %719 = vperm.xlu0 %7933, %v641_v47   ;;  %v6689_v47 = vld [vmem:[%s12456_s10 + $0x110] sm:$0xff] }
  0x4e   :  { %724 = vperm.xlu1 %7934, %v642_v48   ;;  %729 = vperm.xlu0 %7933, %v643_v49   ;;  %v6690_v48 = vld [vmem:[%s12456_s10 + $0x118] sm:$0xff] }
  0x52   :  { %2292 = vperm.xlu1 %7934, %v6592_v50   ;;  %2287 = vperm.xlu0 %7933, %v6591_v51   ;;  %v6691_v50 = vld [vmem:[%s12456_s10 + $0x120] sm:$0xff]  ;;  %v6692_v51 = vld [vmem:[%s12456_s10 + $0x128] sm:$0xff] }
  0x56   :  { %2302 = vperm.xlu1 %7934, %v6594_v52   ;;  %2297 = vperm.xlu0 %7933, %v6593_v53   ;;  %v6693_v53 = vld [vmem:[%s12456_s10 + $0x130] sm:$0xff] }
  0x5a   :  { %2312 = vperm.xlu1 %7934, %v6596_v54   ;;  %2307 = vperm.xlu0 %7933, %v6595_v55   ;;  %v6694_v54 = vld [vmem:[%s12456_s10 + $0x138] sm:$0xff] }
  0x5e   :  { %2322 = vperm.xlu1 %7934, %v6598_v56   ;;  %2317 = vperm.xlu0 %7933, %v6597_v57   ;;  %v6818_v57 = vld [vmem:[%s12455_s8 + $0x88] sm:$0xff] }
  0x62   :  { %2491 = vperm.xlu1 %7934, %v6616_v58   ;;  %2486 = vperm.xlu0 %7933, %v6615_v59   ;;  %v6817_v58 = vld [vmem:[%s12455_s8 + $0x80] sm:$0xff] }
  0x66   :  { %2501 = vperm.xlu1 %7934, %v6618_v60   ;;  %2496 = vperm.xlu0 %7933, %v6617_v61   ;;  %v6820_v60 = vld [vmem:[%s12455_s8 + $0x98] sm:$0xff]  ;;  %v6819_v61 = vld [vmem:[%s12455_s8 + $0x90] sm:$0xff] }
  0x6a   :  { %2511 = vperm.xlu1 %7934, %v6620_v62   ;;  %2506 = vperm.xlu0 %7933, %v6619_v63   ;;  %v6822_v63 = vld [vmem:[%s12455_s8 + $0xa8] sm:$0xff] }
  0x6e   :  { %2521 = vperm.xlu1 %7934, %v6622_v0   ;;  %2516 = vperm.xlu0 %7933, %v6621_v1   ;;  %v6821_v0 = vld [vmem:[%s12455_s8 + $0xa0] sm:$0xff] }
  0x72   :  { %2658 = vperm.xlu1 %7934, %v6640_v3   ;;  %2653 = vperm.xlu0 %7933, %v6639_v4   ;;  %v6824_v3 = vld [vmem:[%s12455_s8 + $0xb8] sm:$0xff]  ;;  %v6823_v4 = vld [vmem:[%s12455_s8 + $0xb0] sm:$0xff] }
  0x76   :  { %2668 = vperm.xlu1 %7934, %v6642_v5   ;;  %2663 = vperm.xlu0 %7933, %v6641_v6   ;;  %v6857_v6 = vld [vmem:[%s12456_s10 + $0x180] sm:$0xff] }
  0x7a   :  { %2678 = vperm.xlu1 %7934, %v6644_v7   ;;  %2673 = vperm.xlu0 %7933, %v6643_v8   ;;  %v6858_v7 = vld [vmem:[%s12456_s10 + $0x188] sm:$0xff] }
  0x7e   :  { %2688 = vperm.xlu1 %7934, %v6646_v9   ;;  %2683 = vperm.xlu0 %7933, %v6645_v10   ;;  %v6859_v9 = vld [vmem:[%s12456_s10 + $0x190] sm:$0xff]  ;;  %v6860_v10 = vld [vmem:[%s12456_s10 + $0x198] sm:$0xff] }
  0x81   :  { %v8705_v25 = vpop.permute.xlu1 %103  ;;  %v8707_v26 = vpop.permute.xlu0 %93 }
  0x82   :  { %2852 = vperm.xlu1 %7934, %v6679_v11   ;;  %2857 = vperm.xlu0 %7933, %v6680_v12  }
  0x85   :  { %v8715_v29 = vpop.permute.xlu1 %108  ;;  %v8723_v32 = vpop.permute.xlu0 %98 }
  0x86   :  { %2862 = vperm.xlu1 %7934, %v6681_v13   ;;  %2867 = vperm.xlu0 %7933, %v6682_v14   ;;  %v6861_v13 = vld [vmem:[%s12456_s10 + $0x1a0] sm:$0xff]  ;;  %v6862_v14 = vld [vmem:[%s12456_s10 + $0x1a8] sm:$0xff] }
  0x89   :  { %v8731_v35 = vpop.permute.xlu1 %118  ;;  %v8733_v36 = vpop.permute.xlu0 %113 }
  0x8a   :  { %2872 = vperm.xlu1 %7934, %v6683_v15   ;;  %2877 = vperm.xlu0 %7933, %v6684_v16  }
  0x8d   :  { %v8741_v39 = vpop.permute.xlu1 %128  ;;  %v8749_v42 = vpop.permute.xlu0 %123 }
  0x8e   :  { %2882 = vperm.xlu1 %7934, %v6685_v17   ;;  %2887 = vperm.xlu0 %7933, %v6686_v18  }
  0x91   :  { %v8757_v45 = vpop.permute.xlu1 %296  ;;  %v8759_v46 = vpop.permute.xlu0 %291 }
  0x92   :  { %4398 = vperm.xlu1 %7934, %v6770_v19   ;;  %4393 = vperm.xlu0 %7933, %v6769_v20  }
  0x95   :  { %v8767_v49 = vpop.permute.xlu1 %306  ;;  %v8775_v52 = vpop.permute.xlu0 %301 }
  0x96   :  { %4408 = vperm.xlu1 %7934, %v6772_v21   ;;  %4403 = vperm.xlu0 %7933, %v6771_v22   ;;  %v6863_v21 = vld [vmem:[%s12456_s10 + $0x1b0] sm:$0xff]  ;;  %v6864_v22 = vld [vmem:[%s12456_s10 + $0x1b8] sm:$0xff] }
  0x99   :  { %v8783_v55 = vpop.permute.xlu1 %316  ;;  %v8785_v56 = vpop.permute.xlu0 %311 }
  0x9a   :  { %4418 = vperm.xlu1 %7934, %v6774_v23   ;;  %4413 = vperm.xlu0 %7933, %v6773_v24  }
  0x9d   :  { %v8793_v59 = vpop.permute.xlu1 %326  ;;  %v8801_v62 = vpop.permute.xlu0 %321 }
  0x9e   :  { %4428 = vperm.xlu1 %7934, %v6776_v27   ;;  %4423 = vperm.xlu0 %7933, %v6775_v28  }
  0xa1   :  { %v8809_v1 = vpop.permute.xlu1 %462  ;;  %v8811_v2 = vpop.permute.xlu0 %457 }
  0xa2   :  { %4597 = vperm.xlu1 %7934, %v6794_v30   ;;  %4592 = vperm.xlu0 %7933, %v6793_v31  }
  0xa5   :  { %v8819_v5 = vpop.permute.xlu1 %472  ;;  %v8827_v8 = vpop.permute.xlu0 %467 }
  0xa6   :  { %4607 = vperm.xlu1 %7934, %v6796_v33   ;;  %4602 = vperm.xlu0 %7933, %v6795_v34   ;;  %v6865_v33 = vld [vmem:[%s12456_s10 + $0x1c0] sm:$0xff]  ;;  %v6866_v34 = vld [vmem:[%s12456_s10 + $0x1c8] sm:$0xff] }
  0xa9   :  { %v8835_v11 = vpop.permute.xlu1 %482  ;;  %v8837_v12 = vpop.permute.xlu0 %477 }
  0xaa   :  { %4617 = vperm.xlu1 %7934, %v6798_v37   ;;  %4612 = vperm.xlu0 %7933, %v6797_v38  }
  0xad   :  { %v8847_v19 = vpop.permute.xlu1 %492  ;;  %v8855_v23 = vpop.permute.xlu0 %487 }
  0xae   :  { %4627 = vperm.xlu1 %7934, %v6800_v40   ;;  %4622 = vperm.xlu0 %7933, %v6799_v41  }
  0xb1   :  { %v8868_v41 = vpop.permute.xlu0 %659 }
  0xb2   :  { %2892 = vperm.xlu1 %7934, %v6687_v43   ;;  %2897 = vperm.xlu0 %7933, %v6688_v44  }
  0xb6   :  { %2902 = vperm.xlu1 %7934, %v6689_v47   ;;  %2907 = vperm.xlu0 %7933, %v6690_v48   ;;  %v6867_v48 = vld [vmem:[%s12456_s10 + $0x1d0] sm:$0xff] }
  0xba   :  { %2912 = vperm.xlu1 %7934, %v6691_v50   ;;  %2917 = vperm.xlu0 %7933, %v6692_v51  }
  0xbe   :  { %2922 = vperm.xlu1 %7934, %v6693_v53   ;;  %2927 = vperm.xlu0 %7933, %v6694_v54  }
  0xc2   :  { %4764 = vperm.xlu1 %7934, %v6818_v57   ;;  %4759 = vperm.xlu0 %7933, %v6817_v58  }
  0xc6   :  { %4774 = vperm.xlu1 %7934, %v6820_v60   ;;  %4769 = vperm.xlu0 %7933, %v6819_v61   ;;  %v6869_v60 = vld [vmem:[%s12456_s10 + $0x1e0] sm:$0xff]  ;;  %v6870_v61 = vld [vmem:[%s12456_s10 + $0x1e8] sm:$0xff] }
  0xca   :  { %4784 = vperm.xlu1 %7934, %v6822_v63   ;;  %4779 = vperm.xlu0 %7933, %v6821_v0   ;;  %v8887_v0 = vpop.permute.xlu0 %669 }
  0xce   :  { %4794 = vperm.xlu1 %7934, %v6824_v3   ;;  %4789 = vperm.xlu0 %7933, %v6823_v4   ;;  %v6872_v4 = vld [vmem:[%s12456_s10 + $0x1f8] sm:$0xff] }
  0xd2   :  { %4958 = vperm.xlu1 %7934, %v6857_v6   ;;  %4963 = vperm.xlu0 %7933, %v6858_v7   ;;  %v7936_v6 = vld [vmem:[%s12457_s5 + $0x8] sm:$0xff]   ;;  %v7937_v7 = vld [vmem:[%s12457_s5 + $0x10] sm:$0xff]  }
  0xd6   :  { %4968 = vperm.xlu1 %7934, %v6859_v9   ;;  %4973 = vperm.xlu0 %7933, %v6860_v10   ;;  %v8903_v10 = vpop.permute.xlu0 %679 }
  0xd8   :  { %v7216_v15 = vpop.f32.mrb[0].mxu0 }
  0xd9   :  { %v228_v16 = vadd.f32 %v7216_v15, %v8723_v32  ;;  %v222_v17 = vpop.f32.mrb[1].mxu0  ;;  %v647_v15 = vld [vmem:[%s12456_s10 + $0x98] sm:$0xff] }
  0xda   :  { %v223_v18 = vadd.f32 %v222_v17, %v8707_v26  ;;  %4978 = vperm.xlu1 %7934, %v6861_v13   ;;  %4983 = vperm.xlu0 %7933, %v6862_v14   ;;  %v645_v13 = vld [vmem:[%s12456_s10 + $0x88] sm:$0xff]  ;;  %v644_v14 = vld [vmem:[%s12456_s10 + $0x80] sm:$0xff] }
  0xdb   :  { %v262_v20 = vmax.f32 %v228_v16, 0.0  ;;  %v646_v16 = vld [vmem:[%s12456_s10 + $0x90] sm:$0xff] }
  0xdc   :  { %v261_v24 = vmax.f32 %v223_v18, 0.0  ;;  %v7219_v27 = vpop.f32.mrb[2].mxu0  ;;  %v8921_v18 = vpop.permute.xlu0 %689 }
  0xdd   :  { %v238_v28 = vadd.f32 %v7219_v27, %v8715_v29  ;;  %v232_v26 = vpop.f32.mrb[3].mxu0 }
  0xde   :  { %v233_v30 = vadd.f32 %v232_v26, %v8705_v25  ;;  %4988 = vperm.xlu1 %7934, %v6863_v21   ;;  %4993 = vperm.xlu0 %7933, %v6864_v22   ;;  %v277_v31 = vpack.c.bf16 %v262_v20, %v261_v24  ;;  %v8866_v25 = vpop.permute.xlu1 %654  ;;  %v7938_v20 = vld [vmem:[%s12457_s5 + $0x18] sm:$0xff]   ;;  %v649_v21 = vld [vmem:[%s12456_s10 + $0xa8] sm:$0xff]  ;;  %v648_v22 = vld [vmem:[%s12456_s10 + $0xa0] sm:$0xff] }
  0xdf   :  { %v264_v32 = vmax.f32 %v238_v28, 0.0  ;;  %v651_v28 = vld [vmem:[%s12456_s10 + $0xb8] sm:$0xff]  ;;  %v650_v26 = vld [vmem:[%s12456_s10 + $0xb0] sm:$0xff] }
  0xe0   :  { %v263_v37 = vmax.f32 %v233_v30, 0.0  ;;  %v7222_v38 = vpop.f32.mrb[4].mxu0  ;;  %7226 = vmatprep.subr.bf16.mxu1 %v277_v31  ;;  %v8935_v27 = vpop.permute.xlu0 %699  ;;  %v6696_v30 = vld [vmem:[%s12456_s10 + $0x148] sm:$0xff] }
  0xe1   :  { %v248_v29 = vadd.f32 %v7222_v38, %v8731_v35  ;;  %v242_v40 = vpop.f32.mrb[5].mxu0  ;;  %7227 = vmatpush3.bf16.msra.mxu1 %v277_v31  ;;  %v6868_v35 = vld [vmem:[%s12456_s10 + $0x1d8] sm:$0xff]  ;;  %v6695_v31 = vld [vmem:[%s12456_s10 + $0x140] sm:$0xff] }
  0xe2   :  { %v278_v43 = vpack.c.bf16 %v264_v32, %v263_v37  ;;  %v243_v44 = vadd.f32 %v242_v40, %v8733_v36  ;;  %4998 = vperm.xlu1 %7934, %v6865_v33   ;;  %5003 = vperm.xlu0 %7933, %v6866_v34   ;;  %v8885_v63 = vpop.permute.xlu1 %664  ;;  %v6698_v34 = vld [vmem:[%s12456_s10 + $0x158] sm:$0xff]  ;;  %v6697_v37 = vld [vmem:[%s12456_s10 + $0x150] sm:$0xff]  ;;  %v6700_v40 = vld [vmem:[%s12456_s10 + $0x168] sm:$0xff] }
  0xe3   :  { %v266_v47 = vmax.f32 %v248_v29, 0.0 }
  0xe4   :  { %v265_v50 = vmax.f32 %v243_v44, 0.0  ;;  %v7225_v51 = vpop.f32.mrb[6].mxu0  ;;  %7228 = vmatprep.subr.bf16.mxu1 %v278_v43  ;;  %v8951_v33 = vpop.permute.xlu0 %709  ;;  %v6702_v44 = vld [vmem:[%s12456_s10 + $0x178] sm:$0xff] }
  0xe5   :  { %v258_v53 = vadd.f32 %v7225_v51, %v8741_v39  ;;  %v252_v54 = vpop.f32.mrb[7].mxu0  ;;  %7229 = vmatpush3.bf16.msra.mxu1 %v278_v43  ;;  %v6699_v43 = vld [vmem:[%s12456_s10 + $0x160] sm:$0xff] }
  0xe6   :  { %v279_v57 = vpack.c.bf16 %v266_v47, %v265_v50  ;;  %v253_v36 = vadd.f32 %v252_v54, %v8749_v42  ;;  %5008 = vperm.xlu1 %7934, %v6867_v48   ;;  %5013 = vperm.xlu0 %7933, %v6868_v35   ;;  %v6871_v42 = vld [vmem:[%s12456_s10 + $0x1f0] sm:$0xff]  ;;  %v8901_v9 = vpop.permute.xlu1 %674  ;;  %v6874_v50 = vld [vmem:[%s12456_s10 + $0x208] sm:$0xff]  ;;  %v6873_v51 = vld [vmem:[%s12456_s10 + $0x200] sm:$0xff] }
  0xe7   :  { %v268_v58 = vmax.f32 %v258_v53, 0.0  ;;  %v6701_v47 = vld [vmem:[%s12456_s10 + $0x170] sm:$0xff] }
  0xe8   :  { %v267_v39 = vmax.f32 %v253_v36, 0.0  ;;  %7230 = vmatprep.subr.bf16.mxu1 %v279_v57  ;;  %v8961_v29 = vpop.permute.xlu0 %719  ;;  %v6875_v36 = vld [vmem:[%s12456_s10 + $0x210] sm:$0xff] }
  0xe9   :  { %7231 = vmatpush3.bf16.msra.mxu1 %v279_v57  ;;  %v6876_v57 = vld [vmem:[%s12456_s10 + $0x218] sm:$0xff] }
  0xea   :  { %v280_v3 = vpack.c.bf16 %v268_v58, %v267_v39  ;;  %5018 = vperm.xlu1 %7934, %v6869_v60   ;;  %5023 = vperm.xlu0 %7933, %v6870_v61   ;;  %v8919_v17 = vpop.permute.xlu1 %684  ;;  %v6878_v58 = vld [vmem:[%s12456_s10 + $0x228] sm:$0xff]  ;;  %v6877_v60 = vld [vmem:[%s12456_s10 + $0x220] sm:$0xff] }
  0xec   :  { %7232 = vmatprep.subr.bf16.mxu1 %v280_v3  ;;  %v8977_v35 = vpop.permute.xlu0 %729 }
  0xed   :  { %7233 = vmatpush3.bf16.msra.mxu1 %v280_v3  ;;  %v6880_v3 = vld [vmem:[%s12456_s10 + $0x238] sm:$0xff] }
  0xee   :  { %5028 = vperm.xlu1 %7934, %v6871_v42   ;;  %5033 = vperm.xlu0 %7933, %v6872_v4   ;;  %v8933_v24 = vpop.permute.xlu1 %694  ;;  %v6879_v42 = vld [vmem:[%s12456_s10 + $0x230] sm:$0xff] }
  0xf0   :  { %7235 = vmatmul.mubr.msk.bf16.vlgmr.msra.gmra.mrb[0].mxu1 %vm12494_vm1, %v7936_v6  ;;  %v8987_v54 = vpop.permute.xlu0 %2287 }
  0xf1   :  { %7238 = vmatprep.mubr.msk.bf16.mxu1 %vm12494_vm1, %v7937_v7  ;;  %12522 = vst [vmem:[#allocation3_spill] sm:$0xff] %v8987_v54  ;;  %v7939_v7 = vld [vmem:[%s12458_s7] sm:$0xff]  }
  0xf2   :  { %739 = vperm.xlu1 %7934, %v645_v13   ;;  %734 = vperm.xlu0 %7933, %v644_v14   ;;  %v8949_v32 = vpop.permute.xlu1 %704 }
  0xf3   :  { %7250 = vmatprep.mubr.msk.bf16.mxu0 %vm12494_vm1, %v7939_v7 }
  0xf4   :  { %v9003_v39 = vpop.permute.xlu0 %2297 }
  0xf5   :  { %12524 = vst [vmem:[#allocation5_spill] sm:$0xff] %v9003_v39 }
  0xf6   :  { %749 = vperm.xlu1 %7934, %v647_v15   ;;  %744 = vperm.xlu0 %7933, %v646_v16   ;;  %v8959_v38 = vpop.permute.xlu1 %714 }
  0xf8   :  { %7239 = vmatmul.mubr.msk.bf16.gmra.mrb[4].mxu1 %vm12494_vm1, %v7938_v20  ;;  %v9013_v6 = vpop.permute.xlu0 %2307 }
  0xf9   :  { %12526 = vst [vmem:[#allocation7_spill] sm:$0xff] %v9013_v6 }
  0xfa   :  { %759 = vperm.xlu1 %7934, %v649_v21   ;;  %754 = vperm.xlu0 %7933, %v648_v22   ;;  %v8975_v48 = vpop.permute.xlu1 %724 }
  0xfe   :  { %769 = vperm.xlu1 %7934, %v651_v28   ;;  %764 = vperm.xlu0 %7933, %v650_v26   ;;  %v8985_v53 = vpop.permute.xlu1 %2292 }
  0xff   :  { %12521 = vst [vmem:[#allocation2_spill] sm:$0xff] %v8985_v53 }
 0x102   :  { %2937 = vperm.xlu1 %7934, %v6696_v30   ;;  %2932 = vperm.xlu0 %7933, %v6695_v31   ;;  %v9001_v61 = vpop.permute.xlu1 %2302 }
 0x103   :  { %12523 = vst [vmem:[#allocation4_spill] sm:$0xff] %v9001_v61 }
 0x106   :  { %2947 = vperm.xlu1 %7934, %v6698_v34   ;;  %2942 = vperm.xlu0 %7933, %v6697_v37   ;;  %v9011_v4 = vpop.permute.xlu1 %2312 }
 0x107   :  { %12525 = vst [vmem:[#allocation6_spill] sm:$0xff] %v9011_v4 }
 0x10a   :  { %2957 = vperm.xlu1 %7934, %v6700_v40   ;;  %2952 = vperm.xlu0 %7933, %v6699_v43  }
 0x10e   :  { %2967 = vperm.xlu1 %7934, %v6702_v44   ;;  %2962 = vperm.xlu0 %7933, %v6701_v47  }
 0x112   :  { %5043 = vperm.xlu1 %7934, %v6874_v50   ;;  %5038 = vperm.xlu0 %7933, %v6873_v51  }
 0x116   :  { %5053 = vperm.xlu1 %7934, %v6876_v57   ;;  %5048 = vperm.xlu0 %7933, %v6875_v36  }
 0x11a   :  { %5063 = vperm.xlu1 %7934, %v6878_v58   ;;  %5058 = vperm.xlu0 %7933, %v6877_v60  }
 0x11e   :  { %5073 = vperm.xlu1 %7934, %v6880_v3   ;;  %5068 = vperm.xlu0 %7933, %v6879_v42  }
 0x1c3   :  { %v7236_v13 = vpop.f32.mrb[0].mxu1 }
 0x1c4   :  { %v405_v14 = vadd.f32 %v7236_v13, %v8775_v52  ;;  %v396_v15 = vpop.f32.mrb[1].mxu1 }
 0x1c5   :  { %v397_v16 = vadd.f32 %v396_v15, %v8759_v46  ;;  %v7237_v20 = vpop.f32.mrb[2].mxu1 }
 0x1c6   :  { %v408_v21 = vadd.f32 %v7237_v20, %v8767_v49  ;;  %v399_v22 = vpop.f32.mrb[3].mxu1  ;;  %v429_v26 = vmax.f32 %v405_v14, 0.0 }
 0x1c7   :  { %v400_v28 = vadd.f32 %v399_v22, %v8757_v45  ;;  %v427_v31 = vmax.f32 %v397_v16, 0.0 }
 0x1c8   :  { %v430_v30 = vmax.f32 %v408_v21, 0.0 }
 0x1c9   :  { %v428_v34 = vmax.f32 %v400_v28, 0.0 }
 0x1ca   :  { %v444_v37 = vpack.c.bf16 %v430_v30, %v429_v26 }
 0x1cb   :  { %v443_v40 = vpack.c.bf16 %v428_v34, %v427_v31  ;;  %v7240_v43 = vpop.f32.mrb[4].mxu1 }
 0x1cc   :  { %v421_v44 = vadd.f32 %v7240_v43, %v8801_v62  ;;  %v412_v47 = vpop.f32.mrb[5].mxu1  ;;  %v7943_v62 = vld [vmem:[%s12459_s9] sm:$0xff]  }
 0x1cd   :  { %v413_v52 = vadd.f32 %v412_v47, %v8785_v56  ;;  %v7241_v50 = vpop.f32.mrb[6].mxu1  ;;  %7242 = vmatprep.subr.bf16.mxu0 %v443_v40  ;;  %v7940_v56 = vld [vmem:[%s12458_s7 + $0x8] sm:$0xff]   ;;  %7266 = vmatprep.mubr.msk.bf16.mxu1 %vm12494_vm1, %v7943_v62 }
 0x1ce   :  { %v424_v46 = vadd.f32 %v7241_v50, %v8793_v59  ;;  %v415_v49 = vpop.f32.mrb[7].mxu1  ;;  %7243 = vmatpush3.bf16.msra.mxu0 %v443_v40  ;;  %v433_v51 = vmax.f32 %v421_v44, 0.0  ;;  %v7942_v59 = vld [vmem:[%s12458_s7 + $0x18] sm:$0xff]   ;;  %v7952_v62 = vld [vmem:[%s12459_s9 + $0x48] sm:$0xff]  }
 0x1cf   :  { %v416_v45 = vadd.f32 %v415_v49, %v8783_v55  ;;  %7244 = vmatprep.subr.bf16.mxu0 %v444_v37  ;;  %v431_v36 = vmax.f32 %v413_v52, 0.0  ;;  %v7941_v55 = vld [vmem:[%s12458_s7 + $0x10] sm:$0xff]  }
 0x1d0   :  { %v434_v57 = vmax.f32 %v424_v46, 0.0 }
 0x1d1   :  { %v432_v58 = vmax.f32 %v416_v45, 0.0 }
 0x1d2   :  { %v446_v60 = vpack.c.bf16 %v434_v57, %v433_v51  ;;  %7245 = vmatpush3.bf16.msra.mxu0 %v444_v37  ;;  %v7948_v51 = vld [vmem:[%s12459_s9 + $0x28] sm:$0xff]   ;;  %v7949_v57 = vld [vmem:[%s12459_s9 + $0x30] sm:$0xff]  }
 0x1d3   :  { %v445_v3 = vpack.c.bf16 %v432_v58, %v431_v36  ;;  %v9073_v36 = vpop.permute.xlu0 %2317  ;;  %v9077_v58 = vpop.permute.xlu1 %2322 }
 0x1d4   :  { %12527 = vst [vmem:[#allocation8_spill] sm:$0xff] %v9073_v36  ;;  %12528 = vst [vmem:[#allocation9_spill] sm:$0xff] %v9077_v58 }
 0x1d5   :  { %7246 = vmatprep.subr.bf16.mxu0 %v445_v3 }
 0x1d6   :  { %7247 = vmatpush3.bf16.msra.mxu0 %v445_v3 }
 0x1d7   :  { %7248 = vmatprep.subr.bf16.mxu0 %v446_v60  ;;  %v9082_v3 = vpop.permute.xlu0 %2486 }
 0x1d8   :  { %12529 = vst [vmem:[#allocation10_spill] sm:$0xff] %v9082_v3 }
 0x1da   :  { %7249 = vmatpush3.bf16.msra.mxu0 %v446_v60  ;;  %v7950_v60 = vld [vmem:[%s12459_s9 + $0x38] sm:$0xff]  }
 0x1dd   :  { %7251 = vmatmul.mubr.msk.bf16.vlgmr.msra.gmra.mrb[8].mxu0 %vm12494_vm1, %v7940_v56  ;;  %v7951_v56 = vld [vmem:[%s12459_s9 + $0x40] sm:$0xff]  }
 0x1de   :  { %7254 = vmatprep.mubr.msk.bf16.mxu0 %vm12494_vm1, %v7941_v55  ;;  %v9088_v55 = vpop.permute.xlu1 %2491 }
 0x1df   :  { %12530 = vst [vmem:[#allocation11_spill] sm:$0xff] %v9088_v55 }
 0x1e5   :  { %7255 = vmatmul.mubr.msk.bf16.gmra.mrb[12].mxu0 %vm12494_vm1, %v7942_v59  ;;  %v9091_v59 = vpop.permute.xlu0 %2496 }
 0x1e6   :  { %12531 = vst [vmem:[#allocation12_spill] sm:$0xff] %v9091_v59 }
 0x2b0   :  { %v7252_v42 = vpop.f32.mrb[8].mxu0 }
 0x2b1   :  { %v570_v7 = vadd.f32 %v7252_v42, %v8827_v8  ;;  %v561_v13 = vpop.f32.mrb[9].mxu0  ;;  %v7953_v42 = vld [vmem:[%s12459_s9 + $0x50] sm:$0xff]  }
 0x2b2   :  { %v562_v14 = vadd.f32 %v561_v13, %v8811_v2  ;;  %v7253_v15 = vpop.f32.mrb[10].mxu0  ;;  %v9102_v13 = vpop.permute.xlu0 %2506 }
 0x2b3   :  { %v573_v16 = vadd.f32 %v7253_v15, %v8819_v5  ;;  %v564_v20 = vpop.f32.mrb[11].mxu0  ;;  %v594_v22 = vmax.f32 %v570_v7, 0.0  ;;  %v9099_v7 = vpop.permute.xlu1 %2501  ;;  %12533 = vst [vmem:[#allocation14_spill] sm:$0xff] %v9102_v13 }
 0x2b4   :  { %v565_v21 = vadd.f32 %v564_v20, %v8809_v1  ;;  %v592_v26 = vmax.f32 %v562_v14, 0.0  ;;  %12532 = vst [vmem:[#allocation13_spill] sm:$0xff] %v9099_v7  ;;  %v7954_v14 = vld [vmem:[%s12459_s9 + $0x58] sm:$0xff]  }
 0x2b5   :  { %v595_v28 = vmax.f32 %v573_v16, 0.0 }
 0x2b6   :  { %v593_v30 = vmax.f32 %v565_v21, 0.0  ;;  %v9110_v16 = vpop.permute.xlu0 %2516 }
 0x2b7   :  { %v625_v31 = vpack.c.bf16 %v595_v28, %v594_v22  ;;  %v9108_v15 = vpop.permute.xlu1 %2511  ;;  %12535 = vst [vmem:[#allocation16_spill] sm:$0xff] %v9110_v16 }
 0x2b8   :  { %v624_v34 = vpack.c.bf16 %v593_v30, %v592_v26  ;;  %v7256_v37 = vpop.f32.mrb[12].mxu0  ;;  %12534 = vst [vmem:[#allocation15_spill] sm:$0xff] %v9108_v15 }
 0x2b9   :  { %v586_v40 = vadd.f32 %v7256_v37, %v8855_v23  ;;  %v577_v43 = vpop.f32.mrb[13].mxu0  ;;  %v7947_v23 = vld [vmem:[%s12459_s9 + $0x20] sm:$0xff]  }
 0x2ba   :  { %v578_v8 = vadd.f32 %v577_v43, %v8837_v12  ;;  %v7257_v44 = vpop.f32.mrb[14].mxu0  ;;  %7258 = vmatprep.subr.bf16.mxu1 %v624_v34  ;;  %v7944_v12 = vld [vmem:[%s12459_s9 + $0x8] sm:$0xff]   ;;  %v9115_v21 = vpop.permute.xlu0 %2653 }
 0x2bb   :  { %v589_v2 = vadd.f32 %v7257_v44, %v8847_v19  ;;  %v580_v5 = vpop.f32.mrb[15].mxu0  ;;  %7259 = vmatpush3.bf16.msra.mxu1 %v624_v34  ;;  %v598_v47 = vmax.f32 %v586_v40, 0.0  ;;  %v7946_v19 = vld [vmem:[%s12459_s9 + $0x18] sm:$0xff]   ;;  %v9113_v20 = vpop.permute.xlu1 %2521  ;;  %12537 = vst [vmem:[#allocation18_spill] sm:$0xff] %v9115_v21 }
 0x2bc   :  { %v581_v1 = vadd.f32 %v580_v5, %v8835_v11  ;;  %7260 = vmatprep.subr.bf16.mxu1 %v625_v31  ;;  %v596_v50 = vmax.f32 %v578_v8, 0.0  ;;  %v7945_v11 = vld [vmem:[%s12459_s9 + $0x10] sm:$0xff]   ;;  %12536 = vst [vmem:[#allocation17_spill] sm:$0xff] %v9113_v20 }
 0x2bd   :  { %v599_v52 = vmax.f32 %v589_v2, 0.0 }
 0x2be   :  { %v597_v46 = vmax.f32 %v581_v1, 0.0  ;;  %v9119_v28 = vpop.permute.xlu0 %2663 }
 0x2bf   :  { %v627_v49 = vpack.c.bf16 %v599_v52, %v598_v47  ;;  %7261 = vmatpush3.bf16.msra.mxu1 %v625_v31  ;;  %v9117_v22 = vpop.permute.xlu1 %2658  ;;  %12539 = vst [vmem:[#allocation20_spill] sm:$0xff] %v9119_v28 }
 0x2c0   :  { %v626_v45 = vpack.c.bf16 %v597_v46, %v596_v50  ;;  %12538 = vst [vmem:[#allocation19_spill] sm:$0xff] %v9117_v22 }
 0x2c2   :  { %7262 = vmatprep.subr.bf16.mxu1 %v626_v45  ;;  %v9123_v30 = vpop.permute.xlu0 %2673 }
 0x2c3   :  { %7263 = vmatpush3.bf16.msra.mxu1 %v626_v45  ;;  %v9121_v26 = vpop.permute.xlu1 %2668  ;;  %12541 = vst [vmem:[#allocation22_spill] sm:$0xff] %v9123_v30 }
 0x2c4   :  { %7264 = vmatprep.subr.bf16.mxu1 %v627_v49  ;;  %12540 = vst [vmem:[#allocation21_spill] sm:$0xff] %v9121_v26 }
 0x2c6   :  { %v9127_v34 = vpop.permute.xlu0 %2683 }
 0x2c7   :  { %7265 = vmatpush3.bf16.msra.mxu1 %v627_v49  ;;  %v9125_v31 = vpop.permute.xlu1 %2678  ;;  %12543 = vst [vmem:[#allocation24_spill] sm:$0xff] %v9127_v34 }
 0x2c8   :  { %12542 = vst [vmem:[#allocation23_spill] sm:$0xff] %v9125_v31 }
 0x2ca   :  { %7267 = vmatmul.mubr.msk.bf16.vlgmr.msra.gmra.mrb[8].mxu1 %vm12494_vm1, %v7944_v12  ;;  %v9131_v40 = vpop.permute.xlu0 %2857 }
 0x2cb   :  { %7270 = vmatprep.mubr.msk.bf16.mxu1 %vm12494_vm1, %v7945_v11  ;;  %v9129_v37 = vpop.permute.xlu1 %2688  ;;  %12545 = vst [vmem:[#allocation26_spill] sm:$0xff] %v9131_v40 }
 0x2cc   :  { %12544 = vst [vmem:[#allocation25_spill] sm:$0xff] %v9129_v37 }
 0x2ce   :  { %v9135_v8 = vpop.permute.xlu0 %2867 }
 0x2cf   :  { %v9133_v43 = vpop.permute.xlu1 %2852  ;;  %12547 = vst [vmem:[#allocation28_spill] sm:$0xff] %v9135_v8 }
 0x2d0   :  { %12546 = vst [vmem:[#allocation27_spill] sm:$0xff] %v9133_v43 }
 0x2d2   :  { %7271 = vmatmul.mubr.msk.bf16.gmra.mrb[12].mxu1 %vm12494_vm1, %v7946_v19  ;;  %v9139_v2 = vpop.permute.xlu0 %2877 }
 0x2d3   :  { %7274 = vmatprep.mubr.msk.bf16.mxu1 %vm12494_vm1, %v7947_v23  ;;  %v9137_v44 = vpop.permute.xlu1 %2862  ;;  %12549 = vst [vmem:[#allocation30_spill] sm:$0xff] %v9139_v2 }
 0x2d4   :  { %12548 = vst [vmem:[#allocation29_spill] sm:$0xff] %v9137_v44 }
 0x2d6   :  { %v9143_v1 = vpop.permute.xlu0 %2887 }
 0x2d7   :  { %v9141_v5 = vpop.permute.xlu1 %2872  ;;  %12551 = vst [vmem:[#allocation32_spill] sm:$0xff] %v9143_v1 }
 0x2d8   :  { %12550 = vst [vmem:[#allocation31_spill] sm:$0xff] %v9141_v5 }
 0x2da   :  { %7275 = vmatmul.mubr.msk.bf16.gmra.mrb[16].mxu1 %vm12494_vm1, %v7948_v51  ;;  %v9147_v52 = vpop.permute.xlu0 %4393 }
 0x2db   :  { %7278 = vmatprep.mubr.msk.bf16.mxu1 %vm12494_vm1, %v7949_v57  ;;  %v9145_v47 = vpop.permute.xlu1 %2882  ;;  %12553 = vst [vmem:[#allocation34_spill] sm:$0xff] %v9147_v52 }
 0x2dc   :  { %12552 = vst [vmem:[#allocation33_spill] sm:$0xff] %v9145_v47 }
 0x2de   :  { %v9151_v46 = vpop.permute.xlu0 %4403 }
 0x2df   :  { %v9149_v50 = vpop.permute.xlu1 %4398  ;;  %12555 = vst [vmem:[#allocation36_spill] sm:$0xff] %v9151_v46 }
 0x2e0   :  { %12554 = vst [vmem:[#allocation35_spill] sm:$0xff] %v9149_v50 }
 0x2e2   :  { %7279 = vmatmul.mubr.msk.bf16.gmra.mrb[20].mxu1 %vm12494_vm1, %v7950_v60  ;;  %v9155_v45 = vpop.permute.xlu0 %4413 }
 0x2e3   :  { %7282 = vmatprep.mubr.msk.bf16.mxu1 %vm12494_vm1, %v7951_v56  ;;  %v9153_v49 = vpop.permute.xlu1 %4408  ;;  %12557 = vst [vmem:[#allocation38_spill] sm:$0xff] %v9155_v45 }
 0x2e4   :  { %12556 = vst [vmem:[#allocation37_spill] sm:$0xff] %v9153_v49 }
 0x2e6   :  { %v9159_v11 = vpop.permute.xlu0 %4423 }
 0x2e7   :  { %v9157_v12 = vpop.permute.xlu1 %4418  ;;  %12559 = vst [vmem:[#allocation40_spill] sm:$0xff] %v9159_v11 }
 0x2e8   :  { %12558 = vst [vmem:[#allocation39_spill] sm:$0xff] %v9157_v12 }
 0x2ea   :  { %7283 = vmatmul.mubr.msk.bf16.gmra.mrb[24].mxu1 %vm12494_vm1, %v7952_v62  ;;  %v9163_v23 = vpop.permute.xlu0 %4592  ;;  %v12463_v62 = vmov 0.0|0.0  }
 0x2eb   :  { %7286 = vmatprep.mubr.msk.bf16.mxu1 %vm12494_vm1, %v7953_v42  ;;  %v9161_v19 = vpop.permute.xlu1 %4428  ;;  %12561 = vst [vmem:[#allocation42_spill] sm:$0xff] %v9163_v23  ;;  %7848 = vmatprep.subr.bf16.mxu0 %v12463_v62 }
 0x2ec   :  { %12560 = vst [vmem:[#allocation41_spill] sm:$0xff] %v9161_v19  ;;  %7920 = vmatprep.subr.bf16.mxu1 %v12463_v62 }
 0x2ee   :  { %v9167_v57 = vpop.permute.xlu0 %4602 }
 0x2ef   :  { %v9165_v51 = vpop.permute.xlu1 %4597  ;;  %12563 = vst [vmem:[#allocation44_spill] sm:$0xff] %v9167_v57 }
 0x2f0   :  { %12562 = vst [vmem:[#allocation43_spill] sm:$0xff] %v9165_v51 }
 0x2f2   :  { %7287 = vmatmul.mubr.msk.bf16.gmra.mrb[28].mxu1 %vm12494_vm1, %v7954_v14  ;;  %v9171_v56 = vpop.permute.xlu0 %4612 }
 0x2f3   :  { %v9169_v60 = vpop.permute.xlu1 %4607  ;;  %12565 = vst [vmem:[#allocation46_spill] sm:$0xff] %v9171_v56  ;;  %v12465_v56 = vmov 0.0  }
 0x2f4   :  { %12564 = vst [vmem:[#allocation45_spill] sm:$0xff] %v9169_v60  ;;  %7306 = vmatprep.mubr.msk.f32.mxu0 %vm12491_vm2, %v12465_v56  ;;  %7388 = vmatprep.mubr.msk.f32.mxu1 %vm12491_vm2, %v12465_v56 }
 0x2f6   :  { %v9177_v14 = vpop.permute.xlu0 %4622 }
 0x2f7   :  { %v9175_v42 = vpop.permute.xlu1 %4617  ;;  %12567 = vst [vmem:[#allocation48_spill] sm:$0xff] %v9177_v14 }
 0x2f8   :  { %12566 = vst [vmem:[#allocation47_spill] sm:$0xff] %v9175_v42 }
 0x2fa   :  { %v9181_v23 = vpop.permute.xlu0 %2897 }
 0x2fb   :  { %v9179_v11 = vpop.permute.xlu1 %4627  ;;  %12569 = vst [vmem:[#allocation50_spill] sm:$0xff] %v9181_v23 }
 0x2fc   :  { %12568 = vst [vmem:[#allocation49_spill] sm:$0xff] %v9179_v11 }
 0x2fe   :  { %v9185_v57 = vpop.permute.xlu0 %2907 }
 0x2ff   :  { %v9183_v51 = vpop.permute.xlu1 %2892  ;;  %12571 = vst [vmem:[#allocation52_spill] sm:$0xff] %v9185_v57 }
 0x300   :  { %12570 = vst [vmem:[#allocation51_spill] sm:$0xff] %v9183_v51 }
 0x302   :  { %v9193_v62 = vpop.permute.xlu0 %2917 }
 0x303   :  { %v9187_v60 = vpop.permute.xlu1 %2902  ;;  %12573 = vst [vmem:[#allocation54_spill] sm:$0xff] %v9193_v62 }
 0x304   :  { %12572 = vst [vmem:[#allocation53_spill] sm:$0xff] %v9187_v60 }
 0x306   :  { %v9197_v11 = vpop.permute.xlu0 %2927 }
 0x307   :  { %v9195_v42 = vpop.permute.xlu1 %2912  ;;  %12575 = vst [vmem:[#allocation56_spill] sm:$0xff] %v9197_v11 }
 0x308   :  { %12574 = vst [vmem:[#allocation55_spill] sm:$0xff] %v9195_v42 }
 0x30a   :  { %v9201_v19 = vpop.permute.xlu0 %4759 }
 0x30b   :  { %v9199_v14 = vpop.permute.xlu1 %2922  ;;  %12577 = vst [vmem:[#allocation58_spill] sm:$0xff] %v9201_v19 }
 0x30c   :  { %12576 = vst [vmem:[#allocation57_spill] sm:$0xff] %v9199_v14 }
 0x30e   :  { %v9205_v12 = vpop.permute.xlu0 %4769 }
 0x30f   :  { %v9203_v45 = vpop.permute.xlu1 %4764  ;;  %12579 = vst [vmem:[#allocation60_spill] sm:$0xff] %v9205_v12  ;;  %v39_v12 = vlaneseq }
 0x310   :  { %12578 = vst [vmem:[#allocation59_spill] sm:$0xff] %v9203_v45 }
 0x312   :  { %v9209_v49 = vpop.permute.xlu0 %4779 }
 0x313   :  { %v9207_v46 = vpop.permute.xlu1 %4774  ;;  %12581 = vst [vmem:[#allocation62_spill] sm:$0xff] %v9209_v49  ;;  %v9229_v49 = vshrl.u32 %v39_v12, 7 }
 0x314   :  { %12580 = vst [vmem:[#allocation61_spill] sm:$0xff] %v9207_v46 }
 0x315   :  { %12591 = vst [vmem:[#allocation72_spill] sm:$0xff] %v9229_v49  ;;  %vm12489_vm4 = vcmp.lt.s32.totalorder %v9229_v49, 7 }
 0x316   :  { %v9213_v56 = vpop.permute.xlu0 %4789 }
 0x317   :  { %v9211_v52 = vpop.permute.xlu1 %4784  ;;  %12583 = vst [vmem:[#allocation64_spill] sm:$0xff] %v9213_v56  ;;  %v9234_v56 = vadd.s32 8, %v9229_v49 }
 0x318   :  { %12582 = vst [vmem:[#allocation63_spill] sm:$0xff] %v9211_v52 }
 0x319   :  { %12593 = vst [vmem:[#allocation74_spill] sm:$0xff] %v9234_v56  ;;  %vm12490_vm3 = vcmp.lt.s32.totalorder %v9234_v56, 10  ;;  %v43_v7 = vcvt.s32.f32 %v9234_v56  ;;  %vm12495_vm5 = vcmp.eq.s32.totalorder %v9234_v56, 9 }
 0x31a   :  { %v9217_v62 = vpop.permute.xlu0 %4963 }
 0x31b   :  { %v9215_v50 = vpop.permute.xlu1 %4794  ;;  %12585 = vst [vmem:[#allocation66_spill] sm:$0xff] %v9217_v62  ;;  %v1298_v58 = vadd.f32 1.0, %v43_v7 }
 0x31c   :  { %12584 = vst [vmem:[#allocation65_spill] sm:$0xff] %v9215_v50 }
 0x31e   :  { %v9221_v42 = vpop.permute.xlu0 %4973 }
 0x31f   :  { %v9219_v11 = vpop.permute.xlu1 %4958  ;;  %12587 = vst [vmem:[#allocation68_spill] sm:$0xff] %v9221_v42 }
 0x320   :  { %12586 = vst [vmem:[#allocation67_spill] sm:$0xff] %v9219_v11 }
 0x322   :  { %v9225_v45 = vpop.permute.xlu0 %4983 }
 0x323   :  { %v9223_v19 = vpop.permute.xlu1 %4968  ;;  %12589 = vst [vmem:[#allocation70_spill] sm:$0xff] %v9225_v45 }
 0x324   :  { %12588 = vst [vmem:[#allocation69_spill] sm:$0xff] %v9223_v19 }
 0x326   :  { %v9231_v52 = vpop.permute.xlu0 %4993 }
 0x327   :  { %v9227_v46 = vpop.permute.xlu1 %4978  ;;  %12592 = vst [vmem:[#allocation73_spill] sm:$0xff] %v9231_v52 }
 0x328   :  { %12590 = vst [vmem:[#allocation71_spill] sm:$0xff] %v9227_v46 }
 0x32a   :  { %v9238_v14 = vpop.permute.xlu0 %5003 }
 0x32b   :  { %v9236_v50 = vpop.permute.xlu1 %4988  ;;  %12595 = vst [vmem:[#allocation76_spill] sm:$0xff] %v9238_v14 }
 0x32c   :  { %12594 = vst [vmem:[#allocation75_spill] sm:$0xff] %v9236_v50 }
 0x32e   :  { %v9257_v23 = vpop.permute.xlu0 %5013 }
 0x32f   :  { %v9251_v51 = vpop.permute.xlu1 %4998  ;;  %12597 = vst [vmem:[#allocation78_spill] sm:$0xff] %v9257_v23 }
 0x330   :  { %12596 = vst [vmem:[#allocation77_spill] sm:$0xff] %v9251_v51 }
 0x333   :  { %v9260_v51 = vpop.permute.xlu1 %5008 }
 0x334   :  { %12598 = vst [vmem:[#allocation79_spill] sm:$0xff] %v9260_v51 }
 0x337   :  { %v9283_v51 = vpop.permute.xlu1 %5018 }
 0x338   :  { %12600 = vst [vmem:[#allocation81_spill] sm:$0xff] %v9283_v51 }
 0x39d   :  { %v7268_v62 = vpop.f32.mrb[8].mxu1 }
 0x39e   :  { %v902_v11 = vpop.f32.mrb[9].mxu1  ;;  %v9243_v12 = vadd.f32 %v7268_v62, %v8885_v63 }
 0x39f   :  { %v7269_v19 = vpop.f32.mrb[10].mxu1  ;;  %v903_v52 = vadd.f32 %v902_v11, %v8866_v25 }
 0x3a0   :  { %v914_v45 = vadd.f32 %v7269_v19, %v8887_v0  ;;  %v905_v42 = vpop.f32.mrb[11].mxu1 }
 0x3a1   :  { %v906_v46 = vadd.f32 %v905_v42, %v8868_v41 }
 0x3a2   :  { %v9249_v50 = vsel %vm12490_vm3, %v914_v45, -inf }
 0x3a3   :  { %v1014_v14 = vmax.f32 %v9243_v12, %v9249_v50  ;;  %v1000_v0 = vsel %vm12490_vm3, %v906_v46, -inf }
 0x3a4   :  { %v1007_v19 = vmax.f32 %v903_v52, %v1000_v0 }
 0x3a5   :  { %v1015_v63 = vrot.slane %v1014_v14, 4  ;;  %v7272_v62 = vpop.f32.mrb[12].mxu1 }
 0x3a6   :  { %v1008_v41 = vrot.slane %v1007_v19, 4  ;;  %v918_v42 = vpop.f32.mrb[13].mxu1  ;;  %v9263_v2 = vadd.f32 %v7272_v62, %v8919_v17 }
 0x3a7   :  { %v1016_v25 = vmax.f32 %v1014_v14, %v1015_v63  ;;  %v7273_v11 = vpop.f32.mrb[14].mxu1  ;;  %v9267_v23 = vadd.f32 %v918_v42, %v8901_v9 }
 0x3a8   :  { %v1009_v57 = vmax.f32 %v1007_v19, %v1008_v41  ;;  %v930_v45 = vadd.f32 %v7273_v11, %v8921_v18  ;;  %v921_v60 = vpop.f32.mrb[15].mxu1  ;;  %v9273_v19 = vpop.permute.xlu0 %5023 }
 0x3a9   :  { %v1017_v5 = vrot.slane %v1016_v25, 2  ;;  %v922_v46 = vadd.f32 %v921_v60, %v8903_v10  ;;  %12599 = vst [vmem:[#allocation80_spill] sm:$0xff] %v9273_v19 }
 0x3aa   :  { %v1010_v47 = vrot.slane %v1009_v57, 2  ;;  %v9271_v14 = vsel %vm12490_vm3, %v930_v45, -inf }
 0x3ab   :  { %v1018_v18 = vmax.f32 %v1016_v25, %v1017_v5  ;;  %v1028_v63 = vmax.f32 %v9263_v2, %v9271_v14  ;;  %v9279_v17 = vsel %vm12490_vm3, %v922_v46, -inf }
 0x3ac   :  { %v1011_v62 = vmax.f32 %v1009_v57, %v1010_v47  ;;  %v1021_v10 = vmax.f32 %v9267_v23, %v9279_v17  ;;  %v9289_v40 = vpop.permute.xlu0 %5033 }
 0x3ad   :  { %v1019_v9 = vrot.slane %v1018_v18, 1  ;;  %v1029_v60 = vrot.slane %v1028_v63, 4  ;;  %v7276_v41 = vpop.f32.mrb[16].mxu1  ;;  %12601 = vst [vmem:[#allocation82_spill] sm:$0xff] %v9289_v40 }
 0x3ae   :  { %v1012_v42 = vrot.slane %v1011_v62, 1  ;;  %v1022_v11 = vrot.slane %v1021_v10, 4  ;;  %v934_v45 = vpop.f32.mrb[17].mxu1  ;;  %v9286_v46 = vadd.f32 %v7276_v41, %v8949_v32 }
 0x3af   :  { %v1020_v5 = vmax.f32 %v1018_v18, %v1019_v9  ;;  %v1030_v25 = vmax.f32 %v1028_v63, %v1029_v60  ;;  %v7277_v19 = vpop.f32.mrb[18].mxu1 }
 0x3b0   :  { %v1013_v1 = vmax.f32 %v1011_v62, %v1012_v42  ;;  %v1023_v43 = vmax.f32 %v1021_v10, %v1022_v11  ;;  %v946_v47 = vadd.f32 %v7277_v19, %v8951_v33  ;;  %v937_v57 = vpop.f32.mrb[19].mxu1  ;;  %v9299_v33 = vadd.f32 %v934_v45, %v8933_v24 }
 0x3b1   :  { %v1037_v44 = vsub.f32 %v9243_v12, %v1020_v5  ;;  %v1038_v8 = vsub.f32 %v9249_v50, %v1020_v5  ;;  %v1031_v31 = vrot.slane %v1030_v25, 2  ;;  %v938_v51 = vadd.f32 %v937_v57, %v8935_v27 }
 0x3b2   :  { %v1035_v18 = vsub.f32 %v903_v52, %v1013_v1  ;;  %v1036_v63 = vsub.f32 %v1000_v0, %v1013_v1  ;;  %v1024_v9 = vrot.slane %v1023_v43, 2  ;;  %v9296_v62 = vsel %vm12490_vm3, %v946_v47, -inf  ;;  %v9307_v1 = vpop.permute.xlu1 %5028 }
 0x3b3   :  { %v1032_v32 = vmax.f32 %v1030_v25, %v1031_v31  ;;  %v1400_v19 = vmax.f32 %v9286_v46, %v9296_v62  ;;  %v9305_v27 = vsel %vm12490_vm3, %v938_v51, -inf  ;;  %12602 = vst [vmem:[#allocation83_spill] sm:$0xff] %v9307_v1  ;;  %v1047_v24 = vmul.f32 1.442695, %v1037_v44 }
 0x3b4   :  { %v1043_v12 = vmul.f32 1.442695, %v1035_v18  ;;  %v1045_v10 = vmul.f32 1.442695, %v1036_v63  ;;  %v1025_v50 = vmax.f32 %v1023_v43, %v1024_v9  ;;  %v1393_v31 = vmax.f32 %v9299_v33, %v9305_v27  ;;  %v735_v43 = vpop.permute.xlu0 %734 }
 0x3b5   :  { %v1033_v52 = vrot.slane %v1032_v32, 1  ;;  %v1401_v0 = vrot.slane %v1400_v19, 4  ;;  %v7280_v60 = vpop.f32.mrb[20].mxu1  ;;  %v1049_v41 = vmul.f32 1.442695, %v1038_v8 }
 0x3b6   :  { %v1026_v42 = vrot.slane %v1025_v50, 1  ;;  %v9312_v11 = vadd.f32 %v7280_v60, %v8975_v48  ;;  %v950_v45 = vpop.f32.mrb[21].mxu1  ;;  %7995 = vpow2.f32 %v1043_v12  ;;  %v1394_v25 = vrot.slane %v1393_v31, 4 }
 0x3b7   :  { %v1034_v5 = vmax.f32 %v1032_v32, %v1033_v52  ;;  %v1402_v51 = vmax.f32 %v1400_v19, %v1401_v0  ;;  %v7281_v47 = vpop.f32.mrb[22].mxu1  ;;  %7997 = vpow2.f32 %v1045_v10  ;;  %v9315_v18 = vadd.f32 %v950_v45, %v8959_v38  ;;  %v740_v10 = vpop.permute.xlu1 %739 }
 0x3b8   :  { %v1027_v57 = vmax.f32 %v1025_v50, %v1026_v42  ;;  %v962_v63 = vadd.f32 %v7281_v47, %v8977_v35  ;;  %v953_v44 = vpop.f32.mrb[23].mxu1  ;;  %v1395_v60 = vmax.f32 %v1393_v31, %v1394_v25  ;;  %7999 = vpow2.f32 %v1047_v24 }
 0x3b9   :  { %v1041_v8 = vsub.f32 %v9263_v2, %v1034_v5  ;;  %v1042_v48 = vsub.f32 %v9271_v14, %v1034_v5  ;;  %v1403_v9 = vrot.slane %v1402_v51, 2  ;;  %v954_v38 = vadd.f32 %v953_v44, %v8961_v29 }
 0x3ba   :  { %v1039_v12 = vsub.f32 %v9267_v23, %v1027_v57  ;;  %v1040_v32 = vsub.f32 %v9279_v17, %v1027_v57  ;;  %v9324_v19 = vsel %vm12490_vm3, %v962_v63, -inf  ;;  %v1396_v0 = vrot.slane %v1395_v60, 2  ;;  %v745_v17 = vpop.permute.xlu0 %744 }
 0x3bb   :  { %v1055_v50 = vmul.f32 1.442695, %v1041_v8  ;;  %v1057_v35 = vmul.f32 1.442695, %v1042_v48  ;;  %v1404_v52 = vmax.f32 %v1402_v51, %v1403_v9  ;;  %v1414_v14 = vmax.f32 %v9312_v11, %v9324_v19 }
 0x3bc   :  { %v1051_v2 = vmul.f32 1.442695, %v1039_v12  ;;  %v9331_v23 = vsel %vm12490_vm3, %v954_v38, -inf  ;;  %8001 = vpow2.f32 %v1049_v41  ;;  %v1397_v42 = vmax.f32 %v1395_v60, %v1396_v0  ;;  %v750_v60 = vpop.permute.xlu1 %749 }
 0x3bd   :  { %v1405_v31 = vrot.slane %v1404_v52, 1  ;;  %v1407_v29 = vmax.f32 %v9315_v18, %v9331_v23  ;;  %v7284_v45 = vpop.f32.mrb[24].mxu1  ;;  %8003 = vpow2.f32 %v1055_v50  ;;  %v1415_v5 = vrot.slane %v1414_v14, 4 }
 0x3be   :  { %v9335_v51 = vadd.f32 %v7284_v45, %v745_v17  ;;  %v966_v24 = vpop.f32.mrb[25].mxu1  ;;  %8005 = vpow2.f32 %v1057_v35  ;;  %v1398_v47 = vrot.slane %v1397_v42, 1  ;;  %v1053_v44 = vmul.f32 1.442695, %v1040_v32  ;;  %v755_v40 = vpop.permute.xlu0 %754 }
 0x3bf   :  { %v1406_v25 = vmax.f32 %v1404_v52, %v1405_v31  ;;  %v1408_v57 = vrot.slane %v1407_v29, 4  ;;  %v7285_v63 = vpop.f32.mrb[26].mxu1  ;;  %8007 = vpow2.f32 %v1051_v2  ;;  %v1416_v8 = vmax.f32 %v1414_v14, %v1415_v5 }
 0x3c0   :  { %v1722_v41 = vand.u32 2147483647, %v9335_v51  ;;  %v969_v48 = vpop.f32.mrb[27].mxu1  ;;  %v7996_v9 = vpop.eup %7995  ;;  %v1399_v50 = vmax.f32 %v1397_v42, %v1398_v47  ;;  %v9340_v31 = vadd.f32 %v966_v24, %v735_v43  ;;  %v9342_v45 = vadd.f32 %v7285_v63, %v750_v60 }
 0x3c1   :  { %v1423_v12 = vsub.f32 %v9286_v46, %v1406_v25  ;;  %v1424_v38 = vsub.f32 %v9296_v62, %v1406_v25  ;;  %v1409_v0 = vmax.f32 %v1407_v29, %v1408_v57  ;;  %v7998_v17 = vpop.eup %7997  ;;  %v1417_v35 = vrot.slane %v1416_v8, 2 }
 0x3c2   :  { %v1730_v52 = vsub.f32 0.0, %v1722_v41  ;;  %v1421_v14 = vsub.f32 %v9299_v33, %v1399_v50  ;;  %v1422_v5 = vsub.f32 %v9305_v27, %v1399_v50  ;;  %8009 = vpow2.f32 %v1053_v44  ;;  %v9347_v43 = vpop.eup %7999 }
 0x3c3   :  { %v1433_v32 = vmul.f32 1.442695, %v1423_v12  ;;  %v1435_v2 = vmul.f32 1.442695, %v1424_v38  ;;  %v1418_v46 = vmax.f32 %v1416_v8, %v1417_v35  ;;  %v1410_v1 = vrot.slane %v1409_v0, 2 }
 0x3c4   :  { %v1740_v62 = vmul.f32 1.442695, %v1730_v52  ;;  %v1429_v42 = vmul.f32 1.442695, %v1421_v14  ;;  %v1431_v29 = vmul.f32 1.442695, %v1422_v5  ;;  %v9350_v44 = vadd.f32 %v969_v48, %v740_v10  ;;  %v760_v52 = vpop.permute.xlu1 %759  ;;  %v765_v14 = vpop.permute.xlu0 %764 }
 0x3c5   :  { %8011 = vpow2.f32 %v1433_v32  ;;  %v1720_v25 = vand.u32 2147483647, %v9340_v31  ;;  %v1419_v24 = vrot.slane %v1418_v46, 1  ;;  %v1411_v47 = vmax.f32 %v1409_v0, %v1410_v1  ;;  %v7288_v57 = vpop.f32.mrb[28].mxu1 }
 0x3c6   :  { %8013 = vpow2.f32 %v1435_v2  ;;  %v8002_v63 = vpop.eup %8001  ;;  %v1723_v27 = vand.u32 2147483647, %v9342_v45  ;;  %v982_v8 = vpop.f32.mrb[29].mxu1  ;;  %v7849_v38 = vpack.c.bf16 %v7998_v17, %v7996_v9  ;;  %v9359_v17 = vadd.f32 %v7288_v57, %v765_v14 }
 0x3c7   :  { %8015 = vpow2.f32 %v1429_v42  ;;  %v1728_v33 = vsub.f32 0.0, %v1720_v25  ;;  %v9352_v41 = vpop.eup %8003  ;;  %v1420_v60 = vmax.f32 %v1418_v46, %v1419_v24  ;;  %v1412_v12 = vrot.slane %v1411_v47, 1  ;;  %v7289_v50 = vpop.f32.mrb[30].mxu1 }
 0x3c8   :  { %8017 = vpow2.f32 %v1431_v29  ;;  %v9354_v35 = vpop.eup %8005  ;;  %v1731_v0 = vsub.f32 0.0, %v1723_v27  ;;  %v985_v32 = vpop.f32.mrb[31].mxu1  ;;  %v1721_v42 = vand.u32 2147483647, %v9350_v44  ;;  %7850 = vmatpush3.bf16.msra.mxu0 %v7849_v38  ;;  %v9361_v46 = vadd.f32 %v982_v8, %v755_v40 }
 0x3c9   :  { %8019 = vpow2.f32 %v1740_v62  ;;  %v1736_v1 = vmul.f32 1.442695, %v1728_v33  ;;  %v8008_v2 = vpop.eup %8007  ;;  %v1427_v10 = vsub.f32 %v9312_v11, %v1420_v60  ;;  %v1428_v48 = vsub.f32 %v9324_v19, %v1420_v60 }
 0x3ca   :  { %v1413_v5 = vmax.f32 %v1411_v47, %v1412_v12  ;;  %v1742_v9 = vmul.f32 1.442695, %v1731_v0  ;;  %v12603_v62 = vmov 0.0|0.0   ;;  %v1729_v19 = vsub.f32 0.0, %v1721_v42  ;;  %v770_v12 = vpop.permute.xlu1 %769 }
 0x3cb   :  { %8021 = vpow2.f32 %v1736_v1  ;;  %7851 = vmatprep.subr.bf16.mxu0 %v12603_v62  ;;  %v1441_v29 = vmul.f32 1.442695, %v1427_v10  ;;  %v1443_v25 = vmul.f32 1.442695, %v1428_v48  ;;  %v1726_v47 = vand.u32 2147483647, %v9359_v17 }
 0x3cc   :  { %v1425_v24 = vsub.f32 %v9315_v18, %v1413_v5  ;;  %v1426_v11 = vsub.f32 %v9331_v23, %v1413_v5  ;;  %8023 = vpow2.f32 %v1742_v9  ;;  %v8010_v33 = vpop.eup %8009  ;;  %v1738_v40 = vmul.f32 1.442695, %v1729_v19 }
 0x3cd   :  { %8025 = vpow2.f32 %v1441_v29  ;;  %v1734_v8 = vsub.f32 0.0, %v1726_v47  ;;  %v1724_v38 = vand.u32 2147483647, %v9361_v46  ;;  %v9368_v18 = vadd.f32 %v7289_v50, %v770_v12  ;;  %v9383_v12 = vld [vmem:[%s12460_s2] sm:$0xff] }
 0x3ce   :  { %v1437_v27 = vmul.f32 1.442695, %v1425_v24  ;;  %v1439_v60 = vmul.f32 1.442695, %v1426_v11  ;;  %8027 = vpow2.f32 %v1443_v25  ;;  %v7852_v23 = vpack.c.bf16 %v8002_v63, %v9347_v43 }
 0x3cf   :  { %v8012_v57 = vpop.eup %8011  ;;  %v9371_v0 = vadd.f32 %v985_v32, %v760_v52  ;;  %v1748_v10 = vmul.f32 1.442695, %v1734_v8  ;;  %v1732_v48 = vsub.f32 0.0, %v1724_v38  ;;  %v7855_v5 = vpack.c.bf16 %v8010_v33, %v8008_v2 }
 0x3d0   :  { %v8014_v1 = vpop.eup %8013  ;;  %8029 = vpow2.f32 %v1437_v27  ;;  %v1727_v9 = vand.u32 2147483647, %v9368_v18  ;;  %7853 = vmatpush3.bf16.msra.mxu0 %v7852_v23  ;;  %v7858_v43 = vpack.c.bf16 %v9354_v35, %v9352_v41 }
 0x3d1   :  { %v8016_v14 = vpop.eup %8015  ;;  %8031 = vpow2.f32 %v1439_v60  ;;  %v1744_v25 = vmul.f32 1.442695, %v1732_v48  ;;  %v1725_v50 = vand.u32 2147483647, %v9371_v0  ;;  %7854 = vmatprep.subr.bf16.mxu0 %v12603_v62  ;;  %v7864_v24 = vpack.c.bf16 %v8014_v1, %v8012_v57 }
 0x3d2   :  { %v8018_v42 = vpop.eup %8017  ;;  %8033 = vpow2.f32 %v1738_v40  ;;  %v1735_v52 = vsub.f32 0.0, %v1727_v9  ;;  %v12604_v48 = vmov 0.0  }
 0x3d3   :  { %v8020_v29 = vpop.eup %8019  ;;  %8035 = vpow2.f32 %v1748_v10  ;;  %v7861_v32 = vpack.c.bf16 %v8018_v42, %v8016_v14  ;;  %v1733_v11 = vsub.f32 0.0, %v1725_v50  ;;  %v6500_v4 = vsel %vm12495_vm5, 1.0, %v12604_v48 }
 0x3d4   :  { %v1754_v63 = vadd.f32 1.0, %v8020_v29  ;;  %8037 = vpow2.f32 %v1744_v25  ;;  %v1750_v47 = vmul.f32 1.442695, %v1735_v52  ;;  %7856 = vmatpush3.bf16.msra.mxu0 %v7855_v5  ;;  %v9394_v5 = vld [vmem:[%s12460_s2 + $0x8] sm:$0xff]  ;;  %v1714_v25 = vmax.f32 %v9335_v51, 0.0 }
 0x3d5   :  { %v8022_v2 = vpop.eup %8021  ;;  %7924 = vmatpush3.bf16.msra.mxu1 %v7861_v32  ;;  %v1746_v27 = vmul.f32 1.442695, %v1733_v11  ;;  %7857 = vmatprep.subr.bf16.mxu0 %v12603_v62 }
 0x3d6   :  { %8039 = vlog2.f32 %v1754_v63  ;;  %v1752_v19 = vadd.f32 1.0, %v8022_v2  ;;  %v8024_v33 = vpop.eup %8023  ;;  %7921 = vmatprep.subr.bf16.mxu1 %v12603_v62  ;;  %v9406_v63 = vld [vmem:[%s12460_s2 + $0x10] sm:$0xff] }
 0x3d7   :  { %v8026_v60 = vpop.eup %8025  ;;  %v1755_v41 = vadd.f32 1.0, %v8024_v33 }
 0x3d8   :  { %8041 = vlog2.f32 %v1752_v19  ;;  %v8028_v35 = vpop.eup %8027  ;;  %7859 = vmatpush3.bf16.msra.mxu0 %v7858_v43 }
 0x3d9   :  { %8043 = vpow2.f32 %v1750_v47  ;;  %7925 = vmatpush3.bf16.msra.mxu1 %v7864_v24  ;;  %v7870_v40 = vpack.c.bf16 %v8028_v35, %v8026_v60  ;;  %7860 = vmatprep.subr.bf16.mxu0 %v12603_v62  ;;  %v1715_v47 = vmax.f32 %v9342_v45, 0.0 }
 0x3da   :  { %v8030_v57 = vpop.eup %8029  ;;  %8045 = vlog2.f32 %v1755_v41  ;;  %7922 = vmatprep.subr.bf16.mxu1 %v12603_v62  ;;  %v9421_v41 = vld [vmem:[%s12460_s2 + $0x18] sm:$0xff] }
 0x3db   :  { %v8032_v8 = vpop.eup %8031  ;;  %8047 = vpow2.f32 %v1746_v27  ;;  %7307 = vmatmul.mubr.msk.f32.vlgmr.msra.gmra.mrb[16].mxu0 %vm12494_vm1, %v9383_v12  ;;  %v1712_v27 = vmax.f32 %v9340_v31, 0.0  ;;  %v62_v31 = vld [vmem:[%s12460_s2 + $0x30] sm:$0xff] }
 0x3dc   :  { %v8034_v38 = vpop.eup %8033  ;;  %v7867_v1 = vpack.c.bf16 %v8032_v8, %v8030_v57  ;;  %7862 = vmatpush3.bf16.msra.mxu0 %v7861_v32  ;;  %7309 = vmatprep.mubr.msk.f32.mxu0 %vm12491_vm2, %v12604_v48 }
 0x3dd   :  { %v8036_v23 = vpop.eup %8035  ;;  %v1753_v14 = vadd.f32 1.0, %v8034_v38  ;;  %7863 = vmatprep.subr.bf16.mxu0 %v12603_v62 }
 0x3de   :  { %v1758_v10 = vadd.f32 1.0, %v8036_v23  ;;  %v8038_v42 = vpop.eup %8037  ;;  %7926 = vmatpush3.bf16.msra.mxu1 %v7867_v1  ;;  %v1713_v23 = vmax.f32 %v9350_v44, 0.0  ;;  %v9451_v44 = vld [vmem:[%s12452_s1] sm:$0xff] }
 0x3df   :  { %8049 = vlog2.f32 %v1753_v14  ;;  %v1756_v29 = vadd.f32 1.0, %v8038_v42  ;;  %7923 = vmatprep.subr.bf16.mxu1 %v12603_v62  ;;  %7310 = vmatmul.mubr.msk.f32.gmra.mrb[18].mxu0 %vm12494_vm1, %v9394_v5 }
 0x3e0   :  { %v8040_v9 = vpop.eup %8039  ;;  %8051 = vlog2.f32 %v1758_v10  ;;  %7865 = vmatpush3.bf16.msra.mxu0 %v7864_v24  ;;  %7312 = vmatprep.mubr.msk.f32.mxu0 %vm12491_vm2, %v12604_v48  ;;  %v61_v24 = vld [vmem:[%s12460_s2 + $0x28] sm:$0xff]  ;;  %v9443_v10 = vld [vmem:[%s12460_s2 + $0x20] sm:$0xff] }
 0x3e1   :  { %v1765_v50 = vmul.f32 0.6931472, %v8040_v9  ;;  %8053 = vlog2.f32 %v1756_v29  ;;  %7866 = vmatprep.subr.bf16.mxu0 %v12603_v62 }
 0x3e2   :  { %v8042_v43 = vpop.eup %8041  ;;  %7927 = vmatpush3.bf16.msra.mxu1 %v7870_v40 }
 0x3e3   :  { %v8044_v52 = vpop.eup %8043  ;;  %v1778_v32 = vadd.f32 %v1765_v50, %v1714_v25  ;;  %v1761_v2 = vmul.f32 0.6931472, %v8042_v43  ;;  %7313 = vmatmul.mubr.msk.f32.gmra.mrb[20].mxu0 %vm12494_vm1, %v9406_v63  ;;  %v63_v43 = vld [vmem:[%s12460_s2 + $0x38] sm:$0xff] }
 0x3e4   :  { %v8046_v51 = vpop.eup %8045  ;;  %v1759_v11 = vadd.f32 1.0, %v8044_v52  ;;  %7868 = vmatpush3.bf16.msra.mxu0 %v7867_v1  ;;  %7315 = vmatprep.mubr.msk.f32.mxu0 %vm12491_vm2, %v12604_v48 }
 0x3e5   :  { %v8048_v19 = vpop.eup %8047  ;;  %v1767_v33 = vmul.f32 0.6931472, %v8046_v51  ;;  %v9423_v35 = vadd.f32 0.001, %v1778_v32  ;;  %7869 = vmatprep.subr.bf16.mxu0 %v12603_v62  ;;  %7389 = vmatmul.mubr.msk.f32.vlgmr.msra.gmra.mrb[32].mxu1 %vm12494_vm1, %v61_v24  ;;  %v1776_v57 = vadd.f32 %v1761_v2, %v1712_v27  ;;  %v1718_v32 = vmax.f32 %v9359_v17, 0.0 }
 0x3e6   :  { %8055 = vlog2.f32 %v1759_v11  ;;  %v1757_v60 = vadd.f32 1.0, %v8048_v19  ;;  %7391 = vmatprep.mubr.msk.f32.mxu1 %vm12491_vm2, %v12604_v48  ;;  %v1716_v51 = vmax.f32 %v9361_v46, 0.0  ;;  %v64_v46 = vld [vmem:[%s12460_s2 + $0x40] sm:$0xff] }
 0x3e7   :  { %12605 = vst [vmem:[#allocation84_spill] sm:$0xff] %v9423_v35  ;;  %v1779_v45 = vadd.f32 %v1767_v33, %v1715_v47  ;;  %7316 = vmatmul.mubr.msk.f32.gmra.mrb[22].mxu0 %vm12494_vm1, %v9421_v41  ;;  %v1794_v42 = vrot.slane %v9423_v35, 1  ;;  %v9454_v25 = vadd.f32 0.001, %v1776_v57 }
 0x3e8   :  { %8057 = vlog2.f32 %v1757_v60  ;;  %7871 = vmatpush3.bf16.msra.mxu0 %v7870_v40  ;;  %7318 = vmatprep.mubr.msk.f32.mxu0 %vm12491_vm2, %v12604_v48 }
 0x3e9   :  { %v8050_v8 = vpop.eup %8049  ;;  %v9432_v38 = vadd.f32 0.001, %v1779_v45  ;;  %7392 = vmatmul.mubr.msk.f32.gmra.mrb[34].mxu1 %vm12494_vm1, %v62_v31  ;;  %7424 = vmatprep.subr.mxu0 %v9451_v44  ;;  %v1792_v27 = vrot.slane %v9454_v25, 1  ;;  %v1719_v45 = vmax.f32 %v9368_v18, 0.0 }
 0x3ea   :  { %v8052_v1 = vpop.eup %8051  ;;  %v1763_v14 = vmul.f32 0.6931472, %v8050_v8  ;;  %7394 = vmatprep.mubr.msk.f32.mxu1 %vm12491_vm2, %v12604_v48 }
 0x3eb   :  { %12606 = vst [vmem:[#allocation85_spill] sm:$0xff] %v9432_v38  ;;  %v1795_v9 = vrot.slane %v9432_v38, 1  ;;  %v1773_v29 = vmul.f32 0.6931472, %v8052_v1  ;;  %v8054_v40 = vpop.eup %8053  ;;  %7319 = vmatmul.mubr.msk.f32.gmra.mrb[24].mxu0 %vm12494_vm1, %v9443_v10 }
 0x3ec   :  { %v1777_v50 = vadd.f32 %v1763_v14, %v1713_v23  ;;  %v1769_v2 = vmul.f32 0.6931472, %v8054_v40  ;;  %7321 = vmatprep.mubr.msk.f32.mxu0 %vm12491_vm2, %v12604_v48  ;;  %v1717_v14 = vmax.f32 %v9371_v0, 0.0 }
 0x3ed   :  { %v9463_v52 = vsel %vm12489_vm4, %v1794_v42, %v1795_v9  ;;  %v1782_v19 = vadd.f32 %v1773_v29, %v1718_v32  ;;  %7395 = vmatmul.mubr.msk.f32.gmra.mrb[36].mxu1 %vm12494_vm1, %v63_v43 }
 0x3ee   :  { %12607 = vst [vmem:[#allocation86_spill] sm:$0xff] %v9463_v52  ;;  %v9469_v11 = vadd.f32 0.001, %v1777_v50  ;;  %v1780_v47 = vadd.f32 %v1769_v2, %v1716_v51  ;;  %7397 = vmatprep.mubr.msk.f32.mxu1 %vm12491_vm2, %v12604_v48 }
 0x3ef   :  { %7322 = vmatmul.mubr.msk.f32.gmra.mrb[26].mxu0 %vm12494_vm1, %v61_v24  ;;  %v9496_v29 = vadd.f32 0.001, %v1782_v19 }
 0x3f0   :  { %v8056_v33 = vpop.eup %8055  ;;  %v1793_v17 = vrot.slane %v9469_v11, 1  ;;  %v9481_v60 = vadd.f32 0.001, %v1780_v47  ;;  %7324 = vmatprep.mubr.msk.f32.mxu0 %vm12491_vm2, %v12604_v48 }
 0x3f1   :  { %v1775_v57 = vmul.f32 0.6931472, %v8056_v33  ;;  %7398 = vmatmul.mubr.msk.f32.gmra.mrb[38].mxu1 %vm12494_vm1, %v64_v46  ;;  %v1798_v51 = vrot.slane %v9496_v29, 1 }
 0x3f2   :  { %12608 = vst [vmem:[#allocation87_spill] sm:$0xff] %v9481_v60  ;;  %v8058_v8 = vpop.eup %8057  ;;  %v9487_v1 = vsel %vm12489_vm4, %v1793_v17, %v1794_v42  ;;  %v9491_v23 = vsel %vm12489_vm4, %v1792_v27, %v1793_v17  ;;  %v1796_v18 = vrot.slane %v9481_v60, 1  ;;  %7400 = vmatprep.mubr.msk.f32.mxu1 %vm12491_vm2, %v12604_v48  ;;  %v65_v42 = vld [vmem:[%s12460_s2 + $0x48] sm:$0xff] }
 0x3f3   :  { %v1783_v40 = vadd.f32 %v1775_v57, %v1719_v45  ;;  %v1771_v24 = vmul.f32 0.6931472, %v8058_v8  ;;  %7325 = vmatmul.mubr.msk.f32.gmra.mrb[28].mxu0 %vm12494_vm1, %v62_v31  ;;  %v70_v57 = vld [vmem:[%s12460_s2 + $0x70] sm:$0xff]  ;;  %v71_v8 = vld [vmem:[%s12460_s2 + $0x78] sm:$0xff] }
 0x3f4   :  { %v9507_v0 = vsel %vm12489_vm4, %v1795_v9, %v1796_v18  ;;  %7327 = vmatprep.mubr.msk.f32.mxu0 %vm12491_vm2, %v12604_v48  ;;  %v66_v9 = vld [vmem:[%s12460_s2 + $0x50] sm:$0xff] }
 0x3f5   :  { %12609 = vst [vmem:[#allocation88_spill] sm:$0xff] %v9507_v0  ;;  %v9509_v50 = vadd.f32 0.001, %v1783_v40  ;;  %v1781_v32 = vadd.f32 %v1771_v24, %v1717_v14  ;;  %7401 = vmatmul.mubr.msk.f32.gmra.mrb[40].mxu1 %vm12494_vm1, %v65_v42  ;;  %v72_v14 = vld [vmem:[%s12460_s2 + $0x80] sm:$0xff]  ;;  %v6590_v40 = vld [vmem:[%s12453_s3 + $0x78] sm:$0xff] }
 0x3f6   :  { %7403 = vmatprep.mubr.msk.f32.mxu1 %vm12491_vm2, %v12604_v48 }
 0x3f7   :  { %v1799_v2 = vrot.slane %v9509_v50, 1  ;;  %v9516_v19 = vadd.f32 0.001, %v1781_v32  ;;  %7328 = vmatmul.mubr.msk.f32.gmra.mrb[30].mxu0 %vm12494_vm1, %v63_v43  ;;  %v67_v43 = vld [vmem:[%s12460_s2 + $0x58] sm:$0xff] }
 0x3f8   :  { %7330 = vmatprep.mubr.msk.f32.mxu0 %vm12491_vm2, %v12604_v48 }
 0x3f9   :  { %12610 = vst [vmem:[#allocation89_spill] sm:$0xff] %v9516_v19  ;;  %v9526_v31 = vsel %vm12489_vm4, %v1798_v51, %v1799_v2  ;;  %v9530_v47 = vsel %vm12489_vm4, %v1799_v2, %v1792_v27  ;;  %v1797_v33 = vrot.slane %v9516_v19, 1  ;;  %7404 = vmatmul.mubr.msk.f32.gmra.mrb[42].mxu1 %vm12494_vm1, %v66_v9  ;;  %v68_v27 = vld [vmem:[%s12460_s2 + $0x60] sm:$0xff] }
 0x3fa   :  { %7406 = vmatprep.mubr.msk.f32.mxu1 %vm12491_vm2, %v12604_v48 }
 0x3fb   :  { %v9538_v17 = vsel %vm12489_vm4, %v1797_v33, %v1798_v51  ;;  %v9542_v45 = vsel %vm12489_vm4, %v1796_v18, %v1797_v33  ;;  %7331 = vmatmul.mubr.msk.f32.gmra.mrb[32].mxu0 %vm12494_vm1, %v64_v46  ;;  %v69_v46 = vld [vmem:[%s12460_s2 + $0x68] sm:$0xff]  ;;  %v6589_v18 = vld [vmem:[%s12453_s3 + $0x70] sm:$0xff] }
 0x3fc   :  { %12611 = vst [vmem:[#allocation90_spill] sm:$0xff] %v9538_v17  ;;  %12612 = vst [vmem:[#allocation91_spill] sm:$0xff] %v9542_v45  ;;  %7333 = vmatprep.mubr.msk.f32.mxu0 %vm12491_vm2, %v12604_v48  ;;  %v9743_v17 = vmul.f32 1e-06, %v6500_v4 }
 0x3fd   :  { %7407 = vmatmul.mubr.msk.f32.gmra.mrb[44].mxu1 %vm12494_vm1, %v67_v43 }
 0x3fe   :  { %7409 = vmatprep.mubr.msk.f32.mxu1 %vm12491_vm2, %v12604_v48  ;;  %12620 = vst [vmem:[#allocation99_spill] sm:$0xff] %v9743_v17 }
 0x3ff   :  { %7334 = vmatmul.mubr.msk.f32.gmra.mrb[34].mxu0 %vm12494_vm1, %v65_v42 }
 0x400   :  { %7336 = vmatprep.mubr.msk.f32.mxu0 %vm12491_vm2, %v12604_v48 }
 0x401   :  { %7410 = vmatmul.mubr.msk.f32.gmra.mrb[46].mxu1 %vm12494_vm1, %v68_v27 }
 0x402   :  { %7412 = vmatprep.mubr.msk.f32.mxu1 %vm12491_vm2, %v12604_v48 }
 0x403   :  { %7337 = vmatmul.mubr.msk.f32.gmra.mrb[36].mxu0 %vm12494_vm1, %v66_v9 }
 0x404   :  { %7339 = vmatprep.mubr.msk.f32.mxu0 %vm12491_vm2, %v12604_v48 }
 0x405   :  { %7413 = vmatmul.mubr.msk.f32.gmra.mrb[48].mxu1 %vm12494_vm1, %v69_v46 }
 0x406   :  { %7415 = vmatprep.mubr.msk.f32.mxu1 %vm12491_vm2, %v12604_v48 }
 0x407   :  { %7340 = vmatmul.mubr.msk.f32.gmra.mrb[38].mxu0 %vm12494_vm1, %v67_v43 }
 0x408   :  { %7342 = vmatprep.mubr.msk.f32.mxu0 %vm12491_vm2, %v12604_v48 }
 0x409   :  { %7416 = vmatmul.mubr.msk.f32.gmra.mrb[50].mxu1 %vm12494_vm1, %v70_v57 }
 0x40a   :  { %7418 = vmatprep.mubr.msk.f32.mxu1 %vm12491_vm2, %v12604_v48 }
 0x40b   :  { %7343 = vmatmul.mubr.msk.f32.gmra.mrb[40].mxu0 %vm12494_vm1, %v68_v27 }
 0x40c   :  { %7345 = vmatprep.mubr.msk.f32.mxu0 %vm12491_vm2, %v12604_v48 }
 0x40d   :  { %7419 = vmatmul.mubr.msk.f32.gmra.mrb[52].mxu1 %vm12494_vm1, %v71_v8 }
 0x40e   :  { %7421 = vmatprep.mubr.msk.f32.mxu1 %vm12491_vm2, %v12604_v48 }
 0x40f   :  { %7346 = vmatmul.mubr.msk.f32.gmra.mrb[42].mxu0 %vm12494_vm1, %v69_v46 }
 0x410   :  { %7348 = vmatprep.mubr.msk.f32.mxu0 %vm12491_vm2, %v12604_v48 }
 0x411   :  { %7422 = vmatmul.mubr.msk.f32.gmra.mrb[54].mxu1 %vm12494_vm1, %v72_v14 }
 0x413   :  { %7349 = vmatmul.mubr.msk.f32.gmra.mrb[44].mxu0 %vm12494_vm1, %v70_v57 }
 0x414   :  { %7351 = vmatprep.mubr.msk.f32.mxu0 %vm12491_vm2, %v12604_v48 }
 0x417   :  { %7352 = vmatmul.mubr.msk.f32.gmra.mrb[46].mxu0 %vm12494_vm1, %v71_v8 }
 0x418   :  { %7354 = vmatprep.mubr.msk.f32.mxu0 %vm12491_vm2, %v12604_v48 }
 0x41b   :  { %7355 = vmatmul.mubr.msk.f32.gmra.mrb[48].mxu0 %vm12494_vm1, %v72_v14 }
 0x41c   :  { %7373 = vmatprep.mubr.msk.f32.mxu0 %vm12491_vm2, %v12604_v48 }
 0x41f   :  { %7374 = vmatmul.mubr.msk.f32.vlgmr.msra.gmra.mrb[50].mxu0 %vm12494_vm1, %v9383_v12  ;;  %v6583_v12 = vld [vmem:[%s12453_s3 + $0x40] sm:$0xff] }
 0x420   :  { %7376 = vmatprep.mubr.msk.f32.mxu0 %vm12491_vm2, %v12604_v48  ;;  %7425 = vmatpush3.msra.mxu0 %v9451_v44  ;;  %v6588_v44 = vld [vmem:[%s12453_s3 + $0x68] sm:$0xff] }
 0x423   :  { %7377 = vmatmul.mubr.msk.f32.gmra.mrb[52].mxu0 %vm12494_vm1, %v9394_v5  ;;  %v6584_v5 = vld [vmem:[%s12453_s3 + $0x48] sm:$0xff] }
 0x424   :  { %7379 = vmatprep.mubr.msk.f32.mxu0 %vm12491_vm2, %v12604_v48 }
 0x427   :  { %7380 = vmatmul.mubr.msk.f32.gmra.mrb[54].mxu0 %vm12494_vm1, %v9406_v63  ;;  %v6585_v63 = vld [vmem:[%s12453_s3 + $0x50] sm:$0xff] }
 0x428   :  { %7382 = vmatprep.mubr.msk.f32.mxu0 %vm12491_vm2, %v12604_v48 }
 0x42b   :  { %7383 = vmatmul.mubr.msk.f32.gmra.mrb[56].mxu0 %vm12494_vm1, %v9421_v41  ;;  %v6586_v41 = vld [vmem:[%s12453_s3 + $0x58] sm:$0xff] }
 0x42c   :  { %7385 = vmatprep.mubr.msk.f32.mxu0 %vm12491_vm2, %v12604_v48 }
 0x42f   :  { %7386 = vmatmul.mubr.msk.f32.gmra.mrb[58].mxu0 %vm12494_vm1, %v9443_v10  ;;  %v6587_v10 = vld [vmem:[%s12453_s3 + $0x60] sm:$0xff] }
 0x430   :  { %7426 = vmatprep.mubr.msk.f32.mxu0 %vm131_vm0, %v6583_v12 }
 0x433   :  { %7427 = vmatmul.mubr.msk.f32.vlgmr.msra.gmra.mrb[60].mxu0 %vm131_vm0, %v6584_v5 }
 0x434   :  { %7429 = vmatprep.mubr.msk.f32.mxu0 %vm131_vm0, %v6585_v63 }
 0x437   :  { %7430 = vmatmul.mubr.msk.f32.gmra.mrb[62].mxu0 %vm131_vm0, %v6586_v41 }
 0x438   :  { %7432 = vmatprep.mubr.msk.f32.mxu0 %vm131_vm0, %v6587_v10 }
 0x43b   :  { %7433 = vmatmul.mubr.msk.f32.gmra.mrb[64].mxu0 %vm131_vm0, %v6588_v44 }
 0x43c   :  { %7435 = vmatprep.mubr.msk.f32.mxu0 %vm131_vm0, %v6589_v18 }
 0x43f   :  { %7436 = vmatmul.mubr.msk.f32.gmra.mrb[66].mxu0 %vm131_vm0, %v6590_v40 }
 0x4ae   :  { %v9659_v24 = vpop.f32.mrb[16].mxu0 }
 0x4af   :  { %v7308_v42 = vpop.f32.mrb[17].mxu0 }
 0x4b2   :  { %v9661_v32 = vpop.f32.mrb[18].mxu0 }
 0x4b3   :  { %v7311_v51 = vpop.f32.mrb[19].mxu0 }
 0x4b6   :  { %v9663_v2 = vpop.f32.mrb[20].mxu0 }
 0x4b7   :  { %v7314_v9 = vpop.f32.mrb[21].mxu0 }
 0x4b8   :  { %v9665_v33 = vpop.f32.mrb[32].mxu1 }
 0x4b9   :  { %v7390_v43 = vpop.f32.mrb[33].mxu1  ;;  %v9762_v4 = vmul.f32 0.99, %v9665_v33 }
 0x4ba   :  { %v9667_v27 = vpop.f32.mrb[22].mxu0 }
 0x4bb   :  { %v7317_v46 = vpop.f32.mrb[23].mxu0 }
 0x4bc   :  { %v9669_v57 = vpop.f32.mrb[34].mxu1 }
 0x4bd   :  { %v7393_v8 = vpop.f32.mrb[35].mxu1 }
 0x4be   :  { %v9671_v14 = vpop.f32.mrb[24].mxu0 }
 0x4bf   :  { %v7320_v12 = vpop.f32.mrb[25].mxu0 }
 0x4c0   :  { %v9673_v5 = vpop.f32.mrb[36].mxu1 }
 0x4c1   :  { %v7396_v63 = vpop.f32.mrb[37].mxu1 }
 0x4c2   :  { %v9675_v41 = vpop.f32.mrb[26].mxu0 }
 0x4c3   :  { %v7323_v10 = vpop.f32.mrb[27].mxu0 }
 0x4c4   :  { %v9677_v44 = vpop.f32.mrb[38].mxu1 }
 0x4c5   :  { %v7399_v18 = vpop.f32.mrb[39].mxu1 }
 0x4c6   :  { %v9679_v40 = vpop.f32.mrb[28].mxu0 }
 0x4c7   :  { %v7326_v42 = vpop.f32.mrb[29].mxu0 }
 0x4c8   :  { %v9681_v51 = vpop.f32.mrb[40].mxu1  ;;  %v74_v42 = vld [vmem:[%s12461_s0] sm:$0xf] }
 0x4c9   :  { %v7402_v9 = vpop.f32.mrb[41].mxu1  ;;  %v1809_v28 = vmax.f32 %v74_v42, 0.0 }
 0x4ca   :  { %v9683_v43 = vpop.f32.mrb[30].mxu0  ;;  %v8371_v9 = vmov 1966171168  }
 0x4cb   :  { %v7329_v46 = vpop.f32.mrb[31].mxu0  ;;  %v1810_v20 = vmin.f32 %v1809_v28, 1.0 }
 0x4cc   :  { %v9685_v8 = vpop.f32.mrb[42].mxu1  ;;  %v1262_v46 = vunpack.c.l.s4 %v8371_v9 }
 0x4cd   :  { %v7405_v12 = vpop.f32.mrb[43].mxu1  ;;  %v1682_v45 = vmul.f32 0.99, %v9685_v8 }
 0x4ce   :  { %v9687_v37 = vpop.f32.mrb[32].mxu0  ;;  %v1263_v62 = vunpack.c.0.s8 %v1262_v46  ;;  %v42_v46 = vcvt.s32.f32 %v9229_v49 }
 0x4cf   :  { %v7332_v63 = vpop.f32.mrb[33].mxu0 }
 0x4d0   :  { %v9689_v30 = vpop.f32.mrb[44].mxu1  ;;  %v9707_v16 = vsub.s32 %v1263_v62, %v9229_v49  ;;  %v1297_v62 = vadd.f32 1.0, %v42_v46  ;;  %v9729_v39 = vmul.f32 0.001, %v42_v46 }
 0x4d1   :  { %v7408_v10 = vpop.f32.mrb[45].mxu1 }
 0x4d2   :  { %v9691_v34 = vpop.f32.mrb[34].mxu0  ;;  %12613 = vst [vmem:[#allocation92_spill] sm:$0xff] %v9707_v16  ;;  %12615 = vst [vmem:[#allocation94_spill] sm:$0xff] %v9729_v39 }
 0x4d3   :  { %v7335_v18 = vpop.f32.mrb[35].mxu0 }
 0x4d4   :  { %v9693_v22 = vpop.f32.mrb[46].mxu1 }
 0x4d5   :  { %v7411_v26 = vpop.f32.mrb[47].mxu1  ;;  %v1684_v8 = vmul.f32 0.99, %v9693_v22 }
 0x4d6   :  { %v9698_v21 = vpop.f32.mrb[36].mxu0 }
 0x4d7   :  { %v7338_v12 = vpop.f32.mrb[37].mxu0 }
 0x4d8   :  { %v9700_v63 = vpop.f32.mrb[48].mxu1  ;;  %v1818_v12 = vrot.slane %v1810_v20, %v9707_v16 }
 0x4d9   :  { %v7414_v10 = vpop.f32.mrb[49].mxu1 }
 0x4da   :  { %v9702_v15 = vpop.f32.mrb[38].mxu0  ;;  %v1819_v3 = vcombine.high %v1818_v12, %v1818_v12 }
 0x4db   :  { %v7341_v18 = vpop.f32.mrb[39].mxu0  ;;  %v9828_v22 = vmul.f32 0.99, %v9702_v15 }
 0x4dc   :  { %v9704_v13 = vpop.f32.mrb[50].mxu1 }
 0x4dd   :  { %v7417_v55 = vpop.f32.mrb[51].mxu1  ;;  %12627 = vst [vmem:[#allocation106_spill] sm:$0xff] %v9828_v22 }
 0x4de   :  { %v9709_v9 = vpop.f32.mrb[40].mxu0 }
 0x4df   :  { %v7344_v26 = vpop.f32.mrb[41].mxu0 }
 0x4e0   :  { %v9712_v42 = vpop.f32.mrb[52].mxu1 }
 0x4e1   :  { %v7420_v10 = vpop.f32.mrb[53].mxu1 }
 0x4e2   :  { %v9716_v18 = vpop.f32.mrb[42].mxu0 }
 0x4e3   :  { %v7347_v28 = vpop.f32.mrb[43].mxu0 }
 0x4e4   :  { %v1591_v59 = vpop.f32.mrb[54].mxu1  ;;  %v9727_v28 = vrot.slane %v1819_v3, %v9707_v16  ;;  %v9746_v3 = vrot.slane %v1818_v12, %v9707_v16  ;;  %v1638_v12 = vmul.f32 0.99, %v9669_v57  ;;  %v1680_v57 = vmul.f32 0.99, %v9677_v44 }
 0x4e5   :  { %v1602_v55 = vrot.slane %v1591_v59, %v9707_v16  ;;  %v7423_v36 = vpop.f32.mrb[55].mxu1  ;;  %v9731_v59 = vmul.f32 0.001, %v43_v7  ;;  %v9749_v7 = vmul.f32 0.99, %v9659_v24 }
 0x4e6   :  { %v9719_v26 = vpop.f32.mrb[44].mxu0  ;;  %12614 = vst [vmem:[#allocation93_spill] sm:$0xff] %v9727_v28  ;;  %v9733_v36 = vmul.f32 0.001, %v1297_v62  ;;  %12621 = vst [vmem:[#allocation100_spill] sm:$0xff] %v9746_v3  ;;  %v9782_v33 = vcombine.high %v9746_v3, %v9746_v3 }
 0x4e7   :  { %v7350_v20 = vpop.f32.mrb[45].mxu0  ;;  %v1603_v6 = vcombine.high %v1602_v55, %v1602_v55  ;;  %v1610_v10 = vrot.slane %v1602_v55, %v9707_v16  ;;  %12616 = vst [vmem:[#allocation95_spill] sm:$0xff] %v9731_v59  ;;  %v9739_v55 = vsub.s32 0, %v9229_v49  ;;  %v9756_v62 = vmul.f32 0.99, %v9661_v32 }
 0x4e8   :  { %12617 = vst [vmem:[#allocation96_spill] sm:$0xff] %v9733_v36  ;;  %v9736_v20 = vmul.f32 0.001, %v1298_v58  ;;  %v9753_v58 = vcombine.high %v9727_v28, %v9727_v28  ;;  %v9765_v24 = vmul.f32 0.99, %v9667_v27  ;;  %12625 = vst [vmem:[#allocation104_spill] sm:$0xff] %v9782_v33 }
 0x4e9   :  { %v1617_v61 = vrot.slane %v1603_v6, %v9707_v16  ;;  %v1618_v54 = vcombine.high %v1610_v10, %v1610_v10  ;;  %8059 = vrcp.f32 %v1610_v10  ;;  %12619 = vst [vmem:[#allocation98_spill] sm:$0xff] %v9739_v55  ;;  %v9759_v10 = vmul.f32 0.99, %v9663_v2 }
 0x4ea   :  { %12618 = vst [vmem:[#allocation97_spill] sm:$0xff] %v9736_v20  ;;  %v9741_v53 = vpop.f32.mrb[46].mxu0  ;;  %12622 = vst [vmem:[#allocation101_spill] sm:$0xff] %v9753_v58  ;;  %v1639_v32 = vmul.f32 0.99, %v9673_v5  ;;  %v9778_v2 = vsel %vm12490_vm3, 1.0, %v12604_v48  ;;  %v9791_v5 = vrot.slane %v9746_v3, %v9739_v55  ;;  %v9816_v0 = vrot.slane %v9727_v28, %v9739_v55 }
 0x4eb   :  { %v1619_v46 = vcombine.high %v1617_v61, %v1617_v61  ;;  %8061 = vrcp.f32 %v1617_v61  ;;  %v7353_v6 = vpop.f32.mrb[47].mxu0  ;;  %v9768_v61 = vmul.f32 0.99, %v9671_v14  ;;  %12624 = vst [vmem:[#allocation103_spill] sm:$0xff] %v9778_v2  ;;  %v9785_v27 = vmul.f32 0.99, %v9679_v40 }
 0x4ec   :  { %8063 = vrcp.f32 %v1618_v54  ;;  %v9772_v6 = vmul.f32 0.99, %v9675_v41  ;;  %v1681_v49 = vmul.f32 0.99, %v9681_v51  ;;  %v9800_v40 = vrot.slane %v9753_v58, %v9739_v55 }
 0x4ed   :  { %12623 = vst [vmem:[#allocation102_spill] sm:$0xff] %v9768_v61  ;;  %8065 = vrcp.f32 %v1619_v46  ;;  %v9794_v46 = vmul.f32 0.99, %v9683_v43  ;;  %v9803_v44 = vmul.f32 0.99, %v9687_v37  ;;  %v7955_v43 = vld [vmem:[%s12457_s5 + $0x20] sm:$0xff]  }
 0x4ee   :  { %v1256_v54 = vpop.f32.mrb[48].mxu0  ;;  %v9811_v51 = vmul.f32 0.99, %v9691_v34  ;;  %7446 = vmatprep.mubr.msk.bf16.mxu0 %vm12494_vm1, %v7955_v43  ;;  %v1685_v28 = vmul.f32 0.99, %v9700_v63 }
 0x4ef   :  { %v1267_v14 = vrot.slane %v1256_v54, %v9707_v16  ;;  %v7356_v41 = vpop.f32.mrb[49].mxu0  ;;  %v1683_v54 = vmul.f32 0.99, %v9689_v30  ;;  %v9820_v30 = vrot.slane %v9782_v33, %v9739_v55  ;;  %v1686_v58 = vmul.f32 0.99, %v9704_v13 }
 0x4f0   :  { %v9839_v13 = vmul.f32 0.99, %v9709_v9  ;;  %v1358_v9 = vmul.f32 0.99, %v9741_v53 }
 0x4f1   :  { %v1268_v41 = vcombine.high %v1267_v14, %v1267_v14  ;;  %v1275_v19 = vrot.slane %v1267_v14, %v9707_v16  ;;  %12626 = vst [vmem:[#allocation105_spill] sm:$0xff] %v9820_v30  ;;  %v9823_v14 = vmul.f32 0.99, %v9698_v21  ;;  %v1687_v21 = vmul.f32 0.99, %v9712_v42 }
 0x4f2   :  { %v1511_v60 = vpop.f32.mrb[50].mxu0  ;;  %12629 = vst [vmem:[#allocation108_spill] sm:$0xff] %v9839_v13  ;;  %v1357_v42 = vmul.f32 0.99, %v9719_v26 }
 0x4f3   :  { %v8060_v37 = vpop.eup %8059  ;;  %v1282_v38 = vrot.slane %v1268_v41, %v9707_v16  ;;  %v1283_v3 = vcombine.high %v1275_v19, %v1275_v19  ;;  %8067 = vrcp.f32 %v1275_v19  ;;  %v7375_v34 = vpop.f32.mrb[51].mxu0  ;;  %v1632_v61 = vmul.f32 0.99, %v1511_v60 }
 0x4f4   :  { %v1647_v33 = vrot.slane %v8060_v37, %v9739_v55 }
 0x4f5   :  { %v8062_v30 = vpop.eup %8061  ;;  %v1284_v52 = vcombine.high %v1282_v38, %v1282_v38  ;;  %8069 = vrcp.f32 %v1282_v38  ;;  %v1356_v38 = vmul.f32 0.99, %v9716_v18 }
 0x4f6   :  { %v8064_v41 = vpop.eup %8063  ;;  %8071 = vrcp.f32 %v1283_v3  ;;  %v1664_v19 = vmul.f32 %v1647_v33, %v1632_v61  ;;  %v1688_v34 = vmul.f32 %v1680_v57, %v1647_v33  ;;  %v1689_v43 = vmul.f32 %v1681_v49, %v1647_v33  ;;  %v1516_v16 = vpop.f32.mrb[52].mxu0 }
 0x4f7   :  { %v8066_v15 = vpop.eup %8065  ;;  %8073 = vrcp.f32 %v1284_v52  ;;  %v1633_v35 = vmul.f32 0.99, %v1516_v16  ;;  %v7378_v63 = vpop.f32.mrb[53].mxu0  ;;  %v1651_v60 = vrot.slane %v8062_v30, %v9739_v55  ;;  %v9836_v37 = vrot.slane %v8064_v41, %v9739_v55 }
 0x4f8   :  { %v1659_v3 = vrot.slane %v8066_v15, %v9739_v55  ;;  %v9848_v13 = vadd.f32 %v1664_v19, %v9733_v36 }
 0x4f9   :  { %12628 = vst [vmem:[#allocation107_spill] sm:$0xff] %v9836_v37  ;;  %v1665_v49 = vmul.f32 %v1647_v33, %v1633_v35  ;;  %v1690_v61 = vmul.f32 %v1682_v45, %v1651_v60  ;;  %v1691_v57 = vmul.f32 %v1683_v54, %v1651_v60  ;;  %v1669_v16 = vmul.f32 %v9836_v37, %v9762_v4 }
 0x4fa   :  { %v1670_v52 = vmul.f32 %v1659_v3, %v1638_v12  ;;  %v1671_v30 = vmul.f32 %v1659_v3, %v1639_v32  ;;  %v1694_v63 = vmul.f32 %v1686_v58, %v1659_v3  ;;  %v1695_v41 = vmul.f32 %v1687_v21, %v1659_v3  ;;  %v1521_v22 = vpop.f32.mrb[54].mxu0 }
 0x4fb   :  { %v1673_v18 = vadd.f32 %v1665_v49, %v9736_v20  ;;  %v1634_v26 = vmul.f32 0.99, %v1521_v22  ;;  %v7381_v15 = vpop.f32.mrb[55].mxu0  ;;  %v9853_v45 = vadd.f32 %v1688_v34, %v9729_v39  ;;  %v9856_v4 = vadd.f32 %v1689_v43, %v9731_v59 }
 0x4fc   :  { %v1679_v35 = vadd.f32 %v1671_v30, %v9736_v20  ;;  %v9859_v58 = vadd.f32 %v1690_v61, %v9729_v39  ;;  %v9862_v53 = vadd.f32 %v1670_v52, %v9733_v36  ;;  %v9865_v33 = vadd.f32 %v1691_v57, %v9731_v59 }
 0x4fd   :  { %v8068_v12 = vpop.eup %8067  ;;  %v1666_v32 = vmul.f32 %v1651_v60, %v1634_v26  ;;  %v1692_v54 = vmul.f32 %v1684_v8, %v9836_v37  ;;  %v9869_v22 = vadd.f32 %v1694_v63, %v9729_v39  ;;  %v9872_v21 = vadd.f32 %v1695_v41, %v9731_v59 }
 0x4fe   :  { %v1316_v19 = vrot.slane %v8068_v12, %v9739_v55  ;;  %v1526_v34 = vpop.f32.mrb[56].mxu0  ;;  %v9876_v43 = vmul.f32 %v1685_v28, %v9836_v37  ;;  %v9880_v49 = vsel %vm12495_vm5, 1.0, %v1679_v35  ;;  %v9884_v8 = vsel %vm12495_vm5, 1.0, %v1673_v18 }
 0x4ff   :  { %v8070_v3 = vpop.eup %8069  ;;  %v1635_v61 = vmul.f32 0.99, %v1526_v34  ;;  %v7384_v57 = vpop.f32.mrb[57].mxu0  ;;  %v1677_v52 = vadd.f32 %v1669_v16, %v9736_v20  ;;  %v9898_v12 = vadd.f32 %v1666_v32, %v9733_v36 }
 0x500   :  { %v8072_v30 = vpop.eup %8071  ;;  %v9888_v63 = vrot.slane %v8070_v3, %v9739_v55  ;;  %v1334_v28 = vmul.f32 %v1316_v19, %v9756_v62  ;;  %v1333_v41 = vmul.f32 %v1316_v19, %v9749_v7  ;;  %v1359_v26 = vmul.f32 %v9803_v44, %v1316_v19 }
 0x501   :  { %v8074_v15 = vpop.eup %8073  ;;  %v9894_v35 = vrot.slane %v8072_v30, %v9739_v55  ;;  %v1360_v18 = vmul.f32 %v9811_v51, %v1316_v19  ;;  %v9900_v16 = vmul.f32 %v1651_v60, %v1635_v61 }
 0x502   :  { %v1328_v34 = vrot.slane %v8074_v15, %v9739_v55  ;;  %v1341_v3 = vadd.f32 %v1333_v41, %v9733_v36  ;;  %v1367_v62 = vadd.f32 %v1359_v26, %v9729_v39  ;;  %v1342_v7 = vadd.f32 %v1334_v28, %v9736_v20  ;;  %v9906_v44 = vpop.f32.mrb[58].mxu0 }
 0x503   :  { %12630 = vst [vmem:[#allocation109_spill] sm:$0xff] %v9906_v44  ;;  %v9910_v57 = vmul.f32 %v9894_v35, %v9772_v6  ;;  %v9913_v51 = vmul.f32 %v1356_v38, %v9894_v35  ;;  %v9916_v60 = vadd.f32 %v1360_v18, %v9731_v59  ;;  %v1335_v32 = vmul.f32 %v9888_v63, %v9759_v10  ;;  %v7387_v19 = vpop.f32.mrb[59].mxu0 }
 0x504   :  { %v1339_v61 = vmul.f32 %v1328_v34, %v9785_v27  ;;  %v1340_v30 = vmul.f32 %v1328_v34, %v9794_v46  ;;  %v1365_v28 = vmul.f32 %v1357_v42, %v1328_v34  ;;  %v1366_v41 = vmul.f32 %v1358_v9, %v1328_v34 }
 0x505   :  { %vm1860_vm6 = vcmp.ge.f32.partialorder %v9791_v5, %v1367_v62  ;;  %vm1878_vm7 = vcmp.lt.f32.partialorder %v9791_v5, %v1341_v3  ;;  %v1378_v6 = vsel %vm12495_vm5, 1.0, %v1342_v7  ;;  %v9927_v38 = vadd.f32 %v1692_v54, %v9729_v39 }
 0x506   :  { %v1347_v26 = vadd.f32 %v1339_v61, %v9733_v36  ;;  %v1348_v10 = vadd.f32 %v1340_v30, %v9736_v20  ;;  %v1373_v27 = vadd.f32 %v1365_v28, %v9729_v39  ;;  %v1374_v46 = vadd.f32 %v1366_v41, %v9731_v59  ;;  %vm1886_vm8 = vmand %vm1860_vm6, %vm1878_vm7  ;;  %v9933_v42 = vpop.f32.mrb[60].mxu0 }
 0x507   :  { %12631 = vst [vmem:[#allocation110_spill] sm:$0xff] %v9927_v38  ;;  %12632 = vst [vmem:[#allocation111_spill] sm:$0xff] %v9933_v42  ;;  %v1894_v9 = vsel %vm1886_vm8, 1.0, %v12604_v48  ;;  %vm1861_vm9 = vcmp.ge.f32.partialorder %v9791_v5, %v9916_v60  ;;  %v1871_v15 = vadd.f32 %v9743_v17, %v1378_v6  ;;  %v9941_v54 = vsel %vm12495_vm5, 1.0, %v1677_v52  ;;  %v9943_v18 = vpop.f32.mrb[61].mxu0 }
 0x508   :  { %12633 = vst [vmem:[#allocation112_spill] sm:$0xff] %v9941_v54  ;;  %12634 = vst [vmem:[#allocation113_spill] sm:$0xff] %v9943_v18  ;;  %v1384_v34 = vsel %vm12495_vm5, 1.0, %v1348_v10  ;;  %vm1866_vm10 = vcmp.ge.f32.partialorder %v9800_v40, %v1373_v27  ;;  %vm1867_vm11 = vcmp.ge.f32.partialorder %v9800_v40, %v1374_v46  ;;  %vm1884_vm12 = vcmp.lt.f32.partialorder %v9800_v40, %v1347_v26 }
 0x509   :  { %v1877_v7 = vadd.f32 %v9743_v17, %v1384_v34  ;;  %vm1892_vm13 = vmand %vm1866_vm10, %vm1884_vm12  ;;  %v1902_v19 = vmul.f32 %v1894_v9, %v1367_v62  ;;  %v1938_v61 = vmul.f32 %v1894_v9, %v1341_v3  ;;  %v9952_v30 = vmul.f32 %v1894_v9, %v9853_v45 }
 0x50a   :  { %v1900_v52 = vsel %vm1892_vm13, 1.0, %v12604_v48  ;;  %v9956_v28 = vmul.f32 %v1894_v9, %v9848_v13  ;;  %v9959_v41 = vmul.f32 %v1894_v9, %v9454_v25  ;;  %v9962_v10 = vmul.f32 %v1894_v9, %v9491_v23  ;;  %v9964_v55 = vpop.f32.mrb[62].mxu0 }
 0x50b   :  { %12635 = vst [vmem:[#allocation114_spill] sm:$0xff] %v9964_v55  ;;  %vm1885_vm14 = vcmp.lt.f32.partialorder %v9800_v40, %v1877_v7  ;;  %v1908_v62 = vmul.f32 %v1900_v52, %v1373_v27  ;;  %v1944_v3 = vmul.f32 %v1900_v52, %v1347_v26  ;;  %v1980_v45 = vmul.f32 %v1900_v52, %v9869_v22  ;;  %v9968_v18 = vpop.f32.mrb[63].mxu0 }
 0x50c   :  { %12636 = vst [vmem:[#allocation115_spill] sm:$0xff] %v9968_v18  ;;  %vm1893_vm15 = vmand %vm1867_vm11, %vm1885_vm14  ;;  %v2016_v13 = vmul.f32 %v1900_v52, %v9862_v53  ;;  %v2052_v25 = vmul.f32 %v1900_v52, %v9496_v29  ;;  %v2088_v23 = vmul.f32 %v1900_v52, %v9526_v31  ;;  %vm1879_vm6 = vcmp.lt.f32.partialorder %v9791_v5, %v1871_v15 }
 0x50d   :  { %v1901_v9 = vsel %vm1893_vm15, %v9778_v2, 0.0  ;;  %vm1887_vm7 = vmand %vm1861_vm9, %vm1879_vm6  ;;  %v9982_v22 = vmul.f32 %v9823_v14, %v9888_v63  ;;  %v9986_v40 = vmul.f32 %v9888_v63, %v9765_v24  ;;  %v9990_v29 = vadd.f32 %v9876_v43, %v9731_v59 }
 0x50e   :  { %v1909_v31 = vmul.f32 %v1901_v9, %v1374_v46  ;;  %v1945_v53 = vmul.f32 %v1901_v9, %v1384_v34  ;;  %v1981_v26 = vmul.f32 %v1901_v9, %v9872_v21  ;;  %v2017_v27 = vmul.f32 %v1901_v9, %v9880_v49  ;;  %v9994_v5 = vpop.f32.mrb[64].mxu0 }
 0x50f   :  { %12637 = vst [vmem:[#allocation116_spill] sm:$0xff] %v9990_v29  ;;  %12638 = vst [vmem:[#allocation117_spill] sm:$0xff] %v9994_v5  ;;  %v2053_v15 = vmul.f32 %v1901_v9, %v9509_v50  ;;  %v2089_v14 = vmul.f32 %v1901_v9, %v9530_v47  ;;  %v9999_v7 = vsel %vm1887_vm7, %v9778_v2, 0.0  ;;  %v10002_v24 = vadd.f32 %v1335_v32, %v9733_v36  ;;  %v10004_v43 = vpop.f32.mrb[65].mxu0 }
 0x510   :  { %12639 = vst [vmem:[#allocation118_spill] sm:$0xff] %v10004_v43  ;;  %v1931_v46 = vadd.f32 %v1909_v31, %v1908_v62  ;;  %v1967_v34 = vadd.f32 %v1945_v53, %v1944_v3  ;;  %v2003_v52 = vadd.f32 %v1981_v26, %v1980_v45  ;;  %v2039_v21 = vadd.f32 %v2017_v27, %v2016_v13 }
 0x511   :  { %v2075_v18 = vadd.f32 %v2053_v15, %v2052_v25  ;;  %v2111_v49 = vadd.f32 %v2089_v14, %v2088_v23  ;;  %v1903_v5 = vmul.f32 %v9999_v7, %v9916_v60  ;;  %v1939_v50 = vmul.f32 %v9999_v7, %v1378_v6 }
 0x512   :  { %v1932_v47 = vrot.slane %v1931_v46, 4  ;;  %v1968_v9 = vrot.slane %v1967_v34, 4  ;;  %v2004_v55 = vrot.slane %v2003_v52, 4  ;;  %v2040_v42 = vrot.slane %v2039_v21, 4  ;;  %v10009_v54 = vpop.f32.mrb[66].mxu0 }
 0x513   :  { %12640 = vst [vmem:[#allocation119_spill] sm:$0xff] %v10009_v54  ;;  %v2076_v32 = vrot.slane %v2075_v18, 4  ;;  %v2112_v29 = vrot.slane %v2111_v49, 4  ;;  %v1910_v43 = vadd.f32 %v1903_v5, %v1902_v19  ;;  %v1946_v62 = vadd.f32 %v1939_v50, %v1938_v61  ;;  %v10011_v3 = vpop.f32.mrb[67].mxu0 }
 0x514   :  { %v1933_v45 = vadd.f32 %v1932_v47, %v1931_v46  ;;  %v1969_v13 = vadd.f32 %v1968_v9, %v1967_v34  ;;  %v2005_v25 = vadd.f32 %v2004_v55, %v2003_v52  ;;  %v2041_v23 = vadd.f32 %v2040_v42, %v2039_v21 }
 0x515   :  { %v2077_v31 = vadd.f32 %v2076_v32, %v2075_v18  ;;  %v2113_v60 = vadd.f32 %v2112_v29, %v2111_v49  ;;  %v1911_v53 = vrot.slane %v1910_v43, 4  ;;  %v1947_v6 = vrot.slane %v1946_v62, 4 }
 0x516   :  { %v1934_v26 = vrot.slane %v1933_v45, 2  ;;  %v1970_v27 = vrot.slane %v1969_v13, 2  ;;  %v2006_v15 = vrot.slane %v2005_v25, 2  ;;  %v2042_v14 = vrot.slane %v2041_v23, 2 }
 0x517   :  { %v2078_v38 = vrot.slane %v2077_v31, 2  ;;  %v2114_v54 = vrot.slane %v2113_v60, 2  ;;  %v1912_v37 = vadd.f32 %v1911_v53, %v1910_v43  ;;  %v1948_v44 = vadd.f32 %v1947_v6, %v1946_v62 }
 0x518   :  { %v1935_v19 = vadd.f32 %v1934_v26, %v1933_v45  ;;  %v1971_v61 = vadd.f32 %v1970_v27, %v1969_v13  ;;  %v2007_v5 = vadd.f32 %v2006_v15, %v2005_v25  ;;  %v2043_v50 = vadd.f32 %v2042_v14, %v2041_v23 }
 0x519   :  { %v2079_v46 = vadd.f32 %v2078_v38, %v2077_v31  ;;  %v2115_v34 = vadd.f32 %v2114_v54, %v2113_v60  ;;  %v1913_v55 = vrot.slane %v1912_v37, 2  ;;  %v1949_v42 = vrot.slane %v1948_v44, 2 }
 0x51a   :  { %v1936_v18 = vrot.slane %v1935_v19, 1  ;;  %v1972_v29 = vrot.slane %v1971_v61, 1  ;;  %v2008_v52 = vrot.slane %v2007_v5, 1  ;;  %v2044_v21 = vrot.slane %v2043_v50, 1 }
 0x51b   :  { %v10015_v49 = vadd.f32 %v9910_v57, %v9736_v20  ;;  %v2080_v47 = vrot.slane %v2079_v46, 1  ;;  %v1914_v9 = vadd.f32 %v1913_v55, %v1912_v37  ;;  %v1950_v43 = vadd.f32 %v1949_v42, %v1948_v44 }
 0x51c   :  { %v10017_v32 = vadd.f32 %v1936_v18, %v1935_v19  ;;  %v1973_v62 = vadd.f32 %v1972_v29, %v1971_v61  ;;  %v10019_v45 = vadd.f32 %v2008_v52, %v2007_v5  ;;  %v2045_v38 = vadd.f32 %v2044_v21, %v2043_v50  ;;  %v12642_v52 = vld [vmem:[#allocation84_spill] sm:$0xff] }
 0x51d   :  { %v2116_v54 = vrot.slane %v2115_v34, 1  ;;  %v1915_v13 = vrot.slane %v1914_v9, 1  ;;  %v1951_v25 = vrot.slane %v1950_v43, 1  ;;  %v1369_v23 = vadd.f32 %v9982_v22, %v9729_v39 }
 0x51e   :  { %v2121_v31 = vsub.f32 %v1973_v62, %v10017_v32  ;;  %v10025_v57 = vsub.f32 %v2045_v38, %v10019_v45  ;;  %v1975_v37 = vmul.f32 %v9999_v7, %v9856_v4  ;;  %vm1880_vm8 = vcmp.lt.f32.partialorder %v9816_v0, %v10002_v24 }
 0x51f   :  { %v10031_v44 = vadd.f32 %v2080_v47, %v2079_v46  ;;  %v10033_v60 = vadd.f32 %v1915_v13, %v1914_v9  ;;  %v1952_v53 = vadd.f32 %v1951_v25, %v1950_v43  ;;  %v2011_v6 = vmul.f32 %v9999_v7, %v9884_v8 }
 0x520   :  { %8075 = vrcp.f32 %v2121_v31  ;;  %v1982_v22 = vadd.f32 %v1975_v37, %v9952_v30  ;;  %v2047_v26 = vmul.f32 %v9999_v7, %v9469_v11  ;;  %v2083_v4 = vmul.f32 %v9999_v7, %v9487_v1  ;;  %v12645_v31 = vld [vmem:[#allocation102_spill] sm:$0xff] }
 0x521   :  { %v10042_v27 = vadd.f32 %v2116_v54, %v2115_v34  ;;  %v2018_v15 = vadd.f32 %v2011_v6, %v9956_v28  ;;  %v2118_v14 = vsub.f32 %v1952_v53, %v10033_v60  ;;  %vm1862_vm9 = vcmp.ge.f32.partialorder %v9816_v0, %v1369_v23  ;;  %v12641_v28 = vld [vmem:[#allocation106_spill] sm:$0xff] }
 0x522   :  { %v1983_v19 = vrot.slane %v1982_v22, 4  ;;  %v2054_v8 = vadd.f32 %v2047_v26, %v9959_v41  ;;  %v2090_v61 = vadd.f32 %v2083_v4, %v9962_v10  ;;  %vm1888_vm10 = vmand %vm1862_vm9, %vm1880_vm8  ;;  %v1344_v11 = vadd.f32 %v9986_v40, %v9736_v20 }
 0x523   :  { %v2019_v1 = vrot.slane %v2018_v15, 4  ;;  %8077 = vrcp.f32 %v2118_v14  ;;  %v1896_v30 = vsel %vm1888_vm10, 1.0, %v12604_v48  ;;  %v1362_v7 = vmul.f32 %v12641_v28, %v9888_v63  ;;  %v12643_v63 = vld [vmem:[#allocation86_spill] sm:$0xff] }
 0x524   :  { %v1984_v5 = vadd.f32 %v1983_v19, %v1982_v22  ;;  %v2055_v50 = vrot.slane %v2054_v8, 4  ;;  %v2091_v46 = vrot.slane %v2090_v61, 4  ;;  %v1904_v41 = vmul.f32 %v1896_v30, %v1369_v23 }
 0x525   :  { %v2020_v34 = vadd.f32 %v2019_v1, %v2018_v15  ;;  %v1940_v10 = vmul.f32 %v1896_v30, %v10002_v24  ;;  %v1976_v55 = vmul.f32 %v1896_v30, %v9859_v58  ;;  %v10060_v42 = vmul.f32 %v1896_v30, %v9898_v12  ;;  %v12644_v58 = vld [vmem:[#allocation101_spill] sm:$0xff] }
 0x526   :  { %v1985_v40 = vrot.slane %v1984_v5, 2  ;;  %v2056_v18 = vadd.f32 %v2055_v50, %v2054_v8  ;;  %v2092_v29 = vadd.f32 %v2091_v46, %v2090_v61  ;;  %v10063_v21 = vmul.f32 %v1896_v30, %v12642_v52  ;;  %v12646_v8 = vld [vmem:[#allocation100_spill] sm:$0xff] }
 0x527   :  { %v2021_v47 = vrot.slane %v2020_v34, 2  ;;  %v10066_v9 = vmul.f32 %v1896_v30, %v12643_v63  ;;  %v1370_v43 = vadd.f32 %v1362_v7, %v9731_v59  ;;  %v1380_v24 = vsel %vm12495_vm5, 1.0, %v1344_v11 }
 0x528   :  { %v2137_v62 = vsub.f32 %v12644_v58, %v10017_v32  ;;  %v1986_v12 = vadd.f32 %v1985_v40, %v1984_v5  ;;  %v2057_v38 = vrot.slane %v2056_v18, 2  ;;  %v2093_v54 = vrot.slane %v2092_v29, 2 }
 0x529   :  { %v2022_v13 = vadd.f32 %v2021_v47, %v2020_v34  ;;  %v1675_v25 = vadd.f32 %v9900_v16, %v9736_v20  ;;  %v1873_v23 = vadd.f32 %v9743_v17, %v1380_v24  ;;  %v10078_v37 = vmul.f32 %v9894_v35, %v12645_v31 }
 0x52a   :  { %v8076_v53 = vpop.eup %8075  ;;  %v1987_v6 = vrot.slane %v1986_v12, 1  ;;  %v2058_v22 = vadd.f32 %v2057_v38, %v2056_v18  ;;  %v2094_v26 = vadd.f32 %v2093_v54, %v2092_v29  ;;  %vm1863_vm11 = vcmp.ge.f32.partialorder %v9816_v0, %v1370_v43 }
 0x52b   :  { %v10082_v32 = vmul.f32 %v8076_v53, %v10025_v57  ;;  %v2141_v4 = vmul.f32 %v8076_v53, %v2137_v62  ;;  %v2023_v15 = vrot.slane %v2022_v13, 1  ;;  %vm1881_vm12 = vcmp.lt.f32.partialorder %v9816_v0, %v1873_v23 }
 0x52c   :  { %v10085_v16 = vadd.f32 %v1987_v6, %v1986_v12  ;;  %v2059_v14 = vrot.slane %v2058_v22, 1  ;;  %v2095_v19 = vrot.slane %v2094_v26, 1  ;;  %v2134_v61 = vsub.f32 %v12646_v8, %v10033_v60  ;;  %vm1889_vm13 = vmand %vm1863_vm11, %vm1881_vm12 }
 0x52d   :  { %v8078_v11 = vpop.eup %8077  ;;  %v10089_v1 = vsub.f32 1.0, %v2141_v4  ;;  %v2153_v30 = vmul.f32 %v2141_v4, %v2141_v4  ;;  %v2024_v28 = vadd.f32 %v2023_v15, %v2022_v13  ;;  %v1707_v7 = vsel %vm12495_vm5, 1.0, %v1675_v25 }
 0x52e   :  { %v2060_v5 = vadd.f32 %v2059_v14, %v2058_v22  ;;  %v2096_v50 = vadd.f32 %v2095_v19, %v2094_v26  ;;  %v2138_v46 = vmul.f32 %v8078_v11, %v2134_v61  ;;  %v1897_v0 = vsel %vm1889_vm13, %v9778_v2, 0.0 }
 0x52f   :  { %v10095_v34 = vmul.f32 %v10089_v1, %v2141_v4  ;;  %v10098_v40 = vmul.f32 %v2153_v30, %v10082_v32  ;;  %v10101_v60 = vmul.f32 2.0, %v10082_v32  ;;  %v2209_v18 = vmul.f32 %v2153_v30, %v10042_v27 }
 0x530   :  { %v2122_v29 = vsub.f32 %v2024_v28, %v10085_v16  ;;  %v2142_v52 = vsub.f32 1.0, %v2138_v46  ;;  %v2150_v47 = vmul.f32 %v2138_v46, %v2138_v46  ;;  %v2170_v63 = vadd.f32 %v2096_v50, %v2060_v5 }
 0x531   :  { %v2213_v58 = vmul.f32 %v10101_v60, %v10095_v34  ;;  %v1905_v62 = vmul.f32 %v1897_v0, %v1370_v43  ;;  %v1941_v12 = vmul.f32 %v1897_v0, %v1380_v24  ;;  %v1977_v38 = vmul.f32 %v1897_v0, %v9865_v33 }
 0x532   :  { %v2127_v54 = vmul.f32 %v8078_v11, %v2122_v29  ;;  %v2146_v13 = vmul.f32 %v2142_v52, %v2138_v46  ;;  %v2206_v25 = vmul.f32 %v2150_v47, %v2096_v50  ;;  %v2218_v23 = vmul.f32 %v2142_v52, %v2060_v5 }
 0x533   :  { %v10108_v31 = vadd.f32 %v2213_v58, %v2209_v18  ;;  %v1917_v53 = vadd.f32 %v1905_v62, %v1904_v41  ;;  %v1953_v6 = vadd.f32 %v1941_v12, %v1940_v10  ;;  %v1989_v22 = vadd.f32 %v1977_v38, %v1976_v55  ;;  %v12647_v18 = vld [vmem:[#allocation85_spill] sm:$0xff] }
 0x534   :  { %v2154_v26 = vmul.f32 %v2150_v47, %v2127_v54  ;;  %v2158_v4 = vmul.f32 %v2146_v13, %v2060_v5  ;;  %v2174_v15 = vmul.f32 2.0, %v2127_v54  ;;  %v2202_v14 = vmul.f32 %v2127_v54, %v2127_v54 }
 0x535   :  { %v2222_v19 = vmul.f32 %v2218_v23, %v2142_v52  ;;  %v1918_v8 = vrot.slane %v1917_v53, 4  ;;  %v1954_v61 = vrot.slane %v1953_v6, 4  ;;  %v1990_v43 = vrot.slane %v1989_v22, 4 }
 0x536   :  { %v2162_v24 = vadd.f32 %v2158_v4, %v2154_v26  ;;  %v2178_v30 = vsub.f32 %v2170_v63, %v2174_v15  ;;  %v2210_v33 = vmul.f32 %v2174_v15, %v2146_v13  ;;  %v2013_v11 = vmul.f32 %v1897_v0, %v1707_v7  ;;  %v12648_v7 = vld [vmem:[#allocation88_spill] sm:$0xff] }
 0x537   :  { %v1919_v28 = vadd.f32 %v1918_v8, %v1917_v53  ;;  %v1955_v50 = vadd.f32 %v1954_v61, %v1953_v6  ;;  %v1991_v46 = vadd.f32 %v1990_v43, %v1989_v22  ;;  %v2049_v58 = vmul.f32 %v1897_v0, %v12647_v18 }
 0x538   :  { %v10111_v41 = vmul.f32 %v2162_v24, %v2122_v29  ;;  %v2182_v10 = vmul.f32 %v2178_v30, %v2146_v13  ;;  %v2214_v55 = vadd.f32 %v2210_v33, %v2206_v25  ;;  %v2025_v5 = vadd.f32 %v2013_v11, %v10060_v42  ;;  %v12649_v24 = vld [vmem:[#allocation108_spill] sm:$0xff] }
 0x539   :  { %v1920_v47 = vrot.slane %v1919_v28, 2  ;;  %v1956_v52 = vrot.slane %v1955_v50, 2  ;;  %v1992_v62 = vrot.slane %v1991_v46, 2  ;;  %v2061_v12 = vadd.f32 %v2049_v58, %v10063_v21 }
 0x53a   :  { %v2186_v38 = vadd.f32 %v2182_v10, %v2127_v54  ;;  %v2226_v63 = vadd.f32 %v2222_v19, %v2214_v55  ;;  %v2026_v23 = vrot.slane %v2025_v5, 4  ;;  %v2085_v53 = vmul.f32 %v1897_v0, %v12648_v7 }
 0x53b   :  { %v1921_v6 = vadd.f32 %v1920_v47, %v1919_v28  ;;  %v1957_v22 = vadd.f32 %v1956_v52, %v1955_v50  ;;  %v1993_v26 = vadd.f32 %v1992_v62, %v1991_v46  ;;  %v2062_v4 = vrot.slane %v2061_v12, 4  ;;  %v12651_v47 = vld [vmem:[#allocation105_spill] sm:$0xff] }
 0x53c   :  { %8079 = vrcp.f32 %v2186_v38  ;;  %v2230_v29 = vmul.f32 %v2226_v63, %v2202_v14  ;;  %v2027_v13 = vadd.f32 %v2026_v23, %v2025_v5  ;;  %v2097_v25 = vadd.f32 %v2085_v53, %v10066_v9 }
 0x53d   :  { %8081 = vlog2.f32 %v2186_v38  ;;  %v1922_v42 = vrot.slane %v1921_v6, 1  ;;  %v1958_v15 = vrot.slane %v1957_v22, 1  ;;  %v1994_v8 = vrot.slane %v1993_v26, 1  ;;  %v12652_v38 = vld [vmem:[#allocation107_spill] sm:$0xff] }
 0x53e   :  { %8083 = vlog2.f32 %v2230_v29  ;;  %v2028_v21 = vrot.slane %v2027_v13, 2  ;;  %v2063_v54 = vadd.f32 %v2062_v4, %v2061_v12  ;;  %v2098_v19 = vrot.slane %v2097_v25, 4 }
 0x53f   :  { %v10117_v61 = vadd.f32 %v1922_v42, %v1921_v6  ;;  %v1959_v0 = vadd.f32 %v1958_v15, %v1957_v22  ;;  %v1345_v43 = vadd.f32 %v10078_v37, %v9733_v36  ;;  %v1363_v14 = vmul.f32 %v12649_v24, %v9894_v35  ;;  %v12650_v35 = vld [vmem:[#allocation109_spill] sm:$0xff] }
 0x540   :  { %v10123_v30 = vadd.f32 %v1994_v8, %v1993_v26  ;;  %v2029_v9 = vadd.f32 %v2028_v21, %v2027_v13  ;;  %v2064_v33 = vrot.slane %v2063_v54, 2  ;;  %v2099_v11 = vadd.f32 %v2098_v19, %v2097_v25 }
 0x541   :  { %v2119_v28 = vsub.f32 %v1959_v0, %v10117_v61  ;;  %v1371_v50 = vadd.f32 %v1363_v14, %v9729_v39  ;;  %v1372_v46 = vadd.f32 %v9913_v51, %v9731_v59  ;;  %v1382_v18 = vsel %vm12495_vm5, 1.0, %v10015_v49 }
 0x542   :  { %v2030_v37 = vrot.slane %v2029_v9, 1  ;;  %v2065_v58 = vadd.f32 %v2064_v33, %v2063_v54  ;;  %v2100_v10 = vrot.slane %v2099_v11, 2  ;;  %v1636_v55 = vmul.f32 0.99, %v12650_v35 }
 0x543   :  { %v2173_v5 = vadd.f32 %v10042_v27, %v10031_v44  ;;  %8085 = vrcp.f32 %v2119_v28  ;;  %vm1864_vm14 = vcmp.ge.f32.partialorder %v12651_v47, %v1371_v50  ;;  %v1875_v52 = vadd.f32 %v9743_v17, %v1382_v18 }
 0x544   :  { %v2031_v62 = vadd.f32 %v2030_v37, %v2029_v9  ;;  %v2066_v12 = vrot.slane %v2065_v58, 1  ;;  %v2101_v51 = vadd.f32 %v2100_v10, %v2099_v11  ;;  %v1668_v63 = vmul.f32 %v12652_v38, %v1636_v55  ;;  %v12653_v9 = vld [vmem:[#allocation110_spill] sm:$0xff]  ;;  %v12654_v11 = vld [vmem:[#allocation93_spill] sm:$0xff]  ;;  %v12656_v10 = vld [vmem:[#allocation112_spill] sm:$0xff] }
 0x545   :  { %v2221_v49 = vmul.f32 %v10089_v1, %v10031_v44  ;;  %vm1882_vm15 = vcmp.lt.f32.partialorder %v12651_v47, %v1345_v43  ;;  %vm1883_vm6 = vcmp.lt.f32.partialorder %v12651_v47, %v1875_v52  ;;  %v2181_v23 = vsub.f32 %v2173_v5, %v10101_v60 }
 0x546   :  { %v8080_v27 = vpop.eup %8079  ;;  %v2067_v7 = vadd.f32 %v2066_v12, %v2065_v58  ;;  %v2102_v53 = vrot.slane %v2101_v51, 1  ;;  %v10144_v6 = vsub.f32 %v2031_v62, %v10123_v30  ;;  %vm1865_vm7 = vcmp.ge.f32.partialorder %v12651_v47, %v1372_v46  ;;  %vm1890_vm8 = vmand %vm1864_vm14, %vm1882_vm15 }
 0x547   :  { %v8082_v22 = vpop.eup %8081  ;;  %v2191_v26 = vmul.f32 %v8080_v27, %v10111_v41  ;;  %v1676_v4 = vadd.f32 %v1668_v63, %v9733_v36  ;;  %vm1891_vm9 = vmand %vm1865_vm7, %vm1883_vm6  ;;  %v10152_v29 = vsel %vm1890_vm8, 1.0, %v12604_v48  ;;  %v10155_v60 = vmul.f32 %v2181_v23, %v10095_v34 }
 0x548   :  { %v8084_v13 = vpop.eup %8083  ;;  %v2243_v25 = vmul.f32 0.6931472, %v8082_v22  ;;  %v2103_v42 = vadd.f32 %v2102_v53, %v2101_v51  ;;  %v10158_v15 = vsel %vm1891_vm9, %v9778_v2, 0.0  ;;  %v1906_v8 = vmul.f32 %v10152_v29, %v1371_v50 }
 0x549   :  { %v10162_v21 = vadd.f32 %v2191_v26, %v10085_v16  ;;  %v10164_v41 = vmul.f32 0.6931472, %v8084_v13  ;;  %v1907_v54 = vmul.f32 %v10158_v15, %v1372_v46  ;;  %v1942_v19 = vmul.f32 %v10152_v29, %v1345_v43  ;;  %v12655_v16 = vld [vmem:[#allocation116_spill] sm:$0xff] }
 0x54a   :  { %v10168_v0 = vmul.f32 2.0, %v2243_v25  ;;  %v2171_v24 = vadd.f32 %v2103_v42, %v2067_v7  ;;  %v1943_v14 = vmul.f32 %v10158_v15, %v1382_v18  ;;  %v1978_v33 = vmul.f32 %v10152_v29, %v12653_v9  ;;  %v12657_v18 = vld [vmem:[#allocation87_spill] sm:$0xff] }
 0x54b   :  { %v2135_v28 = vsub.f32 %v12654_v11, %v10117_v61  ;;  %v1924_v50 = vadd.f32 %v1907_v54, %v1906_v8  ;;  %v1979_v37 = vmul.f32 %v10158_v15, %v12655_v16  ;;  %v2014_v58 = vmul.f32 %v10152_v29, %v1676_v4  ;;  %v12658_v61 = vld [vmem:[#allocation89_spill] sm:$0xff] }
 0x54c   :  { %v2254_v43 = vsub.f32 %v10164_v41, %v10168_v0  ;;  %v1960_v46 = vadd.f32 %v1943_v14, %v1942_v19  ;;  %v2015_v35 = vmul.f32 %v10158_v15, %v12656_v10  ;;  %v2050_v55 = vmul.f32 %v10152_v29, %v12657_v18  ;;  %v7956_v0 = vld [vmem:[%s12457_s5 + $0x28] sm:$0xff]  }
 0x54d   :  { %v8086_v5 = vpop.eup %8085  ;;  %v1925_v47 = vrot.slane %v1924_v50, 4  ;;  %v1996_v52 = vadd.f32 %v1979_v37, %v1978_v33  ;;  %v2051_v62 = vmul.f32 %v10158_v15, %v12658_v61  ;;  %v2225_v53 = vmul.f32 %v2221_v49, %v10089_v1 }
 0x54e   :  { %v2129_v12 = vmul.f32 %v8086_v5, %v10144_v6  ;;  %v2139_v51 = vmul.f32 %v8086_v5, %v2135_v28  ;;  %v1961_v38 = vrot.slane %v1960_v46, 4  ;;  %v2032_v27 = vadd.f32 %v2015_v35, %v2014_v58 }
 0x54f   :  { %v1926_v63 = vadd.f32 %v1925_v47, %v1924_v50  ;;  %v1997_v23 = vrot.slane %v1996_v52, 4  ;;  %vm12493_vm10 = vcmask 1040384  }
 0x550   :  { %v2143_v22 = vsub.f32 1.0, %v2139_v51  ;;  %v2151_v26 = vmul.f32 %v2139_v51, %v2139_v51  ;;  %v2175_v4 = vmul.f32 2.0, %v2129_v12  ;;  %v2203_v13 = vmul.f32 %v2129_v12, %v2129_v12 }
 0x551   :  { %v1927_v25 = vrot.slane %v1926_v63, 2  ;;  %v1962_v8 = vadd.f32 %v1961_v38, %v1960_v46  ;;  %v1998_v54 = vadd.f32 %v1997_v23, %v1996_v52  ;;  %v2033_v19 = vrot.slane %v2032_v27, 4 }
 0x552   :  { %v2147_v14 = vmul.f32 %v2143_v22, %v2139_v51  ;;  %v2155_v9 = vmul.f32 %v2151_v26, %v2129_v12  ;;  %v2179_v33 = vsub.f32 %v2171_v24, %v2175_v4  ;;  %v2207_v11 = vmul.f32 %v2151_v26, %v2103_v42 }
 0x553   :  { %v2219_v16 = vmul.f32 %v2143_v22, %v2067_v7  ;;  %v1928_v28 = vadd.f32 %v1927_v25, %v1926_v63  ;;  %v1963_v37 = vrot.slane %v1962_v8, 2  ;;  %v1999_v50 = vrot.slane %v1998_v54, 2 }
 0x554   :  { %v2159_v10 = vmul.f32 %v2147_v14, %v2067_v7  ;;  %v2183_v58 = vmul.f32 %v2179_v33, %v2147_v14  ;;  %v2211_v35 = vmul.f32 %v2175_v4, %v2147_v14  ;;  %v2034_v1 = vadd.f32 %v2033_v19, %v2032_v27  ;;  %v12660_v19 = vld [vmem:[#allocation90_spill] sm:$0xff] }
 0x555   :  { %v2223_v49 = vmul.f32 %v2219_v16, %v2143_v22  ;;  %v1929_v18 = vrot.slane %v1928_v28, 1  ;;  %v1964_v5 = vadd.f32 %v1963_v37, %v1962_v8  ;;  %v2000_v47 = vadd.f32 %v1999_v50, %v1998_v54  ;;  %v12664_v50 = vld [vmem:[#allocation113_spill] sm:$0xff] }
 0x556   :  { %v2163_v61 = vadd.f32 %v2159_v10, %v2155_v9  ;;  %v2187_v46 = vadd.f32 %v2183_v58, %v2129_v12  ;;  %v2215_v52 = vadd.f32 %v2211_v35, %v2207_v11  ;;  %v2035_v38 = vrot.slane %v2034_v1, 2  ;;  %v12659_v12 = vld [vmem:[#allocation91_spill] sm:$0xff] }
 0x557   :  { %v10188_v51 = vadd.f32 %v1929_v18, %v1928_v28  ;;  %v1965_v24 = vrot.slane %v1964_v5, 1  ;;  %v2001_v42 = vrot.slane %v2000_v47, 1  ;;  %v2068_v23 = vadd.f32 %v2051_v62, %v2050_v55  ;;  %v12662_v28 = vld [vmem:[#allocation111_spill] sm:$0xff] }
 0x558   :  { %v2167_v63 = vmul.f32 %v2163_v61, %v10144_v6  ;;  %8087 = vrcp.f32 %v2187_v46  ;;  %v2227_v7 = vadd.f32 %v2223_v49, %v2215_v52  ;;  %v2036_v26 = vadd.f32 %v2035_v38, %v2034_v1  ;;  %v12668_v61 = vld [vmem:[#allocation115_spill] sm:$0xff] }
 0x559   :  { %8089 = vlog2.f32 %v2187_v46  ;;  %v1966_v27 = vadd.f32 %v1965_v24, %v1964_v5  ;;  %v10191_v22 = vadd.f32 %v2001_v42, %v2000_v47  ;;  %v2069_v4 = vrot.slane %v2068_v23, 4  ;;  %v12667_v47 = vld [vmem:[#allocation5_spill] sm:$0xff]  ;;  %v12669_v24 = vld [vmem:[#allocation6_spill] sm:$0xff] }
 0x55a   :  { %v2231_v25 = vmul.f32 %v2227_v7, %v2203_v13  ;;  %v2037_v8 = vrot.slane %v2036_v26, 1  ;;  %v2086_v54 = vmul.f32 %v10152_v29, %v12659_v12  ;;  %v2087_v14 = vmul.f32 %v10158_v15, %v12660_v19  ;;  %v12661_v29 = vld [vmem:[#allocation2_spill] sm:$0xff]  ;;  %v12663_v15 = vld [vmem:[#allocation3_spill] sm:$0xff]  ;;  %v12670_v42 = vld [vmem:[#allocation117_spill] sm:$0xff] }
 0x55b   :  { %v2070_v9 = vadd.f32 %v2069_v4, %v2068_v23  ;;  %v2120_v55 = vsub.f32 %v1966_v27, %v10188_v51  ;;  %v2189_v6 = vadd.f32 %v10155_v60, %v10082_v32  ;;  %v2205_v62 = vmul.f32 %v10082_v32, %v10082_v32  ;;  %v12671_v7 = vld [vmem:[#allocation7_spill] sm:$0xff] }
 0x55c   :  { %8091 = vlog2.f32 %v2231_v25  ;;  %v2038_v33 = vadd.f32 %v2037_v8, %v2036_v26  ;;  %v2104_v11 = vadd.f32 %v2087_v14, %v2086_v54  ;;  %v2229_v13 = vadd.f32 %v2225_v53, %v10108_v31  ;;  %v12665_v31 = vld [vmem:[#allocation4_spill] sm:$0xff]  ;;  %v12666_v53 = vld [vmem:[#allocation114_spill] sm:$0xff]  ;;  %v12673_v54 = vld [vmem:[#allocation9_spill] sm:$0xff] }
 0x55d   :  { %v2071_v16 = vrot.slane %v2070_v9, 2  ;;  %8093 = vrcp.f32 %v2120_v55  ;;  %v2421_v37 = vadd.f32 %v12662_v28, %v12661_v29  ;;  %v2416_v10 = vadd.f32 %v12664_v50, %v12663_v15  ;;  %v12672_v26 = vld [vmem:[#allocation118_spill] sm:$0xff]  ;;  %v12674_v19 = vld [vmem:[#allocation119_spill] sm:$0xff] }
 0x55e   :  { %v2105_v58 = vrot.slane %v2104_v11, 4  ;;  %v10208_v35 = vsub.f32 %v2038_v33, %v10191_v22  ;;  %8095 = vrcp.f32 %v2189_v6  ;;  %v2233_v60 = vmul.f32 %v2229_v13, %v2205_v62 }
 0x55f   :  { %v2072_v32 = vadd.f32 %v2071_v16, %v2070_v9  ;;  %8097 = vlog2.f32 %v2189_v6  ;;  %v2455_v1 = vmax.f32 %v2421_v37, 0.0  ;;  %v2454_v49 = vmax.f32 %v2416_v10, 0.0  ;;  %v12675_v37 = vld [vmem:[#allocation8_spill] sm:$0xff] }
 0x560   :  { %v2106_v18 = vadd.f32 %v2105_v58, %v2104_v11  ;;  %8099 = vlog2.f32 %v2233_v60  ;;  %v2431_v5 = vadd.f32 %v12666_v53, %v12665_v31  ;;  %v2426_v46 = vadd.f32 %v12668_v61, %v12667_v47  ;;  %v12676_v60 = vld [vmem:[#allocation104_spill] sm:$0xff] }
 0x561   :  { %v2073_v52 = vrot.slane %v2072_v32, 1  ;;  %v2471_v38 = vpack.c.bf16 %v2455_v1, %v2454_v49  ;;  %v2441_v23 = vadd.f32 %v12670_v42, %v12669_v24  ;;  %v2436_v27 = vadd.f32 %v12672_v26, %v12671_v7 }
 0x562   :  { %v8088_v4 = vpop.eup %8087  ;;  %v2107_v25 = vrot.slane %v2106_v18, 2  ;;  %v2457_v8 = vmax.f32 %v2431_v5, 0.0  ;;  %v2456_v12 = vmax.f32 %v2426_v46, 0.0  ;;  %v2451_v14 = vadd.f32 %v12674_v19, %v12673_v54 }
 0x563   :  { %v8090_v9 = vpop.eup %8089  ;;  %v2193_v55 = vmul.f32 %v8088_v4, %v2167_v63  ;;  %v2459_v6 = vmax.f32 %v2441_v23, 0.0  ;;  %7438 = vmatprep.subr.bf16.mxu0 %v2471_v38  ;;  %v2458_v62 = vmax.f32 %v2436_v27, 0.0  ;;  %v2446_v15 = vadd.f32 %v10011_v3, %v12675_v37 }
 0x564   :  { %v2245_v33 = vmul.f32 0.6931472, %v8090_v9  ;;  %v2108_v11 = vadd.f32 %v2107_v25, %v2106_v18  ;;  %v2472_v13 = vpack.c.bf16 %v2457_v8, %v2456_v12  ;;  %7439 = vmatpush3.bf16.msra.mxu0 %v2471_v38  ;;  %v2461_v16 = vmax.f32 %v2451_v14, 0.0 }
 0x565   :  { %v10221_v29 = vadd.f32 %v2193_v55, %v10123_v30  ;;  %v2473_v28 = vpack.c.bf16 %v2459_v6, %v2458_v62  ;;  %v2161_v50 = vmul.f32 %v10095_v34, %v10031_v44  ;;  %v2074_v63 = vadd.f32 %v2073_v52, %v2072_v32 }
 0x566   :  { %v8092_v10 = vpop.eup %8091  ;;  %v2109_v58 = vrot.slane %v2108_v11, 1  ;;  %v2136_v1 = vsub.f32 %v12676_v60, %v10188_v51  ;;  %7440 = vmatprep.subr.bf16.mxu0 %v2472_v13  ;;  %v2251_v31 = vmul.f32 2.0, %v2245_v33  ;;  %v2460_v53 = vmax.f32 %v2446_v15, 0.0 }
 0x567   :  { %v8094_v49 = vpop.eup %8093  ;;  %v2237_v18 = vmul.f32 0.6931472, %v8092_v10  ;;  %v2165_v30 = vadd.f32 %v2161_v50, %v10098_v40  ;;  %v2259_v40 = vsel %vm12493_vm10, %v2254_v43, 0.0 }
 0x568   :  { %v8096_v5 = vpop.eup %8095  ;;  %v2110_v47 = vadd.f32 %v2109_v58, %v2108_v11  ;;  %v2131_v3 = vmul.f32 %v8094_v49, %v10208_v35  ;;  %v2140_v61 = vmul.f32 %v8094_v49, %v2136_v1  ;;  %7441 = vmatpush3.bf16.msra.mxu0 %v2472_v13  ;;  %v2474_v32 = vpack.c.bf16 %v2461_v16, %v2460_v53  ;;  %v7957_v11 = vld [vmem:[%s12457_s5 + $0x30] sm:$0xff]  }
 0x569   :  { %v8098_v44 = vpop.eup %8097  ;;  %v2255_v34 = vsub.f32 %v2237_v18, %v2251_v31  ;;  %7442 = vmatprep.subr.bf16.mxu0 %v2473_v28  ;;  %v2169_v51 = vmul.f32 %v2165_v30, %v10025_v57 }
 0x56a   :  { %v8100_v46 = vpop.eup %8099  ;;  %v2144_v52 = vsub.f32 1.0, %v2140_v61  ;;  %v2152_v38 = vmul.f32 %v2140_v61, %v2140_v61  ;;  %v2172_v24 = vadd.f32 %v2110_v47, %v2074_v63  ;;  %v2176_v42 = vmul.f32 2.0, %v2131_v3 }
 0x56b   :  { %v2260_v23 = vsel %vm12493_vm10, %v2255_v34, 0.0  ;;  %v2241_v7 = vmul.f32 0.6931472, %v8100_v46  ;;  %v2249_v12 = vmul.f32 0.6931472, %v8098_v44  ;;  %v2197_v54 = vmul.f32 %v8096_v5, %v2169_v51  ;;  %v12679_v34 = vld [vmem:[#allocation10_spill] sm:$0xff] }
 0x56c   :  { %v2261_v26 = vadd.f32 %v2260_v23, %v2259_v40  ;;  %v2148_v27 = vmul.f32 %v2144_v52, %v2140_v61  ;;  %v2156_v4 = vmul.f32 %v2152_v38, %v2131_v3  ;;  %v2180_v25 = vsub.f32 %v2172_v24, %v2176_v42  ;;  %7443 = vmatpush3.bf16.msra.mxu0 %v2473_v28  ;;  %v12680_v46 = vld [vmem:[#allocation13_spill] sm:$0xff]  ;;  %v12681_v24 = vld [vmem:[#allocation11_spill] sm:$0xff] }
 0x56d   :  { %v2208_v8 = vmul.f32 %v2152_v38, %v2110_v47  ;;  %v2220_v57 = vmul.f32 %v2144_v52, %v2074_v63  ;;  %7444 = vmatprep.subr.bf16.mxu0 %v2474_v32  ;;  %v2253_v41 = vmul.f32 2.0, %v2249_v12  ;;  %v10241_v43 = vadd.f32 %v2197_v54, %v10019_v45  ;;  %v7958_v45 = vld [vmem:[%s12457_s5 + $0x38] sm:$0xff]   ;;  %v7959_v47 = vld [vmem:[%s12458_s7 + $0x20] sm:$0xff]  }
 0x56e   :  { %v2160_v19 = vmul.f32 %v2148_v27, %v2074_v63  ;;  %v2184_v14 = vmul.f32 %v2180_v25, %v2148_v27  ;;  %v2212_v9 = vmul.f32 %v2176_v42, %v2148_v27  ;;  %v2204_v28 = vmul.f32 %v2131_v3, %v2131_v3  ;;  %v12683_v54 = vld [vmem:[#allocation14_spill] sm:$0xff] }
 0x56f   :  { %v2224_v55 = vmul.f32 %v2220_v57, %v2144_v52  ;;  %v2257_v13 = vsub.f32 %v2241_v7, %v2253_v41 }
 0x570   :  { %v2164_v6 = vadd.f32 %v2160_v19, %v2156_v4  ;;  %v2188_v62 = vadd.f32 %v2184_v14, %v2131_v3  ;;  %v2216_v33 = vadd.f32 %v2212_v9, %v2208_v8  ;;  %7445 = vmatpush3.bf16.msra.mxu0 %v2474_v32  ;;  %v12682_v8 = vld [vmem:[#allocation16_spill] sm:$0xff]  ;;  %v12684_v9 = vld [vmem:[#allocation17_spill] sm:$0xff] }
 0x571   :  { %v2264_v30 = vsel %vm12493_vm10, %v2257_v13, 0.0 }
 0x572   :  { %v2168_v16 = vmul.f32 %v2164_v6, %v10208_v35  ;;  %8101 = vrcp.f32 %v2188_v62  ;;  %v2228_v37 = vadd.f32 %v2224_v55, %v2216_v33 }
 0x573   :  { %8103 = vlog2.f32 %v2188_v62  ;;  %7447 = vmatmul.mubr.msk.bf16.vlgmr.msra.gmra.mrb[68].mxu0 %vm12494_vm1, %v7956_v0  ;;  %v12685_v0 = vld [vmem:[#allocation15_spill] sm:$0xff] }
 0x574   :  { %v2232_v15 = vmul.f32 %v2228_v37, %v2204_v28  ;;  %7450 = vmatprep.mubr.msk.bf16.mxu0 %vm12494_vm1, %v7957_v11  ;;  %v7960_v37 = vld [vmem:[%s12458_s7 + $0x28] sm:$0xff]  }
 0x576   :  { %8105 = vlog2.f32 %v2232_v15  ;;  %v7961_v15 = vld [vmem:[%s12458_s7 + $0x30] sm:$0xff]  }
 0x57b   :  { %7451 = vmatmul.mubr.msk.bf16.gmra.mrb[72].mxu0 %vm12494_vm1, %v7958_v45  ;;  %v12686_v45 = vmov 0.0|0.0  }
 0x57c   :  { %v8102_v50 = vpop.eup %8101  ;;  %7462 = vmatprep.mubr.msk.bf16.mxu0 %vm12494_vm1, %v7959_v47 }
 0x57d   :  { %v8104_v10 = vpop.eup %8103  ;;  %v2195_v63 = vmul.f32 %v8102_v50, %v2168_v16  ;;  %v7962_v50 = vld [vmem:[%s12458_s7 + $0x38] sm:$0xff]  }
 0x57e   :  { %v2247_v35 = vmul.f32 0.6931472, %v8104_v10  ;;  %v7963_v10 = vld [vmem:[%s12459_s9 + $0x60] sm:$0xff]  }
 0x57f   :  { %v10254_v58 = vadd.f32 %v2195_v63, %v10191_v22  ;;  %v12678_v22 = vld [vmem:[#allocation12_spill] sm:$0xff]  ;;  %7478 = vmatprep.mubr.msk.bf16.mxu1 %vm12494_vm1, %v7963_v10 }
 0x580   :  { %v8106_v60 = vpop.eup %8105  ;;  %v2252_v49 = vmul.f32 2.0, %v2247_v35  ;;  %v12687_v35 = vld [vmem:[#allocation20_spill] sm:$0xff] }
 0x581   :  { %v2239_v1 = vmul.f32 0.6931472, %v8106_v60 }
 0x583   :  { %v2256_v18 = vsub.f32 %v2239_v1, %v2252_v49  ;;  %v12688_v49 = vld [vmem:[#allocation18_spill] sm:$0xff] }
 0x585   :  { %v2262_v31 = vsel %vm12493_vm10, %v2256_v18, 0.0 }
 0x586   :  { %v2263_v53 = vadd.f32 %v2262_v31, %v2261_v26 }
 0x588   :  { %v10258_v5 = vadd.f32 %v2264_v30, %v2263_v53  ;;  %v12689_v53 = vld [vmem:[#allocation21_spill] sm:$0xff] }
 0x58a   :  { %12677 = vst [vmem:[#allocation106_spill] sm:$0xff] %v10258_v5  ;;  %v3948_v5 = vmax.f32 %v10241_v43, 0.0 }
 0x646   :  { %v7448_v3 = vpop.f32.mrb[68].mxu0 }
 0x647   :  { %v2599_v61 = vadd.f32 %v7448_v3, %v12678_v22  ;;  %v2590_v44 = vpop.f32.mrb[69].mxu0  ;;  %v12690_v3 = vld [vmem:[#allocation19_spill] sm:$0xff] }
 0x648   :  { %v2591_v32 = vadd.f32 %v2590_v44, %v12679_v34  ;;  %v7449_v51 = vpop.f32.mrb[70].mxu0 }
 0x649   :  { %v2602_v52 = vadd.f32 %v7449_v51, %v12680_v46  ;;  %v2593_v38 = vpop.f32.mrb[71].mxu0  ;;  %v2623_v40 = vmax.f32 %v2599_v61, 0.0 }
 0x64a   :  { %v2594_v42 = vadd.f32 %v2593_v38, %v12681_v24  ;;  %v2621_v7 = vmax.f32 %v2591_v32, 0.0  ;;  %v12691_v38 = vld [vmem:[#allocation24_spill] sm:$0xff] }
 0x64b   :  { %v2624_v23 = vmax.f32 %v2602_v52, 0.0 }
 0x64c   :  { %v2622_v26 = vmax.f32 %v2594_v42, 0.0 }
 0x64d   :  { %v2639_v27 = vpack.c.bf16 %v2624_v23, %v2623_v40  ;;  %v12692_v40 = vld [vmem:[#allocation22_spill] sm:$0xff] }
 0x64e   :  { %v2638_v4 = vpack.c.bf16 %v2622_v26, %v2621_v7  ;;  %v7452_v25 = vpop.f32.mrb[72].mxu0  ;;  %v12693_v26 = vld [vmem:[#allocation25_spill] sm:$0xff] }
 0x64f   :  { %v2615_v57 = vadd.f32 %v7452_v25, %v12682_v8  ;;  %v2606_v12 = vpop.f32.mrb[73].mxu0  ;;  %v12694_v25 = vld [vmem:[#allocation23_spill] sm:$0xff] }
 0x650   :  { %v2607_v19 = vadd.f32 %v2606_v12, %v12683_v54  ;;  %v7453_v14 = vpop.f32.mrb[74].mxu0  ;;  %7454 = vmatprep.subr.bf16.mxu0 %v2638_v4 }
 0x651   :  { %v2618_v55 = vadd.f32 %v7453_v14, %v12684_v9  ;;  %v2609_v41 = vpop.f32.mrb[75].mxu0  ;;  %7455 = vmatpush3.bf16.msra.mxu0 %v2638_v4  ;;  %v2627_v62 = vmax.f32 %v2615_v57, 0.0 }
 0x652   :  { %v2610_v6 = vadd.f32 %v2609_v41, %v12685_v0  ;;  %7456 = vmatprep.subr.bf16.mxu0 %v2639_v27  ;;  %v2625_v11 = vmax.f32 %v2607_v19, 0.0  ;;  %v7965_v41 = vld [vmem:[%s12459_s9 + $0x70] sm:$0xff]   ;;  %v7966_v0 = vld [vmem:[%s12459_s9 + $0x78] sm:$0xff]  }
 0x653   :  { %v2628_v33 = vmax.f32 %v2618_v55, 0.0  ;;  %v7964_v55 = vld [vmem:[%s12459_s9 + $0x68] sm:$0xff]  }
 0x654   :  { %v2626_v13 = vmax.f32 %v2610_v6, 0.0  ;;  %v7967_v6 = vld [vmem:[%s12459_s9 + $0x80] sm:$0xff]  }
 0x655   :  { %v2641_v16 = vpack.c.bf16 %v2628_v33, %v2627_v62  ;;  %7457 = vmatpush3.bf16.msra.mxu0 %v2639_v27  ;;  %v7968_v62 = vld [vmem:[%s12459_s9 + $0x88] sm:$0xff]   ;;  %v7969_v33 = vld [vmem:[%s12459_s9 + $0x90] sm:$0xff]  }
 0x656   :  { %v2640_v28 = vpack.c.bf16 %v2626_v13, %v2625_v11  ;;  %v7970_v11 = vld [vmem:[%s12459_s9 + $0x98] sm:$0xff]   ;;  %v7971_v13 = vld [vmem:[%s12459_s9 + $0xa0] sm:$0xff]  }
 0x658   :  { %7458 = vmatprep.subr.bf16.mxu0 %v2640_v28 }
 0x659   :  { %7459 = vmatpush3.bf16.msra.mxu0 %v2640_v28  ;;  %v7973_v28 = vld [vmem:[%s12459_s9 + $0xb0] sm:$0xff]  }
 0x65a   :  { %7460 = vmatprep.subr.bf16.mxu0 %v2641_v16 }
 0x65d   :  { %7461 = vmatpush3.bf16.msra.mxu0 %v2641_v16  ;;  %v7972_v16 = vld [vmem:[%s12459_s9 + $0xa8] sm:$0xff]  }
 0x65e   :  { %7872 = vmatprep.subr.bf16.mxu0 %v12686_v45 }
 0x660   :  { %7463 = vmatmul.mubr.msk.bf16.vlgmr.msra.gmra.mrb[76].mxu0 %vm12494_vm1, %v7960_v37  ;;  %v7974_v37 = vld [vmem:[%s12459_s9 + $0xb8] sm:$0xff]  }
 0x661   :  { %7466 = vmatprep.mubr.msk.bf16.mxu0 %vm12494_vm1, %v7961_v15 }
 0x668   :  { %7467 = vmatmul.mubr.msk.bf16.gmra.mrb[80].mxu0 %vm12494_vm1, %v7962_v50 }
 0x669   :  { %7518 = vmatprep.mubr.msk.f32.mxu0 %vm12491_vm2, %v12604_v48 }
 0x733   :  { %v7464_v63 = vpop.f32.mrb[76].mxu0 }
 0x734   :  { %v2766_v60 = vadd.f32 %v7464_v63, %v12687_v35  ;;  %v2757_v1 = vpop.f32.mrb[77].mxu0  ;;  %v12695_v63 = vld [vmem:[#allocation28_spill] sm:$0xff] }
 0x735   :  { %v2758_v18 = vadd.f32 %v2757_v1, %v12688_v49  ;;  %v7465_v31 = vpop.f32.mrb[78].mxu0  ;;  %v12696_v1 = vld [vmem:[#allocation29_spill] sm:$0xff] }
 0x736   :  { %v2769_v30 = vadd.f32 %v7465_v31, %v12689_v53  ;;  %v2760_v47 = vpop.f32.mrb[79].mxu0  ;;  %v2790_v61 = vmax.f32 %v2766_v60, 0.0  ;;  %v12698_v53 = vld [vmem:[#allocation27_spill] sm:$0xff] }
 0x737   :  { %v2761_v22 = vadd.f32 %v2760_v47, %v12690_v3  ;;  %v2788_v34 = vmax.f32 %v2758_v18, 0.0  ;;  %v12697_v18 = vld [vmem:[#allocation26_spill] sm:$0xff] }
 0x738   :  { %v2791_v44 = vmax.f32 %v2769_v30, 0.0 }
 0x739   :  { %v2789_v32 = vmax.f32 %v2761_v22, 0.0 }
 0x73a   :  { %v2822_v51 = vpack.c.bf16 %v2791_v44, %v2790_v61 }
 0x73b   :  { %v2821_v46 = vpack.c.bf16 %v2789_v32, %v2788_v34  ;;  %v7468_v52 = vpop.f32.mrb[80].mxu0 }
 0x73c   :  { %v2782_v24 = vadd.f32 %v7468_v52, %v12691_v38  ;;  %v2773_v42 = vpop.f32.mrb[81].mxu0 }
 0x73d   :  { %v2774_v23 = vadd.f32 %v2773_v42, %v12692_v40  ;;  %v7469_v7 = vpop.f32.mrb[82].mxu0  ;;  %7470 = vmatprep.subr.bf16.mxu1 %v2821_v46 }
 0x73e   :  { %v2785_v27 = vadd.f32 %v7469_v7, %v12693_v26  ;;  %v2776_v4 = vpop.f32.mrb[83].mxu0  ;;  %7471 = vmatpush3.bf16.msra.mxu1 %v2821_v46  ;;  %v2794_v57 = vmax.f32 %v2782_v24, 0.0  ;;  %v12699_v24 = vld [vmem:[#allocation32_spill] sm:$0xff]  ;;  %v12700_v7 = vld [vmem:[#allocation33_spill] sm:$0xff] }
 0x73f   :  { %v2777_v8 = vadd.f32 %v2776_v4, %v12694_v25  ;;  %7472 = vmatprep.subr.bf16.mxu1 %v2822_v51  ;;  %v2792_v54 = vmax.f32 %v2774_v23, 0.0 }
 0x740   :  { %v2795_v12 = vmax.f32 %v2785_v27, 0.0  ;;  %v12701_v27 = vld [vmem:[#allocation30_spill] sm:$0xff] }
 0x741   :  { %v2793_v19 = vmax.f32 %v2777_v8, 0.0  ;;  %v12702_v8 = vld [vmem:[#allocation31_spill] sm:$0xff] }
 0x742   :  { %v2824_v14 = vpack.c.bf16 %v2795_v12, %v2794_v57  ;;  %7473 = vmatpush3.bf16.msra.mxu1 %v2822_v51 }
 0x743   :  { %v2823_v9 = vpack.c.bf16 %v2793_v19, %v2792_v54 }
 0x745   :  { %7474 = vmatprep.subr.bf16.mxu1 %v2823_v9 }
 0x746   :  { %7475 = vmatpush3.bf16.msra.mxu1 %v2823_v9 }
 0x747   :  { %7476 = vmatprep.subr.bf16.mxu1 %v2824_v14 }
 0x74a   :  { %7477 = vmatpush3.bf16.msra.mxu1 %v2824_v14 }
 0x74b   :  { %7884 = vmatprep.subr.bf16.mxu1 %v12686_v45 }
 0x74d   :  { %7479 = vmatmul.mubr.msk.bf16.vlgmr.msra.gmra.mrb[56].mxu1 %vm12494_vm1, %v7964_v55 }
 0x74e   :  { %7482 = vmatprep.mubr.msk.bf16.mxu1 %vm12494_vm1, %v7965_v41 }
 0x755   :  { %7483 = vmatmul.mubr.msk.bf16.gmra.mrb[60].mxu1 %vm12494_vm1, %v7966_v0 }
 0x756   :  { %7486 = vmatprep.mubr.msk.bf16.mxu1 %vm12494_vm1, %v7967_v6 }
 0x75d   :  { %7487 = vmatmul.mubr.msk.bf16.gmra.mrb[64].mxu1 %vm12494_vm1, %v7968_v62 }
 0x75e   :  { %7490 = vmatprep.mubr.msk.bf16.mxu1 %vm12494_vm1, %v7969_v33 }
 0x765   :  { %7491 = vmatmul.mubr.msk.bf16.gmra.mrb[68].mxu1 %vm12494_vm1, %v7970_v11 }
 0x766   :  { %7494 = vmatprep.mubr.msk.bf16.mxu1 %vm12494_vm1, %v7971_v13 }
 0x76d   :  { %7495 = vmatmul.mubr.msk.bf16.gmra.mrb[72].mxu1 %vm12494_vm1, %v7972_v16 }
 0x76e   :  { %7498 = vmatprep.mubr.msk.bf16.mxu1 %vm12494_vm1, %v7973_v28 }
 0x775   :  { %7499 = vmatmul.mubr.msk.bf16.gmra.mrb[76].mxu1 %vm12494_vm1, %v7974_v37 }
 0x776   :  { %7585 = vmatprep.mubr.msk.f32.mxu1 %vm12491_vm2, %v12604_v48 }
 0x820   :  { %v7480_v15 = vpop.f32.mrb[56].mxu1 }
 0x821   :  { %v3100_v50 = vpop.f32.mrb[57].mxu1  ;;  %v3109_v49 = vadd.f32 %v7480_v15, %v12696_v1 }
 0x822   :  { %v7481_v10 = vpop.f32.mrb[58].mxu1  ;;  %v3101_v30 = vadd.f32 %v3100_v50, %v12698_v53  ;;  %v12703_v50 = vld [vmem:[#allocation53_spill] sm:$0xff]  ;;  %v12705_v53 = vld [vmem:[#allocation50_spill] sm:$0xff] }
 0x823   :  { %v3112_v35 = vadd.f32 %v7481_v10, %v12695_v63  ;;  %v3103_v60 = vpop.f32.mrb[59].mxu1  ;;  %v12704_v63 = vld [vmem:[#allocation52_spill] sm:$0xff] }
 0x824   :  { %v3104_v31 = vadd.f32 %v3103_v60, %v12697_v18 }
 0x825   :  { %v3198_v47 = vsel %vm12490_vm3, %v3112_v35, -inf }
 0x826   :  { %v3210_v3 = vmax.f32 %v3109_v49, %v3198_v47  ;;  %v3196_v22 = vsel %vm12490_vm3, %v3104_v31, -inf }
 0x827   :  { %v3203_v61 = vmax.f32 %v3101_v30, %v3196_v22 }
 0x828   :  { %v3211_v44 = vrot.slane %v3210_v3, 4  ;;  %v7484_v34 = vpop.f32.mrb[60].mxu1 }
 0x829   :  { %v3204_v32 = vrot.slane %v3203_v61, 4  ;;  %v3116_v51 = vpop.f32.mrb[61].mxu1  ;;  %v10356_v26 = vadd.f32 %v7484_v34, %v12700_v7 }
 0x82a   :  { %v3212_v46 = vmax.f32 %v3210_v3, %v3211_v44  ;;  %v7485_v52 = vpop.f32.mrb[62].mxu1  ;;  %v10360_v57 = vadd.f32 %v3116_v51, %v12702_v8 }
 0x82b   :  { %v3205_v38 = vmax.f32 %v3203_v61, %v3204_v32  ;;  %v3128_v42 = vadd.f32 %v7485_v52, %v12699_v24  ;;  %v3119_v40 = vpop.f32.mrb[63].mxu1 }
 0x82c   :  { %v3213_v23 = vrot.slane %v3212_v46, 2  ;;  %v3120_v4 = vadd.f32 %v3119_v40, %v12701_v27 }
 0x82d   :  { %v3206_v25 = vrot.slane %v3205_v38, 2  ;;  %v10364_v12 = vsel %vm12490_vm3, %v3128_v42, -inf }
 0x82e   :  { %v3214_v54 = vmax.f32 %v3212_v46, %v3213_v23  ;;  %v3224_v19 = vmax.f32 %v10356_v26, %v10364_v12  ;;  %v10370_v14 = vsel %vm12490_vm3, %v3120_v4, -inf  ;;  %v12706_v46 = vld [vmem:[#allocation51_spill] sm:$0xff] }
 0x82f   :  { %v3207_v9 = vmax.f32 %v3205_v38, %v3206_v25  ;;  %v3217_v55 = vmax.f32 %v10360_v57, %v10370_v14  ;;  %v12707_v25 = vld [vmem:[#allocation57_spill] sm:$0xff] }
 0x830   :  { %v3215_v41 = vrot.slane %v3214_v54, 1  ;;  %v3225_v0 = vrot.slane %v3224_v19, 4  ;;  %v7488_v6 = vpop.f32.mrb[64].mxu1 }
 0x831   :  { %v3208_v62 = vrot.slane %v3207_v9, 1  ;;  %v3218_v33 = vrot.slane %v3217_v55, 4  ;;  %v3132_v11 = vpop.f32.mrb[65].mxu1  ;;  %v10375_v10 = vadd.f32 %v7488_v6, %v12703_v50 }
 0x832   :  { %v3216_v13 = vmax.f32 %v3214_v54, %v3215_v41  ;;  %v3226_v16 = vmax.f32 %v3224_v19, %v3225_v0  ;;  %v7489_v28 = vpop.f32.mrb[66].mxu1  ;;  %v10384_v52 = vadd.f32 %v3132_v11, %v12706_v46  ;;  %v2933_v19 = vpop.permute.xlu0 %2932  ;;  %v12709_v11 = vld [vmem:[#allocation56_spill] sm:$0xff] }
 0x833   :  { %v3209_v37 = vmax.f32 %v3207_v9, %v3208_v62  ;;  %v3219_v15 = vmax.f32 %v3217_v55, %v3218_v33  ;;  %v3144_v35 = vadd.f32 %v7489_v28, %v12704_v63  ;;  %v3135_v60 = vpop.f32.mrb[67].mxu1  ;;  %v12708_v62 = vld [vmem:[#allocation55_spill] sm:$0xff] }
 0x834   :  { %v3233_v1 = vsub.f32 %v3109_v49, %v3216_v13  ;;  %v3234_v18 = vsub.f32 %v3198_v47, %v3216_v13  ;;  %v3227_v31 = vrot.slane %v3226_v16, 2  ;;  %v3136_v3 = vadd.f32 %v3135_v60, %v12705_v53 }
 0x835   :  { %v3231_v61 = vsub.f32 %v3101_v30, %v3209_v37  ;;  %v3232_v44 = vsub.f32 %v3196_v22, %v3209_v37  ;;  %v3220_v34 = vrot.slane %v3219_v15, 2  ;;  %v10381_v32 = vsel %vm12490_vm3, %v3144_v35, -inf }
 0x836   :  { %v3228_v51 = vmax.f32 %v3226_v16, %v3227_v31  ;;  %v3537_v38 = vmax.f32 %v10375_v10, %v10381_v32  ;;  %v10390_v42 = vsel %vm12490_vm3, %v3136_v3, -inf  ;;  %v3243_v7 = vmul.f32 1.442695, %v3233_v1  ;;  %v12710_v1 = vld [vmem:[#allocation54_spill] sm:$0xff]  ;;  %v2938_v31 = vpop.permute.xlu1 %2937 }
 0x837   :  { %v3239_v24 = vmul.f32 1.442695, %v3231_v61  ;;  %v3241_v49 = vmul.f32 1.442695, %v3232_v44  ;;  %v3221_v47 = vmax.f32 %v3219_v15, %v3220_v34  ;;  %v3530_v40 = vmax.f32 %v10384_v52, %v10390_v42 }
 0x838   :  { %v3229_v30 = vrot.slane %v3228_v51, 1  ;;  %v3538_v22 = vrot.slane %v3537_v38, 4  ;;  %v7492_v23 = vpop.f32.mrb[68].mxu1  ;;  %v3245_v27 = vmul.f32 1.442695, %v3234_v18 }
 0x839   :  { %v3222_v4 = vrot.slane %v3221_v47, 1  ;;  %v10395_v8 = vadd.f32 %v7492_v23, %v12707_v25  ;;  %v3148_v54 = vpop.f32.mrb[69].mxu1  ;;  %8107 = vpow2.f32 %v3239_v24  ;;  %v3531_v41 = vrot.slane %v3530_v40, 4 }
 0x83a   :  { %v3230_v9 = vmax.f32 %v3228_v51, %v3229_v30  ;;  %v3539_v55 = vmax.f32 %v3537_v38, %v3538_v22  ;;  %v7493_v0 = vpop.f32.mrb[70].mxu1  ;;  %8109 = vpow2.f32 %v3241_v49  ;;  %v10398_v33 = vadd.f32 %v3148_v54, %v12708_v62 }
 0x83b   :  { %v3223_v6 = vmax.f32 %v3221_v47, %v3222_v4  ;;  %v3160_v13 = vadd.f32 %v7493_v0, %v12709_v11  ;;  %v3151_v16 = vpop.f32.mrb[71].mxu1  ;;  %v3532_v50 = vmax.f32 %v3530_v40, %v3531_v41  ;;  %8111 = vpow2.f32 %v3243_v7 }
 0x83c   :  { %v3237_v28 = vsub.f32 %v10356_v26, %v3230_v9  ;;  %v3238_v37 = vsub.f32 %v10364_v12, %v3230_v9  ;;  %v3540_v15 = vrot.slane %v3539_v55, 2  ;;  %v3152_v18 = vadd.f32 %v3151_v16, %v12710_v1  ;;  %v2948_v9 = vpop.permute.xlu1 %2947 }
 0x83d   :  { %v3235_v63 = vsub.f32 %v10360_v57, %v3223_v6  ;;  %v3236_v35 = vsub.f32 %v10370_v14, %v3223_v6  ;;  %v10407_v60 = vsel %vm12490_vm3, %v3160_v13, -inf  ;;  %v3533_v44 = vrot.slane %v3532_v50, 2  ;;  %v2943_v14 = vpop.permute.xlu0 %2942 }
 0x83e   :  { %v3251_v53 = vmul.f32 1.442695, %v3237_v28  ;;  %v3253_v3 = vmul.f32 1.442695, %v3238_v37  ;;  %v3541_v61 = vmax.f32 %v3539_v55, %v3540_v15  ;;  %v3551_v12 = vmax.f32 %v10395_v8, %v10407_v60 }
 0x83f   :  { %v3247_v26 = vmul.f32 1.442695, %v3235_v63  ;;  %v10414_v57 = vsel %vm12490_vm3, %v3152_v18, -inf  ;;  %8113 = vpow2.f32 %v3245_v27  ;;  %v3534_v51 = vmax.f32 %v3532_v50, %v3533_v44 }
 0x840   :  { %v3542_v34 = vrot.slane %v3541_v61, 1  ;;  %v3544_v46 = vmax.f32 %v10398_v33, %v10414_v57  ;;  %v7496_v38 = vpop.f32.mrb[72].mxu1  ;;  %8115 = vpow2.f32 %v3251_v53  ;;  %v3552_v24 = vrot.slane %v3551_v12, 4 }
 0x841   :  { %v10418_v49 = vadd.f32 %v7496_v38, %v2943_v14  ;;  %v3164_v47 = vpop.f32.mrb[73].mxu1  ;;  %8117 = vpow2.f32 %v3253_v3  ;;  %v3535_v22 = vrot.slane %v3534_v51, 1  ;;  %v3249_v7 = vmul.f32 1.442695, %v3236_v35  ;;  %v2953_v35 = vpop.permute.xlu0 %2952 }
 0x842   :  { %v3543_v30 = vmax.f32 %v3541_v61, %v3542_v34  ;;  %v3545_v40 = vrot.slane %v3544_v46, 4  ;;  %v7497_v23 = vpop.f32.mrb[74].mxu1  ;;  %8119 = vpow2.f32 %v3247_v26  ;;  %v3553_v4 = vmax.f32 %v3551_v12, %v3552_v24 }
 0x843   :  { %v3859_v27 = vand.u32 2147483647, %v10418_v49  ;;  %v3167_v25 = vpop.f32.mrb[75].mxu1  ;;  %v8108_v54 = vpop.eup %8107  ;;  %v3536_v0 = vmax.f32 %v3534_v51, %v3535_v22  ;;  %v10423_v16 = vadd.f32 %v3164_v47, %v2933_v19  ;;  %v10425_v28 = vadd.f32 %v7497_v23, %v2948_v9 }
 0x844   :  { %v3560_v55 = vsub.f32 %v10375_v10, %v3543_v30  ;;  %v3561_v41 = vsub.f32 %v10381_v32, %v3543_v30  ;;  %v3546_v6 = vmax.f32 %v3544_v46, %v3545_v40  ;;  %v8110_v62 = vpop.eup %8109  ;;  %v3554_v11 = vrot.slane %v3553_v4, 2  ;;  %v2958_v22 = vpop.permute.xlu1 %2957 }
 0x845   :  { %v3867_v13 = vsub.f32 0.0, %v3859_v27  ;;  %v3558_v50 = vsub.f32 %v10384_v52, %v3536_v0  ;;  %v3559_v63 = vsub.f32 %v10390_v42, %v3536_v0  ;;  %8121 = vpow2.f32 %v3249_v7  ;;  %v10430_v19 = vpop.eup %8111  ;;  %v2963_v27 = vpop.permute.xlu0 %2962 }
 0x846   :  { %v3570_v37 = vmul.f32 1.442695, %v3560_v55  ;;  %v3572_v15 = vmul.f32 1.442695, %v3561_v41  ;;  %v3555_v10 = vmax.f32 %v3553_v4, %v3554_v11  ;;  %v3547_v1 = vrot.slane %v3546_v6, 2 }
 0x847   :  { %v3877_v32 = vmul.f32 1.442695, %v3867_v13  ;;  %v3566_v18 = vmul.f32 1.442695, %v3558_v50  ;;  %v3568_v53 = vmul.f32 1.442695, %v3559_v63  ;;  %v10433_v14 = vadd.f32 %v3167_v25, %v2938_v31 }
 0x848   :  { %8123 = vpow2.f32 %v3570_v37  ;;  %v3857_v3 = vand.u32 2147483647, %v10423_v16  ;;  %v3556_v61 = vrot.slane %v3555_v10, 1  ;;  %v3548_v44 = vmax.f32 %v3546_v6, %v3547_v1  ;;  %v7500_v26 = vpop.f32.mrb[76].mxu1 }
 0x849   :  { %8125 = vpow2.f32 %v3572_v15  ;;  %v8114_v12 = vpop.eup %8113  ;;  %v3860_v42 = vand.u32 2147483647, %v10425_v28  ;;  %v3180_v34 = vpop.f32.mrb[77].mxu1  ;;  %v7873_v24 = vpack.c.bf16 %v8110_v62, %v8108_v54  ;;  %v3858_v55 = vand.u32 2147483647, %v10433_v14 }
 0x84a   :  { %8127 = vpow2.f32 %v3566_v18  ;;  %v3865_v52 = vsub.f32 0.0, %v3857_v3  ;;  %v10435_v51 = vpop.eup %8115  ;;  %v3557_v46 = vmax.f32 %v3555_v10, %v3556_v61  ;;  %v3549_v38 = vrot.slane %v3548_v44, 1  ;;  %v7501_v47 = vpop.f32.mrb[78].mxu1 }
 0x84b   :  { %8129 = vpow2.f32 %v3568_v53  ;;  %v10437_v30 = vpop.eup %8117  ;;  %v3868_v23 = vsub.f32 0.0, %v3860_v42  ;;  %v3183_v7 = vpop.f32.mrb[79].mxu1  ;;  %7874 = vmatpush3.bf16.msra.mxu0 %v7873_v24  ;;  %v10442_v41 = vadd.f32 %v7500_v26, %v2963_v27  ;;  %v10444_v0 = vadd.f32 %v3180_v34, %v2953_v35 }
 0x84c   :  { %8131 = vpow2.f32 %v3877_v32  ;;  %v3873_v40 = vmul.f32 1.442695, %v3865_v52  ;;  %v8120_v4 = vpop.eup %8119  ;;  %v3564_v31 = vsub.f32 %v10395_v8, %v3557_v46  ;;  %v3565_v25 = vsub.f32 %v10407_v60, %v3557_v46  ;;  %7875 = vmatprep.subr.bf16.mxu0 %v12686_v45  ;;  %v2968_v10 = vpop.permute.xlu1 %2967 }
 0x84d   :  { %v3550_v9 = vmax.f32 %v3548_v44, %v3549_v38  ;;  %v3879_v54 = vmul.f32 1.442695, %v3868_v23  ;;  %v3866_v60 = vsub.f32 0.0, %v3858_v55  ;;  %v3863_v13 = vand.u32 2147483647, %v10442_v41 }
 0x84e   :  { %8133 = vpow2.f32 %v3873_v40  ;;  %v3578_v6 = vmul.f32 1.442695, %v3564_v31  ;;  %v3580_v62 = vmul.f32 1.442695, %v3565_v25  ;;  %v3861_v32 = vand.u32 2147483647, %v10444_v0 }
 0x84f   :  { %v3562_v11 = vsub.f32 %v10398_v33, %v3550_v9  ;;  %v3563_v8 = vsub.f32 %v10414_v57, %v3550_v9  ;;  %8135 = vpow2.f32 %v3879_v54  ;;  %v8122_v37 = vpop.eup %8121  ;;  %v3875_v35 = vmul.f32 1.442695, %v3866_v60 }
 0x850   :  { %8137 = vpow2.f32 %v3578_v6  ;;  %v3871_v1 = vsub.f32 0.0, %v3863_v13  ;;  %v10451_v33 = vadd.f32 %v7501_v47, %v2968_v10  ;;  %v7876_v57 = vpack.c.bf16 %v8114_v12, %v10430_v19  ;;  %v8332_v6 = vld [vmem:[%s12452_s1] sm:$0xff] }
 0x851   :  { %v3574_v15 = vmul.f32 1.442695, %v3562_v11  ;;  %v3576_v50 = vmul.f32 1.442695, %v3563_v8  ;;  %8139 = vpow2.f32 %v3580_v62  ;;  %v10454_v53 = vadd.f32 %v3183_v7, %v2958_v22  ;;  %v8333_v13 = vld [vmem:[%s12460_s2] sm:$0xff] }
 0x852   :  { %v8124_v63 = vpop.eup %8123  ;;  %v3885_v61 = vmul.f32 1.442695, %v3871_v1  ;;  %v3869_v44 = vsub.f32 0.0, %v3861_v32  ;;  %v7879_v26 = vpack.c.bf16 %v8122_v37, %v8120_v4  ;;  %v3864_v42 = vand.u32 2147483647, %v10451_v33  ;;  %7877 = vmatpush3.bf16.msra.mxu0 %v7876_v57  ;;  %v8334_v1 = vld [vmem:[%s12460_s2 + $0x8] sm:$0xff] }
 0x853   :  { %v8126_v18 = vpop.eup %8125  ;;  %8141 = vpow2.f32 %v3574_v15  ;;  %v3862_v38 = vand.u32 2147483647, %v10454_v53  ;;  %7878 = vmatprep.subr.bf16.mxu0 %v12686_v45  ;;  %v7882_v19 = vpack.c.bf16 %v10437_v30, %v10435_v51  ;;  %v3851_v10 = vmax.f32 %v10418_v49, 0.0 }
 0x854   :  { %v8128_v3 = vpop.eup %8127  ;;  %8143 = vpow2.f32 %v3576_v50  ;;  %v3881_v46 = vmul.f32 1.442695, %v3869_v44  ;;  %v3872_v24 = vsub.f32 0.0, %v3864_v42  ;;  %v7888_v22 = vpack.c.bf16 %v8126_v18, %v8124_v63  ;;  %v8335_v42 = vld [vmem:[%s12460_s2 + $0x10] sm:$0xff] }
 0x855   :  { %v8130_v52 = vpop.eup %8129  ;;  %8145 = vpow2.f32 %v3875_v35  ;;  %v3870_v23 = vsub.f32 0.0, %v3862_v38  ;;  %v3852_v49 = vmax.f32 %v10425_v28, 0.0 }
 0x856   :  { %v8132_v34 = vpop.eup %8131  ;;  %8147 = vpow2.f32 %v3885_v61  ;;  %v7885_v47 = vpack.c.bf16 %v8130_v52, %v8128_v3  ;;  %v3887_v4 = vmul.f32 1.442695, %v3872_v24  ;;  %7880 = vmatpush3.bf16.msra.mxu0 %v7879_v26 }
 0x857   :  { %v3891_v12 = vadd.f32 1.0, %v8132_v34  ;;  %8149 = vpow2.f32 %v3881_v46  ;;  %v3883_v31 = vmul.f32 1.442695, %v3870_v23  ;;  %7881 = vmatprep.subr.bf16.mxu0 %v12686_v45  ;;  %v3849_v34 = vmax.f32 %v10423_v16, 0.0  ;;  %v8336_v16 = vld [vmem:[%s12460_s2 + $0x18] sm:$0xff] }
 0x858   :  { %v8134_v40 = vpop.eup %8133  ;;  %7886 = vmatpush3.bf16.msra.mxu1 %v7885_v47 }
 0x859   :  { %8151 = vlog2.f32 %v3891_v12  ;;  %v3889_v7 = vadd.f32 1.0, %v8134_v40  ;;  %v8136_v27 = vpop.eup %8135  ;;  %7887 = vmatprep.subr.bf16.mxu1 %v12686_v45 }
 0x85a   :  { %v8138_v25 = vpop.eup %8137  ;;  %v3892_v51 = vadd.f32 1.0, %v8136_v27  ;;  %7883 = vmatpush3.bf16.msra.mxu0 %v7882_v19 }
 0x85b   :  { %8153 = vlog2.f32 %v3889_v7  ;;  %v8140_v30 = vpop.eup %8139  ;;  %7636 = vmatprep.subr.mxu0 %v8332_v6 }
 0x85c   :  { %8155 = vpow2.f32 %v3887_v4  ;;  %7889 = vmatpush3.bf16.msra.mxu1 %v7888_v22  ;;  %v7894_v55 = vpack.c.bf16 %v8140_v30, %v8138_v25  ;;  %v3850_v22 = vmax.f32 %v10433_v14, 0.0  ;;  %v3855_v14 = vmax.f32 %v10442_v41, 0.0 }
 0x85d   :  { %v8142_v9 = vpop.eup %8141  ;;  %8157 = vlog2.f32 %v3892_v51  ;;  %7890 = vmatprep.subr.bf16.mxu1 %v12686_v45  ;;  %7519 = vmatmul.mubr.msk.f32.vlgmr.msra.gmra.mrb[84].mxu0 %vm12494_vm1, %v8333_v13 }
 0x85e   :  { %v8144_v54 = vpop.eup %8143  ;;  %8159 = vpow2.f32 %v3883_v31  ;;  %7521 = vmatprep.mubr.msk.f32.mxu0 %vm12491_vm2, %v12604_v48  ;;  %7637 = vmatpush3.msra.mxu0 %v8332_v6 }
 0x85f   :  { %v8146_v62 = vpop.eup %8145  ;;  %v7891_v11 = vpack.c.bf16 %v8144_v54, %v8142_v9  ;;  %v3853_v9 = vmax.f32 %v10444_v0, 0.0  ;;  %v8337_v54 = vld [vmem:[%s12460_s2 + $0x20] sm:$0xff] }
 0x860   :  { %v8148_v8 = vpop.eup %8147  ;;  %v3890_v60 = vadd.f32 1.0, %v8146_v62 }
 0x861   :  { %v3895_v37 = vadd.f32 1.0, %v8148_v8  ;;  %7892 = vmatpush3.bf16.msra.mxu1 %v7891_v11  ;;  %v8150_v15 = vpop.eup %8149  ;;  %7522 = vmatmul.mubr.msk.f32.gmra.mrb[86].mxu0 %vm12494_vm1, %v8334_v1 }
 0x862   :  { %8161 = vlog2.f32 %v3890_v60  ;;  %7893 = vmatprep.subr.bf16.mxu1 %v12686_v45  ;;  %v3893_v63 = vadd.f32 1.0, %v8150_v15  ;;  %7524 = vmatprep.mubr.msk.f32.mxu0 %vm12491_vm2, %v12604_v48  ;;  %v8338_v15 = vld [vmem:[%s12460_s2 + $0x28] sm:$0xff]  ;;  %v3946_v45 = vmax.f32 %v10221_v29, 0.0 }
 0x863   :  { %v8152_v50 = vpop.eup %8151  ;;  %8163 = vlog2.f32 %v3895_v37 }
 0x864   :  { %v3902_v35 = vmul.f32 0.6931472, %v8152_v50  ;;  %8165 = vlog2.f32 %v3893_v63 }
 0x865   :  { %v8154_v32 = vpop.eup %8153  ;;  %7895 = vmatpush3.bf16.msra.mxu1 %v7894_v55  ;;  %7525 = vmatmul.mubr.msk.f32.gmra.mrb[88].mxu0 %vm12494_vm1, %v8335_v42 }
 0x866   :  { %v8156_v18 = vpop.eup %8155  ;;  %v3915_v57 = vadd.f32 %v3902_v35, %v3851_v10  ;;  %v3898_v61 = vmul.f32 0.6931472, %v8154_v32  ;;  %7527 = vmatprep.mubr.msk.f32.mxu0 %vm12491_vm2, %v12604_v48 }
 0x867   :  { %v8158_v3 = vpop.eup %8157  ;;  %v3896_v44 = vadd.f32 1.0, %v8156_v18 }
 0x868   :  { %v8160_v26 = vpop.eup %8159  ;;  %v3904_v52 = vmul.f32 0.6931472, %v8158_v3  ;;  %7586 = vmatmul.mubr.msk.f32.vlgmr.msra.gmra.mrb[80].mxu1 %vm12494_vm1, %v8333_v13  ;;  %v10492_v28 = vadd.f32 0.001, %v3915_v57  ;;  %v3913_v19 = vadd.f32 %v3898_v61, %v3849_v34  ;;  %v3856_v13 = vmax.f32 %v10451_v33, 0.0 }
 0x869   :  { %8167 = vlog2.f32 %v3896_v44  ;;  %v3894_v46 = vadd.f32 1.0, %v8160_v26  ;;  %7588 = vmatprep.mubr.msk.f32.mxu1 %vm12491_vm2, %v12604_v48  ;;  %7528 = vmatmul.mubr.msk.f32.gmra.mrb[90].mxu0 %vm12494_vm1, %v8336_v16  ;;  %v3854_v33 = vmax.f32 %v10454_v53, 0.0  ;;  %v8339_v53 = vld [vmem:[%s12460_s2 + $0x30] sm:$0xff] }
 0x86a   :  { %v3916_v38 = vadd.f32 %v3904_v52, %v3852_v49  ;;  %7530 = vmatprep.mubr.msk.f32.mxu0 %vm12491_vm2, %v12604_v48  ;;  %v3931_v23 = vrot.slane %v10492_v28, 1  ;;  %v10508_v31 = vadd.f32 0.001, %v3913_v19 }
 0x86b   :  { %8169 = vlog2.f32 %v3894_v46  ;;  %v8340_v46 = vld [vmem:[%s12460_s2 + $0x38] sm:$0xff] }
 0x86c   :  { %v8162_v12 = vpop.eup %8161  ;;  %v10494_v24 = vadd.f32 0.001, %v3916_v38  ;;  %7589 = vmatmul.mubr.msk.f32.gmra.mrb[82].mxu1 %vm12494_vm1, %v8334_v1  ;;  %v3929_v11 = vrot.slane %v10508_v31, 1 }
 0x86d   :  { %v8164_v47 = vpop.eup %8163  ;;  %v3900_v40 = vmul.f32 0.6931472, %v8162_v12  ;;  %7591 = vmatprep.mubr.msk.f32.mxu1 %vm12491_vm2, %v12604_v48  ;;  %7531 = vmatmul.mubr.msk.f32.gmra.mrb[92].mxu0 %vm12494_vm1, %v8337_v54  ;;  %v8341_v12 = vld [vmem:[%s12460_s2 + $0x40] sm:$0xff] }
 0x86e   :  { %v3932_v7 = vrot.slane %v10494_v24, 1  ;;  %v3910_v4 = vmul.f32 0.6931472, %v8164_v47  ;;  %v8166_v27 = vpop.eup %8165  ;;  %7533 = vmatprep.mubr.msk.f32.mxu0 %vm12491_vm2, %v12604_v48  ;;  %v8343_v47 = vld [vmem:[%s12460_s2 + $0x50] sm:$0xff] }
 0x86f   :  { %v3914_v25 = vadd.f32 %v3900_v40, %v3850_v22  ;;  %v3906_v55 = vmul.f32 0.6931472, %v8166_v27  ;;  %v8344_v22 = vld [vmem:[%s12460_s2 + $0x58] sm:$0xff]  ;;  %v8345_v40 = vld [vmem:[%s12460_s2 + $0x60] sm:$0xff] }
 0x870   :  { %v10512_v30 = vsel %vm12489_vm4, %v3931_v23, %v3932_v7  ;;  %7592 = vmatmul.mubr.msk.f32.gmra.mrb[84].mxu1 %vm12494_vm1, %v8335_v42  ;;  %v3919_v41 = vadd.f32 %v3910_v4, %v3855_v14  ;;  %v8348_v4 = vld [vmem:[%s12460_s2 + $0x78] sm:$0xff]  ;;  %v6761_v27 = vld [vmem:[%s12453_s3 + $0x80] sm:$0xff]  ;;  %v6762_v14 = vld [vmem:[%s12453_s3 + $0x88] sm:$0xff] }
 0x871   :  { %12712 = vst [vmem:[#allocation84_spill] sm:$0xff] %v10512_v30  ;;  %v10521_v6 = vadd.f32 0.001, %v3914_v25  ;;  %7594 = vmatprep.mubr.msk.f32.mxu1 %vm12491_vm2, %v12604_v48  ;;  %v3917_v62 = vadd.f32 %v3906_v55, %v3853_v9  ;;  %7534 = vmatmul.mubr.msk.f32.gmra.mrb[94].mxu0 %vm12494_vm1, %v8338_v15  ;;  %v8349_v25 = vld [vmem:[%s12460_s2 + $0x80] sm:$0xff]  ;;  %v6763_v9 = vld [vmem:[%s12453_s3 + $0x90] sm:$0xff]  ;;  %v6764_v55 = vld [vmem:[%s12453_s3 + $0x98] sm:$0xff] }
 0x872   :  { %7536 = vmatprep.mubr.msk.f32.mxu0 %vm12491_vm2, %v12604_v48  ;;  %v10550_v35 = vadd.f32 0.001, %v3919_v41  ;;  %v6766_v41 = vld [vmem:[%s12453_s3 + $0xa8] sm:$0xff] }
 0x873   :  { %v8168_v0 = vpop.eup %8167  ;;  %v3930_v8 = vrot.slane %v10521_v6, 1  ;;  %v10529_v60 = vadd.f32 0.001, %v3917_v62  ;;  %v6767_v62 = vld [vmem:[%s12453_s3 + $0xb0] sm:$0xff] }
 0x874   :  { %v3912_v37 = vmul.f32 0.6931472, %v8168_v0  ;;  %7595 = vmatmul.mubr.msk.f32.gmra.mrb[86].mxu1 %vm12494_vm1, %v8336_v16  ;;  %v3935_v44 = vrot.slane %v10550_v35, 1  ;;  %v8342_v16 = vld [vmem:[%s12460_s2 + $0x48] sm:$0xff]  ;;  %v6768_v0 = vld [vmem:[%s12453_s3 + $0xb8] sm:$0xff] }
 0x875   :  { %v8170_v50 = vpop.eup %8169  ;;  %v10539_v63 = vsel %vm12489_vm4, %v3930_v8, %v3931_v23  ;;  %v10543_v10 = vsel %vm12489_vm4, %v3929_v11, %v3930_v8  ;;  %7597 = vmatprep.mubr.msk.f32.mxu1 %vm12491_vm2, %v12604_v48  ;;  %v3933_v1 = vrot.slane %v10529_v60, 1  ;;  %7537 = vmatmul.mubr.msk.f32.gmra.mrb[96].mxu0 %vm12494_vm1, %v8339_v53  ;;  %v8346_v23 = vld [vmem:[%s12460_s2 + $0x68] sm:$0xff] }
 0x876   :  { %12713 = vst [vmem:[#allocation86_spill] sm:$0xff] %v10539_v63  ;;  %v3920_v32 = vadd.f32 %v3912_v37, %v3856_v13  ;;  %v3908_v18 = vmul.f32 0.6931472, %v8170_v50  ;;  %7539 = vmatprep.mubr.msk.f32.mxu0 %vm12491_vm2, %v12604_v48 }
 0x877   :  { %v10555_v57 = vsel %vm12489_vm4, %v3932_v7, %v3933_v1  ;;  %v8347_v7 = vld [vmem:[%s12460_s2 + $0x70] sm:$0xff] }
 0x878   :  { %12714 = vst [vmem:[#allocation101_spill] sm:$0xff] %v10555_v57  ;;  %v10557_v3 = vadd.f32 0.001, %v3920_v32  ;;  %v3918_v61 = vadd.f32 %v3908_v18, %v3854_v33  ;;  %7598 = vmatmul.mubr.msk.f32.gmra.mrb[88].mxu1 %vm12494_vm1, %v8337_v54  ;;  %v6765_v54 = vld [vmem:[%s12453_s3 + $0xa0] sm:$0xff] }
 0x879   :  { %7600 = vmatprep.mubr.msk.f32.mxu1 %vm12491_vm2, %v12604_v48  ;;  %7540 = vmatmul.mubr.msk.f32.gmra.mrb[98].mxu0 %vm12494_vm1, %v8340_v46 }
 0x87a   :  { %v3936_v26 = vrot.slane %v10557_v3, 1  ;;  %v10570_v49 = vadd.f32 0.001, %v3918_v61  ;;  %7542 = vmatprep.mubr.msk.f32.mxu0 %vm12491_vm2, %v12604_v48 }
 0x87c   :  { %v10574_v52 = vsel %vm12489_vm4, %v3935_v44, %v3936_v26  ;;  %v10578_v42 = vsel %vm12489_vm4, %v3936_v26, %v3929_v11  ;;  %v3934_v34 = vrot.slane %v10570_v49, 1  ;;  %7601 = vmatmul.mubr.msk.f32.gmra.mrb[90].mxu1 %vm12494_vm1, %v8338_v15 }
 0x87d   :  { %12715 = vst [vmem:[#allocation102_spill] sm:$0xff] %v10574_v52  ;;  %12716 = vst [vmem:[#allocation100_spill] sm:$0xff] %v10578_v42  ;;  %7603 = vmatprep.mubr.msk.f32.mxu1 %vm12491_vm2, %v12604_v48  ;;  %7543 = vmatmul.mubr.msk.f32.gmra.mrb[100].mxu0 %vm12494_vm1, %v8341_v12 }
 0x87e   :  { %v10592_v38 = vsel %vm12489_vm4, %v3934_v34, %v3935_v44  ;;  %v10596_v19 = vsel %vm12489_vm4, %v3933_v1, %v3934_v34  ;;  %7545 = vmatprep.mubr.msk.f32.mxu0 %vm12491_vm2, %v12604_v48 }
 0x87f   :  { %12717 = vst [vmem:[#allocation85_spill] sm:$0xff] %v10592_v38  ;;  %12718 = vst [vmem:[#allocation88_spill] sm:$0xff] %v10596_v19  ;;  %v10780_v19 = vmin.f32 %v3946_v45, 1.0 }
 0x880   :  { %7604 = vmatmul.mubr.msk.f32.gmra.mrb[92].mxu1 %vm12494_vm1, %v8339_v53 }
 0x881   :  { %7606 = vmatprep.mubr.msk.f32.mxu1 %vm12491_vm2, %v12604_v48  ;;  %7546 = vmatmul.mubr.msk.f32.gmra.mrb[102].mxu0 %vm12494_vm1, %v8342_v16  ;;  %12720 = vst [vmem:[#allocation109_spill] sm:$0xff] %v10780_v19 }
 0x882   :  { %7548 = vmatprep.mubr.msk.f32.mxu0 %vm12491_vm2, %v12604_v48 }
 0x884   :  { %7607 = vmatmul.mubr.msk.f32.gmra.mrb[94].mxu1 %vm12494_vm1, %v8340_v46 }
 0x885   :  { %7609 = vmatprep.mubr.msk.f32.mxu1 %vm12491_vm2, %v12604_v48  ;;  %7549 = vmatmul.mubr.msk.f32.gmra.mrb[104].mxu0 %vm12494_vm1, %v8343_v47 }
 0x886   :  { %7551 = vmatprep.mubr.msk.f32.mxu0 %vm12491_vm2, %v12604_v48 }
 0x888   :  { %7610 = vmatmul.mubr.msk.f32.gmra.mrb[96].mxu1 %vm12494_vm1, %v8341_v12 }
 0x889   :  { %7612 = vmatprep.mubr.msk.f32.mxu1 %vm12491_vm2, %v12604_v48  ;;  %7552 = vmatmul.mubr.msk.f32.gmra.mrb[106].mxu0 %vm12494_vm1, %v8344_v22 }
 0x88a   :  { %7554 = vmatprep.mubr.msk.f32.mxu0 %vm12491_vm2, %v12604_v48 }
 0x88c   :  { %7613 = vmatmul.mubr.msk.f32.gmra.mrb[98].mxu1 %vm12494_vm1, %v8342_v16 }
 0x88d   :  { %7615 = vmatprep.mubr.msk.f32.mxu1 %vm12491_vm2, %v12604_v48  ;;  %7555 = vmatmul.mubr.msk.f32.gmra.mrb[108].mxu0 %vm12494_vm1, %v8345_v40 }
 0x88e   :  { %7557 = vmatprep.mubr.msk.f32.mxu0 %vm12491_vm2, %v12604_v48 }
 0x890   :  { %7616 = vmatmul.mubr.msk.f32.gmra.mrb[100].mxu1 %vm12494_vm1, %v8343_v47 }
 0x891   :  { %7618 = vmatprep.mubr.msk.f32.mxu1 %vm12491_vm2, %v12604_v48  ;;  %7558 = vmatmul.mubr.msk.f32.gmra.mrb[110].mxu0 %vm12494_vm1, %v8346_v23 }
 0x892   :  { %7560 = vmatprep.mubr.msk.f32.mxu0 %vm12491_vm2, %v12604_v48 }
 0x894   :  { %7619 = vmatmul.mubr.msk.f32.gmra.mrb[102].mxu1 %vm12494_vm1, %v8344_v22 }
 0x895   :  { %7621 = vmatprep.mubr.msk.f32.mxu1 %vm12491_vm2, %v12604_v48  ;;  %7561 = vmatmul.mubr.msk.f32.gmra.mrb[112].mxu0 %vm12494_vm1, %v8347_v7 }
 0x896   :  { %7563 = vmatprep.mubr.msk.f32.mxu0 %vm12491_vm2, %v12604_v48 }
 0x898   :  { %7622 = vmatmul.mubr.msk.f32.gmra.mrb[104].mxu1 %vm12494_vm1, %v8345_v40 }
 0x899   :  { %7624 = vmatprep.mubr.msk.f32.mxu1 %vm12491_vm2, %v12604_v48  ;;  %7564 = vmatmul.mubr.msk.f32.gmra.mrb[114].mxu0 %vm12494_vm1, %v8348_v4 }
 0x89a   :  { %7566 = vmatprep.mubr.msk.f32.mxu0 %vm12491_vm2, %v12604_v48 }
 0x89c   :  { %7625 = vmatmul.mubr.msk.f32.gmra.mrb[106].mxu1 %vm12494_vm1, %v8346_v23 }
 0x89d   :  { %7627 = vmatprep.mubr.msk.f32.mxu1 %vm12491_vm2, %v12604_v48  ;;  %7567 = vmatmul.mubr.msk.f32.gmra.mrb[116].mxu0 %vm12494_vm1, %v8349_v25 }
 0x89e   :  { %7638 = vmatprep.mubr.msk.f32.mxu0 %vm131_vm0, %v6761_v27 }
 0x8a0   :  { %7628 = vmatmul.mubr.msk.f32.gmra.mrb[108].mxu1 %vm12494_vm1, %v8347_v7 }
 0x8a1   :  { %7630 = vmatprep.mubr.msk.f32.mxu1 %vm12491_vm2, %v12604_v48  ;;  %7639 = vmatmul.mubr.msk.f32.vlgmr.msra.gmra.mrb[118].mxu0 %vm131_vm0, %v6762_v14 }
 0x8a2   :  { %7641 = vmatprep.mubr.msk.f32.mxu0 %vm131_vm0, %v6763_v9 }
 0x8a4   :  { %7631 = vmatmul.mubr.msk.f32.gmra.mrb[110].mxu1 %vm12494_vm1, %v8348_v4 }
 0x8a5   :  { %7633 = vmatprep.mubr.msk.f32.mxu1 %vm12491_vm2, %v12604_v48  ;;  %7642 = vmatmul.mubr.msk.f32.gmra.mrb[120].mxu0 %vm131_vm0, %v6764_v55 }
 0x8a6   :  { %7644 = vmatprep.mubr.msk.f32.mxu0 %vm131_vm0, %v6765_v54 }
 0x8a8   :  { %7634 = vmatmul.mubr.msk.f32.gmra.mrb[112].mxu1 %vm12494_vm1, %v8349_v25 }
 0x8a9   :  { %7645 = vmatmul.mubr.msk.f32.gmra.mrb[122].mxu0 %vm131_vm0, %v6766_v41 }
 0x8aa   :  { %7647 = vmatprep.mubr.msk.f32.mxu0 %vm131_vm0, %v6767_v62 }
 0x8ad   :  { %7648 = vmatmul.mubr.msk.f32.gmra.mrb[124].mxu0 %vm131_vm0, %v6768_v0 }
 0x930   :  { %v10713_v11 = vpop.f32.mrb[84].mxu0 }
 0x931   :  { %v7520_v8 = vpop.f32.mrb[85].mxu0 }
 0x934   :  { %v10715_v13 = vpop.f32.mrb[86].mxu0 }
 0x935   :  { %v7523_v37 = vpop.f32.mrb[87].mxu0  ;;  %v10789_v29 = vmul.f32 0.99, %v10715_v13  ;;  %v12725_v13 = vld [vmem:[#allocation92_spill] sm:$0xff] }
 0x938   :  { %v10717_v15 = vpop.f32.mrb[88].mxu0 }
 0x939   :  { %v7526_v33 = vpop.f32.mrb[89].mxu0  ;;  %v10792_v43 = vmul.f32 0.99, %v10717_v15 }
 0x93b   :  { %v10719_v50 = vpop.f32.mrb[80].mxu1 }
 0x93c   :  { %v7587_v1 = vpop.f32.mrb[81].mxu1  ;;  %v10721_v32 = vpop.f32.mrb[90].mxu0 }
 0x93d   :  { %v7529_v61 = vpop.f32.mrb[91].mxu0 }
 0x93f   :  { %v10723_v18 = vpop.f32.mrb[82].mxu1 }
 0x940   :  { %v7590_v53 = vpop.f32.mrb[83].mxu1  ;;  %v10725_v44 = vpop.f32.mrb[92].mxu0  ;;  %v10801_v45 = vmul.f32 0.99, %v10723_v18 }
 0x941   :  { %v7532_v34 = vpop.f32.mrb[93].mxu0 }
 0x942   :  { %12723 = vst [vmem:[#allocation110_spill] sm:$0xff] %v10801_v45 }
 0x943   :  { %v10727_v26 = vpop.f32.mrb[84].mxu1 }
 0x944   :  { %v7593_v46 = vpop.f32.mrb[85].mxu1  ;;  %v10729_v12 = vpop.f32.mrb[94].mxu0 }
 0x945   :  { %v7535_v47 = vpop.f32.mrb[95].mxu0  ;;  %v10817_v18 = vmul.f32 0.99, %v10729_v12 }
 0x947   :  { %v10731_v16 = vpop.f32.mrb[86].mxu1 }
 0x948   :  { %v7596_v22 = vpop.f32.mrb[87].mxu1  ;;  %v10733_v40 = vpop.f32.mrb[96].mxu0 }
 0x949   :  { %v7538_v7 = vpop.f32.mrb[97].mxu0  ;;  %v10820_v45 = vmul.f32 0.99, %v10733_v40 }
 0x94b   :  { %v10735_v23 = vpop.f32.mrb[88].mxu1 }
 0x94c   :  { %v7599_v4 = vpop.f32.mrb[89].mxu1  ;;  %v3356_v27 = vpop.f32.mrb[98].mxu0 }
 0x94d   :  { %v7541_v14 = vpop.f32.mrb[99].mxu0  ;;  %v10825_v57 = vmul.f32 0.99, %v3356_v27 }
 0x94f   :  { %v10737_v25 = vpop.f32.mrb[90].mxu1 }
 0x950   :  { %v7602_v9 = vpop.f32.mrb[91].mxu1  ;;  %v10739_v55 = vpop.f32.mrb[100].mxu0  ;;  %v10839_v40 = vmul.f32 0.99, %v10737_v25 }
 0x951   :  { %v7544_v41 = vpop.f32.mrb[101].mxu0  ;;  %v10836_v12 = vmul.f32 0.99, %v10739_v55 }
 0x952   :  { %12729 = vst [vmem:[#allocation87_spill] sm:$0xff] %v10839_v40 }
 0x953   :  { %v10741_v54 = vpop.f32.mrb[92].mxu1 }
 0x954   :  { %v7605_v62 = vpop.f32.mrb[93].mxu1  ;;  %v10743_v0 = vpop.f32.mrb[102].mxu0  ;;  %v10853_v25 = vmul.f32 0.99, %v10741_v54 }
 0x955   :  { %v7547_v37 = vpop.f32.mrb[103].mxu0  ;;  %v10850_v55 = vmul.f32 0.99, %v10743_v0 }
 0x956   :  { %12731 = vst [vmem:[#allocation89_spill] sm:$0xff] %v10853_v25 }
 0x957   :  { %v10745_v8 = vpop.f32.mrb[94].mxu1 }
 0x958   :  { %v7608_v33 = vpop.f32.mrb[95].mxu1  ;;  %v10747_v1 = vpop.f32.mrb[104].mxu0  ;;  %v10856_v40 = vmul.f32 0.99, %v10745_v8 }
 0x959   :  { %v7550_v53 = vpop.f32.mrb[105].mxu0  ;;  %v10860_v63 = vmul.f32 0.99, %v10747_v1 }
 0x95a   :  { %v7975_v53 = vld [vmem:[%s12457_s5 + $0x40] sm:$0xff]   ;;  %12732 = vst [vmem:[#allocation91_spill] sm:$0xff] %v10856_v40 }
 0x95b   :  { %v10749_v61 = vpop.f32.mrb[96].mxu1  ;;  %7658 = vmatprep.mubr.msk.bf16.mxu0 %vm12494_vm1, %v7975_v53  ;;  %v3947_v53 = vmax.f32 %v10254_v58, 0.0 }
 0x95c   :  { %v7611_v34 = vpop.f32.mrb[97].mxu1  ;;  %v10751_v46 = vpop.f32.mrb[106].mxu0 }
 0x95d   :  { %v7553_v22 = vpop.f32.mrb[107].mxu0  ;;  %v10868_v8 = vmul.f32 0.99, %v10751_v46 }
 0x95f   :  { %v10753_v47 = vpop.f32.mrb[98].mxu1 }
 0x960   :  { %v7614_v7 = vpop.f32.mrb[99].mxu1  ;;  %v10755_v4 = vpop.f32.mrb[108].mxu0 }
 0x961   :  { %v7556_v9 = vpop.f32.mrb[109].mxu0  ;;  %v3945_v7 = vmax.f32 %v10162_v21, 0.0  ;;  %v10784_v21 = vmul.f32 0.99, %v10713_v11  ;;  %v10809_v11 = vmul.f32 0.99, %v10727_v26 }
 0x962   :  { %v10828_v26 = vmul.f32 0.99, %v10735_v23 }
 0x963   :  { %v10757_v14 = vpop.f32.mrb[100].mxu1  ;;  %v10778_v42 = vmin.f32 %v3945_v7, 1.0  ;;  %v10795_v7 = vmul.f32 0.99, %v10719_v50  ;;  %12724 = vst [vmem:[#allocation93_spill] sm:$0xff] %v10809_v11 }
 0x964   :  { %v7617_v41 = vpop.f32.mrb[101].mxu1  ;;  %v10759_v62 = vpop.f32.mrb[110].mxu0  ;;  %12728 = vst [vmem:[#allocation112_spill] sm:$0xff] %v10828_v26 }
 0x965   :  { %v7559_v33 = vpop.f32.mrb[111].mxu0  ;;  %12719 = vst [vmem:[#allocation108_spill] sm:$0xff] %v10778_v42  ;;  %12722 = vst [vmem:[#allocation107_spill] sm:$0xff] %v10795_v7  ;;  %v12726_v7 = vld [vmem:[#allocation98_spill] sm:$0xff] }
 0x967   :  { %v10761_v37 = vpop.f32.mrb[102].mxu1 }
 0x968   :  { %v7620_v51 = vpop.f32.mrb[103].mxu1  ;;  %v10766_v34 = vpop.f32.mrb[112].mxu0 }
 0x969   :  { %v7562_v9 = vpop.f32.mrb[113].mxu0 }
 0x96a   :  { %v10786_v9 = vmin.f32 %v3948_v5, 1.0  ;;  %v10806_v5 = vmul.f32 0.99, %v10725_v44  ;;  %v10823_v44 = vmul.f32 0.99, %v10731_v16 }
 0x96b   :  { %v10768_v22 = vpop.f32.mrb[104].mxu1 }
 0x96c   :  { %v7623_v41 = vpop.f32.mrb[105].mxu1  ;;  %v10774_v33 = vpop.f32.mrb[114].mxu0  ;;  %12721 = vst [vmem:[#allocation105_spill] sm:$0xff] %v10786_v9  ;;  %12727 = vst [vmem:[#allocation116_spill] sm:$0xff] %v10823_v44  ;;  %v10843_v16 = vrot.slane %v10786_v9, %v12726_v7  ;;  %v12730_v44 = vld [vmem:[#allocation35_spill] sm:$0xff]  ;;  %v12733_v9 = vld [vmem:[#allocation34_spill] sm:$0xff] }
 0x96d   :  { %v7565_v52 = vpop.f32.mrb[115].mxu0 }
 0x96e   :  { %v10798_v52 = vmul.f32 0.99, %v10721_v32  ;;  %v10814_v32 = vrot.slane %v10778_v42, %v12726_v7 }
 0x96f   :  { %v10776_v51 = vpop.f32.mrb[106].mxu1 }
 0x970   :  { %v7626_v38 = vpop.f32.mrb[107].mxu1  ;;  %v3401_v58 = vpop.f32.mrb[116].mxu0 }
 0x971   :  { %v3412_v15 = vrot.slane %v3401_v58, %v12725_v13  ;;  %v7568_v41 = vpop.f32.mrb[117].mxu0 }
 0x973   :  { %v10803_v38 = vpop.f32.mrb[108].mxu1  ;;  %v3413_v58 = vcombine.high %v3412_v15, %v3412_v15  ;;  %v3420_v41 = vrot.slane %v3412_v15, %v12725_v13 }
 0x974   :  { %v7629_v50 = vpop.f32.mrb[109].mxu1  ;;  %v7640_v27 = vpop.f32.mrb[118].mxu0 }
 0x975   :  { %v10833_v50 = vrot.slane %v10780_v19, %v12726_v7  ;;  %v3427_v26 = vrot.slane %v3413_v58, %v12725_v13  ;;  %v3428_v15 = vcombine.high %v3420_v41, %v3420_v41  ;;  %8171 = vrcp.f32 %v3420_v41  ;;  %v4521_v19 = vpop.f32.mrb[119].mxu0 }
 0x976   :  { %v4527_v11 = vadd.f32 %v7640_v27, %v12730_v44  ;;  %v4522_v30 = vadd.f32 %v4521_v19, %v12733_v9  ;;  %v10862_v44 = vmin.f32 %v3947_v53, 1.0  ;;  %v12735_v19 = vld [vmem:[#allocation37_spill] sm:$0xff]  ;;  %v10873_v53 = vmul.f32 0.99, %v10755_v4 }
 0x977   :  { %v10845_v23 = vpop.f32.mrb[110].mxu1  ;;  %v3429_v58 = vcombine.high %v3427_v26, %v3427_v26  ;;  %8173 = vrcp.f32 %v3427_v26  ;;  %v10888_v4 = vmul.f32 0.99, %v10759_v62 }
 0x978   :  { %v7632_v42 = vpop.f32.mrb[111].mxu1  ;;  %v4561_v41 = vmax.f32 %v4527_v11, 0.0  ;;  %8175 = vrcp.f32 %v3428_v15  ;;  %v4560_v0 = vmax.f32 %v4522_v30, 0.0  ;;  %v7643_v54 = vpop.f32.mrb[120].mxu0  ;;  %v10876_v11 = vmul.f32 0.99, %v10753_v47 }
 0x979   :  { %v10865_v42 = vmul.f32 0.99, %v10749_v61  ;;  %8177 = vrcp.f32 %v3429_v58  ;;  %v4537_v9 = vadd.f32 %v7643_v54, %v12735_v19  ;;  %v4531_v1 = vpop.f32.mrb[121].mxu0  ;;  %v12737_v30 = vld [vmem:[#allocation36_spill] sm:$0xff]  ;;  %v10891_v47 = vmul.f32 0.99, %v10761_v37 }
 0x97a   :  { %12736 = vst [vmem:[#allocation2_spill] sm:$0xff] %v10876_v11  ;;  %v4577_v61 = vpack.c.bf16 %v4561_v41, %v4560_v0  ;;  %v4532_v15 = vadd.f32 %v4531_v1, %v12737_v30  ;;  %v12740_v19 = vld [vmem:[#allocation39_spill] sm:$0xff]  ;;  %v10897_v30 = vmul.f32 0.99, %v10768_v22 }
 0x97b   :  { %12734 = vst [vmem:[#allocation90_spill] sm:$0xff] %v10865_v42  ;;  %v3728_v27 = vpop.f32.mrb[112].mxu1  ;;  %v10880_v42 = vmul.f32 0.99, %v10757_v14  ;;  %v4563_v46 = vmax.f32 %v4537_v9, 0.0  ;;  %12739 = vst [vmem:[#allocation3_spill] sm:$0xff] %v10891_v47 }
 0x97c   :  { %v3739_v40 = vrot.slane %v3728_v27, %v12725_v13  ;;  %v7635_v26 = vpop.f32.mrb[113].mxu1  ;;  %v10885_v27 = vrot.slane %v10862_v44, %v12726_v7  ;;  %v4562_v41 = vmax.f32 %v4532_v15, 0.0  ;;  %v7646_v0 = vpop.f32.mrb[122].mxu0  ;;  %7650 = vmatprep.subr.bf16.mxu0 %v4577_v61  ;;  %v3496_v14 = vmul.f32 0.99, %v10766_v34 }
 0x97d   :  { %12738 = vst [vmem:[#allocation111_spill] sm:$0xff] %v10880_v42  ;;  %v4547_v9 = vadd.f32 %v7646_v0, %v12740_v19  ;;  %v4541_v1 = vpop.f32.mrb[123].mxu0  ;;  %7651 = vmatpush3.bf16.msra.mxu0 %v4577_v61  ;;  %v12741_v42 = vld [vmem:[#allocation38_spill] sm:$0xff]  ;;  %v3497_v15 = vmul.f32 0.99, %v10774_v33  ;;  %v12742_v33 = vld [vmem:[#allocation41_spill] sm:$0xff] }
 0x97e   :  { %v3740_v58 = vcombine.high %v3739_v40, %v3739_v40  ;;  %v3747_v54 = vrot.slane %v3739_v40, %v12725_v13  ;;  %v4578_v62 = vpack.c.bf16 %v4563_v46, %v4562_v41  ;;  %v4542_v11 = vadd.f32 %v4541_v1, %v12741_v42 }
 0x97f   :  { %v8172_v37 = vpop.eup %8171  ;;  %v4565_v47 = vmax.f32 %v4547_v9, 0.0  ;;  %v10903_v61 = vmul.f32 0.99, %v10776_v51  ;;  %v10906_v46 = vmul.f32 0.99, %v10803_v38 }
 0x980   :  { %v3754_v40 = vrot.slane %v3740_v58, %v12725_v13  ;;  %v3755_v26 = vcombine.high %v3747_v54, %v3747_v54  ;;  %8179 = vrcp.f32 %v3747_v54  ;;  %v3457_v34 = vrot.slane %v8172_v37, %v12726_v7  ;;  %v7649_v0 = vpop.f32.mrb[124].mxu0  ;;  %7652 = vmatprep.subr.bf16.mxu0 %v4578_v62 }
 0x981   :  { %v4564_v58 = vmax.f32 %v4542_v11, 0.0  ;;  %v8174_v22 = vpop.eup %8173  ;;  %v10909_v42 = vmul.f32 0.99, %v10845_v23  ;;  %v10912_v54 = vadd.f32 %v7649_v0, %v12742_v33  ;;  %v10914_v41 = vpop.f32.mrb[125].mxu0  ;;  %7653 = vmatpush3.bf16.msra.mxu0 %v4578_v62 }
 0x982   :  { %v3756_v25 = vcombine.high %v3754_v40, %v3754_v40  ;;  %8181 = vrcp.f32 %v3754_v40  ;;  %12744 = vst [vmem:[#allocation4_spill] sm:$0xff] %v10914_v41  ;;  %v8176_v51 = vpop.eup %8175  ;;  %v3461_v11 = vrot.slane %v8174_v22, %v12726_v7  ;;  %v3474_v19 = vmul.f32 %v3457_v34, %v10784_v21 }
 0x983   :  { %8183 = vrcp.f32 %v3755_v26  ;;  %12743 = vst [vmem:[#allocation113_spill] sm:$0xff] %v10912_v54  ;;  %v3475_v9 = vmul.f32 %v3457_v34, %v10789_v29  ;;  %v3498_v38 = vmul.f32 %v10836_v12, %v3457_v34  ;;  %v8178_v1 = vpop.eup %8177  ;;  %v3465_v23 = vrot.slane %v8176_v51, %v12726_v7 }
 0x984   :  { %8185 = vrcp.f32 %v3756_v25  ;;  %v3499_v25 = vmul.f32 %v10850_v55, %v3457_v34  ;;  %v4579_v40 = vpack.c.bf16 %v4565_v47, %v4564_v58  ;;  %v3469_v37 = vrot.slane %v8178_v1, %v12726_v7 }
 0x985   :  { %v3476_v62 = vmul.f32 %v3461_v11, %v10792_v43  ;;  %v3477_v0 = vmul.f32 %v3461_v11, %v10798_v52  ;;  %v10927_v21 = vadd.f32 %v3474_v19, %v9733_v36  ;;  %v3478_v29 = vmul.f32 %v3465_v23, %v10806_v5 }
 0x986   :  { %v3479_v12 = vmul.f32 %v3465_v23, %v10817_v18  ;;  %v3483_v22 = vadd.f32 %v3475_v9, %v9736_v20  ;;  %v3500_v55 = vmul.f32 %v10860_v63, %v3461_v11  ;;  %7654 = vmatprep.subr.bf16.mxu0 %v4579_v40  ;;  %v3480_v47 = vmul.f32 %v3469_v37, %v10820_v45 }
 0x987   :  { %v3481_v34 = vmul.f32 %v3469_v37, %v10825_v57  ;;  %v10936_v43 = vadd.f32 %v3476_v62, %v9733_v36  ;;  %v3485_v52 = vadd.f32 %v3477_v0, %v9736_v20  ;;  %7655 = vmatpush3.bf16.msra.mxu0 %v4579_v40  ;;  %v10940_v58 = vadd.f32 %v3478_v29, %v9733_v36 }
 0x988   :  { %v3487_v5 = vadd.f32 %v3479_v12, %v9736_v20  ;;  %v3501_v18 = vmul.f32 %v10868_v8, %v3461_v11  ;;  %v3502_v63 = vmul.f32 %v10873_v53, %v3465_v23  ;;  %v10946_v45 = vadd.f32 %v3480_v47, %v9733_v36 }
 0x989   :  { %v3489_v57 = vadd.f32 %v3481_v34, %v9736_v20  ;;  %v3503_v51 = vmul.f32 %v10888_v4, %v3465_v23  ;;  %v3504_v19 = vmul.f32 %v3496_v14, %v3469_v37  ;;  %v3505_v1 = vmul.f32 %v3497_v15, %v3469_v37 }
 0x98a   :  { %v8180_v33 = vpop.eup %8179  ;;  %v3506_v40 = vadd.f32 %v3498_v38, %v9729_v39  ;;  %v3507_v62 = vadd.f32 %v3499_v25, %v9731_v59  ;;  %v3508_v0 = vadd.f32 %v3500_v55, %v9729_v39  ;;  %v3509_v53 = vadd.f32 %v3501_v18, %v9731_v59 }
 0x98b   :  { %v3510_v11 = vadd.f32 %v3502_v63, %v9729_v39  ;;  %v3511_v29 = vadd.f32 %v3503_v51, %v9731_v59  ;;  %v10959_v12 = vadd.f32 %v3504_v19, %v9729_v39  ;;  %v10964_v14 = vadd.f32 %v3505_v1, %v9731_v59 }
 0x98c   :  { %v8182_v9 = vpop.eup %8181  ;;  %v3515_v15 = vsel %vm12495_vm5, 1.0, %v3483_v22  ;;  %v3517_v38 = vsel %vm12495_vm5, 1.0, %v3485_v52  ;;  %v3519_v23 = vsel %vm12495_vm5, 1.0, %v3487_v5  ;;  %v10974_v25 = vsel %vm12495_vm5, 1.0, %v3489_v57 }
 0x98d   :  { %v10953_v8 = vpop.eup %8183  ;;  %vm3969_vm0 = vcmp.ge.f32.partialorder %v10814_v32, %v3506_v40  ;;  %vm3970_vm11 = vcmp.ge.f32.partialorder %v10814_v32, %v3507_v62  ;;  %vm3971_vm12 = vcmp.ge.f32.partialorder %v10833_v50, %v3508_v0  ;;  %vm3972_vm13 = vcmp.ge.f32.partialorder %v10833_v50, %v3509_v53 }
 0x98e   :  { %v10961_v4 = vpop.eup %8185  ;;  %vm3973_vm14 = vcmp.ge.f32.partialorder %v10885_v27, %v3510_v11  ;;  %vm3974_vm15 = vcmp.ge.f32.partialorder %v10885_v27, %v3511_v29  ;;  %v3978_v37 = vadd.f32 %v3515_v15, %v9743_v17  ;;  %v3980_v22 = vadd.f32 %v3517_v38, %v9743_v17 }
 0x98f   :  { %v3982_v55 = vadd.f32 %v3519_v23, %v9743_v17  ;;  %v3984_v47 = vadd.f32 %v10974_v25, %v9743_v17  ;;  %vm3985_vm8 = vcmp.lt.f32.partialorder %v10814_v32, %v10927_v21  ;;  %vm3987_vm9 = vcmp.lt.f32.partialorder %v10833_v50, %v10936_v43 }
 0x990   :  { %vm3989_vm4 = vcmp.lt.f32.partialorder %v10885_v27, %v10940_v58  ;;  %vm3986_vm3 = vcmp.lt.f32.partialorder %v10814_v32, %v3978_v37  ;;  %vm3988_vm2 = vcmp.lt.f32.partialorder %v10833_v50, %v3980_v22  ;;  %vm3993_vm5 = vmand %vm3969_vm0, %vm3985_vm8  ;;  %v11011_v52 = vrot.slane %v8180_v33, %v12726_v7 }
 0x991   :  { %vm3990_vm10 = vcmp.lt.f32.partialorder %v10885_v27, %v3982_v55  ;;  %vm3992_vm7 = vcmp.lt.f32.partialorder %v10843_v16, %v3984_v47  ;;  %vm3994_vm6 = vmand %vm3970_vm11, %vm3986_vm3  ;;  %v11008_v34 = vsel %vm3993_vm5, 1.0, %v12604_v48  ;;  %v11014_v5 = vrot.slane %v8182_v9, %v12726_v7 }
 0x992   :  { %vm3995_vm1 = vmand %vm3971_vm12, %vm3987_vm9  ;;  %v11019_v18 = vsel %vm3994_vm6, %v9778_v2, 0.0  ;;  %v4009_v63 = vmul.f32 %v11008_v34, %v3506_v40  ;;  %v4045_v32 = vmul.f32 %v11008_v34, %v10927_v21  ;;  %v11026_v57 = vmul.f32 %v11008_v34, %v10508_v31 }
 0x993   :  { %vm3996_vm3 = vmand %vm3972_vm13, %vm3988_vm2  ;;  %v11031_v33 = vsel %vm3995_vm1, 1.0, %v12604_v48  ;;  %v4010_v51 = vmul.f32 %v11019_v18, %v3507_v62  ;;  %v4046_v19 = vmul.f32 %v11019_v18, %v3515_v15  ;;  %v11037_v9 = vmul.f32 %v11019_v18, %v10521_v6 }
 0x994   :  { %vm3997_vm5 = vmand %vm3973_vm14, %vm3989_vm4  ;;  %v11045_v31 = vsel %vm3996_vm3, %v9778_v2, 0.0  ;;  %v4011_v50 = vmul.f32 %v11031_v33, %v3508_v0  ;;  %v4047_v21 = vmul.f32 %v11031_v33, %v10936_v43  ;;  %v11052_v1 = vmul.f32 %v11031_v33, %v10492_v28 }
 0x995   :  { %vm3998_vm1 = vmand %vm3974_vm15, %vm3990_vm10  ;;  %v11059_v6 = vsel %vm3997_vm5, 1.0, %v12604_v48  ;;  %v4012_v40 = vmul.f32 %v11045_v31, %v3509_v53  ;;  %v4017_v62 = vadd.f32 %v4010_v51, %v4009_v63  ;;  %v4048_v0 = vmul.f32 %v11045_v31, %v3517_v38 }
 0x996   :  { %vm12745_vm2 = vcmp.lt.f32.partialorder %v10843_v16, %v10946_v45  ;;  %vm12746_vm4 = vcmp.ge.f32.partialorder %v10843_v16, %v10959_v12  ;;  %v11070_v28 = vsel %vm3998_vm1, %v9778_v2, 0.0  ;;  %v4013_v27 = vmul.f32 %v11059_v6, %v3510_v11 }
 0x997   :  { %vm3999_vm0 = vmand %vm12746_vm4, %vm12745_vm2  ;;  %v4049_v43 = vmul.f32 %v11059_v6, %v10940_v58  ;;  %v4053_v15 = vadd.f32 %v4046_v19, %v4045_v32  ;;  %vm12747_vm10 = vcmp.ge.f32.partialorder %v10843_v16, %v10964_v14  ;;  %v4014_v38 = vmul.f32 %v11070_v28, %v3511_v29 }
 0x998   :  { %vm4000_vm11 = vmand %vm12747_vm10, %vm3992_vm7  ;;  %v11081_v53 = vsel %vm3999_vm0, 1.0, %v12604_v48  ;;  %v4018_v37 = vrot.slane %v4017_v62, 4  ;;  %v4024_v22 = vadd.f32 %v4012_v40, %v4011_v50  ;;  %v4050_v11 = vmul.f32 %v11070_v28, %v3519_v23 }
 0x999   :  { %v11085_v55 = vsel %vm4000_vm11, %v9778_v2, 0.0  ;;  %v4015_v58 = vmul.f32 %v11081_v53, %v10959_v12  ;;  %v4051_v47 = vmul.f32 %v11081_v53, %v10946_v45  ;;  %v4031_v51 = vadd.f32 %v4014_v38, %v4013_v27 }
 0x99a   :  { %v4016_v16 = vmul.f32 %v11085_v55, %v10964_v14  ;;  %v4019_v63 = vadd.f32 %v4018_v37, %v4017_v62  ;;  %v4025_v32 = vrot.slane %v4024_v22, 4  ;;  %v4052_v29 = vmul.f32 %v11085_v55, %v10974_v25 }
 0x99b   :  { %v4054_v19 = vrot.slane %v4053_v15, 4  ;;  %v4060_v50 = vadd.f32 %v4048_v0, %v4047_v21  ;;  %v4067_v40 = vadd.f32 %v4050_v11, %v4049_v43  ;;  %v4032_v12 = vrot.slane %v4031_v51, 4 }
 0x99c   :  { %v4020_v26 = vrot.slane %v4019_v63, 2  ;;  %v4026_v2 = vadd.f32 %v4025_v32, %v4024_v22  ;;  %v4038_v17 = vadd.f32 %v4016_v16, %v4015_v58  ;;  %v4074_v45 = vadd.f32 %v4052_v29, %v4051_v47 }
 0x99d   :  { %v4055_v23 = vadd.f32 %v4054_v19, %v4053_v15  ;;  %v4061_v13 = vrot.slane %v4060_v50, 4  ;;  %v4068_v48 = vrot.slane %v4067_v40, 4  ;;  %v4033_v14 = vadd.f32 %v4032_v12, %v4031_v51 }
 0x99e   :  { %v4021_v54 = vadd.f32 %v4020_v26, %v4019_v63  ;;  %v4027_v41 = vrot.slane %v4026_v2, 2  ;;  %v4039_v62 = vrot.slane %v4038_v17, 4  ;;  %v4075_v56 = vrot.slane %v4074_v45, 4 }
 0x99f   :  { %v4056_v37 = vrot.slane %v4055_v23, 2  ;;  %v4062_v27 = vadd.f32 %v4061_v13, %v4060_v50  ;;  %v4069_v38 = vadd.f32 %v4068_v48, %v4067_v40  ;;  %v4034_v21 = vrot.slane %v4033_v14, 2 }
 0x9a0   :  { %v4022_v25 = vrot.slane %v4021_v54, 1  ;;  %v4028_v59 = vadd.f32 %v4027_v41, %v4026_v2  ;;  %v4040_v0 = vadd.f32 %v4039_v62, %v4038_v17  ;;  %v4076_v58 = vadd.f32 %v4075_v56, %v4074_v45 }
 0x9a1   :  { %v4057_v43 = vadd.f32 %v4056_v37, %v4055_v23  ;;  %v4063_v22 = vrot.slane %v4062_v27, 2  ;;  %v4070_v11 = vrot.slane %v4069_v38, 2  ;;  %v4035_v47 = vadd.f32 %v4034_v21, %v4033_v14  ;;  %v12748_v21 = vld [vmem:[#allocation86_spill] sm:$0xff] }
 0x9a2   :  { %v11096_v15 = vadd.f32 %v4022_v25, %v4021_v54  ;;  %v4029_v16 = vrot.slane %v4028_v59, 1  ;;  %v4041_v26 = vrot.slane %v4040_v0, 2  ;;  %v4077_v29 = vrot.slane %v4076_v58, 2 }
 0x9a3   :  { %v4058_v63 = vrot.slane %v4057_v43, 1  ;;  %v4064_v32 = vadd.f32 %v4063_v22, %v4062_v27  ;;  %v4071_v51 = vadd.f32 %v4070_v11, %v4069_v38  ;;  %v4036_v48 = vrot.slane %v4035_v47, 1  ;;  %v12749_v11 = vld [vmem:[#allocation84_spill] sm:$0xff] }
 0x9a4   :  { %v11098_v13 = vadd.f32 %v4029_v16, %v4028_v59  ;;  %v4042_v19 = vadd.f32 %v4041_v26, %v4040_v0  ;;  %v4156_v17 = vmul.f32 %v11045_v31, %v10494_v24  ;;  %v4078_v54 = vadd.f32 %v4077_v29, %v4076_v58  ;;  %v12750_v16 = vld [vmem:[#allocation101_spill] sm:$0xff] }
 0x9a5   :  { %v11102_v2 = vadd.f32 %v4058_v63, %v4057_v43  ;;  %v4065_v41 = vrot.slane %v4064_v32, 1  ;;  %v4072_v56 = vrot.slane %v4071_v51, 1  ;;  %v11104_v50 = vadd.f32 %v4036_v48, %v4035_v47  ;;  %v12752_v47 = vld [vmem:[#allocation85_spill] sm:$0xff] }
 0x9a6   :  { %v4043_v40 = vrot.slane %v4042_v19, 1  ;;  %v4157_v12 = vmul.f32 %v11059_v6, %v10529_v60  ;;  %v4158_v59 = vmul.f32 %v11070_v28, %v10570_v49  ;;  %v4079_v14 = vrot.slane %v4078_v54, 1 }
 0x9a7   :  { %v11110_v23 = vadd.f32 %v4065_v41, %v4064_v32  ;;  %v11112_v45 = vadd.f32 %v4072_v56, %v4071_v51  ;;  %v4159_v24 = vmul.f32 %v11081_v53, %v10550_v35  ;;  %v4160_v37 = vmul.f32 %v11085_v55, %v10557_v3  ;;  %v12753_v51 = vld [vmem:[#allocation102_spill] sm:$0xff] }
 0x9a8   :  { %v11116_v62 = vadd.f32 %v4043_v40, %v4042_v19  ;;  %v4161_v27 = vadd.f32 %v11037_v9, %v11026_v57  ;;  %v4168_v60 = vadd.f32 %v4156_v17, %v11052_v1  ;;  %v11123_v38 = vadd.f32 %v4079_v14, %v4078_v54  ;;  %v12751_v9 = vld [vmem:[#allocation88_spill] sm:$0xff] }
 0x9a9   :  { %v4175_v49 = vadd.f32 %v4158_v59, %v4157_v12  ;;  %v4189_v25 = vmul.f32 %v11008_v34, %v10543_v10  ;;  %v4190_v0 = vmul.f32 %v11019_v18, %v12748_v21  ;;  %v4182_v22 = vadd.f32 %v4160_v37, %v4159_v24  ;;  %v12754_v19 = vld [vmem:[#allocation100_spill] sm:$0xff] }
 0x9aa   :  { %v4162_v35 = vrot.slane %v4161_v27, 4  ;;  %v4169_v43 = vrot.slane %v4168_v60, 4  ;;  %v4191_v3 = vmul.f32 %v11031_v33, %v12749_v11  ;;  %v4192_v57 = vmul.f32 %v11045_v31, %v12750_v16 }
 0x9ab   :  { %v4176_v58 = vrot.slane %v4175_v49, 4  ;;  %v4193_v1 = vmul.f32 %v11059_v6, %v12751_v9  ;;  %v4194_v26 = vmul.f32 %v11070_v28, %v12752_v47  ;;  %v4183_v32 = vrot.slane %v4182_v22, 4 }
 0x9ac   :  { %v4163_v10 = vadd.f32 %v4162_v35, %v4161_v27  ;;  %v4170_v63 = vadd.f32 %v4169_v43, %v4168_v60  ;;  %v4195_v29 = vmul.f32 %v11081_v53, %v12753_v51  ;;  %v4196_v17 = vmul.f32 %v11085_v55, %v12754_v19 }
 0x9ad   :  { %v4177_v48 = vadd.f32 %v4176_v58, %v4175_v49  ;;  %v4197_v41 = vadd.f32 %v4190_v0, %v4189_v25  ;;  %v4204_v56 = vadd.f32 %v4192_v57, %v4191_v3  ;;  %v4184_v12 = vadd.f32 %v4183_v32, %v4182_v22 }
 0x9ae   :  { %v4164_v54 = vrot.slane %v4163_v10, 2  ;;  %v4171_v40 = vrot.slane %v4170_v63, 2  ;;  %v4211_v59 = vadd.f32 %v4194_v26, %v4193_v1  ;;  %v4218_v21 = vadd.f32 %v4196_v17, %v4195_v29 }
 0x9af   :  { %v4178_v14 = vrot.slane %v4177_v48, 2  ;;  %v4198_v24 = vrot.slane %v4197_v41, 4  ;;  %v4205_v37 = vrot.slane %v4204_v56, 4  ;;  %v4185_v35 = vrot.slane %v4184_v12, 2 }
 0x9b0   :  { %v4165_v27 = vadd.f32 %v4164_v54, %v4163_v10  ;;  %v4172_v60 = vadd.f32 %v4171_v40, %v4170_v63  ;;  %v4212_v43 = vrot.slane %v4211_v59, 4  ;;  %v4219_v58 = vrot.slane %v4218_v21, 4 }
 0x9b1   :  { %v4179_v11 = vadd.f32 %v4178_v14, %v4177_v48  ;;  %v4199_v16 = vadd.f32 %v4198_v24, %v4197_v41  ;;  %v4206_v49 = vadd.f32 %v4205_v37, %v4204_v56  ;;  %v4186_v25 = vadd.f32 %v4185_v35, %v4184_v12 }
 0x9b2   :  { %v4166_v9 = vrot.slane %v4165_v27, 1  ;;  %v4173_v47 = vrot.slane %v4172_v60, 1  ;;  %v4213_v0 = vadd.f32 %v4212_v43, %v4211_v59  ;;  %v4220_v1 = vadd.f32 %v4219_v58, %v4218_v21  ;;  %v12755_v21 = vld [vmem:[#allocation108_spill] sm:$0xff]  ;;  %v12756_v43 = vld [vmem:[#allocation109_spill] sm:$0xff] }
 0x9b3   :  { %v4180_v3 = vrot.slane %v4179_v11, 1  ;;  %v4200_v57 = vrot.slane %v4199_v16, 2  ;;  %v4207_v22 = vrot.slane %v4206_v49, 2  ;;  %v4187_v10 = vrot.slane %v4186_v25, 1 }
 0x9b4   :  { %v11141_v26 = vadd.f32 %v4166_v9, %v4165_v27  ;;  %v11143_v32 = vadd.f32 %v4173_v47, %v4172_v60  ;;  %v4214_v63 = vrot.slane %v4213_v0, 2  ;;  %v4221_v19 = vrot.slane %v4220_v1, 2  ;;  %v12758_v9 = vld [vmem:[#allocation107_spill] sm:$0xff] }
 0x9b5   :  { %v11145_v51 = vadd.f32 %v4180_v3, %v4179_v11  ;;  %v4201_v29 = vadd.f32 %v4200_v57, %v4199_v16  ;;  %v4208_v48 = vadd.f32 %v4207_v22, %v4206_v49  ;;  %v11147_v17 = vadd.f32 %v4187_v10, %v4186_v25  ;;  %v12759_v25 = vld [vmem:[#allocation110_spill] sm:$0xff]  ;;  %v12760_v3 = vld [vmem:[#allocation93_spill] sm:$0xff]  ;;  %v12761_v22 = vld [vmem:[#allocation116_spill] sm:$0xff] }
 0x9b6   :  { %v4215_v41 = vadd.f32 %v4214_v63, %v4213_v0  ;;  %v4225_v56 = vsub.f32 %v11102_v2, %v11096_v15  ;;  %v4226_v54 = vsub.f32 %v11110_v23, %v11098_v13  ;;  %v4222_v59 = vadd.f32 %v4221_v19, %v4220_v1  ;;  %v12763_v63 = vld [vmem:[#allocation87_spill] sm:$0xff] }
 0x9b7   :  { %v4202_v40 = vrot.slane %v4201_v29, 1  ;;  %v4209_v12 = vrot.slane %v4208_v48, 1  ;;  %v4227_v14 = vsub.f32 %v11112_v45, %v11104_v50  ;;  %v4228_v37 = vsub.f32 %v11123_v38, %v11116_v62  ;;  %v12765_v19 = vld [vmem:[#allocation91_spill] sm:$0xff] }
 0x9b8   :  { %v4216_v24 = vrot.slane %v4215_v41, 1  ;;  %8187 = vrcp.f32 %v4225_v56  ;;  %v4241_v27 = vsub.f32 %v12755_v21, %v11096_v15  ;;  %v4223_v35 = vrot.slane %v4222_v59, 1  ;;  %v12757_v15 = vld [vmem:[#allocation105_spill] sm:$0xff]  ;;  %v12766_v21 = vld [vmem:[#allocation90_spill] sm:$0xff] }
 0x9b9   :  { %v11159_v60 = vadd.f32 %v4202_v40, %v4201_v29  ;;  %v11161_v2 = vadd.f32 %v4209_v12, %v4208_v48  ;;  %8189 = vrcp.f32 %v4226_v54  ;;  %v4242_v45 = vsub.f32 %v12756_v43, %v11098_v13  ;;  %v12764_v29 = vld [vmem:[#allocation89_spill] sm:$0xff]  ;;  %v12767_v43 = vld [vmem:[#allocation2_spill] sm:$0xff] }
 0x9ba   :  { %v11163_v23 = vadd.f32 %v4216_v24, %v4215_v41  ;;  %8191 = vrcp.f32 %v4227_v14  ;;  %v4243_v11 = vsub.f32 %v10862_v44, %v11104_v50  ;;  %v11169_v38 = vadd.f32 %v4223_v35, %v4222_v59 }
 0x9bb   :  { %8193 = vrcp.f32 %v4228_v37  ;;  %v4244_v16 = vsub.f32 %v12757_v15, %v11116_v62  ;;  %v11175_v49 = vadd.f32 %v11159_v60, %v11141_v26  ;;  %v11179_v58 = vadd.f32 %v11161_v2, %v11143_v32 }
 0x9bc   :  { %v11183_v13 = vadd.f32 %v11163_v23, %v11145_v51  ;;  %v3792_v44 = vrot.slane %v10953_v8, %v12726_v7  ;;  %v3796_v50 = vrot.slane %v10961_v4, %v12726_v7  ;;  %v11191_v62 = vadd.f32 %v11169_v38, %v11147_v17  ;;  %v12762_v8 = vld [vmem:[#allocation112_spill] sm:$0xff] }
 0x9bd   :  { %v3801_v47 = vmul.f32 %v11011_v52, %v12758_v9  ;;  %v3802_v0 = vmul.f32 %v11011_v52, %v12759_v25  ;;  %v3803_v57 = vmul.f32 %v11014_v5, %v12760_v3  ;;  %v3804_v1 = vmul.f32 %v11014_v5, %v12761_v22  ;;  %v12768_v9 = vld [vmem:[#allocation111_spill] sm:$0xff] }
 0x9be   :  { %v3805_v10 = vmul.f32 %v3792_v44, %v12762_v8  ;;  %v3806_v4 = vmul.f32 %v3792_v44, %v12763_v63  ;;  %v3807_v48 = vmul.f32 %v3796_v50, %v12764_v29  ;;  %v3808_v41 = vmul.f32 %v3796_v50, %v12765_v19 }
 0x9bf   :  { %v11206_v56 = vadd.f32 %v3801_v47, %v9733_v36  ;;  %v3810_v54 = vadd.f32 %v3802_v0, %v9736_v20  ;;  %v11210_v40 = vadd.f32 %v3803_v57, %v9733_v36  ;;  %v3812_v12 = vadd.f32 %v3804_v1, %v9736_v20  ;;  %v12769_v0 = vld [vmem:[#allocation3_spill] sm:$0xff] }
 0x9c0   :  { %v11214_v59 = vadd.f32 %v3805_v10, %v9733_v36  ;;  %v3814_v14 = vadd.f32 %v3806_v4, %v9736_v20  ;;  %v11218_v24 = vadd.f32 %v3807_v48, %v9733_v36  ;;  %v3816_v37 = vadd.f32 %v3808_v41, %v9736_v20  ;;  %v12770_v4 = vld [vmem:[#allocation95_spill] sm:$0xff]  ;;  %v12773_v36 = vld [vmem:[#allocation74_spill] sm:$0xff] }
 0x9c1   :  { %v3825_v35 = vmul.f32 %v12766_v21, %v11011_v52  ;;  %v3826_v15 = vmul.f32 %v12767_v43, %v11011_v52  ;;  %v3827_v47 = vmul.f32 %v12768_v9, %v11014_v5  ;;  %v3828_v3 = vmul.f32 %v12769_v0, %v11014_v5 }
 0x9c2   :  { %v11227_v25 = vpop.eup %8187  ;;  %v3829_v57 = vmul.f32 %v10897_v30, %v3792_v44  ;;  %v3830_v22 = vmul.f32 %v10903_v61, %v3792_v44  ;;  %v3831_v1 = vmul.f32 %v10906_v46, %v3796_v50  ;;  %v3832_v52 = vmul.f32 %v10909_v42, %v3796_v50 }
 0x9c3   :  { %v11234_v8 = vpop.eup %8189  ;;  %v4245_v10 = vmul.f32 %v11227_v25, %v4241_v27  ;;  %v3833_v63 = vadd.f32 %v3825_v35, %v9729_v39  ;;  %v3834_v29 = vadd.f32 %v3826_v15, %v12770_v4  ;;  %v3835_v30 = vadd.f32 %v3827_v47, %v9729_v39 }
 0x9c4   :  { %v11240_v48 = vpop.eup %8191  ;;  %v4246_v5 = vmul.f32 %v11234_v8, %v4242_v45  ;;  %v3836_v61 = vadd.f32 %v3828_v3, %v12770_v4  ;;  %v3837_v46 = vadd.f32 %v3829_v57, %v9729_v39  ;;  %v3838_v50 = vadd.f32 %v3830_v22, %v12770_v4 }
 0x9c5   :  { %v11246_v44 = vpop.eup %8193  ;;  %v4247_v27 = vmul.f32 %v11240_v48, %v4243_v11  ;;  %v4249_v19 = vsub.f32 1.0, %v4245_v10  ;;  %v11249_v42 = vmul.f32 %v4245_v10, %v4245_v10  ;;  %v3839_v45 = vadd.f32 %v3831_v1, %v9729_v39 }
 0x9c6   :  { %v4248_v41 = vmul.f32 %v11246_v44, %v4244_v16  ;;  %v4250_v21 = vsub.f32 1.0, %v4246_v5  ;;  %v11253_v35 = vmul.f32 %v4246_v5, %v4246_v5  ;;  %vm12774_vm12 = vcmp.eq.s32.totalorder %v12773_v36, 9 }
 0x9c7   :  { %v4251_v43 = vsub.f32 1.0, %v4247_v27  ;;  %v11256_v15 = vmul.f32 %v4249_v19, %v4245_v10  ;;  %v11258_v9 = vmul.f32 %v4247_v27, %v4247_v27  ;;  %v11262_v11 = vmul.f32 %v11249_v42, %v11159_v60  ;;  %vm12775_vm13 = vmmov %vm12774_vm12 }
 0x9c8   :  { %v4252_v47 = vsub.f32 1.0, %v4248_v41  ;;  %v11264_v0 = vmul.f32 %v4250_v21, %v4246_v5  ;;  %v11266_v3 = vmul.f32 %v4248_v41, %v4248_v41  ;;  %v11270_v16 = vmul.f32 %v11253_v35, %v11161_v2  ;;  %vm12776_vm14 = vmmov %vm12774_vm12 }
 0x9c9   :  { %v11272_v57 = vmul.f32 %v4251_v43, %v4247_v27  ;;  %v11276_v22 = vmul.f32 %v11258_v9, %v11163_v23  ;;  %v4325_v1 = vmul.f32 %v4249_v19, %v11141_v26  ;;  %v4326_v60 = vmul.f32 %v4250_v21, %v11143_v32  ;;  %vm12777_vm15 = vmmov %vm12774_vm12 }
 0x9ca   :  { %v11280_v10 = vmul.f32 %v4252_v47, %v4248_v41  ;;  %v11284_v5 = vmul.f32 %v11266_v3, %v11169_v38  ;;  %v4327_v39 = vmul.f32 %v4251_v43, %v11145_v51  ;;  %v4328_v2 = vmul.f32 %v4252_v47, %v11147_v17 }
 0x9cb   :  { %12771 = vst [vmem:[#allocation114_spill] sm:$0xff] %v11276_v22  ;;  %v11288_v27 = vmul.f32 %v4325_v1, %v4249_v19  ;;  %v11290_v20 = vmul.f32 %v4326_v60, %v4250_v21  ;;  %v3840_v23 = vadd.f32 %v3832_v52, %v12770_v4  ;;  %v3842_v7 = vsel %vm12774_vm12, 1.0, %v3810_v54 }
 0x9cc   :  { %12772 = vst [vmem:[#allocation5_spill] sm:$0xff] %v11284_v5  ;;  %v11295_v22 = vmul.f32 %v4327_v39, %v4251_v43  ;;  %v11297_v41 = vmul.f32 %v4328_v2, %v4252_v47  ;;  %v3844_v38 = vsel %vm12775_vm13, 1.0, %v3812_v12  ;;  %v3846_v5 = vsel %vm12776_vm14, 1.0, %v3814_v14 }
 0x9cd   :  { %v3848_v19 = vsel %vm12777_vm15, 1.0, %v3816_v37  ;;  %v4081_v21 = vmul.f32 %v11008_v34, %v3833_v63  ;;  %v4082_v52 = vmul.f32 %v11019_v18, %v3834_v29  ;;  %v4083_v1 = vmul.f32 %v11031_v33, %v3835_v30 }
 0x9ce   :  { %v4084_v39 = vmul.f32 %v11045_v31, %v3836_v61  ;;  %v4085_v54 = vmul.f32 %v11059_v6, %v3837_v46  ;;  %v4086_v43 = vmul.f32 %v11070_v28, %v3838_v50  ;;  %v4087_v12 = vmul.f32 %v11081_v53, %v3839_v45 }
 0x9cf   :  { %v4088_v47 = vmul.f32 %v11085_v55, %v3840_v23  ;;  %v4089_v14 = vadd.f32 %v4082_v52, %v4081_v21  ;;  %v4117_v37 = vmul.f32 %v11008_v34, %v11206_v56  ;;  %v4118_v63 = vmul.f32 %v11019_v18, %v3842_v7 }
 0x9d0   :  { %v4096_v60 = vadd.f32 %v4084_v39, %v4083_v1  ;;  %v4103_v29 = vadd.f32 %v4086_v43, %v4085_v54  ;;  %v4119_v30 = vmul.f32 %v11031_v33, %v11210_v40  ;;  %v4120_v61 = vmul.f32 %v11045_v31, %v3844_v38 }
 0x9d1   :  { %v4090_v46 = vrot.slane %v4089_v14, 4  ;;  %v4110_v2 = vadd.f32 %v4088_v47, %v4087_v12  ;;  %v4121_v50 = vmul.f32 %v11059_v6, %v11214_v59  ;;  %v4122_v45 = vmul.f32 %v11070_v28, %v3846_v5 }
 0x9d2   :  { %v4097_v23 = vrot.slane %v4096_v60, 4  ;;  %v4104_v21 = vrot.slane %v4103_v29, 4  ;;  %v4123_v34 = vmul.f32 %v11081_v53, %v11218_v24  ;;  %v4124_v7 = vmul.f32 %v11085_v55, %v3848_v19 }
 0x9d3   :  { %v4091_v18 = vadd.f32 %v4090_v46, %v4089_v14  ;;  %v4111_v56 = vrot.slane %v4110_v2, 4  ;;  %v4125_v52 = vadd.f32 %v4118_v63, %v4117_v37  ;;  %v4132_v33 = vadd.f32 %v4120_v61, %v4119_v30 }
 0x9d4   :  { %v4098_v40 = vadd.f32 %v4097_v23, %v4096_v60  ;;  %v4105_v31 = vadd.f32 %v4104_v21, %v4103_v29  ;;  %v4139_v38 = vadd.f32 %v4122_v45, %v4121_v50  ;;  %v4146_v1 = vadd.f32 %v4124_v7, %v4123_v34 }
 0x9d5   :  { %v4092_v39 = vrot.slane %v4091_v18, 2  ;;  %v4112_v54 = vadd.f32 %v4111_v56, %v4110_v2  ;;  %v4126_v6 = vrot.slane %v4125_v52, 4  ;;  %v4133_v59 = vrot.slane %v4132_v33, 4 }
 0x9d6   :  { %v4099_v28 = vrot.slane %v4098_v40, 2  ;;  %v4106_v5 = vrot.slane %v4105_v31, 2  ;;  %v4140_v43 = vrot.slane %v4139_v38, 4  ;;  %v4147_v12 = vrot.slane %v4146_v1, 4 }
 0x9d7   :  { %v4093_v47 = vadd.f32 %v4092_v39, %v4091_v18  ;;  %v4113_v53 = vrot.slane %v4112_v54, 2  ;;  %v4127_v24 = vadd.f32 %v4126_v6, %v4125_v52  ;;  %v4134_v55 = vadd.f32 %v4133_v59, %v4132_v33 }
 0x9d8   :  { %v4100_v19 = vadd.f32 %v4099_v28, %v4098_v40  ;;  %v4107_v14 = vadd.f32 %v4106_v5, %v4105_v31  ;;  %v4141_v37 = vadd.f32 %v4140_v43, %v4139_v38  ;;  %v4148_v63 = vadd.f32 %v4147_v12, %v4146_v1  ;;  %v12778_v12 = vld [vmem:[#allocation40_spill] sm:$0xff] }
 0x9d9   :  { %v4094_v60 = vrot.slane %v4093_v47, 1  ;;  %v4114_v29 = vadd.f32 %v4113_v53, %v4112_v54  ;;  %v4128_v30 = vrot.slane %v4127_v24, 2  ;;  %v4135_v61 = vrot.slane %v4134_v55, 2 }
 0x9da   :  { %v4101_v46 = vrot.slane %v4100_v19, 1  ;;  %v4108_v2 = vrot.slane %v4107_v14, 1  ;;  %v4142_v50 = vrot.slane %v4141_v37, 2  ;;  %v4149_v45 = vrot.slane %v4148_v63, 2 }
 0x9db   :  { %v11325_v23 = vadd.f32 %v4094_v60, %v4093_v47  ;;  %v4115_v21 = vrot.slane %v4114_v29, 1  ;;  %v4129_v34 = vadd.f32 %v4128_v30, %v4127_v24  ;;  %v4136_v7 = vadd.f32 %v4135_v61, %v4134_v55  ;;  %v12779_v47 = vld [vmem:[#allocation4_spill] sm:$0xff]  ;;  %v12780_v60 = vld [vmem:[#allocation113_spill] sm:$0xff] }
 0x9dc   :  { %v11327_v18 = vadd.f32 %v4101_v46, %v4100_v19  ;;  %v11329_v56 = vadd.f32 %v4108_v2, %v4107_v14  ;;  %v4143_v52 = vadd.f32 %v4142_v50, %v4141_v37  ;;  %v4150_v33 = vadd.f32 %v4149_v45, %v4148_v63 }
 0x9dd   :  { %v11331_v40 = vadd.f32 %v4115_v21, %v4114_v29  ;;  %v4130_v31 = vrot.slane %v4129_v34, 1  ;;  %v4137_v38 = vrot.slane %v4136_v7, 1  ;;  %v4265_v1 = vmul.f32 %v11256_v15, %v11141_v26 }
 0x9de   :  { %v4144_v39 = vrot.slane %v4143_v52, 1  ;;  %v4151_v54 = vrot.slane %v4150_v33, 1  ;;  %v4266_v6 = vmul.f32 %v11264_v0, %v11143_v32  ;;  %v4267_v59 = vmul.f32 %v11272_v57, %v11145_v51 }
 0x9df   :  { %v4131_v28 = vadd.f32 %v4130_v31, %v4129_v34  ;;  %v4138_v5 = vadd.f32 %v4137_v38, %v4136_v7  ;;  %v4268_v43 = vmul.f32 %v11280_v10, %v11147_v17  ;;  %v4552_v53 = vadd.f32 %v12779_v47, %v12778_v12 }
 0x9e0   :  { %v4145_v24 = vadd.f32 %v4144_v39, %v4143_v52  ;;  %v4152_v55 = vadd.f32 %v4151_v54, %v4150_v33  ;;  %v12781_v17 = vmax.f32 %v12780_v60, 0.0  ;;  %vm12782_vm6 = vcmask 523264  }
 0x9e1   :  { %v4229_v26 = vsub.f32 %v4131_v28, %v11325_v23  ;;  %v4230_v19 = vsub.f32 %v4138_v5, %v11327_v18  ;;  %v4566_v14 = vmax.f32 %v4552_v53, 0.0  ;;  %vm12783_vm7 = vmmov %vm12782_vm6  ;;  %v7978_v53 = vld [vmem:[%s12457_s5 + $0x58] sm:$0xff]   ;;  %vm12787_vm9 = vcmask 1040384  }
 0x9e2   :  { %v4231_v32 = vsub.f32 %v4145_v24, %v11329_v56  ;;  %v4232_v37 = vsub.f32 %v4152_v55, %v11331_v40  ;;  %vm12786_vm8 = vmmov %vm12782_vm6  ;;  %vm12807_vm11 = vmmov 0  }
 0x9e3   :  { %v4234_v51 = vmul.f32 %v11227_v25, %v4229_v26  ;;  %v4236_v63 = vmul.f32 %v11234_v8, %v4230_v19  ;;  %v4580_v29 = vpack.c.bf16 %v12781_v17, %v4566_v14  ;;  %v7976_v25 = vld [vmem:[%s12457_s5 + $0x48] sm:$0xff]   ;;  %v12784_v14 = vld [vmem:[#allocation114_spill] sm:$0xff]  ;;  %vm12788_vm3 = vmmov %vm12787_vm9 }
 0x9e4   :  { %v4238_v30 = vmul.f32 %v11240_v48, %v4231_v32  ;;  %v4240_v61 = vmul.f32 %v11246_v44, %v4232_v37  ;;  %v7977_v48 = vld [vmem:[%s12457_s5 + $0x50] sm:$0xff]   ;;  %vm12789_vm5 = vmmov %vm12788_vm3 }
 0x9e5   :  { %v4261_v46 = vmul.f32 %v11249_v42, %v4234_v51  ;;  %v4262_v2 = vmul.f32 %v11253_v35, %v4236_v63  ;;  %v4281_v50 = vmul.f32 2.0, %v4234_v51  ;;  %v4282_v45 = vmul.f32 2.0, %v4236_v63  ;;  %7656 = vmatprep.subr.bf16.mxu0 %v4580_v29  ;;  %vm12790_vm1 = vmmov %vm12788_vm3 }
 0x9e6   :  { %v4263_v8 = vmul.f32 %v11258_v9, %v4238_v30  ;;  %v4264_v21 = vmul.f32 %v11266_v3, %v4240_v61  ;;  %v4283_v34 = vmul.f32 2.0, %v4238_v30  ;;  %v4284_v7 = vmul.f32 2.0, %v4240_v61  ;;  %7657 = vmatpush3.bf16.msra.mxu0 %v4580_v29  ;;  %vm12793_vm2 = vmmov %vm12782_vm6 }
 0x9e7   :  { %v4269_v44 = vadd.f32 %v4265_v1, %v4261_v46  ;;  %v4270_v42 = vadd.f32 %v4266_v6, %v4262_v2  ;;  %v4285_v35 = vsub.f32 %v11175_v49, %v4281_v50  ;;  %v4286_v52 = vsub.f32 %v11179_v58, %v4282_v45  ;;  %vm12803_vm4 = vmmov %vm12793_vm2 }
 0x9e8   :  { %v4271_v33 = vadd.f32 %v4267_v59, %v4263_v8  ;;  %v4272_v31 = vadd.f32 %v4268_v43, %v4264_v21  ;;  %v4287_v38 = vsub.f32 %v11183_v13, %v4283_v34  ;;  %v4288_v9 = vsub.f32 %v11191_v62, %v4284_v7  ;;  %vm12804_vm0 = vmmov %vm12793_vm2 }
 0x9e9   :  { %v4273_v3 = vmul.f32 %v4269_v44, %v4229_v26  ;;  %v4274_v39 = vmul.f32 %v4270_v42, %v4230_v19  ;;  %v4289_v54 = vmul.f32 %v4285_v35, %v11256_v15  ;;  %v4290_v28 = vmul.f32 %v4286_v52, %v11264_v0  ;;  %7659 = vmatmul.mubr.msk.bf16.vlgmr.msra.gmra.mrb[128].mxu0 %vm12782_vm6, %v7976_v25  ;;  %vm12805_vm10 = vmmov %vm12804_vm0 }
 0x9ea   :  { %v4275_v1 = vmul.f32 %v4271_v33, %v4231_v32  ;;  %v4276_v6 = vmul.f32 %v4272_v31, %v4232_v37  ;;  %v4291_v49 = vmul.f32 %v4287_v38, %v11272_v57  ;;  %v4292_v58 = vmul.f32 %v4288_v9, %v11280_v10  ;;  %7662 = vmatprep.mubr.msk.bf16.mxu0 %vm12783_vm7, %v7977_v48  ;;  %v12785_v37 = vld [vmem:[#allocation5_spill] sm:$0xff]  ;;  %vm12808_vm12 = vmmov %vm12804_vm0 }
 0x9eb   :  { %v4293_v59 = vadd.f32 %v4289_v54, %v4234_v51  ;;  %v4294_v13 = vadd.f32 %v4290_v28, %v4236_v63  ;;  %v4317_v43 = vmul.f32 %v4281_v50, %v11256_v15  ;;  %v4318_v12 = vmul.f32 %v4282_v45, %v11264_v0  ;;  %vm12817_vm13 = vmmov %vm12804_vm0 }
 0x9ec   :  { %v4295_v5 = vadd.f32 %v4291_v49, %v4238_v30  ;;  %v4296_v62 = vadd.f32 %v4292_v58, %v4240_v61  ;;  %v4319_v47 = vmul.f32 %v4283_v34, %v11272_v57  ;;  %v4309_v24 = vmul.f32 %v4234_v51, %v4234_v51  ;;  %vm12818_vm14 = vmmov %vm12804_vm0 }
 0x9ed   :  { %8195 = vrcp.f32 %v4293_v59  ;;  %v4320_v55 = vmul.f32 %v4284_v7, %v11280_v10  ;;  %v4321_v26 = vadd.f32 %v4317_v43, %v11262_v11  ;;  %v4322_v19 = vadd.f32 %v4318_v12, %v11270_v16  ;;  %vm12819_vm15 = vmmov %vm12804_vm0 }
 0x9ee   :  { %8197 = vrcp.f32 %v4294_v13  ;;  %v4323_v32 = vadd.f32 %v4319_v47, %v12784_v14  ;;  %v4310_v15 = vmul.f32 %v4236_v63, %v4236_v63  ;;  %v4311_v0 = vmul.f32 %v4238_v30, %v4238_v30  ;;  %v12794_v14 = vld [vmem:[#allocation44_spill] sm:$0xff]  ;;  %vm12820_vm6 = vmmov %vm12804_vm0 }
 0x9ef   :  { %8199 = vrcp.f32 %v4295_v5  ;;  %v4324_v57 = vadd.f32 %v4320_v55, %v12785_v37  ;;  %v4333_v60 = vadd.f32 %v11288_v27, %v4321_v26  ;;  %v4334_v17 = vadd.f32 %v11290_v20, %v4322_v19  ;;  %v7979_v26 = vld [vmem:[%s12458_s7 + $0x40] sm:$0xff]   ;;  %vm12821_vm7 = vmmov %vm12804_vm0 }
 0x9f0   :  { %8201 = vrcp.f32 %v4296_v62  ;;  %v4335_v51 = vadd.f32 %v11295_v22, %v4323_v32  ;;  %v4312_v10 = vmul.f32 %v4240_v61, %v4240_v61 }
 0x9f1   :  { %8203 = vlog2.f32 %v4293_v59  ;;  %7663 = vmatmul.mubr.msk.bf16.gmra.mrb[132].mxu0 %vm12786_vm8, %v7978_v53  ;;  %v4336_v11 = vadd.f32 %v11297_v41, %v4324_v57  ;;  %v4337_v16 = vmul.f32 %v4333_v60, %v4309_v24  ;;  %v4338_v29 = vmul.f32 %v4334_v17, %v4310_v15  ;;  %v12791_v24 = vld [vmem:[#allocation106_spill] sm:$0xff]  ;;  %v12796_v60 = vld [vmem:[#allocation45_spill] sm:$0xff]  ;;  %vm12822_vm8 = vmmov %vm12804_vm0 }
 0x9f2   :  { %8205 = vlog2.f32 %v4294_v13  ;;  %v4339_v46 = vmul.f32 %v4335_v51, %v4311_v0  ;;  %7674 = vmatprep.mubr.msk.bf16.mxu0 %vm12793_vm2, %v7979_v26  ;;  %v12795_v0 = vld [vmem:[#allocation42_spill] sm:$0xff]  ;;  %vm12827_vm2 = vmmov %vm12804_vm0 }
 0x9f3   :  { %8207 = vlog2.f32 %v4295_v5  ;;  %v4340_v63 = vmul.f32 %v4336_v11, %v4312_v10  ;;  %v12797_v10 = vld [vmem:[#allocation43_spill] sm:$0xff] }
 0x9f4   :  { %8209 = vlog2.f32 %v4296_v62 }
 0x9f5   :  { %8211 = vlog2.f32 %v4337_v16 }
 0x9f6   :  { %8213 = vlog2.f32 %v4338_v29 }
 0x9f7   :  { %v8196_v27 = vpop.eup %8195  ;;  %8215 = vlog2.f32 %v4339_v46 }
 0x9f8   :  { %v8198_v20 = vpop.eup %8197  ;;  %v4298_v30 = vmul.f32 %v8196_v27, %v4273_v3  ;;  %8217 = vlog2.f32 %v4340_v63 }
 0x9f9   :  { %v8200_v22 = vpop.eup %8199  ;;  %v4300_v2 = vmul.f32 %v8198_v20, %v4274_v39 }
 0x9fa   :  { %v8202_v50 = vpop.eup %8201  ;;  %v4302_v61 = vmul.f32 %v8200_v22, %v4275_v1  ;;  %v11390_v41 = vadd.f32 %v4298_v30, %v11325_v23  ;;  %v12798_v22 = vld [vmem:[#allocation48_spill] sm:$0xff] }
 0x9fb   :  { %v8204_v45 = vpop.eup %8203  ;;  %v4304_v25 = vmul.f32 %v8202_v50, %v4276_v6  ;;  %v11393_v8 = vadd.f32 %v4300_v2, %v11327_v18 }
 0x9fc   :  { %v8206_v21 = vpop.eup %8205  ;;  %v11396_v34 = vadd.f32 %v4302_v61, %v11329_v56  ;;  %v4350_v7 = vmul.f32 0.6931472, %v8204_v45  ;;  %v12799_v61 = vld [vmem:[#allocation46_spill] sm:$0xff] }
 0x9fd   :  { %v8208_v48 = vpop.eup %8207  ;;  %v11399_v44 = vadd.f32 %v4304_v25, %v11331_v40  ;;  %v4352_v42 = vmul.f32 0.6931472, %v8206_v21  ;;  %v12800_v21 = vld [vmem:[#allocation49_spill] sm:$0xff] }
 0x9fe   :  { %v8210_v35 = vpop.eup %8209  ;;  %v4354_v52 = vmul.f32 0.6931472, %v8208_v48  ;;  %v4357_v9 = vmul.f32 2.0, %v4350_v7 }
 0x9ff   :  { %v8212_v33 = vpop.eup %8211  ;;  %v4356_v23 = vmul.f32 0.6931472, %v8210_v35  ;;  %v4358_v39 = vmul.f32 2.0, %v4352_v42  ;;  %v12801_v42 = vld [vmem:[#allocation47_spill] sm:$0xff] }
 0xa00   :  { %v8214_v31 = vpop.eup %8213  ;;  %v4342_v38 = vmul.f32 0.6931472, %v8212_v33  ;;  %v4359_v56 = vmul.f32 2.0, %v4354_v52 }
 0xa01   :  { %v8216_v3 = vpop.eup %8215  ;;  %v4344_v18 = vmul.f32 0.6931472, %v8214_v31  ;;  %v4360_v49 = vmul.f32 2.0, %v4356_v23 }
 0xa02   :  { %v8218_v54 = vpop.eup %8217  ;;  %v4346_v28 = vmul.f32 0.6931472, %v8216_v3  ;;  %v4361_v1 = vsub.f32 %v4342_v38, %v4357_v9  ;;  %v7980_v3 = vld [vmem:[%s12458_s7 + $0x48] sm:$0xff]  }
 0xa03   :  { %v4348_v6 = vmul.f32 0.6931472, %v8218_v54  ;;  %v4362_v58 = vsub.f32 %v4344_v18, %v4358_v39  ;;  %v7981_v18 = vld [vmem:[%s12458_s7 + $0x50] sm:$0xff]   ;;  %v12802_v39 = vmov 0.0|0.0   ;;  %v7982_v54 = vld [vmem:[%s12458_s7 + $0x58] sm:$0xff]  }
 0xa04   :  { %v4363_v40 = vsub.f32 %v4346_v28, %v4359_v56  ;;  %v4365_v59 = vsel %vm12787_vm9, %v4361_v1, 0.0  ;;  %v12806_v28 = vmov 0.0   ;;  %v7983_v56 = vld [vmem:[%s12459_s9 + $0xc0] sm:$0xff]   ;;  %vm12823_vm9 = vmmov %vm12804_vm0 }
 0xa05   :  { %v4366_v13 = vsel %vm12788_vm3, %v4362_v58, 0.0  ;;  %v4364_v5 = vsub.f32 %v4348_v6, %v4360_v49  ;;  %7690 = vmatprep.mubr.msk.bf16.mxu1 %vm12808_vm12, %v7983_v56  ;;  %v12809_v6 = vld [vmem:[#allocation60_spill] sm:$0xff]  ;;  %vm12824_vm3 = vmmov %vm12804_vm0 }
 0xa06   :  { %v4367_v62 = vadd.f32 %v4366_v13, %v4365_v59  ;;  %v4368_v43 = vsel %vm12789_vm5, %v4363_v40, 0.0  ;;  %v12810_v40 = vld [vmem:[#allocation58_spill] sm:$0xff]  ;;  %vm12825_vm5 = vmmov %vm12804_vm0 }
 0xa07   :  { %v4370_v47 = vsel %vm12790_vm1, %v4364_v5, 0.0  ;;  %v12811_v5 = vld [vmem:[#allocation61_spill] sm:$0xff]  ;;  %vm12826_vm1 = vmmov %vm12804_vm0 }
 0xa08   :  { %v4369_v12 = vadd.f32 %v4368_v43, %v4367_v62 }
 0xa0a   :  { %v4371_v53 = vadd.f32 %v4370_v47, %v4369_v12  ;;  %v12812_v12 = vld [vmem:[#allocation59_spill] sm:$0xff] }
 0xa0c   :  { %v11406_v55 = vadd.f32 %v4371_v53, %v12791_v24 }
 0xa0e   :  { %12792 = vst [vmem:[#allocation115_spill] sm:$0xff] %v11406_v55 }
 0xabc   :  { %v7660_v19 = vpop.f32.mrb[128].mxu0 }
 0xabd   :  { %v4705_v32 = vadd.f32 %v7660_v19, %v12794_v14  ;;  %v4696_v15 = vpop.f32.mrb[129].mxu0 }
 0xabe   :  { %v4697_v37 = vadd.f32 %v4696_v15, %v12795_v0  ;;  %v7661_v57 = vpop.f32.mrb[130].mxu0  ;;  %v12813_v0 = vld [vmem:[#allocation64_spill] sm:$0xff] }
 0xabf   :  { %v4708_v17 = vadd.f32 %v7661_v57, %v12796_v60  ;;  %v4699_v51 = vpop.f32.mrb[131].mxu0  ;;  %v4729_v16 = vmax.f32 %v4705_v32, 0.0  ;;  %v12814_v60 = vld [vmem:[#allocation62_spill] sm:$0xff] }
 0xac0   :  { %v4700_v11 = vadd.f32 %v4699_v51, %v12797_v10  ;;  %v4727_v46 = vmax.f32 %v4697_v37, 0.0  ;;  %v12815_v10 = vld [vmem:[#allocation65_spill] sm:$0xff] }
 0xac1   :  { %v4730_v29 = vmax.f32 %v4708_v17, 0.0 }
 0xac2   :  { %v4728_v63 = vmax.f32 %v4700_v11, 0.0 }
 0xac3   :  { %v4745_v27 = vpack.c.bf16 %v4730_v29, %v4729_v16  ;;  %v12816_v29 = vld [vmem:[#allocation63_spill] sm:$0xff] }
 0xac4   :  { %v4744_v20 = vpack.c.bf16 %v4728_v63, %v4727_v46  ;;  %v7664_v30 = vpop.f32.mrb[132].mxu0 }
 0xac5   :  { %v4721_v2 = vadd.f32 %v7664_v30, %v12798_v22  ;;  %v4712_v50 = vpop.f32.mrb[133].mxu0 }
 0xac6   :  { %v4713_v45 = vadd.f32 %v4712_v50, %v12799_v61  ;;  %v7665_v25 = vpop.f32.mrb[134].mxu0  ;;  %7666 = vmatprep.subr.bf16.mxu0 %v4744_v20  ;;  %v7984_v50 = vld [vmem:[%s12459_s9 + $0xc8] sm:$0xff]   ;;  %v7985_v61 = vld [vmem:[%s12459_s9 + $0xd0] sm:$0xff]  }
 0xac7   :  { %v4724_v7 = vadd.f32 %v7665_v25, %v12800_v21  ;;  %v4715_v48 = vpop.f32.mrb[135].mxu0  ;;  %7667 = vmatpush3.bf16.msra.mxu0 %v4744_v20  ;;  %v4733_v52 = vmax.f32 %v4721_v2, 0.0  ;;  %v7987_v25 = vld [vmem:[%s12459_s9 + $0xe0] sm:$0xff]   ;;  %v7988_v21 = vld [vmem:[%s12459_s9 + $0xe8] sm:$0xff]  }
 0xac8   :  { %v4716_v35 = vadd.f32 %v4715_v48, %v12801_v42  ;;  %7668 = vmatprep.subr.bf16.mxu0 %v4745_v27  ;;  %v4731_v23 = vmax.f32 %v4713_v45, 0.0  ;;  %v7986_v45 = vld [vmem:[%s12459_s9 + $0xd8] sm:$0xff]   ;;  %v7991_v42 = vld [vmem:[%s12459_s9 + $0x100] sm:$0xff]  }
 0xac9   :  { %v4734_v33 = vmax.f32 %v4724_v7, 0.0  ;;  %v7989_v7 = vld [vmem:[%s12459_s9 + $0xf0] sm:$0xff]   ;;  %v7990_v48 = vld [vmem:[%s12459_s9 + $0xf8] sm:$0xff]  }
 0xaca   :  { %v4732_v31 = vmax.f32 %v4716_v35, 0.0  ;;  %v7992_v35 = vld [vmem:[%s12459_s9 + $0x108] sm:$0xff]  }
 0xacb   :  { %v4747_v38 = vpack.c.bf16 %v4734_v33, %v4733_v52  ;;  %7669 = vmatpush3.bf16.msra.mxu0 %v4745_v27  ;;  %v7993_v52 = vld [vmem:[%s12459_s9 + $0x110] sm:$0xff]   ;;  %v7994_v33 = vld [vmem:[%s12459_s9 + $0x118] sm:$0xff]  }
 0xacc   :  { %v4746_v9 = vpack.c.bf16 %v4732_v31, %v4731_v23 }
 0xace   :  { %7670 = vmatprep.subr.bf16.mxu0 %v4746_v9 }
 0xacf   :  { %7671 = vmatpush3.bf16.msra.mxu0 %v4746_v9  ;;  %v12828_v9 = vld [vmem:[#allocation68_spill] sm:$0xff] }
 0xad0   :  { %7672 = vmatprep.subr.bf16.mxu0 %v4747_v38 }
 0xad3   :  { %7673 = vmatpush3.bf16.msra.mxu0 %v4747_v38 }
 0xad4   :  { %7896 = vmatprep.subr.bf16.mxu0 %v12802_v39 }
 0xad6   :  { %7675 = vmatmul.mubr.msk.bf16.vlgmr.msra.gmra.mrb[136].mxu0 %vm12803_vm4, %v7980_v3  ;;  %vm12832_vm4 = vcmp.lt.s32.totalorder %v12773_v36, 10 }
 0xad7   :  { %7678 = vmatprep.mubr.msk.bf16.mxu0 %vm12804_vm0, %v7981_v18  ;;  %vm12833_vm0 = vmmov %vm12832_vm4 }
 0xad8   :  { %vm12839_vm12 = vmmov %vm12833_vm0 }
 0xade   :  { %7679 = vmatmul.mubr.msk.bf16.gmra.mrb[140].mxu0 %vm12805_vm10, %v7982_v54  ;;  %v12829_v54 = vld [vmem:[#allocation69_spill] sm:$0xff]  ;;  %vm12838_vm10 = vmmov %vm12833_vm0 }
 0xadf   :  { %7730 = vmatprep.mubr.msk.f32.mxu0 %vm12807_vm11, %v12806_v28 }
 0xba9   :  { %v7676_v1 = vpop.f32.mrb[136].mxu0 }
 0xbaa   :  { %v4872_v49 = vadd.f32 %v7676_v1, %v12809_v6  ;;  %v4863_v58 = vpop.f32.mrb[137].mxu0  ;;  %v12830_v1 = vld [vmem:[#allocation66_spill] sm:$0xff] }
 0xbab   :  { %v4864_v59 = vadd.f32 %v4863_v58, %v12810_v40  ;;  %v7677_v13 = vpop.f32.mrb[138].mxu0 }
 0xbac   :  { %v4875_v62 = vadd.f32 %v7677_v13, %v12811_v5  ;;  %v4866_v43 = vpop.f32.mrb[139].mxu0  ;;  %v4896_v53 = vmax.f32 %v4872_v49, 0.0  ;;  %v12831_v49 = vld [vmem:[#allocation67_spill] sm:$0xff] }
 0xbad   :  { %v4867_v47 = vadd.f32 %v4866_v43, %v12812_v12  ;;  %v4894_v26 = vmax.f32 %v4864_v59, 0.0 }
 0xbae   :  { %v4897_v24 = vmax.f32 %v4875_v62, 0.0 }
 0xbaf   :  { %v4895_v19 = vmax.f32 %v4867_v47, 0.0 }
 0xbb0   :  { %v4928_v14 = vpack.c.bf16 %v4897_v24, %v4896_v53 }
 0xbb1   :  { %v4927_v32 = vpack.c.bf16 %v4895_v19, %v4894_v26  ;;  %v7680_v15 = vpop.f32.mrb[140].mxu0  ;;  %v12834_v19 = vld [vmem:[#allocation73_spill] sm:$0xff] }
 0xbb2   :  { %v4888_v37 = vadd.f32 %v7680_v15, %v12813_v0  ;;  %v4879_v57 = vpop.f32.mrb[141].mxu0  ;;  %v12835_v0 = vld [vmem:[#allocation75_spill] sm:$0xff] }
 0xbb3   :  { %v4880_v17 = vadd.f32 %v4879_v57, %v12814_v60  ;;  %v7681_v51 = vpop.f32.mrb[142].mxu0  ;;  %7682 = vmatprep.subr.bf16.mxu1 %v4927_v32  ;;  %v12836_v57 = vld [vmem:[#allocation70_spill] sm:$0xff] }
 0xbb4   :  { %v4891_v11 = vadd.f32 %v7681_v51, %v12815_v10  ;;  %v4882_v16 = vpop.f32.mrb[143].mxu0  ;;  %7683 = vmatpush3.bf16.msra.mxu1 %v4927_v32  ;;  %v4900_v63 = vmax.f32 %v4888_v37, 0.0  ;;  %v12837_v51 = vld [vmem:[#allocation71_spill] sm:$0xff] }
 0xbb5   :  { %v4883_v46 = vadd.f32 %v4882_v16, %v12816_v29  ;;  %7684 = vmatprep.subr.bf16.mxu1 %v4928_v14  ;;  %v4898_v20 = vmax.f32 %v4880_v17, 0.0 }
 0xbb6   :  { %v4901_v27 = vmax.f32 %v4891_v11, 0.0 }
 0xbb7   :  { %v4899_v30 = vmax.f32 %v4883_v46, 0.0 }
 0xbb8   :  { %v4930_v22 = vpack.c.bf16 %v4901_v27, %v4900_v63  ;;  %7685 = vmatpush3.bf16.msra.mxu1 %v4928_v14 }
 0xbb9   :  { %v4929_v2 = vpack.c.bf16 %v4899_v30, %v4898_v20 }
 0xbbb   :  { %7686 = vmatprep.subr.bf16.mxu1 %v4929_v2 }
 0xbbc   :  { %7687 = vmatpush3.bf16.msra.mxu1 %v4929_v2 }
 0xbbd   :  { %7688 = vmatprep.subr.bf16.mxu1 %v4930_v22 }
 0xbc0   :  { %7689 = vmatpush3.bf16.msra.mxu1 %v4930_v22 }
 0xbc1   :  { %7908 = vmatprep.subr.bf16.mxu1 %v12802_v39 }
 0xbc3   :  { %7691 = vmatmul.mubr.msk.bf16.vlgmr.msra.gmra.mrb[116].mxu1 %vm12817_vm13, %v7984_v50  ;;  %vm12843_vm13 = vmmov %vm12833_vm0 }
 0xbc4   :  { %7694 = vmatprep.mubr.msk.bf16.mxu1 %vm12818_vm14, %v7985_v61  ;;  %vm12845_vm14 = vmmov %vm12833_vm0 }
 0xbcb   :  { %7695 = vmatmul.mubr.msk.bf16.gmra.mrb[120].mxu1 %vm12819_vm15, %v7986_v45  ;;  %vm12849_vm15 = vmmov %vm12833_vm0 }
 0xbcc   :  { %7698 = vmatprep.mubr.msk.bf16.mxu1 %vm12820_vm6, %v7987_v25  ;;  %vm12851_vm6 = vmmov %vm12833_vm0 }
 0xbd3   :  { %7699 = vmatmul.mubr.msk.bf16.gmra.mrb[124].mxu1 %vm12821_vm7, %v7988_v21  ;;  %vm12852_vm7 = vmmov %vm12826_vm1 }
 0xbd4   :  { %7702 = vmatprep.mubr.msk.bf16.mxu1 %vm12822_vm8, %v7989_v7  ;;  %vm12853_vm8 = vmmov %vm12826_vm1 }
 0xbdb   :  { %7703 = vmatmul.mubr.msk.bf16.gmra.mrb[128].mxu1 %vm12823_vm9, %v7990_v48  ;;  %vm12854_vm9 = vmmov %vm12826_vm1 }
 0xbdc   :  { %7706 = vmatprep.mubr.msk.bf16.mxu1 %vm12824_vm3, %v7991_v42  ;;  %v12840_v42 = vld [vmem:[#allocation79_spill] sm:$0xff]  ;;  %vm12855_vm3 = vmmov %vm12826_vm1 }
 0xbe3   :  { %7707 = vmatmul.mubr.msk.bf16.gmra.mrb[132].mxu1 %vm12825_vm5, %v7992_v35  ;;  %vm12856_vm5 = vmmov %vm12826_vm1 }
 0xbe4   :  { %7710 = vmatprep.mubr.msk.bf16.mxu1 %vm12826_vm1, %v7993_v52  ;;  %v12841_v52 = vld [vmem:[#allocation78_spill] sm:$0xff] }
 0xbeb   :  { %7711 = vmatmul.mubr.msk.bf16.gmra.mrb[136].mxu1 %vm12827_vm2, %v7994_v33 }
 0xbec   :  { %7797 = vmatprep.mubr.msk.f32.mxu1 %vm12807_vm11, %v12806_v28 }
 0xc96   :  { %v7692_v23 = vpop.f32.mrb[116].mxu1 }
 0xc97   :  { %v5206_v31 = vpop.f32.mrb[117].mxu1  ;;  %v5215_v56 = vadd.f32 %v7692_v23, %v12829_v54 }
 0xc98   :  { %v7693_v38 = vpop.f32.mrb[118].mxu1  ;;  %v5207_v58 = vadd.f32 %v5206_v31, %v12831_v49 }
 0xc99   :  { %v5218_v3 = vadd.f32 %v7693_v38, %v12828_v9  ;;  %v5209_v18 = vpop.f32.mrb[119].mxu1 }
 0xc9a   :  { %v5210_v6 = vadd.f32 %v5209_v18, %v12830_v1 }
 0xc9b   :  { %v5304_v40 = vsel %vm12832_vm4, %v5218_v3, -inf  ;;  %v12842_v3 = vld [vmem:[#allocation76_spill] sm:$0xff]  ;;  %vm12859_vm4 = vmmov %vm12826_vm1 }
 0xc9c   :  { %v5316_v59 = vmax.f32 %v5215_v56, %v5304_v40  ;;  %v5302_v13 = vsel %vm12833_vm0, %v5210_v6, -inf  ;;  %vm12860_vm0 = vmmov %vm12826_vm1 }
 0xc9d   :  { %v5309_v5 = vmax.f32 %v5207_v58, %v5302_v13 }
 0xc9e   :  { %v5317_v62 = vrot.slane %v5316_v59, 4  ;;  %v7696_v43 = vpop.f32.mrb[120].mxu1 }
 0xc9f   :  { %v5310_v12 = vrot.slane %v5309_v5, 4  ;;  %v5222_v47 = vpop.f32.mrb[121].mxu1  ;;  %v11504_v37 = vadd.f32 %v7696_v43, %v12835_v0 }
 0xca0   :  { %v5318_v53 = vmax.f32 %v5316_v59, %v5317_v62  ;;  %v7697_v24 = vpop.f32.mrb[122].mxu1  ;;  %v11508_v10 = vadd.f32 %v5222_v47, %v12837_v51 }
 0xca1   :  { %v5311_v26 = vmax.f32 %v5309_v5, %v5310_v12  ;;  %v5234_v14 = vadd.f32 %v7697_v24, %v12834_v19  ;;  %v5225_v32 = vpop.f32.mrb[123].mxu1  ;;  %v12844_v5 = vld [vmem:[#allocation77_spill] sm:$0xff] }
 0xca2   :  { %v5319_v15 = vrot.slane %v5318_v53, 2  ;;  %v5226_v60 = vadd.f32 %v5225_v32, %v12836_v57  ;;  %v12846_v32 = vld [vmem:[#allocation83_spill] sm:$0xff]  ;;  %v5039_v57 = vpop.permute.xlu0 %5038 }
 0xca3   :  { %v5312_v17 = vrot.slane %v5311_v26, 2  ;;  %v11512_v11 = vsel %vm12838_vm10, %v5234_v14, -inf  ;;  %vm12861_vm10 = vmmov %vm12860_vm0 }
 0xca4   :  { %v5320_v16 = vmax.f32 %v5318_v53, %v5319_v15  ;;  %v5330_v29 = vmax.f32 %v11504_v37, %v11512_v11  ;;  %v11518_v46 = vsel %vm12839_vm12, %v5226_v60, -inf  ;;  %vm12862_vm12 = vmmov %vm12860_vm0 }
 0xca5   :  { %v5313_v63 = vmax.f32 %v5311_v26, %v5312_v17  ;;  %v5323_v27 = vmax.f32 %v11508_v10, %v11518_v46 }
 0xca6   :  { %v5321_v20 = vrot.slane %v5320_v16, 1  ;;  %v5331_v30 = vrot.slane %v5330_v29, 4  ;;  %v7700_v22 = vpop.f32.mrb[124].mxu1 }
 0xca7   :  { %v5314_v2 = vrot.slane %v5313_v63, 1  ;;  %v5324_v50 = vrot.slane %v5323_v27, 4  ;;  %v5238_v61 = vpop.f32.mrb[125].mxu1  ;;  %v11523_v35 = vadd.f32 %v7700_v22, %v12840_v42 }
 0xca8   :  { %v5322_v45 = vmax.f32 %v5320_v16, %v5321_v20  ;;  %v5332_v25 = vmax.f32 %v5330_v29, %v5331_v30  ;;  %v7701_v21 = vpop.f32.mrb[126].mxu1  ;;  %v11532_v62 = vadd.f32 %v5238_v61, %v12844_v5  ;;  %v12848_v20 = vld [vmem:[#allocation82_spill] sm:$0xff] }
 0xca9   :  { %v5315_v7 = vmax.f32 %v5313_v63, %v5314_v2  ;;  %v5325_v48 = vmax.f32 %v5323_v27, %v5324_v50  ;;  %v5250_v33 = vadd.f32 %v7701_v21, %v12841_v52  ;;  %v5241_v23 = vpop.f32.mrb[127].mxu1  ;;  %v12847_v63 = vld [vmem:[#allocation81_spill] sm:$0xff]  ;;  %v5044_v52 = vpop.permute.xlu1 %5043 }
 0xcaa   :  { %v5339_v31 = vsub.f32 %v5215_v56, %v5322_v45  ;;  %v5340_v38 = vsub.f32 %v5304_v40, %v5322_v45  ;;  %v5333_v9 = vrot.slane %v5332_v25, 2  ;;  %v5242_v18 = vadd.f32 %v5241_v23, %v12842_v3 }
 0xcab   :  { %v5337_v54 = vsub.f32 %v5207_v58, %v5315_v7  ;;  %v5338_v1 = vsub.f32 %v5302_v13, %v5315_v7  ;;  %v5326_v6 = vrot.slane %v5325_v48, 2  ;;  %v11529_v49 = vsel %vm12843_vm13, %v5250_v33, -inf }
 0xcac   :  { %v5334_v59 = vmax.f32 %v5332_v25, %v5333_v9  ;;  %v5643_v43 = vmax.f32 %v11523_v35, %v11529_v49  ;;  %v11538_v47 = vsel %vm12845_vm14, %v5242_v18, -inf  ;;  %v5349_v26 = vmul.f32 1.442695, %v5339_v31 }
 0xcad   :  { %v5345_v12 = vmul.f32 1.442695, %v5337_v54  ;;  %v5347_v56 = vmul.f32 1.442695, %v5338_v1  ;;  %v5327_v40 = vmax.f32 %v5325_v48, %v5326_v6  ;;  %v5636_v53 = vmax.f32 %v11532_v62, %v11538_v47  ;;  %v12850_v48 = vld [vmem:[#allocation80_spill] sm:$0xff] }
 0xcae   :  { %v5335_v58 = vrot.slane %v5334_v59, 1  ;;  %v5644_v13 = vrot.slane %v5643_v43, 4  ;;  %v7704_v24 = vpop.f32.mrb[128].mxu1  ;;  %v5351_v19 = vmul.f32 1.442695, %v5340_v38 }
 0xcaf   :  { %v5328_v14 = vrot.slane %v5327_v40, 1  ;;  %v11543_v15 = vadd.f32 %v7704_v24, %v12846_v32  ;;  %v5254_v0 = vpop.f32.mrb[129].mxu1  ;;  %8219 = vpow2.f32 %v5345_v12  ;;  %v5637_v51 = vrot.slane %v5636_v53, 4 }
 0xcb0   :  { %v5336_v60 = vmax.f32 %v5334_v59, %v5335_v58  ;;  %v5645_v17 = vmax.f32 %v5643_v43, %v5644_v13  ;;  %v7705_v16 = vpop.f32.mrb[130].mxu1  ;;  %8221 = vpow2.f32 %v5347_v56  ;;  %v11546_v27 = vadd.f32 %v5254_v0, %v12847_v63 }
 0xcb1   :  { %v5329_v29 = vmax.f32 %v5327_v40, %v5328_v14  ;;  %v5266_v30 = vadd.f32 %v7705_v16, %v12848_v20  ;;  %v5257_v22 = vpop.f32.mrb[131].mxu1  ;;  %v5638_v45 = vmax.f32 %v5636_v53, %v5637_v51  ;;  %8223 = vpow2.f32 %v5349_v26  ;;  %v5054_v26 = vpop.permute.xlu1 %5053 }
 0xcb2   :  { %v5343_v2 = vsub.f32 %v11504_v37, %v5336_v60  ;;  %v5344_v50 = vsub.f32 %v11512_v11, %v5336_v60  ;;  %v5646_v61 = vrot.slane %v5645_v17, 2  ;;  %v5258_v42 = vadd.f32 %v5257_v22, %v12850_v48 }
 0xcb3   :  { %v5341_v25 = vsub.f32 %v11508_v10, %v5329_v29  ;;  %v5342_v21 = vsub.f32 %v11518_v46, %v5329_v29  ;;  %v11555_v7 = vsel %vm12849_vm15, %v5266_v30, -inf  ;;  %v5639_v38 = vrot.slane %v5638_v45, 2  ;;  %v5049_v46 = vpop.permute.xlu0 %5048 }
 0xcb4   :  { %v5357_v33 = vmul.f32 1.442695, %v5343_v2  ;;  %v5359_v23 = vmul.f32 1.442695, %v5344_v50  ;;  %v5647_v31 = vmax.f32 %v5645_v17, %v5646_v61  ;;  %v5657_v11 = vmax.f32 %v11543_v15, %v11555_v7 }
 0xcb5   :  { %v5353_v37 = vmul.f32 1.442695, %v5341_v25  ;;  %v11562_v10 = vsel %vm12851_vm6, %v5258_v42, -inf  ;;  %8225 = vpow2.f32 %v5351_v19  ;;  %v5640_v3 = vmax.f32 %v5638_v45, %v5639_v38  ;;  %vm12866_vm6 = vmmov %vm12860_vm0 }
 0xcb6   :  { %v5648_v9 = vrot.slane %v5647_v31, 1  ;;  %v5650_v18 = vmax.f32 %v11546_v27, %v11562_v10  ;;  %v7708_v54 = vpop.f32.mrb[132].mxu1  ;;  %8227 = vpow2.f32 %v5357_v33  ;;  %v5658_v1 = vrot.slane %v5657_v11, 4 }
 0xcb7   :  { %v11566_v6 = vadd.f32 %v7708_v54, %v5049_v46  ;;  %v5270_v59 = vpop.f32.mrb[133].mxu1  ;;  %8229 = vpow2.f32 %v5359_v23  ;;  %v5641_v43 = vrot.slane %v5640_v3, 1  ;;  %v5355_v40 = vmul.f32 1.442695, %v5342_v21  ;;  %v5059_v2 = vpop.permute.xlu0 %5058 }
 0xcb8   :  { %v5649_v5 = vmax.f32 %v5647_v31, %v5648_v9  ;;  %v5651_v12 = vrot.slane %v5650_v18, 4  ;;  %v7709_v56 = vpop.f32.mrb[134].mxu1  ;;  %8231 = vpow2.f32 %v5353_v37  ;;  %v5659_v58 = vmax.f32 %v5657_v11, %v5658_v1 }
 0xcb9   :  { %v5965_v13 = vand.u32 2147483647, %v11566_v6  ;;  %v5273_v53 = vpop.f32.mrb[135].mxu1  ;;  %v8220_v24 = vpop.eup %8219  ;;  %v5642_v32 = vmax.f32 %v5640_v3, %v5641_v43  ;;  %v11571_v16 = vadd.f32 %v5270_v59, %v5039_v57  ;;  %v11573_v29 = vadd.f32 %v7709_v56, %v5054_v26 }
 0xcba   :  { %v5666_v19 = vsub.f32 %v11523_v35, %v5649_v5  ;;  %v5667_v14 = vsub.f32 %v11529_v49, %v5649_v5  ;;  %v5652_v0 = vmax.f32 %v5650_v18, %v5651_v12  ;;  %v8222_v60 = vpop.eup %8221  ;;  %v5660_v17 = vrot.slane %v5659_v58, 2  ;;  %v5064_v18 = vpop.permute.xlu1 %5063 }
 0xcbb   :  { %v5973_v51 = vsub.f32 0.0, %v5965_v13  ;;  %v5664_v30 = vsub.f32 %v11532_v62, %v5642_v32  ;;  %v5665_v22 = vsub.f32 %v11538_v47, %v5642_v32  ;;  %8233 = vpow2.f32 %v5355_v40  ;;  %v11578_v57 = vpop.eup %8223  ;;  %v5069_v43 = vpop.permute.xlu0 %5068 }
 0xcbc   :  { %v5676_v63 = vmul.f32 1.442695, %v5666_v19  ;;  %v5678_v20 = vmul.f32 1.442695, %v5667_v14  ;;  %v5661_v35 = vmax.f32 %v5659_v58, %v5660_v17  ;;  %v5653_v50 = vrot.slane %v5652_v0, 2 }
 0xcbd   :  { %v5983_v49 = vmul.f32 1.442695, %v5973_v51  ;;  %v5672_v61 = vmul.f32 1.442695, %v5664_v30  ;;  %v5674_v45 = vmul.f32 1.442695, %v5665_v22  ;;  %v11581_v23 = vadd.f32 %v5273_v53, %v5044_v52 }
 0xcbe   :  { %8235 = vpow2.f32 %v5676_v63  ;;  %v5963_v25 = vand.u32 2147483647, %v11571_v16  ;;  %v5662_v21 = vrot.slane %v5661_v35, 1  ;;  %v5654_v48 = vmax.f32 %v5652_v0, %v5653_v50  ;;  %v7712_v42 = vpop.f32.mrb[136].mxu1  ;;  %v5074_v51 = vpop.permute.xlu1 %5073 }
 0xcbf   :  { %8237 = vpow2.f32 %v5678_v20  ;;  %v8226_v33 = vpop.eup %8225  ;;  %v5966_v47 = vand.u32 2147483647, %v11573_v29  ;;  %v5286_v31 = vpop.f32.mrb[137].mxu1  ;;  %v7897_v46 = vpack.c.bf16 %v8222_v60, %v8220_v24  ;;  %v5964_v40 = vand.u32 2147483647, %v11581_v23 }
 0xcc0   :  { %8239 = vpow2.f32 %v5672_v61  ;;  %v5971_v62 = vsub.f32 0.0, %v5963_v25  ;;  %v11583_v38 = vpop.eup %8227  ;;  %v5663_v37 = vmax.f32 %v5661_v35, %v5662_v21  ;;  %v5655_v11 = vrot.slane %v5654_v48, 1  ;;  %v7713_v9 = vpop.f32.mrb[138].mxu1 }
 0xcc1   :  { %8241 = vpow2.f32 %v5674_v45  ;;  %v11585_v3 = vpop.eup %8229  ;;  %v5974_v1 = vsub.f32 0.0, %v5966_v47  ;;  %v5289_v59 = vpop.f32.mrb[139].mxu1  ;;  %7898 = vmatpush3.bf16.msra.mxu0 %v7897_v46  ;;  %v11590_v13 = vadd.f32 %v7712_v42, %v5069_v43  ;;  %v11592_v53 = vadd.f32 %v5286_v31, %v5059_v2 }
 0xcc2   :  { %8243 = vpow2.f32 %v5983_v49  ;;  %v5979_v54 = vmul.f32 1.442695, %v5971_v62  ;;  %v8232_v5 = vpop.eup %8231  ;;  %v5670_v52 = vsub.f32 %v11543_v15, %v5663_v37  ;;  %v5671_v12 = vsub.f32 %v11555_v7, %v5663_v37  ;;  %7899 = vmatprep.subr.bf16.mxu0 %v12802_v39 }
 0xcc3   :  { %v5656_v56 = vmax.f32 %v5654_v48, %v5655_v11  ;;  %v5985_v58 = vmul.f32 1.442695, %v5974_v1  ;;  %v5972_v7 = vsub.f32 0.0, %v5964_v40  ;;  %v5969_v14 = vand.u32 2147483647, %v11590_v13 }
 0xcc4   :  { %8245 = vpow2.f32 %v5979_v54  ;;  %v5684_v24 = vmul.f32 1.442695, %v5670_v52  ;;  %v5686_v26 = vmul.f32 1.442695, %v5671_v12  ;;  %v5967_v30 = vand.u32 2147483647, %v11592_v53 }
 0xcc5   :  { %v5668_v19 = vsub.f32 %v11546_v27, %v5656_v56  ;;  %v5669_v15 = vsub.f32 %v11562_v10, %v5656_v56  ;;  %8247 = vpow2.f32 %v5985_v58  ;;  %v8234_v32 = vpop.eup %8233  ;;  %v5981_v63 = vmul.f32 1.442695, %v5972_v7  ;;  %v8350_v58 = vld [vmem:[%s12460_s2] sm:$0xff] }
 0xcc6   :  { %8249 = vpow2.f32 %v5684_v24  ;;  %v5977_v20 = vsub.f32 0.0, %v5969_v14  ;;  %v11599_v27 = vadd.f32 %v7713_v9, %v5074_v51  ;;  %v7900_v10 = vpack.c.bf16 %v8226_v33, %v11578_v57 }
 0xcc7   :  { %v5680_v0 = vmul.f32 1.442695, %v5668_v19  ;;  %v5682_v60 = vmul.f32 1.442695, %v5669_v15  ;;  %8251 = vpow2.f32 %v5686_v26  ;;  %v11602_v2 = vadd.f32 %v5289_v59, %v5064_v18 }
 0xcc8   :  { %v8236_v17 = vpop.eup %8235  ;;  %v5991_v50 = vmul.f32 1.442695, %v5977_v20  ;;  %v5975_v49 = vsub.f32 0.0, %v5967_v30  ;;  %v7903_v61 = vpack.c.bf16 %v8234_v32, %v8232_v5  ;;  %v5970_v25 = vand.u32 2147483647, %v11599_v27  ;;  %7901 = vmatpush3.bf16.msra.mxu0 %v7900_v10  ;;  %v8351_v32 = vld [vmem:[%s12460_s2 + $0x8] sm:$0xff] }
 0xcc9   :  { %v8238_v22 = vpop.eup %8237  ;;  %8253 = vpow2.f32 %v5680_v0  ;;  %v5968_v42 = vand.u32 2147483647, %v11602_v2  ;;  %7902 = vmatprep.subr.bf16.mxu0 %v12802_v39  ;;  %v7906_v57 = vpack.c.bf16 %v11585_v3, %v11583_v38  ;;  %v5957_v7 = vmax.f32 %v11566_v6, 0.0 }
 0xcca   :  { %v8240_v35 = vpop.eup %8239  ;;  %8255 = vpow2.f32 %v5682_v60  ;;  %v5987_v48 = vmul.f32 1.442695, %v5975_v49  ;;  %v5978_v62 = vsub.f32 0.0, %v5970_v25  ;;  %v7912_v31 = vpack.c.bf16 %v8238_v22, %v8236_v17  ;;  %v8352_v22 = vld [vmem:[%s12460_s2 + $0x10] sm:$0xff] }
 0xccb   :  { %v8242_v45 = vpop.eup %8241  ;;  %8257 = vpow2.f32 %v5981_v63  ;;  %v5976_v11 = vsub.f32 0.0, %v5968_v42  ;;  %v5958_v6 = vmax.f32 %v11573_v29, 0.0  ;;  %v5955_v10 = vmax.f32 %v11571_v16, 0.0  ;;  %v8353_v16 = vld [vmem:[%s12460_s2 + $0x18] sm:$0xff] }
 0xccc   :  { %v8244_v21 = vpop.eup %8243  ;;  %8259 = vpow2.f32 %v5991_v50  ;;  %v7909_v47 = vpack.c.bf16 %v8242_v45, %v8240_v35  ;;  %v5993_v9 = vmul.f32 1.442695, %v5978_v62  ;;  %7904 = vmatpush3.bf16.msra.mxu0 %v7903_v61 }
 0xccd   :  { %v5997_v33 = vadd.f32 1.0, %v8244_v21  ;;  %8261 = vpow2.f32 %v5987_v48  ;;  %v5989_v54 = vmul.f32 1.442695, %v5976_v11  ;;  %7905 = vmatprep.subr.bf16.mxu0 %v12802_v39  ;;  %v5956_v21 = vmax.f32 %v11581_v23, 0.0 }
 0xcce   :  { %v8246_v37 = vpop.eup %8245  ;;  %7910 = vmatpush3.bf16.msra.mxu1 %v7909_v47  ;;  %v5961_v23 = vmax.f32 %v11590_v13, 0.0 }
 0xccf   :  { %8263 = vlog2.f32 %v5997_v33  ;;  %v5995_v46 = vadd.f32 1.0, %v8246_v37  ;;  %v8248_v18 = vpop.eup %8247  ;;  %7911 = vmatprep.subr.bf16.mxu1 %v12802_v39  ;;  %v12857_v37 = vld [vmem:[#allocation72_spill] sm:$0xff] }
 0xcd0   :  { %v8250_v1 = vpop.eup %8249  ;;  %v5998_v38 = vadd.f32 1.0, %v8248_v18  ;;  %7907 = vmatpush3.bf16.msra.mxu0 %v7906_v57  ;;  %vm12858_vm2 = vcmp.lt.s32.totalorder %v12857_v37, 7  ;;  %v8354_v18 = vld [vmem:[%s12460_s2 + $0x20] sm:$0xff] }
 0xcd1   :  { %8265 = vlog2.f32 %v5995_v46  ;;  %v8252_v3 = vpop.eup %8251  ;;  %v5959_v46 = vmax.f32 %v11592_v53, 0.0  ;;  %vm12863_vm13 = vmmov %vm12858_vm2 }
 0xcd2   :  { %8267 = vpow2.f32 %v5993_v9  ;;  %7913 = vmatpush3.bf16.msra.mxu1 %v7912_v31  ;;  %v7918_v5 = vpack.c.bf16 %v8252_v3, %v8250_v1  ;;  %vm12864_vm14 = vmmov %vm12858_vm2 }
 0xcd3   :  { %v8254_v59 = vpop.eup %8253  ;;  %8269 = vlog2.f32 %v5998_v38  ;;  %7914 = vmatprep.subr.bf16.mxu1 %v12802_v39  ;;  %7731 = vmatmul.mubr.msk.f32.vlgmr.msra.gmra.mrb[126].mxu0 %vm12852_vm7, %v8350_v58  ;;  %vm12865_vm15 = vmmov %vm12858_vm2 }
 0xcd4   :  { %v8256_v43 = vpop.eup %8255  ;;  %8271 = vpow2.f32 %v5989_v54  ;;  %7733 = vmatprep.mubr.msk.f32.mxu0 %vm12807_vm11, %v12806_v28  ;;  %vm12867_vm7 = vmmov %vm12860_vm0 }
 0xcd5   :  { %v8258_v52 = vpop.eup %8257  ;;  %v7915_v12 = vpack.c.bf16 %v8256_v43, %v8254_v59 }
 0xcd6   :  { %v8260_v56 = vpop.eup %8259  ;;  %v5996_v40 = vadd.f32 1.0, %v8258_v52  ;;  %v8355_v52 = vld [vmem:[%s12460_s2 + $0x28] sm:$0xff] }
 0xcd7   :  { %v6001_v24 = vadd.f32 1.0, %v8260_v56  ;;  %7916 = vmatpush3.bf16.msra.mxu1 %v7915_v12  ;;  %v8262_v26 = vpop.eup %8261  ;;  %7734 = vmatmul.mubr.msk.f32.gmra.mrb[144].mxu0 %vm12853_vm8, %v8351_v32  ;;  %vm12868_vm8 = vmmov %vm12858_vm2 }
 0xcd8   :  { %8273 = vlog2.f32 %v5996_v40  ;;  %7917 = vmatprep.subr.bf16.mxu1 %v12802_v39  ;;  %v5999_v15 = vadd.f32 1.0, %v8262_v26  ;;  %7736 = vmatprep.mubr.msk.f32.mxu0 %vm12807_vm11, %v12806_v28 }
 0xcd9   :  { %v8264_v19 = vpop.eup %8263  ;;  %8275 = vlog2.f32 %v6001_v24 }
 0xcda   :  { %v6008_v14 = vmul.f32 0.6931472, %v8264_v19  ;;  %8277 = vlog2.f32 %v5999_v15 }
 0xcdb   :  { %v8266_v0 = vpop.eup %8265  ;;  %7919 = vmatpush3.bf16.msra.mxu1 %v7918_v5  ;;  %7737 = vmatmul.mubr.msk.f32.gmra.mrb[146].mxu0 %vm12854_vm9, %v8352_v22  ;;  %v5962_v5 = vmax.f32 %v11599_v27, 0.0  ;;  %v5960_v27 = vmax.f32 %v11602_v2, 0.0  ;;  %v8356_v2 = vld [vmem:[%s12460_s2 + $0x30] sm:$0xff]  ;;  %vm12870_vm9 = vmmov %vm12858_vm2 }
 0xcdc   :  { %v8268_v60 = vpop.eup %8267  ;;  %v6021_v39 = vadd.f32 %v6008_v14, %v5957_v7  ;;  %v6004_v51 = vmul.f32 0.6931472, %v8266_v0  ;;  %7739 = vmatprep.mubr.msk.f32.mxu0 %vm12807_vm11, %v12806_v28 }
 0xcdd   :  { %v8270_v17 = vpop.eup %8269  ;;  %v6002_v63 = vadd.f32 1.0, %v8268_v60 }
 0xcde   :  { %v8272_v20 = vpop.eup %8271  ;;  %v6010_v30 = vmul.f32 0.6931472, %v8270_v17  ;;  %7798 = vmatmul.mubr.msk.f32.vlgmr.msra.gmra.mrb[114].mxu1 %vm12855_vm3, %v8350_v58  ;;  %v11637_v29 = vadd.f32 0.001, %v6021_v39  ;;  %v6019_v49 = vadd.f32 %v6004_v51, %v5955_v10  ;;  %vm12872_vm3 = vmmov %vm12860_vm0  ;;  %v8360_v10 = vld [vmem:[%s12460_s2 + $0x50] sm:$0xff] }
 0xcdf   :  { %8279 = vlog2.f32 %v6002_v63  ;;  %v6000_v35 = vadd.f32 1.0, %v8272_v20  ;;  %7800 = vmatprep.mubr.msk.f32.mxu1 %vm12807_vm11, %v12806_v28  ;;  %7740 = vmatmul.mubr.msk.f32.gmra.mrb[148].mxu0 %vm12856_vm5, %v8353_v16  ;;  %v8357_v63 = vld [vmem:[%s12460_s2 + $0x38] sm:$0xff]  ;;  %vm12873_vm5 = vmmov %vm12860_vm0 }
 0xce0   :  { %v6022_v50 = vadd.f32 %v6010_v30, %v5958_v6  ;;  %7742 = vmatprep.mubr.msk.f32.mxu0 %vm12807_vm11, %v12806_v28  ;;  %v6037_v42 = vrot.slane %v11637_v29, 1  ;;  %v11653_v47 = vadd.f32 0.001, %v6019_v49  ;;  %v8358_v30 = vld [vmem:[%s12460_s2 + $0x40] sm:$0xff]  ;;  %v8363_v49 = vld [vmem:[%s12460_s2 + $0x68] sm:$0xff] }
 0xce1   :  { %8281 = vlog2.f32 %v6000_v35  ;;  %v8361_v35 = vld [vmem:[%s12460_s2 + $0x58] sm:$0xff] }
 0xce2   :  { %v8274_v61 = vpop.eup %8273  ;;  %v11639_v45 = vadd.f32 0.001, %v6022_v50  ;;  %7801 = vmatmul.mubr.msk.f32.gmra.mrb[140].mxu1 %vm12826_vm1, %v8351_v32  ;;  %v6035_v38 = vrot.slane %v11653_v47, 1  ;;  %vm12874_vm1 = vmmov %vm12858_vm2  ;;  %v8362_v50 = vld [vmem:[%s12460_s2 + $0x60] sm:$0xff] }
 0xce3   :  { %v8276_v25 = vpop.eup %8275  ;;  %v6006_v48 = vmul.f32 0.6931472, %v8274_v61  ;;  %7803 = vmatprep.mubr.msk.f32.mxu1 %vm12807_vm11, %v12806_v28  ;;  %7743 = vmatmul.mubr.msk.f32.gmra.mrb[150].mxu0 %vm12859_vm4, %v8354_v18  ;;  %vm12877_vm4 = vmmov %vm12860_vm0  ;;  %v8364_v61 = vld [vmem:[%s12460_s2 + $0x70] sm:$0xff] }
 0xce4   :  { %v6038_v57 = vrot.slane %v11639_v45, 1  ;;  %v6016_v33 = vmul.f32 0.6931472, %v8276_v25  ;;  %v8278_v62 = vpop.eup %8277  ;;  %7745 = vmatprep.mubr.msk.f32.mxu0 %vm12807_vm11, %v12806_v28  ;;  %v8366_v25 = vld [vmem:[%s12460_s2 + $0x80] sm:$0xff] }
 0xce5   :  { %v6020_v31 = vadd.f32 %v6006_v48, %v5956_v21  ;;  %v6012_v9 = vmul.f32 0.6931472, %v8278_v62 }
 0xce6   :  { %v11657_v11 = vsel %vm12858_vm2, %v6037_v42, %v6038_v57  ;;  %7804 = vmatmul.mubr.msk.f32.gmra.mrb[142].mxu1 %vm12860_vm0, %v8352_v22  ;;  %v6025_v13 = vadd.f32 %v6016_v33, %v5961_v23  ;;  %vm12876_vm2 = vmmov %vm12874_vm1  ;;  %v8359_v22 = vld [vmem:[%s12460_s2 + $0x48] sm:$0xff] }
 0xce7   :  { %v11666_v54 = vadd.f32 0.001, %v6020_v31  ;;  %7806 = vmatprep.mubr.msk.f32.mxu1 %vm12807_vm11, %v12806_v28  ;;  %v6023_v1 = vadd.f32 %v6012_v9, %v5959_v46  ;;  %7746 = vmatmul.mubr.msk.f32.gmra.mrb[152].mxu0 %vm12861_vm10, %v8355_v52  ;;  %vm12878_vm10 = vmmov %vm12860_vm0 }
 0xce8   :  { %7748 = vmatprep.mubr.msk.f32.mxu0 %vm12807_vm11, %v12806_v28  ;;  %v11695_v58 = vadd.f32 0.001, %v6025_v13 }
 0xce9   :  { %v8280_v53 = vpop.eup %8279  ;;  %v6036_v3 = vrot.slane %v11666_v54, 1  ;;  %v11674_v59 = vadd.f32 0.001, %v6023_v1 }
 0xcea   :  { %v6018_v43 = vmul.f32 0.6931472, %v8280_v53  ;;  %7807 = vmatmul.mubr.msk.f32.gmra.mrb[144].mxu1 %vm12862_vm12, %v8353_v16  ;;  %v6041_v32 = vrot.slane %v11695_v58, 1  ;;  %vm12879_vm12 = vmmov %vm12860_vm0  ;;  %v8365_v16 = vld [vmem:[%s12460_s2 + $0x78] sm:$0xff] }
 0xceb   :  { %v8282_v12 = vpop.eup %8281  ;;  %v11684_v56 = vsel %vm12863_vm13, %v6036_v3, %v6037_v42  ;;  %v11688_v40 = vsel %vm12864_vm14, %v6035_v38, %v6036_v3  ;;  %7809 = vmatprep.mubr.msk.f32.mxu1 %vm12807_vm11, %v12806_v28  ;;  %v6039_v24 = vrot.slane %v11674_v59, 1  ;;  %7749 = vmatmul.mubr.msk.f32.gmra.mrb[154].mxu0 %vm12866_vm6, %v8356_v2  ;;  %vm12880_vm13 = vmmov %vm12860_vm0 }
 0xcec   :  { %v6026_v26 = vadd.f32 %v6018_v43, %v5962_v5  ;;  %v6014_v19 = vmul.f32 0.6931472, %v8282_v12  ;;  %7751 = vmatprep.mubr.msk.f32.mxu0 %vm12807_vm11, %v12806_v28  ;;  %vm12881_vm14 = vmmov %vm12860_vm0 }
 0xced   :  { %v11700_v15 = vsel %vm12865_vm15, %v6038_v57, %v6039_v24  ;;  %vm12882_vm15 = vmmov %vm12860_vm0 }
 0xcee   :  { %v11702_v7 = vadd.f32 0.001, %v6026_v26  ;;  %v6024_v14 = vadd.f32 %v6014_v19, %v5960_v27  ;;  %7810 = vmatmul.mubr.msk.f32.gmra.mrb[146].mxu1 %vm12867_vm7, %v8354_v18  ;;  %vm12883_vm6 = vmmov %vm12860_vm0 }
 0xcef   :  { %7812 = vmatprep.mubr.msk.f32.mxu1 %vm12807_vm11, %v12806_v28  ;;  %7752 = vmatmul.mubr.msk.f32.gmra.mrb[156].mxu0 %vm12872_vm3, %v8357_v63  ;;  %vm12884_vm7 = vmmov %vm12860_vm0 }
 0xcf0   :  { %v6042_v0 = vrot.slane %v11702_v7, 1  ;;  %v11715_v60 = vadd.f32 0.001, %v6024_v14  ;;  %7754 = vmatprep.mubr.msk.f32.mxu0 %vm12807_vm11, %v12806_v28  ;;  %vm12887_vm3 = vmmov %vm12860_vm0 }
 0xcf2   :  { %v11719_v39 = vsel %vm12868_vm8, %v6041_v32, %v6042_v0  ;;  %v11723_v17 = vsel %vm12870_vm9, %v6042_v0, %v6035_v38  ;;  %v6040_v51 = vrot.slane %v11715_v60, 1  ;;  %7813 = vmatmul.mubr.msk.f32.gmra.mrb[148].mxu1 %vm12873_vm5, %v8355_v52  ;;  %vm12885_vm8 = vmmov %vm12860_vm0 }
 0xcf3   :  { %12869 = vst [vmem:[#allocation6_spill] sm:$0xff] %v11719_v39  ;;  %12871 = vst [vmem:[#allocation117_spill] sm:$0xff] %v11723_v17  ;;  %7815 = vmatprep.mubr.msk.f32.mxu1 %vm12807_vm11, %v12806_v28  ;;  %7755 = vmatmul.mubr.msk.f32.gmra.mrb[158].mxu0 %vm12877_vm4, %v8358_v30 }
 0xcf4   :  { %v11737_v20 = vsel %vm12874_vm1, %v6040_v51, %v6041_v32  ;;  %v11741_v6 = vsel %vm12876_vm2, %v6039_v24, %v6040_v51  ;;  %7757 = vmatprep.mubr.msk.f32.mxu0 %vm12807_vm11, %v12806_v28  ;;  %vm12886_vm9 = vmmov %vm12860_vm0 }
 0xcf5   :  { %12875 = vst [vmem:[#allocation7_spill] sm:$0xff] %v11737_v20  ;;  %vm12888_vm5 = vmmov %vm12860_vm0 }
 0xcf6   :  { %7816 = vmatmul.mubr.msk.f32.gmra.mrb[150].mxu1 %vm12860_vm0, %v8356_v2  ;;  %vm12889_vm1 = vmmov %vm12860_vm0 }
 0xcf7   :  { %7818 = vmatprep.mubr.msk.f32.mxu1 %vm12807_vm11, %v12806_v28  ;;  %7758 = vmatmul.mubr.msk.f32.gmra.mrb[160].mxu0 %vm12878_vm10, %v8359_v22  ;;  %vm12890_vm2 = vmmov %vm12860_vm0 }
 0xcf8   :  { %7760 = vmatprep.mubr.msk.f32.mxu0 %vm12807_vm11, %v12806_v28  ;;  %vm12891_vm4 = vmmov %vm12860_vm0 }
 0xcf9   :  { %vm12892_vm10 = vmmov %vm12860_vm0 }
 0xcfa   :  { %7819 = vmatmul.mubr.msk.f32.gmra.mrb[152].mxu1 %vm12879_vm12, %v8357_v63  ;;  %vm12893_vm12 = vmmov %vm12860_vm0 }
 0xcfb   :  { %7821 = vmatprep.mubr.msk.f32.mxu1 %vm12807_vm11, %v12806_v28  ;;  %7761 = vmatmul.mubr.msk.f32.gmra.mrb[162].mxu0 %vm12880_vm13, %v8360_v10  ;;  %vm12894_vm13 = vmmov %vm12860_vm0 }
 0xcfc   :  { %7763 = vmatprep.mubr.msk.f32.mxu0 %vm12807_vm11, %v12806_v28 }
 0xcfe   :  { %7822 = vmatmul.mubr.msk.f32.gmra.mrb[154].mxu1 %vm12881_vm14, %v8358_v30 }
 0xcff   :  { %7824 = vmatprep.mubr.msk.f32.mxu1 %vm12807_vm11, %v12806_v28  ;;  %7764 = vmatmul.mubr.msk.f32.gmra.mrb[164].mxu0 %vm12882_vm15, %v8361_v35 }
 0xd00   :  { %7766 = vmatprep.mubr.msk.f32.mxu0 %vm12807_vm11, %v12806_v28 }
 0xd02   :  { %7825 = vmatmul.mubr.msk.f32.gmra.mrb[156].mxu1 %vm12883_vm6, %v8359_v22 }
 0xd03   :  { %7827 = vmatprep.mubr.msk.f32.mxu1 %vm12807_vm11, %v12806_v28  ;;  %7767 = vmatmul.mubr.msk.f32.gmra.mrb[166].mxu0 %vm12884_vm7, %v8362_v50 }
 0xd04   :  { %7769 = vmatprep.mubr.msk.f32.mxu0 %vm12807_vm11, %v12806_v28 }
 0xd06   :  { %7828 = vmatmul.mubr.msk.f32.gmra.mrb[158].mxu1 %vm12885_vm8, %v8360_v10 }
 0xd07   :  { %7830 = vmatprep.mubr.msk.f32.mxu1 %vm12807_vm11, %v12806_v28  ;;  %7770 = vmatmul.mubr.msk.f32.gmra.mrb[168].mxu0 %vm12886_vm9, %v8363_v49 }
 0xd08   :  { %7772 = vmatprep.mubr.msk.f32.mxu0 %vm12807_vm11, %v12806_v28 }
 0xd0a   :  { %7831 = vmatmul.mubr.msk.f32.gmra.mrb[160].mxu1 %vm12887_vm3, %v8361_v35 }
 0xd0b   :  { %7833 = vmatprep.mubr.msk.f32.mxu1 %vm12807_vm11, %v12806_v28  ;;  %7773 = vmatmul.mubr.msk.f32.gmra.mrb[170].mxu0 %vm12888_vm5, %v8364_v61 }
 0xd0c   :  { %7775 = vmatprep.mubr.msk.f32.mxu0 %vm12807_vm11, %v12806_v28 }
 0xd0e   :  { %7834 = vmatmul.mubr.msk.f32.gmra.mrb[162].mxu1 %vm12889_vm1, %v8362_v50 }
 0xd0f   :  { %7836 = vmatprep.mubr.msk.f32.mxu1 %vm12807_vm11, %v12806_v28  ;;  %7776 = vmatmul.mubr.msk.f32.gmra.mrb[172].mxu0 %vm12890_vm2, %v8365_v16 }
 0xd10   :  { %7778 = vmatprep.mubr.msk.f32.mxu0 %vm12807_vm11, %v12806_v28 }
 0xd12   :  { %7837 = vmatmul.mubr.msk.f32.gmra.mrb[164].mxu1 %vm12891_vm4, %v8363_v49 }
 0xd13   :  { %7839 = vmatprep.mubr.msk.f32.mxu1 %vm12807_vm11, %v12806_v28  ;;  %7779 = vmatmul.mubr.msk.f32.gmra.mrb[174].mxu0 %vm12860_vm0, %v8366_v25 }
 0xd16   :  { %7840 = vmatmul.mubr.msk.f32.gmra.mrb[166].mxu1 %vm12892_vm10, %v8364_v61 }
 0xd17   :  { %7842 = vmatprep.mubr.msk.f32.mxu1 %vm12807_vm11, %v12806_v28 }
 0xd1a   :  { %7843 = vmatmul.mubr.msk.f32.gmra.mrb[168].mxu1 %vm12893_vm12, %v8365_v16 }
 0xd1b   :  { %7845 = vmatprep.mubr.msk.f32.mxu1 %vm12807_vm11, %v12806_v28  ;;  %vm12915_vm11 = vcmp.eq.s32.totalorder %v12773_v36, 9 }
 0xd1c   :  { %vm12916_vm14 = vmmov %vm12915_vm11 }
 0xd1d   :  { %vm12917_vm15 = vmmov %vm12915_vm11 }
 0xd1e   :  { %7846 = vmatmul.mubr.msk.f32.gmra.mrb[170].mxu1 %vm12894_vm13, %v8366_v25  ;;  %vm12918_vm6 = vmmov %vm12915_vm11 }
 0xda6   :  { %v11826_v21 = vpop.f32.mrb[126].mxu0 }
 0xda7   :  { %v7732_v48 = vpop.f32.mrb[127].mxu0 }
 0xdaa   :  { %v11828_v42 = vpop.f32.mrb[144].mxu0 }
 0xdab   :  { %v7735_v57 = vpop.f32.mrb[145].mxu0 }
 0xdae   :  { %v11830_v33 = vpop.f32.mrb[146].mxu0 }
 0xdaf   :  { %v7738_v31 = vpop.f32.mrb[147].mxu0 }
 0xdb1   :  { %v11832_v62 = vpop.f32.mrb[114].mxu1 }
 0xdb2   :  { %v7799_v37 = vpop.f32.mrb[115].mxu1  ;;  %v11834_v23 = vpop.f32.mrb[148].mxu0 }
 0xdb3   :  { %v7741_v9 = vpop.f32.mrb[149].mxu0 }
 0xdb5   :  { %v11836_v46 = vpop.f32.mrb[140].mxu1 }
 0xdb6   :  { %v7802_v18 = vpop.f32.mrb[141].mxu1  ;;  %v11838_v13 = vpop.f32.mrb[150].mxu0 }
 0xdb7   :  { %v7744_v53 = vpop.f32.mrb[151].mxu0 }
 0xdb9   :  { %v11840_v1 = vpop.f32.mrb[142].mxu1 }
 0xdba   :  { %v7805_v38 = vpop.f32.mrb[143].mxu1  ;;  %v11842_v3 = vpop.f32.mrb[152].mxu0 }
 0xdbb   :  { %v7747_v43 = vpop.f32.mrb[153].mxu0 }
 0xdbd   :  { %v11844_v5 = vpop.f32.mrb[144].mxu1 }
 0xdbe   :  { %v7808_v52 = vpop.f32.mrb[145].mxu1  ;;  %v11846_v12 = vpop.f32.mrb[154].mxu0 }
 0xdbf   :  { %v7750_v24 = vpop.f32.mrb[155].mxu0 }
 0xdc1   :  { %v11848_v27 = vpop.f32.mrb[146].mxu1 }
 0xdc2   :  { %v7811_v26 = vpop.f32.mrb[147].mxu1  ;;  %v11850_v19 = vpop.f32.mrb[156].mxu0 }
 0xdc3   :  { %v7753_v2 = vpop.f32.mrb[157].mxu0 }
 0xdc5   :  { %v11852_v14 = vpop.f32.mrb[148].mxu1 }
 0xdc6   :  { %v7814_v32 = vpop.f32.mrb[149].mxu1  ;;  %v11854_v0 = vpop.f32.mrb[158].mxu0 }
 0xdc7   :  { %v7756_v63 = vpop.f32.mrb[159].mxu0 }
 0xdc9   :  { %v11856_v51 = vpop.f32.mrb[150].mxu1 }
 0xdca   :  { %v7817_v30 = vpop.f32.mrb[151].mxu1  ;;  %v11858_v22 = vpop.f32.mrb[160].mxu0 }
 0xdcb   :  { %v7759_v35 = vpop.f32.mrb[161].mxu0 }
 0xdcd   :  { %v11860_v10 = vpop.f32.mrb[152].mxu1 }
 0xdce   :  { %v7820_v50 = vpop.f32.mrb[153].mxu1  ;;  %v11862_v49 = vpop.f32.mrb[162].mxu0 }
 0xdcf   :  { %v7762_v16 = vpop.f32.mrb[163].mxu0 }
 0xdd1   :  { %v11864_v61 = vpop.f32.mrb[154].mxu1 }
 0xdd2   :  { %v7823_v25 = vpop.f32.mrb[155].mxu1  ;;  %v11866_v48 = vpop.f32.mrb[164].mxu0 }
 0xdd3   :  { %v7765_v31 = vpop.f32.mrb[165].mxu0 }
 0xdd4   :  { %v6051_v31 = vmax.f32 %v11390_v41, 0.0  ;;  %v6054_v41 = vmax.f32 %v11399_v44, 0.0  ;;  %v11914_v44 = vmul.f32 0.99, %v11832_v62 }
 0xdd5   :  { %v11868_v57 = vpop.f32.mrb[156].mxu1 }
 0xdd6   :  { %v7826_v37 = vpop.f32.mrb[157].mxu1  ;;  %v11870_v9 = vpop.f32.mrb[166].mxu0  ;;  %12897 = vst [vmem:[#allocation9_spill] sm:$0xff] %v11914_v44  ;;  %v5554_v44 = vmul.f32 0.99, %v11846_v12 }
 0xdd7   :  { %v7768_v53 = vpop.f32.mrb[167].mxu0  ;;  %v5596_v12 = vmul.f32 0.99, %v11854_v0  ;;  %v11962_v0 = vmul.f32 0.99, %v11864_v61 }
 0xdd8   :  { %v6052_v53 = vmax.f32 %v11393_v8, 0.0 }
 0xdd9   :  { %v11872_v18 = vpop.f32.mrb[158].mxu1  ;;  %12904 = vst [vmem:[#allocation13_spill] sm:$0xff] %v11962_v0 }
 0xdda   :  { %v7829_v38 = vpop.f32.mrb[159].mxu1  ;;  %v11874_v43 = vpop.f32.mrb[168].mxu0 }
 0xddb   :  { %v7771_v24 = vpop.f32.mrb[169].mxu0  ;;  %v6053_v38 = vmax.f32 %v11396_v34, 0.0 }
 0xddd   :  { %v11876_v52 = vpop.f32.mrb[160].mxu1  ;;  %v11901_v8 = vmin.f32 %v6053_v38, 1.0 }
 0xdde   :  { %v7832_v26 = vpop.f32.mrb[161].mxu1  ;;  %v11878_v2 = vpop.f32.mrb[170].mxu0  ;;  %v11978_v61 = vmul.f32 0.99, %v11876_v52 }
 0xddf   :  { %v7774_v63 = vpop.f32.mrb[171].mxu0  ;;  %v12895_v26 = vld [vmem:[#allocation92_spill] sm:$0xff] }
 0xde0   :  { %12907 = vst [vmem:[#allocation14_spill] sm:$0xff] %v11978_v61 }
 0xde1   :  { %v11880_v32 = vpop.f32.mrb[162].mxu1 }
 0xde2   :  { %v7835_v30 = vpop.f32.mrb[163].mxu1  ;;  %v11882_v35 = vpop.f32.mrb[172].mxu0  ;;  %v11983_v0 = vmul.f32 0.99, %v11880_v32 }
 0xde3   :  { %v7777_v16 = vpop.f32.mrb[173].mxu0  ;;  %v11892_v30 = vmin.f32 %v6051_v31, 1.0 }
 0xde4   :  { %v11896_v16 = vmul.f32 0.99, %v11826_v21  ;;  %v11911_v21 = vmul.f32 0.99, %v11834_v23  ;;  %v11928_v23 = vmin.f32 %v6054_v41, 1.0  ;;  %12908 = vst [vmem:[#allocation17_spill] sm:$0xff] %v11983_v0 }
 0xde5   :  { %v11884_v50 = vpop.f32.mrb[164].mxu1  ;;  %12896 = vst [vmem:[#allocation118_spill] sm:$0xff] %v11892_v30 }
 0xde6   :  { %v7838_v25 = vpop.f32.mrb[165].mxu1  ;;  %v5507_v37 = vpop.f32.mrb[174].mxu0 }
 0xde7   :  { %v5518_v55 = vrot.slane %v5507_v37, %v12895_v26  ;;  %v7780_v63 = vpop.f32.mrb[175].mxu0  ;;  %v11899_v25 = vmin.f32 %v6052_v53, 1.0  ;;  %v5549_v37 = vmul.f32 0.99, %v11828_v42  ;;  %v12898_v53 = vld [vmem:[#allocation98_spill] sm:$0xff] }
 0xde8   :  { %v11918_v38 = vrot.slane %v11892_v30, %v12898_v53  ;;  %v5552_v42 = vmul.f32 0.99, %v11838_v13  ;;  %v11932_v30 = vmul.f32 0.99, %v11844_v5  ;;  %v11948_v5 = vmul.f32 0.99, %v11856_v51 }
 0xde9   :  { %v11889_v24 = vpop.f32.mrb[166].mxu1  ;;  %v5519_v39 = vcombine.high %v5518_v55, %v5518_v55  ;;  %v5526_v20 = vrot.slane %v5518_v55, %v12895_v26  ;;  %v11908_v55 = vmul.f32 0.99, %v11830_v33  ;;  %v5553_v33 = vmul.f32 0.99, %v11842_v3 }
 0xdea   :  { %v7841_v17 = vpop.f32.mrb[167].mxu1  ;;  %12899 = vst [vmem:[#allocation119_spill] sm:$0xff] %v11932_v30  ;;  %v11937_v3 = vmul.f32 0.99, %v11848_v27  ;;  %v11944_v41 = vrot.slane %v11899_v25, %v12898_v53  ;;  %12902 = vst [vmem:[#allocation12_spill] sm:$0xff] %v11948_v5 }
 0xdeb   :  { %v5533_v17 = vrot.slane %v5519_v39, %v12895_v26  ;;  %v5534_v31 = vcombine.high %v5526_v20, %v5526_v20  ;;  %8283 = vrcp.f32 %v5526_v20  ;;  %v11922_v39 = vmul.f32 0.99, %v11836_v46 }
 0xdec   :  { %12900 = vst [vmem:[#allocation8_spill] sm:$0xff] %v11937_v3  ;;  %v5598_v27 = vmul.f32 0.99, %v11862_v49  ;;  %v11974_v49 = vmul.f32 0.99, %v11872_v18 }
 0xded   :  { %v11903_v34 = vpop.f32.mrb[168].mxu1  ;;  %v5535_v20 = vcombine.high %v5533_v17, %v5533_v17  ;;  %8285 = vrcp.f32 %v5533_v17  ;;  %v5555_v17 = vmul.f32 0.99, %v11850_v19  ;;  %v5597_v19 = vmul.f32 0.99, %v11858_v22 }
 0xdee   :  { %v7844_v63 = vpop.f32.mrb[169].mxu1  ;;  %8287 = vrcp.f32 %v5534_v31  ;;  %v11968_v22 = vrot.slane %v11928_v23, %v12898_v53  ;;  %12906 = vst [vmem:[#allocation16_spill] sm:$0xff] %v11974_v49  ;;  %v5603_v18 = vmul.f32 0.99, %v11882_v35  ;;  %v11987_v49 = vmul.f32 0.99, %v11884_v50 }
 0xdef   :  { %v11926_v63 = vmul.f32 0.99, %v11840_v1  ;;  %8289 = vrcp.f32 %v5535_v20  ;;  %v11940_v1 = vmul.f32 0.99, %v11852_v14  ;;  %v11958_v14 = vrot.slane %v11901_v8, %v12898_v53 }
 0xdf0   :  { %12909 = vst [vmem:[#allocation15_spill] sm:$0xff] %v11987_v49  ;;  %v11996_v35 = vmul.f32 0.99, %v11903_v34 }
 0xdf1   :  { %v5834_v62 = vpop.f32.mrb[170].mxu1  ;;  %12901 = vst [vmem:[#allocation104_spill] sm:$0xff] %v11940_v1 }
 0xdf2   :  { %v5845_v46 = vrot.slane %v5834_v62, %v12895_v26  ;;  %v7847_v13 = vpop.f32.mrb[171].mxu1  ;;  %v11954_v62 = vmul.f32 0.99, %v11860_v10  ;;  %v11971_v10 = vmul.f32 0.99, %v11868_v57  ;;  %12911 = vst [vmem:[#allocation18_spill] sm:$0xff] %v11996_v35 }
 0xdf3   :  { %v5599_v13 = vmul.f32 0.99, %v11866_v48  ;;  %v5601_v48 = vmul.f32 0.99, %v11874_v43  ;;  %v11990_v43 = vmul.f32 0.99, %v11889_v24 }
 0xdf4   :  { %v5846_v31 = vcombine.high %v5845_v46, %v5845_v46  ;;  %v5853_v20 = vrot.slane %v5845_v46, %v12895_v26  ;;  %12903 = vst [vmem:[#allocation10_spill] sm:$0xff] %v11954_v62  ;;  %v5600_v46 = vmul.f32 0.99, %v11870_v9  ;;  %12905 = vst [vmem:[#allocation11_spill] sm:$0xff] %v11971_v10  ;;  %v5602_v9 = vmul.f32 0.99, %v11878_v2 }
 0xdf5   :  { %v8284_v62 = vpop.eup %8283  ;;  %12910 = vst [vmem:[#allocation20_spill] sm:$0xff] %v11990_v43  ;;  %v12912_v43 = vld [vmem:[#allocation96_spill] sm:$0xff] }
 0xdf6   :  { %v5860_v51 = vrot.slane %v5846_v31, %v12895_v26  ;;  %v5861_v5 = vcombine.high %v5853_v20, %v5853_v20  ;;  %8291 = vrcp.f32 %v5853_v20  ;;  %v5563_v31 = vrot.slane %v8284_v62, %v12898_v53 }
 0xdf7   :  { %v8286_v57 = vpop.eup %8285 }
 0xdf8   :  { %v5862_v26 = vcombine.high %v5860_v51, %v5860_v51  ;;  %8293 = vrcp.f32 %v5860_v51  ;;  %v8288_v52 = vpop.eup %8287  ;;  %v5567_v20 = vrot.slane %v8286_v57, %v12898_v53  ;;  %v5580_v2 = vmul.f32 %v5563_v31, %v11896_v16 }
 0xdf9   :  { %8295 = vrcp.f32 %v5861_v5  ;;  %v5581_v62 = vmul.f32 %v5563_v31, %v5549_v37  ;;  %v5604_v61 = vmul.f32 %v5596_v12, %v5563_v31  ;;  %v8290_v32 = vpop.eup %8289  ;;  %v5571_v51 = vrot.slane %v8288_v52, %v12898_v53  ;;  %v12913_v37 = vld [vmem:[#allocation97_spill] sm:$0xff] }
 0xdfa   :  { %v5605_v0 = vmul.f32 %v5597_v19, %v5563_v31  ;;  %8297 = vrcp.f32 %v5862_v26  ;;  %v5575_v50 = vrot.slane %v8290_v32, %v12898_v53  ;;  %v5582_v24 = vmul.f32 %v5567_v20, %v11908_v55 }
 0xdfb   :  { %v5583_v5 = vmul.f32 %v5567_v20, %v11911_v21  ;;  %v5588_v57 = vadd.f32 %v5580_v2, %v12912_v43  ;;  %v5584_v49 = vmul.f32 %v5571_v51, %v5552_v42  ;;  %v5585_v16 = vmul.f32 %v5571_v51, %v5553_v33 }
 0xdfc   :  { %v5589_v12 = vadd.f32 %v5581_v62, %v12913_v37  ;;  %v5606_v10 = vmul.f32 %v5598_v27, %v5567_v20  ;;  %v5586_v1 = vmul.f32 %v5575_v50, %v5554_v44  ;;  %v5587_v52 = vmul.f32 %v5575_v50, %v5555_v17  ;;  %v12914_v62 = vld [vmem:[#allocation94_spill] sm:$0xff] }
 0xdfd   :  { %v12004_v19 = vadd.f32 %v5582_v24, %v12912_v43  ;;  %v5591_v34 = vadd.f32 %v5583_v5, %v12913_v37  ;;  %v12008_v26 = vadd.f32 %v5584_v49, %v12912_v43  ;;  %v5593_v55 = vadd.f32 %v5585_v16, %v12913_v37 }
 0xdfe   :  { %v5607_v21 = vmul.f32 %v5599_v13, %v5567_v20  ;;  %v5608_v31 = vmul.f32 %v5600_v46, %v5571_v51  ;;  %v12012_v42 = vadd.f32 %v5586_v1, %v12912_v43  ;;  %v5595_v33 = vadd.f32 %v5587_v52, %v12913_v37 }
 0xdff   :  { %v5609_v27 = vmul.f32 %v5601_v48, %v5571_v51  ;;  %v5610_v44 = vmul.f32 %v5602_v9, %v5575_v50  ;;  %v5611_v2 = vmul.f32 %v5603_v18, %v5575_v50  ;;  %v5612_v32 = vadd.f32 %v5604_v61, %v12914_v62  ;;  %v12919_v51 = vld [vmem:[#allocation99_spill] sm:$0xff] }
 0xe00   :  { %v8292_v17 = vpop.eup %8291  ;;  %v5613_v24 = vadd.f32 %v5605_v0, %v12770_v4  ;;  %v5614_v49 = vadd.f32 %v5606_v10, %v12914_v62  ;;  %v5615_v16 = vadd.f32 %v5607_v21, %v12770_v4  ;;  %v5616_v13 = vadd.f32 %v5608_v31, %v12914_v62 }
 0xe01   :  { %v5617_v1 = vadd.f32 %v5609_v27, %v12770_v4  ;;  %v12022_v46 = vadd.f32 %v5610_v44, %v12914_v62  ;;  %v12027_v9 = vadd.f32 %v5611_v2, %v12770_v4  ;;  %v5621_v0 = vsel %vm12915_vm11, 1.0, %v5589_v12 }
 0xe02   :  { %v8294_v5 = vpop.eup %8293  ;;  %v5623_v10 = vsel %vm12916_vm14, 1.0, %v5591_v34  ;;  %v5625_v61 = vsel %vm12917_vm15, 1.0, %v5593_v55  ;;  %v12037_v18 = vsel %vm12918_vm6, 1.0, %v5595_v33  ;;  %vm6075_vm7 = vcmp.ge.f32.partialorder %v11918_v38, %v5612_v32  ;;  %v12921_v33 = vld [vmem:[#allocation103_spill] sm:$0xff] }
 0xe03   :  { %v12024_v48 = vpop.eup %8295  ;;  %vm6076_vm8 = vcmp.ge.f32.partialorder %v11918_v38, %v5613_v24  ;;  %vm6077_vm9 = vcmp.ge.f32.partialorder %v11944_v41, %v5614_v49  ;;  %vm6078_vm3 = vcmp.ge.f32.partialorder %v11944_v41, %v5615_v16  ;;  %vm6079_vm5 = vcmp.ge.f32.partialorder %v11958_v14, %v5616_v13 }
 0xe04   :  { %v12042_v20 = vpop.eup %8297  ;;  %vm6080_vm1 = vcmp.ge.f32.partialorder %v11958_v14, %v5617_v1  ;;  %v6084_v50 = vadd.f32 %v5621_v0, %v12919_v51  ;;  %v6086_v12 = vadd.f32 %v5623_v10, %v12919_v51  ;;  %v6088_v52 = vadd.f32 %v5625_v61, %v12919_v51 }
 0xe05   :  { %v6090_v34 = vadd.f32 %v12037_v18, %v12919_v51  ;;  %vm6091_vm0 = vcmp.lt.f32.partialorder %v11918_v38, %v5588_v57  ;;  %vm6093_vm10 = vcmp.lt.f32.partialorder %v11944_v41, %v12004_v19  ;;  %vm6095_vm12 = vcmp.lt.f32.partialorder %v11958_v14, %v12008_v26 }
 0xe06   :  { %vm6092_vm13 = vcmp.lt.f32.partialorder %v11918_v38, %v6084_v50  ;;  %vm6094_vm11 = vcmp.lt.f32.partialorder %v11944_v41, %v6086_v12  ;;  %vm6096_vm14 = vcmp.lt.f32.partialorder %v11958_v14, %v6088_v52  ;;  %vm6099_vm6 = vmand %vm6075_vm7, %vm6091_vm0  ;;  %v12075_v21 = vrot.slane %v8292_v17, %v12898_v53 }
 0xe07   :  { %vm6098_vm4 = vcmp.lt.f32.partialorder %v11968_v22, %v6090_v34  ;;  %vm6100_vm2 = vmand %vm6076_vm8, %vm6092_vm13  ;;  %v12072_v55 = vsel %vm6099_vm6, 1.0, %v12806_v28  ;;  %v12078_v31 = vrot.slane %v8294_v5, %v12898_v53  ;;  %vm12957_vm6 = vcmask 1040384  }
 0xe08   :  { %vm6101_vm15 = vmand %vm6077_vm9, %vm6093_vm10  ;;  %v12083_v27 = vsel %vm6100_vm2, %v12921_v33, 0.0  ;;  %v6115_v44 = vmul.f32 %v12072_v55, %v5612_v32  ;;  %v6151_v38 = vmul.f32 %v12072_v55, %v5588_v57  ;;  %v12089_v2 = vmul.f32 %v12072_v55, %v11653_v47 }
 0xe09   :  { %12920 = vst [vmem:[#allocation21_spill] sm:$0xff] %v12078_v31  ;;  %vm6102_vm7 = vmand %vm6078_vm3, %vm6094_vm11  ;;  %v12094_v17 = vsel %vm6101_vm15, 1.0, %v12806_v28  ;;  %v6116_v5 = vmul.f32 %v12083_v27, %v5613_v24  ;;  %v6152_v51 = vmul.f32 %v12083_v27, %v5621_v0  ;;  %v12100_v50 = vmul.f32 %v12083_v27, %v11666_v54 }
 0xe0a   :  { %vm6103_vm8 = vmand %vm6079_vm5, %vm6095_vm12  ;;  %v12108_v47 = vsel %vm6102_vm7, %v12921_v33, 0.0  ;;  %v6117_v41 = vmul.f32 %v12094_v17, %v5614_v49  ;;  %v6153_v57 = vmul.f32 %v12094_v17, %v12004_v19  ;;  %v12115_v32 = vmul.f32 %v12094_v17, %v11637_v29 }
 0xe0b   :  { %vm6104_vm9 = vmand %vm6080_vm1, %vm6096_vm14  ;;  %v12122_v54 = vsel %vm6103_vm8, 1.0, %v12806_v28  ;;  %v6118_v24 = vmul.f32 %v12108_v47, %v5615_v16  ;;  %v6123_v0 = vadd.f32 %v6116_v5, %v6115_v44  ;;  %v6154_v49 = vmul.f32 %v12108_v47, %v5623_v10 }
 0xe0c   :  { %vm12922_vm3 = vcmp.lt.f32.partialorder %v11968_v22, %v12012_v42  ;;  %vm12923_vm5 = vcmp.ge.f32.partialorder %v11968_v22, %v12022_v46  ;;  %v12133_v29 = vsel %vm6104_vm9, %v12921_v33, 0.0  ;;  %v6119_v14 = vmul.f32 %v12122_v54, %v5616_v13  ;;  %vm12958_vm7 = vmmov %vm12957_vm6 }
 0xe0d   :  { %vm6105_vm2 = vmand %vm12923_vm5, %vm12922_vm3  ;;  %v6155_v19 = vmul.f32 %v12122_v54, %v12008_v26  ;;  %v6159_v12 = vadd.f32 %v6152_v51, %v6151_v38  ;;  %vm12924_vm1 = vcmp.ge.f32.partialorder %v11968_v22, %v12027_v9  ;;  %v6120_v10 = vmul.f32 %v12133_v29, %v5617_v1 }
 0xe0e   :  { %vm6106_vm0 = vmand %vm12924_vm1, %vm6098_vm4  ;;  %v12144_v16 = vsel %vm6105_vm2, 1.0, %v12806_v28  ;;  %v6124_v52 = vrot.slane %v6123_v0, 4  ;;  %v6130_v44 = vadd.f32 %v6118_v24, %v6117_v41  ;;  %v6156_v13 = vmul.f32 %v12133_v29, %v5625_v61 }
 0xe0f   :  { %v12148_v5 = vsel %vm6106_vm0, %v12921_v33, 0.0  ;;  %v6121_v26 = vmul.f32 %v12144_v16, %v12022_v46  ;;  %v6157_v34 = vmul.f32 %v12144_v16, %v12012_v42  ;;  %v6137_v51 = vadd.f32 %v6120_v10, %v6119_v14  ;;  %vm12959_vm8 = vmmov %vm12957_vm6 }
 0xe10   :  { %v6122_v22 = vmul.f32 %v12148_v5, %v12027_v9  ;;  %v6125_v28 = vadd.f32 %v6124_v52, %v6123_v0  ;;  %v6131_v38 = vrot.slane %v6130_v44, 4  ;;  %v6158_v1 = vmul.f32 %v12148_v5, %v12037_v18  ;;  %vm12960_vm9 = vmmov %vm12957_vm6 }
 0xe11   :  { %v6160_v41 = vrot.slane %v6159_v12, 4  ;;  %v6166_v33 = vadd.f32 %v6154_v49, %v6153_v57  ;;  %v6173_v24 = vadd.f32 %v6156_v13, %v6155_v19  ;;  %v6138_v46 = vrot.slane %v6137_v51, 4 }
 0xe12   :  { %v6126_v36 = vrot.slane %v6125_v28, 2  ;;  %v6132_v4 = vadd.f32 %v6131_v38, %v6130_v44  ;;  %v6144_v62 = vadd.f32 %v6122_v22, %v6121_v26  ;;  %v6180_v42 = vadd.f32 %v6158_v1, %v6157_v34 }
 0xe13   :  { %v6161_v61 = vadd.f32 %v6160_v41, %v6159_v12  ;;  %v6167_v35 = vrot.slane %v6166_v33, 4  ;;  %v6174_v37 = vrot.slane %v6173_v24, 4  ;;  %v6139_v9 = vadd.f32 %v6138_v46, %v6137_v51 }
 0xe14   :  { %v6127_v43 = vadd.f32 %v6126_v36, %v6125_v28  ;;  %v6133_v3 = vrot.slane %v6132_v4, 2  ;;  %v6145_v0 = vrot.slane %v6144_v62, 4  ;;  %v6181_v30 = vrot.slane %v6180_v42, 4 }
 0xe15   :  { %v6162_v52 = vrot.slane %v6161_v61, 2  ;;  %v6168_v14 = vadd.f32 %v6167_v35, %v6166_v33  ;;  %v6175_v10 = vadd.f32 %v6174_v37, %v6173_v24  ;;  %v6140_v57 = vrot.slane %v6139_v9, 2 }
 0xe16   :  { %v6128_v18 = vrot.slane %v6127_v43, 1  ;;  %v6134_v31 = vadd.f32 %v6133_v3, %v6132_v4  ;;  %v6146_v49 = vadd.f32 %v6145_v0, %v6144_v62  ;;  %v6182_v26 = vadd.f32 %v6181_v30, %v6180_v42 }
 0xe17   :  { %v6163_v19 = vadd.f32 %v6162_v52, %v6161_v61  ;;  %v6169_v44 = vrot.slane %v6168_v14, 2  ;;  %v6176_v13 = vrot.slane %v6175_v10, 2  ;;  %v6141_v34 = vadd.f32 %v6140_v57, %v6139_v9 }
 0xe18   :  { %v12159_v12 = vadd.f32 %v6128_v18, %v6127_v43  ;;  %v6135_v22 = vrot.slane %v6134_v31, 1  ;;  %v6147_v36 = vrot.slane %v6146_v49, 2  ;;  %v6183_v1 = vrot.slane %v6182_v26, 2 }
 0xe19   :  { %v6164_v28 = vrot.slane %v6163_v19, 1  ;;  %v6170_v38 = vadd.f32 %v6169_v44, %v6168_v14  ;;  %v6177_v51 = vadd.f32 %v6176_v13, %v6175_v10  ;;  %v6142_v37 = vrot.slane %v6141_v34, 1 }
 0xe1a   :  { %v12161_v35 = vadd.f32 %v6135_v22, %v6134_v31  ;;  %v6148_v41 = vadd.f32 %v6147_v36, %v6146_v49  ;;  %v6262_v4 = vmul.f32 %v12108_v47, %v11639_v45  ;;  %v6184_v43 = vadd.f32 %v6183_v1, %v6182_v26 }
 0xe1b   :  { %v12165_v3 = vadd.f32 %v6164_v28, %v6163_v19  ;;  %v6171_v62 = vrot.slane %v6170_v38, 1  ;;  %v6178_v30 = vrot.slane %v6177_v51, 1  ;;  %v12167_v33 = vadd.f32 %v6142_v37, %v6141_v34  ;;  %v12927_v28 = vld [vmem:[#allocation117_spill] sm:$0xff] }
 0xe1c   :  { %v6149_v24 = vrot.slane %v6148_v41, 1  ;;  %v6263_v46 = vmul.f32 %v12122_v54, %v11674_v59  ;;  %v6264_v31 = vmul.f32 %v12133_v29, %v11715_v60  ;;  %v6185_v9 = vrot.slane %v6184_v43, 1 }
 0xe1d   :  { %v12173_v61 = vadd.f32 %v6171_v62, %v6170_v38  ;;  %v12175_v42 = vadd.f32 %v6178_v30, %v6177_v51  ;;  %v6265_v45 = vmul.f32 %v12144_v16, %v11695_v58  ;;  %v6266_v52 = vmul.f32 %v12148_v5, %v11702_v7 }
 0xe1e   :  { %v12179_v0 = vadd.f32 %v6149_v24, %v6148_v41  ;;  %v6267_v14 = vadd.f32 %v12100_v50, %v12089_v2  ;;  %v6274_v59 = vadd.f32 %v6262_v4, %v12115_v32  ;;  %v12186_v10 = vadd.f32 %v6185_v9, %v6184_v43  ;;  %v12925_v32 = vld [vmem:[#allocation7_spill] sm:$0xff] }
 0xe1f   :  { %v6281_v60 = vadd.f32 %v6264_v31, %v6263_v46  ;;  %v6295_v18 = vmul.f32 %v12072_v55, %v11688_v40  ;;  %v6296_v57 = vmul.f32 %v12083_v27, %v11684_v56  ;;  %v6288_v19 = vadd.f32 %v6266_v52, %v6265_v45  ;;  %v12926_v56 = vld [vmem:[#allocation6_spill] sm:$0xff] }
 0xe20   :  { %v6268_v58 = vrot.slane %v6267_v14, 4  ;;  %v6275_v49 = vrot.slane %v6274_v59, 4  ;;  %v6297_v7 = vmul.f32 %v12094_v17, %v11657_v11  ;;  %v6298_v2 = vmul.f32 %v12108_v47, %v11700_v15 }
 0xe21   :  { %v6282_v44 = vrot.slane %v6281_v60, 4  ;;  %v6299_v50 = vmul.f32 %v12122_v54, %v11741_v6  ;;  %v6300_v13 = vmul.f32 %v12133_v29, %v12925_v32  ;;  %v6289_v22 = vrot.slane %v6288_v19, 4 }
 0xe22   :  { %v6269_v40 = vadd.f32 %v6268_v58, %v6267_v14  ;;  %v6276_v26 = vadd.f32 %v6275_v49, %v6274_v59  ;;  %v6301_v34 = vmul.f32 %v12144_v16, %v12926_v56  ;;  %v6302_v11 = vmul.f32 %v12148_v5, %v12927_v28 }
 0xe23   :  { %v6283_v36 = vadd.f32 %v6282_v44, %v6281_v60  ;;  %v6303_v38 = vadd.f32 %v6296_v57, %v6295_v18  ;;  %v6310_v51 = vadd.f32 %v6298_v2, %v6297_v7  ;;  %v6290_v37 = vadd.f32 %v6289_v22, %v6288_v19 }
 0xe24   :  { %v6270_v1 = vrot.slane %v6269_v40, 2  ;;  %v6277_v15 = vrot.slane %v6276_v26, 2  ;;  %v6317_v41 = vadd.f32 %v6300_v13, %v6299_v50  ;;  %v6324_v30 = vadd.f32 %v6302_v11, %v6301_v34 }
 0xe25   :  { %v6284_v6 = vrot.slane %v6283_v36, 2  ;;  %v6304_v4 = vrot.slane %v6303_v38, 4  ;;  %v6311_v62 = vrot.slane %v6310_v51, 4  ;;  %v6291_v46 = vrot.slane %v6290_v37, 2 }
 0xe26   :  { %v6271_v43 = vadd.f32 %v6270_v1, %v6269_v40  ;;  %v6278_v24 = vadd.f32 %v6277_v15, %v6276_v26  ;;  %v6318_v31 = vrot.slane %v6317_v41, 4  ;;  %v6325_v14 = vrot.slane %v6324_v30, 4 }
 0xe27   :  { %v6285_v9 = vadd.f32 %v6284_v6, %v6283_v36  ;;  %v6305_v45 = vadd.f32 %v6304_v4, %v6303_v38  ;;  %v6312_v52 = vadd.f32 %v6311_v62, %v6310_v51  ;;  %v6292_v18 = vadd.f32 %v6291_v46, %v6290_v37 }
 0xe28   :  { %v6272_v59 = vrot.slane %v6271_v43, 1  ;;  %v6279_v60 = vrot.slane %v6278_v24, 1  ;;  %v6319_v57 = vadd.f32 %v6318_v31, %v6317_v41  ;;  %v6326_v7 = vadd.f32 %v6325_v14, %v6324_v30  ;;  %v12928_v41 = vld [vmem:[#allocation118_spill] sm:$0xff]  ;;  %v12930_v31 = vld [vmem:[#allocation21_spill] sm:$0xff] }
 0xe29   :  { %v6286_v58 = vrot.slane %v6285_v9, 1  ;;  %v6306_v49 = vrot.slane %v6305_v45, 2  ;;  %v6313_v19 = vrot.slane %v6312_v52, 2  ;;  %v6293_v50 = vrot.slane %v6292_v18, 1 }
 0xe2a   :  { %v12204_v44 = vadd.f32 %v6272_v59, %v6271_v43  ;;  %v12206_v2 = vadd.f32 %v6279_v60, %v6278_v24  ;;  %v6320_v32 = vrot.slane %v6319_v57, 2  ;;  %v6327_v22 = vrot.slane %v6326_v7, 2  ;;  %v12933_v59 = vld [vmem:[#allocation104_spill] sm:$0xff] }
 0xe2b   :  { %v12208_v13 = vadd.f32 %v6286_v58, %v6285_v9  ;;  %v6307_v40 = vadd.f32 %v6306_v49, %v6305_v45  ;;  %v6314_v26 = vadd.f32 %v6313_v19, %v6312_v52  ;;  %v12210_v56 = vadd.f32 %v6293_v50, %v6292_v18  ;;  %v12931_v45 = vld [vmem:[#allocation119_spill] sm:$0xff]  ;;  %v12935_v18 = vld [vmem:[#allocation10_spill] sm:$0xff]  ;;  %v12936_v58 = vld [vmem:[#allocation96_spill] sm:$0xff] }
 0xe2c   :  { %v6321_v34 = vadd.f32 %v6320_v32, %v6319_v57  ;;  %v6331_v36 = vsub.f32 %v12165_v3, %v12159_v12  ;;  %v6332_v28 = vsub.f32 %v12173_v61, %v12161_v35  ;;  %v6328_v51 = vadd.f32 %v6327_v22, %v6326_v7  ;;  %v12937_v19 = vld [vmem:[#allocation97_spill] sm:$0xff] }
 0xe2d   :  { %v6308_v11 = vrot.slane %v6307_v40, 1  ;;  %v6315_v38 = vrot.slane %v6314_v26, 1  ;;  %v6333_v1 = vsub.f32 %v12175_v42, %v12167_v33  ;;  %v6334_v37 = vsub.f32 %v12186_v10, %v12179_v0  ;;  %v12938_v22 = vld [vmem:[#allocation13_spill] sm:$0xff] }
 0xe2e   :  { %v6322_v15 = vrot.slane %v6321_v34, 1  ;;  %8299 = vrcp.f32 %v6331_v36  ;;  %v6347_v6 = vsub.f32 %v12928_v41, %v12159_v12  ;;  %v6329_v62 = vrot.slane %v6328_v51, 1  ;;  %v12939_v36 = vld [vmem:[#allocation11_spill] sm:$0xff] }
 0xe2f   :  { %v12222_v4 = vadd.f32 %v6308_v11, %v6307_v40  ;;  %v12224_v3 = vadd.f32 %v6315_v38, %v6314_v26  ;;  %8301 = vrcp.f32 %v6332_v28  ;;  %v6348_v42 = vsub.f32 %v11899_v25, %v12161_v35  ;;  %v12940_v11 = vld [vmem:[#allocation16_spill] sm:$0xff] }
 0xe30   :  { %v12226_v61 = vadd.f32 %v6322_v15, %v6321_v34  ;;  %8303 = vrcp.f32 %v6333_v1  ;;  %v6349_v30 = vsub.f32 %v11901_v8, %v12167_v33  ;;  %v12232_v10 = vadd.f32 %v6329_v62, %v6328_v51  ;;  %v12929_v33 = vld [vmem:[#allocation9_spill] sm:$0xff]  ;;  %v12941_v1 = vld [vmem:[#allocation14_spill] sm:$0xff]  ;;  %v12943_v62 = vld [vmem:[#allocation15_spill] sm:$0xff] }
 0xe31   :  { %8305 = vrcp.f32 %v6334_v37  ;;  %v6350_v12 = vsub.f32 %v11928_v23, %v12179_v0  ;;  %v12238_v43 = vadd.f32 %v12222_v4, %v12204_v44  ;;  %v12242_v24 = vadd.f32 %v12224_v3, %v12206_v2  ;;  %v12942_v37 = vld [vmem:[#allocation17_spill] sm:$0xff] }
 0xe32   :  { %v12246_v25 = vadd.f32 %v12226_v61, %v12208_v13  ;;  %v5898_v8 = vrot.slane %v12024_v48, %v12898_v53  ;;  %v5902_v35 = vrot.slane %v12042_v20, %v12898_v53  ;;  %v12254_v23 = vadd.f32 %v12232_v10, %v12210_v56  ;;  %v12932_v48 = vld [vmem:[#allocation8_spill] sm:$0xff] }
 0xe33   :  { %v5907_v0 = vmul.f32 %v12075_v21, %v12929_v33  ;;  %v5908_v46 = vmul.f32 %v12075_v21, %v11922_v39  ;;  %v5909_v9 = vmul.f32 %v12930_v31, %v11926_v63  ;;  %v5910_v52 = vmul.f32 %v12930_v31, %v12931_v45  ;;  %v12934_v20 = vld [vmem:[#allocation12_spill] sm:$0xff] }
 0xe34   :  { %v5911_v14 = vmul.f32 %v5898_v8, %v12932_v48  ;;  %v5912_v53 = vmul.f32 %v5898_v8, %v12933_v59  ;;  %v5913_v60 = vmul.f32 %v5902_v35, %v12934_v20  ;;  %v5914_v57 = vmul.f32 %v5902_v35, %v12935_v18  ;;  %v12946_v48 = vld [vmem:[#allocation94_spill] sm:$0xff]  ;;  %v12947_v59 = vld [vmem:[#allocation95_spill] sm:$0xff] }
 0xe35   :  { %v12269_v49 = vadd.f32 %v5907_v0, %v12936_v58  ;;  %v5916_v7 = vadd.f32 %v5908_v46, %v12937_v19  ;;  %v12273_v39 = vadd.f32 %v5909_v9, %v12936_v58  ;;  %v5918_v63 = vadd.f32 %v5910_v52, %v12937_v19  ;;  %v12944_v0 = vld [vmem:[#allocation20_spill] sm:$0xff]  ;;  %v12945_v52 = vld [vmem:[#allocation18_spill] sm:$0xff] }
 0xe36   :  { %v12277_v50 = vadd.f32 %v5911_v14, %v12936_v58  ;;  %v5920_v32 = vadd.f32 %v5912_v53, %v12937_v19  ;;  %v12281_v40 = vadd.f32 %v5913_v60, %v12936_v58  ;;  %v5922_v26 = vadd.f32 %v5914_v57, %v12937_v19 }
 0xe37   :  { %v5931_v34 = vmul.f32 %v12938_v22, %v12075_v21  ;;  %v5932_v28 = vmul.f32 %v12939_v36, %v12075_v21  ;;  %v5933_v38 = vmul.f32 %v12940_v11, %v12930_v31  ;;  %v5934_v15 = vmul.f32 %v12941_v1, %v12930_v31 }
 0xe38   :  { %v12290_v51 = vpop.eup %8299  ;;  %v5935_v41 = vmul.f32 %v12942_v37, %v5898_v8  ;;  %v5936_v33 = vmul.f32 %v12943_v62, %v5898_v8  ;;  %v5937_v46 = vmul.f32 %v12944_v0, %v5902_v35  ;;  %v5938_v21 = vmul.f32 %v12945_v52, %v5902_v35 }
 0xe39   :  { %v12297_v9 = vpop.eup %8301  ;;  %v6351_v45 = vmul.f32 %v12290_v51, %v6347_v6  ;;  %v5939_v14 = vadd.f32 %v5931_v34, %v12946_v48  ;;  %v5940_v53 = vadd.f32 %v5932_v28, %v12947_v59  ;;  %v5941_v60 = vadd.f32 %v5933_v38, %v12946_v48 }
 0xe3a   :  { %v12303_v20 = vpop.eup %8303  ;;  %v6352_v31 = vmul.f32 %v12297_v9, %v6348_v42  ;;  %v5942_v8 = vadd.f32 %v5934_v15, %v12947_v59  ;;  %v5943_v18 = vadd.f32 %v5935_v41, %v12946_v48  ;;  %v5944_v19 = vadd.f32 %v5936_v33, %v12947_v59 }
 0xe3b   :  { %v12309_v57 = vpop.eup %8305  ;;  %v6353_v6 = vmul.f32 %v12303_v20, %v6349_v30  ;;  %v6355_v58 = vsub.f32 1.0, %v6351_v45  ;;  %v12312_v35 = vmul.f32 %v6351_v45, %v6351_v45  ;;  %v5945_v42 = vadd.f32 %v5937_v46, %v12946_v48 }
 0xe3c   :  { %v6354_v22 = vmul.f32 %v12309_v57, %v6350_v12  ;;  %v6356_v34 = vsub.f32 1.0, %v6352_v31  ;;  %v12316_v36 = vmul.f32 %v6352_v31, %v6352_v31  ;;  %vm6484_vm11 = vcmask 1041409  }
 0xe3d   :  { %v6357_v28 = vsub.f32 1.0, %v6353_v6  ;;  %v12319_v11 = vmul.f32 %v6355_v58, %v6351_v45  ;;  %v12321_v38 = vmul.f32 %v6353_v6, %v6353_v6  ;;  %v12325_v30 = vmul.f32 %v12312_v35, %v12222_v4 }
 0xe3e   :  { %v6358_v1 = vsub.f32 1.0, %v6354_v22  ;;  %v12327_v15 = vmul.f32 %v6356_v34, %v6352_v31  ;;  %v12329_v37 = vmul.f32 %v6354_v22, %v6354_v22  ;;  %v12333_v12 = vmul.f32 %v12316_v36, %v12224_v3  ;;  %v12950_v31 = vld [vmem:[#allocation74_spill] sm:$0xff] }
 0xe3f   :  { %v12335_v41 = vmul.f32 %v6357_v28, %v6353_v6  ;;  %v12339_v62 = vmul.f32 %v12321_v38, %v12226_v61  ;;  %v6431_v33 = vmul.f32 %v6355_v58, %v12204_v44  ;;  %v6432_v4 = vmul.f32 %v6356_v34, %v12206_v2 }
 0xe40   :  { %v12343_v0 = vmul.f32 %v6358_v1, %v6354_v22  ;;  %v12347_v46 = vmul.f32 %v12329_v37, %v12232_v10  ;;  %v6433_v45 = vmul.f32 %v6357_v28, %v12208_v13  ;;  %v6434_v3 = vmul.f32 %v6358_v1, %v12210_v56 }
 0xe41   :  { %12948 = vst [vmem:[#allocation19_spill] sm:$0xff] %v12339_v62  ;;  %v12351_v52 = vmul.f32 %v6431_v33, %v6355_v58  ;;  %v12353_v48 = vmul.f32 %v6432_v4, %v6356_v34  ;;  %v5946_v61 = vadd.f32 %v5938_v21, %v12947_v59  ;;  %vm12951_vm4 = vcmp.eq.s32.totalorder %v12950_v31, 9 }
 0xe42   :  { %12949 = vst [vmem:[#allocation24_spill] sm:$0xff] %v12347_v46  ;;  %v5948_v6 = vsel %vm12951_vm4, 1.0, %v5916_v7  ;;  %v12358_v62 = vmul.f32 %v6433_v45, %v6357_v28  ;;  %v12360_v22 = vmul.f32 %v6434_v3, %v6358_v1  ;;  %vm12952_vm10 = vmmov %vm12951_vm4  ;;  %v6187_v34 = vmul.f32 %v12072_v55, %v5939_v14 }
 0xe43   :  { %v5950_v10 = vsel %vm12952_vm10, 1.0, %v5918_v63  ;;  %vm12953_vm12 = vmmov %vm12951_vm4  ;;  %v6188_v21 = vmul.f32 %v12083_v27, %v5940_v53  ;;  %v6189_v59 = vmul.f32 %v12094_v17, %v5941_v60  ;;  %v6190_v7 = vmul.f32 %v12108_v47, %v5942_v8 }
 0xe44   :  { %v5952_v46 = vsel %vm12953_vm12, 1.0, %v5920_v32  ;;  %vm12954_vm13 = vmmov %vm12951_vm4  ;;  %v6191_v28 = vmul.f32 %v12122_v54, %v5943_v18  ;;  %v6192_v1 = vmul.f32 %v12133_v29, %v5944_v19  ;;  %v6193_v63 = vmul.f32 %v12144_v16, %v5945_v42 }
 0xe45   :  { %v5954_v58 = vsel %vm12954_vm13, 1.0, %v5922_v26  ;;  %v6194_v33 = vmul.f32 %v12148_v5, %v5946_v61  ;;  %v6195_v32 = vadd.f32 %v6188_v21, %v6187_v34  ;;  %v6223_v26 = vmul.f32 %v12072_v55, %v12269_v49 }
 0xe46   :  { %v6224_v14 = vmul.f32 %v12083_v27, %v5948_v6  ;;  %v6202_v4 = vadd.f32 %v6190_v7, %v6189_v59  ;;  %v6209_v53 = vadd.f32 %v6192_v1, %v6191_v28  ;;  %v6225_v60 = vmul.f32 %v12094_v17, %v12273_v39 }
 0xe47   :  { %v6226_v8 = vmul.f32 %v12108_v47, %v5950_v10  ;;  %v6196_v18 = vrot.slane %v6195_v32, 4  ;;  %v6216_v45 = vadd.f32 %v6194_v33, %v6193_v63  ;;  %v6227_v19 = vmul.f32 %v12122_v54, %v12277_v50 }
 0xe48   :  { %v6228_v42 = vmul.f32 %v12133_v29, %v5952_v46  ;;  %v6203_v3 = vrot.slane %v6202_v4, 4  ;;  %v6210_v61 = vrot.slane %v6209_v53, 4  ;;  %v6229_v55 = vmul.f32 %v12144_v16, %v12281_v40 }
 0xe49   :  { %v6230_v27 = vmul.f32 %v12148_v5, %v5954_v58  ;;  %v6197_v49 = vadd.f32 %v6196_v18, %v6195_v32  ;;  %v6217_v31 = vrot.slane %v6216_v45, 4  ;;  %v6231_v6 = vadd.f32 %v6224_v14, %v6223_v26 }
 0xe4a   :  { %v6238_v17 = vadd.f32 %v6226_v8, %v6225_v60  ;;  %v6204_v39 = vadd.f32 %v6203_v3, %v6202_v4  ;;  %v6211_v47 = vadd.f32 %v6210_v61, %v6209_v53  ;;  %v6245_v10 = vadd.f32 %v6228_v42, %v6227_v19 }
 0xe4b   :  { %v6252_v34 = vadd.f32 %v6230_v27, %v6229_v55  ;;  %v6198_v21 = vrot.slane %v6197_v49, 2  ;;  %v6218_v59 = vadd.f32 %v6217_v31, %v6216_v45  ;;  %v6232_v54 = vrot.slane %v6231_v6, 4 }
 0xe4c   :  { %v6239_v50 = vrot.slane %v6238_v17, 4  ;;  %v6205_v29 = vrot.slane %v6204_v39, 2  ;;  %v6212_v46 = vrot.slane %v6211_v47, 2  ;;  %v6246_v7 = vrot.slane %v6245_v10, 4 }
 0xe4d   :  { %v6253_v28 = vrot.slane %v6252_v34, 4  ;;  %v6199_v1 = vadd.f32 %v6198_v21, %v6197_v49  ;;  %v6219_v16 = vrot.slane %v6218_v59, 2  ;;  %v6233_v40 = vadd.f32 %v6232_v54, %v6231_v6 }
 0xe4e   :  { %v6240_v5 = vadd.f32 %v6239_v50, %v6238_v17  ;;  %v6206_v58 = vadd.f32 %v6205_v29, %v6204_v39  ;;  %v6213_v63 = vadd.f32 %v6212_v46, %v6211_v47  ;;  %v6247_v33 = vadd.f32 %v6246_v7, %v6245_v10 }
 0xe4f   :  { %v6254_v32 = vadd.f32 %v6253_v28, %v6252_v34  ;;  %v6200_v26 = vrot.slane %v6199_v1, 1  ;;  %v6220_v14 = vadd.f32 %v6219_v16, %v6218_v59  ;;  %v6234_v4 = vrot.slane %v6233_v40, 2 }
 0xe50   :  { %v6241_v53 = vrot.slane %v6240_v5, 2  ;;  %v6207_v60 = vrot.slane %v6206_v58, 1  ;;  %v6214_v8 = vrot.slane %v6213_v63, 1  ;;  %v6248_v18 = vrot.slane %v6247_v33, 2 }
 0xe51   :  { %v6255_v45 = vrot.slane %v6254_v32, 2  ;;  %v12388_v19 = vadd.f32 %v6200_v26, %v6199_v1  ;;  %v6221_v42 = vrot.slane %v6220_v14, 1  ;;  %v6235_v3 = vadd.f32 %v6234_v4, %v6233_v40 }
 0xe52   :  { %v6242_v61 = vadd.f32 %v6241_v53, %v6240_v5  ;;  %v12390_v55 = vadd.f32 %v6207_v60, %v6206_v58  ;;  %v12392_v27 = vadd.f32 %v6214_v8, %v6213_v63  ;;  %v6249_v49 = vadd.f32 %v6248_v18, %v6247_v33 }
 0xe53   :  { %v6256_v31 = vadd.f32 %v6255_v45, %v6254_v32  ;;  %v12394_v6 = vadd.f32 %v6221_v42, %v6220_v14  ;;  %v6236_v17 = vrot.slane %v6235_v3, 1  ;;  %v6371_v47 = vmul.f32 %v12319_v11, %v12204_v44 }
 0xe54   :  { %v6243_v39 = vrot.slane %v6242_v61, 1  ;;  %v6250_v10 = vrot.slane %v6249_v49, 1  ;;  %v6372_v21 = vmul.f32 %v12327_v15, %v12206_v2  ;;  %v6373_v59 = vmul.f32 %v12335_v41, %v12208_v13 }
 0xe55   :  { %v6257_v34 = vrot.slane %v6256_v31, 1  ;;  %v6237_v54 = vadd.f32 %v6236_v17, %v6235_v3  ;;  %v6374_v29 = vmul.f32 %v12343_v0, %v12210_v56  ;;  %vm6487_vm14 = vcmask 1042434  }
 0xe56   :  { %v6244_v50 = vadd.f32 %v6243_v39, %v6242_v61  ;;  %v6251_v46 = vadd.f32 %v6250_v10, %v6249_v49  ;;  %vm6490_vm15 = vcmask 1043459  }
 0xe57   :  { %v6258_v7 = vadd.f32 %v6257_v34, %v6256_v31  ;;  %v6335_v28 = vsub.f32 %v6237_v54, %v12388_v19 }
 0xe58   :  { %v6336_v1 = vsub.f32 %v6244_v50, %v12390_v55  ;;  %v6337_v44 = vsub.f32 %v6251_v46, %v12392_v27 }
 0xe59   :  { %v6338_v16 = vsub.f32 %v6258_v7, %v12394_v6  ;;  %v6340_v2 = vmul.f32 %v12290_v51, %v6335_v28 }
 0xe5a   :  { %v6342_v40 = vmul.f32 %v12297_v9, %v6336_v1  ;;  %v6344_v13 = vmul.f32 %v12303_v20, %v6337_v44 }
 0xe5b   :  { %v6346_v5 = vmul.f32 %v12309_v57, %v6338_v16  ;;  %v6367_v56 = vmul.f32 %v12312_v35, %v6340_v2  ;;  %v6387_v63 = vmul.f32 2.0, %v6340_v2  ;;  %v6415_v39 = vmul.f32 %v6340_v2, %v6340_v2 }
 0xe5c   :  { %v6368_v58 = vmul.f32 %v12316_v36, %v6342_v40  ;;  %v6388_v33 = vmul.f32 2.0, %v6342_v40  ;;  %v6369_v32 = vmul.f32 %v12321_v38, %v6344_v13  ;;  %v6389_v14 = vmul.f32 2.0, %v6344_v13 }
 0xe5d   :  { %v6370_v26 = vmul.f32 %v12329_v37, %v6346_v5  ;;  %v6390_v4 = vmul.f32 2.0, %v6346_v5  ;;  %v6375_v53 = vadd.f32 %v6371_v47, %v6367_v56  ;;  %v6391_v9 = vsub.f32 %v12238_v43, %v6387_v63 }
 0xe5e   :  { %v6376_v51 = vadd.f32 %v6372_v21, %v6368_v58  ;;  %v6392_v20 = vsub.f32 %v12242_v24, %v6388_v33  ;;  %v6377_v60 = vadd.f32 %v6373_v59, %v6369_v32  ;;  %v6393_v35 = vsub.f32 %v12246_v25, %v6389_v14  ;;  %v12955_v21 = vld [vmem:[#allocation19_spill] sm:$0xff] }
 0xe5f   :  { %v6378_v57 = vadd.f32 %v6374_v29, %v6370_v26  ;;  %v6394_v36 = vsub.f32 %v12254_v23, %v6390_v4  ;;  %v6379_v8 = vmul.f32 %v6375_v53, %v6335_v28  ;;  %v6395_v38 = vmul.f32 %v6391_v9, %v12319_v11  ;;  %v12956_v29 = vld [vmem:[#allocation24_spill] sm:$0xff] }
 0xe60   :  { %v6380_v18 = vmul.f32 %v6376_v51, %v6336_v1  ;;  %v6396_v37 = vmul.f32 %v6392_v20, %v12327_v15  ;;  %v6381_v45 = vmul.f32 %v6377_v60, %v6337_v44  ;;  %v6397_v3 = vmul.f32 %v6393_v35, %v12335_v41 }
 0xe61   :  { %v6382_v42 = vmul.f32 %v6378_v57, %v6338_v16  ;;  %v6398_v43 = vmul.f32 %v6394_v36, %v12343_v0  ;;  %v6399_v61 = vadd.f32 %v6395_v38, %v6340_v2  ;;  %v6423_v25 = vmul.f32 %v6387_v63, %v12319_v11 }
 0xe62   :  { %v6400_v24 = vadd.f32 %v6396_v37, %v6342_v40  ;;  %v6401_v49 = vadd.f32 %v6397_v3, %v6344_v13  ;;  %v6424_v23 = vmul.f32 %v6388_v33, %v12327_v15  ;;  %v6425_v17 = vmul.f32 %v6389_v14, %v12335_v41 }
 0xe63   :  { %v6402_v31 = vadd.f32 %v6398_v43, %v6346_v5  ;;  %8307 = vrcp.f32 %v6399_v61  ;;  %v6426_v47 = vmul.f32 %v6390_v4, %v12343_v0  ;;  %v6427_v10 = vadd.f32 %v6423_v25, %v12325_v30 }
 0xe64   :  { %8309 = vrcp.f32 %v6400_v24  ;;  %v6428_v34 = vadd.f32 %v6424_v23, %v12333_v12  ;;  %v6429_v59 = vadd.f32 %v6425_v17, %v12955_v21  ;;  %v6416_v54 = vmul.f32 %v6342_v40, %v6342_v40  ;;  %v12961_v21 = vld [vmem:[#allocation115_spill] sm:$0xff] }
 0xe65   :  { %8311 = vrcp.f32 %v6401_v49  ;;  %v6417_v50 = vmul.f32 %v6344_v13, %v6344_v13  ;;  %v6430_v11 = vadd.f32 %v6426_v47, %v12956_v29  ;;  %v6439_v15 = vadd.f32 %v12351_v52, %v6427_v10 }
 0xe66   :  { %8313 = vrcp.f32 %v6402_v31  ;;  %v6440_v41 = vadd.f32 %v12353_v48, %v6428_v34  ;;  %v6441_v46 = vadd.f32 %v12358_v62, %v6429_v59  ;;  %v6418_v0 = vmul.f32 %v6346_v5, %v6346_v5 }
 0xe67   :  { %8315 = vlog2.f32 %v6399_v61  ;;  %v6442_v7 = vadd.f32 %v12360_v22, %v6430_v11  ;;  %v6443_v30 = vmul.f32 %v6439_v15, %v6415_v39 }
 0xe68   :  { %8317 = vlog2.f32 %v6400_v24  ;;  %v6444_v12 = vmul.f32 %v6440_v41, %v6416_v54  ;;  %v6445_v28 = vmul.f32 %v6441_v46, %v6417_v50 }
 0xe69   :  { %8319 = vlog2.f32 %v6401_v49  ;;  %v6446_v1 = vmul.f32 %v6442_v7, %v6418_v0 }
 0xe6a   :  { %8321 = vlog2.f32 %v6402_v31 }
 0xe6b   :  { %8323 = vlog2.f32 %v6443_v30 }
 0xe6c   :  { %8325 = vlog2.f32 %v6444_v12 }
 0xe6d   :  { %v8308_v44 = vpop.eup %8307  ;;  %8327 = vlog2.f32 %v6445_v28 }
 0xe6e   :  { %v8310_v52 = vpop.eup %8309  ;;  %v6404_v16 = vmul.f32 %v8308_v44, %v6379_v8  ;;  %8329 = vlog2.f32 %v6446_v1 }
 0xe6f   :  { %v8312_v48 = vpop.eup %8311  ;;  %v6406_v62 = vmul.f32 %v8310_v52, %v6380_v18 }
 0xe70   :  { %v8314_v2 = vpop.eup %8313  ;;  %v6408_v40 = vmul.f32 %v8312_v48, %v6381_v45  ;;  %v6411_v22 = vadd.f32 %v6404_v16, %v12388_v19 }
 0xe71   :  { %v8316_v13 = vpop.eup %8315  ;;  %v6410_v5 = vmul.f32 %v8314_v2, %v6382_v42  ;;  %v6412_v56 = vadd.f32 %v6406_v62, %v12390_v55 }
 0xe72   :  { %v8318_v58 = vpop.eup %8317  ;;  %v6413_v63 = vadd.f32 %v6408_v40, %v12392_v27  ;;  %v6456_v33 = vmul.f32 0.6931472, %v8316_v13 }
 0xe73   :  { %v8320_v32 = vpop.eup %8319  ;;  %v6414_v26 = vadd.f32 %v6410_v5, %v12394_v6  ;;  %v6458_v14 = vmul.f32 0.6931472, %v8318_v58  ;;  %v6483_v4 = vrot.slane %v6412_v56, 7 }
 0xe74   :  { %v8322_v53 = vpop.eup %8321  ;;  %v6460_v51 = vmul.f32 0.6931472, %v8320_v32  ;;  %v6486_v9 = vrot.slane %v6413_v63, 6  ;;  %v6463_v36 = vmul.f32 2.0, %v6456_v33 }
 0xe75   :  { %v8324_v19 = vpop.eup %8323  ;;  %v6462_v20 = vmul.f32 0.6931472, %v8322_v53  ;;  %v6485_v60 = vsel %vm6484_vm11, %v6483_v4, %v6411_v22  ;;  %v6489_v57 = vrot.slane %v6414_v26, 5  ;;  %v6464_v38 = vmul.f32 2.0, %v6458_v14 }
 0xe76   :  { %v8326_v55 = vpop.eup %8325  ;;  %v6448_v35 = vmul.f32 0.6931472, %v8324_v19  ;;  %v6488_v27 = vsel %vm6487_vm14, %v6486_v9, %v6485_v60  ;;  %v6465_v42 = vmul.f32 2.0, %v6460_v51 }
 0xe77   :  { %v8328_v8 = vpop.eup %8327  ;;  %v6450_v18 = vmul.f32 0.6931472, %v8326_v55  ;;  %v6491_v37 = vsel %vm6490_vm15, %v6489_v57, %v6488_v27  ;;  %v6466_v61 = vmul.f32 2.0, %v6462_v20 }
 0xe78   :  { %v8330_v6 = vpop.eup %8329  ;;  %v6452_v45 = vmul.f32 0.6931472, %v8328_v8  ;;  %v6467_v3 = vsub.f32 %v6448_v35, %v6463_v36  ;;  %6493 = vst [vmem:[%s12462_s11] sm:$0xf] %v6491_v37 }
 0xe79   :  { %v6454_v43 = vmul.f32 0.6931472, %v8330_v6  ;;  %v6468_v24 = vsub.f32 %v6450_v18, %v6464_v38 }
 0xe7a   :  { %v6469_v49 = vsub.f32 %v6452_v45, %v6465_v42  ;;  %v6471_v25 = vsel %vm12957_vm6, %v6467_v3, 0.0 }
 0xe7b   :  { %v6470_v31 = vsub.f32 %v6454_v43, %v6466_v61  ;;  %v6472_v23 = vsel %vm12958_vm7, %v6468_v24, 0.0 }
 0xe7c   :  { %v6473_v17 = vadd.f32 %v6472_v23, %v6471_v25  ;;  %v6474_v39 = vsel %vm12959_vm8, %v6469_v49, 0.0 }
 0xe7d   :  { %v6476_v10 = vsel %vm12960_vm9, %v6470_v31, 0.0 }
 0xe7e   :  { %v6475_v47 = vadd.f32 %v6474_v39, %v6473_v17 }
 0xe80   :  { %v6477_v34 = vadd.f32 %v6476_v10, %v6475_v47 }
 0xe82   :  { %v6478_v59 = vadd.f32 %v6477_v34, %v12961_v21 }
 0xe84   :  { %6494 = vst [vmem:[%s12462_s11 + $0x4] sm:$0x1] %v6478_v59 }

</bundles_post_ra>
